<compile_context>
chip_gen: v6e
topology: v6e:2x2x1
jax: 0.10.0
libtpu: 0.0.40
codegen_flags: <defaults>
</compile_context>

<pallas_src>
import functools

import jax
import jax.numpy as jnp
from jax.experimental import pallas as pl
from jax.experimental.pallas import tpu as pltpu


def _round_up(x, m):
    return ((x + m - 1) // m) * m


# ---------------------------------------------------------------------------
# Pallas kernel: (Cout, K) @ (K, tm) GEMM, f32 accumulate, fused LeakyReLU
# ---------------------------------------------------------------------------
def _gemm_lrelu_kernel(w_ref, a_ref, o_ref, *, slope, apply_act):
    acc = jnp.dot(w_ref[...], a_ref[...], preferred_element_type=jnp.float32)
    if apply_act:
        acc = jnp.where(acc >= 0.0, acc, acc * slope)
    o_ref[...] = acc.astype(o_ref.dtype)


def _choose_tm(M, K, cout, tm, vmem_budget=24 * 1024 * 1024):
    """Lane tile for M: multiple of 128 (lane-dense stores), >=2 grid blocks when possible
    (v7x has 2 TensorCores), shrunk if the double-buffered blocks would blow a conservative
    VMEM budget (matters at the module default chn=32 deep layers)."""
    if M <= 256:
        return M                                  # single block; block dim == full array dim
    tm_eff = min(tm, _round_up((M + 1) // 2, 128))
    while tm_eff > 128:
        est = 2 * (cout * K * 2                   # weight block (bf16), double-buffered
                   + K * tm_eff * 2               # A^T block (bf16)
                   + cout * tm_eff * 4)           # output block (f32 upper bound)
        if est <= vmem_budget:
            break
        tm_eff -= 128
    return tm_eff


def pallas_gemm_lrelu(w_m, a_t, *, slope, apply_act, out_dtype, tm=512):
    """w_m: (Cout, K), a_t: (K, M)  ->  (Cout, M) = LeakyReLU(w_m @ a_t)."""
    cout, K = w_m.shape
    K2, M = a_t.shape
    assert K == K2
    tm_eff = _choose_tm(M, K, cout, tm)
    grid = ((M + tm_eff - 1) // tm_eff,)
    return pl.pallas_call(
        functools.partial(_gemm_lrelu_kernel, slope=slope, apply_act=apply_act),
        out_shape=jax.ShapeDtypeStruct((cout, M), out_dtype),
        grid=grid,
        in_specs=[
            pl.BlockSpec((cout, K), lambda j: (0, 0)),      # weights: grid-invariant, VMEM-resident
            pl.BlockSpec((K, tm_eff), lambda j: (0, j)),    # patch columns: lane-dense tiles
        ],
        out_specs=pl.BlockSpec((cout, tm_eff), lambda j: (0, j)),
        compiler_params=pltpu.CompilerParams(dimension_semantics=("parallel",)),
    )(w_m, a_t)


# ---------------------------------------------------------------------------
# Wrapper-side layout plumbing: channel-first im2col (data movement only)
# ---------------------------------------------------------------------------
def _im2col_cfirst(x, k, stride):
    """x: (C, N, H, W) -> A^T of shape (C*k*k, N*Ho*Wo); K ordering (c, kh, kw)
    matches a direct reshape of the PyTorch (Cout, Cin, kh, kw) weight."""
    C, N, H, W = x.shape
    Ho = (H - k) // stride + 1
    Wo = (W - k) // stride + 1
    taps = []
    for kh in range(k):
        for kw in range(k):
            taps.append(x[:, :,
                          kh:kh + stride * (Ho - 1) + 1:stride,
                          kw:kw + stride * (Wo - 1) + 1:stride])
    a_t = jnp.stack(taps, axis=1)                 # (C, k*k, N, Ho, Wo)
    return a_t.reshape(C * k * k, N * Ho * Wo), Ho, Wo


def conv2d_block_layer(x_cnhw, w_oikk, *, stride=2, slope=0.02, tm=512):
    """Valid conv (padding=0), bias=False, fused LeakyReLU. Channel-first in/out, bf16 out."""
    cout, cin, k, _ = w_oikk.shape
    a_t, Ho, Wo = _im2col_cfirst(x_cnhw.astype(jnp.bfloat16), k, stride)
    w_m = w_oikk.reshape(cout, cin * k * k).astype(jnp.bfloat16)
    out = pallas_gemm_lrelu(w_m, a_t, slope=slope, apply_act=True,
                            out_dtype=jnp.bfloat16, tm=tm)
    N = x_cnhw.shape[1]
    return out.reshape(cout, N, Ho, Wo)


def classifier_conv(x_cnhw, w, b):
    """3x3 stride-1 conv with bias. Tiny (M = batch) -> plain jnp dot per the perf review."""
    cout, cin, k, _ = w.shape
    a_t, Ho, Wo = _im2col_cfirst(x_cnhw.astype(jnp.float32), k, 1)
    w_m = w.reshape(cout, cin * k * k).astype(jnp.float32)
    out = w_m @ a_t + b.reshape(cout, 1)          # (1, N*Ho*Wo)
    N = x_cnhw.shape[1]
    return out.reshape(cout, N, Ho, Wo).transpose(1, 0, 2, 3)   # -> NCHW


# ---------------------------------------------------------------------------
# Parameter init: xavier_uniform + spectral normalization (plain-JAX setup)
# ---------------------------------------------------------------------------
def _xavier_uniform(key, shape):
    cout, cin, kh, kw = shape
    fan_in, fan_out = cin * kh * kw, cout * kh * kw
    bound = (6.0 / (fan_in + fan_out)) ** 0.5
    return jax.random.uniform(key, shape, jnp.float32, -bound, bound)


def _spectral_normalize(w, key, n_iter=5):
    # Inference-equivalent spectral norm (power iteration at init); PyTorch updates u per forward.
    w_mat = w.reshape(w.shape[0], -1)
    u = jax.random.normal(key, (w.shape[0],), jnp.float32)
    u = u / (jnp.linalg.norm(u) + 1e-12)
    v = None
    for _ in range(n_iter):
        v = w_mat.T @ u
        v = v / (jnp.linalg.norm(v) + 1e-12)
        u = w_mat @ v
        u = u / (jnp.linalg.norm(u) + 1e-12)
    sigma = u @ (w_mat @ v)
    return w / sigma


def init_discriminator_params(key, chn=8, k_size=5):
    chans = [3, chn, 2 * chn, 4 * chn, 8 * chn, 16 * chn]
    params = {"block": []}
    keys = jax.random.split(key, 16)
    ki = 0
    for layer in range(5):
        shape = (chans[layer + 1], chans[layer], k_size, k_size)
        w = _xavier_uniform(keys[ki], shape); ki += 1
        w = _spectral_normalize(w, keys[ki]); ki += 1
        params["block"].append(w)
    wc = _xavier_uniform(keys[ki], (1, 16 * chn, 3, 3)); ki += 1
    wc = _spectral_normalize(wc, keys[ki]); ki += 1
    fan_in = 16 * chn * 9
    bc = jax.random.uniform(keys[ki], (1,), jnp.float32,
                            -1.0 / fan_in ** 0.5, 1.0 / fan_in ** 0.5)
    params["classifier_w"] = wc
    params["classifier_b"] = bc
    return params


# ---------------------------------------------------------------------------
# Forward pass
# ---------------------------------------------------------------------------
def discriminator_forward(params, x_nchw, slope=0.02):
    x = jnp.transpose(x_nchw, (1, 0, 2, 3))       # NCHW -> CNHW (channel-first, spatial minor)
    for li, w in enumerate(params["block"]):
        x = conv2d_block_layer(x, w, stride=2, slope=slope,
                               tm=1024 if li == 0 else 512)
    return classifier_conv(x, params["classifier_w"], params["classifier_b"])


if __name__ == "__main__":
    key = jax.random.PRNGKey(0)
    k_params, k_input = jax.random.split(key)

    chn = 8  # small channel count for the test (module default is 32)
    # 189 is the minimum spatial size that survives 5 valid stride-2 k=5 convs
    # followed by the 3x3 classifier (-> 1x1 output), since padding=0 everywhere.
    N, C, H, W = 2, 3, 189, 189
    x = jax.random.normal(k_input, (N, C, H, W), jnp.float32)

    params = init_discriminator_params(k_params, chn=chn, k_size=5)
    out = jax.jit(discriminator_forward)(params, x)
    out = jax.block_until_ready(out)

    assert out.shape == (N, 1, 1, 1), out.shape
    assert out.dtype == jnp.float32
    assert bool(jnp.isfinite(out).all())
    print("KERNEL_OK")
</pallas_src>

<mosaic_0001>
module attributes {stable_mosaic.version = 11 : i64} {
  func.func @_gemm_lrelu_kernel(%arg0: i32, %arg1: memref<8x75xbf16, #tpu.memory_space<vmem>>, %arg2: memref<75x1024xbf16, #tpu.memory_space<vmem>>, %arg3: memref<8x1024xbf16, #tpu.memory_space<vmem>>) attributes {dimension_semantics = [#tpu.dimension_semantics<parallel>], iteration_bounds = array<i64: 17>, scalar_prefetch = 0 : i64, scratch_operands = 0 : i64, tpu.core_type = #tpu.core_type<tc>, window_params = [{pipeline_mode = #tpu.pipeline_mode<synchronous>, transform_indices = @transform_0, window_bounds = array<i64: 8, 75>}, {transform_indices = @transform_1, window_bounds = array<i64: 75, 1024>}, {transform_indices = @transform_2, window_bounds = array<i64: 8, 1024>}]} {
    %c0 = arith.constant 0 : index
    %c0_0 = arith.constant 0 : index
    %0 = vector.load %arg1[%c0, %c0_0] : memref<8x75xbf16, #tpu.memory_space<vmem>>, vector<8x75xbf16>
    %c0_1 = arith.constant 0 : index
    %c0_2 = arith.constant 0 : index
    %1 = vector.load %arg2[%c0_1, %c0_2] : memref<75x1024xbf16, #tpu.memory_space<vmem>>, vector<75x1024xbf16>
    %cst = arith.constant dense<0.000000e+00> : vector<8x1024xf32>
    %2 = tpu.matmul %0, %1, %cst {dimension_numbers = #tpu.dot_dimension_numbers<[1], [0], [0], [1], [0, 0, 1, 1], [], []>} : vector<8x75xbf16>, vector<75x1024xbf16>, vector<8x1024xf32> -> vector<8x1024xf32>
    %cst_3 = arith.constant 0.000000e+00 : f32
    %3 = vector.broadcast %cst_3 : f32 to vector<8x1024xf32>
    %4 = arith.cmpf oge, %2, %3 : vector<8x1024xf32>
    %cst_4 = arith.constant 2.000000e-02 : f32
    %5 = vector.broadcast %cst_4 : f32 to vector<8x1024xf32>
    %6 = arith.mulf %2, %5 : vector<8x1024xf32>
    %7 = arith.select %4, %2, %6 : vector<8x1024xi1>, vector<8x1024xf32>
    %8 = arith.truncf %7 : vector<8x1024xf32> to vector<8x1024xbf16>
    %c0_5 = arith.constant 0 : index
    %c0_6 = arith.constant 0 : index
    %9 = vector.load %arg3[%c0_5, %c0_6] : memref<8x1024xbf16, #tpu.memory_space<vmem>>, vector<8x1024xbf16>
    tpu.vector_store %arg3[%c0_5, %c0_6], %8 {strides = array<i32>} : memref<8x1024xbf16, #tpu.memory_space<vmem>>, vector<8x1024xbf16>,
    return
  }
  func.func @transform_0(%arg0: i32) -> (i32, i32) {
    %c0_i32 = arith.constant 0 : i32
    %c0_i32_0 = arith.constant 0 : i32
    %c0_i32_1 = arith.constant 0 : i32
    return %c0_i32, %c0_i32_0 : i32, i32
  }
  func.func @transform_1(%arg0: i32) -> (i32, i32) {
    %c0_i32 = arith.constant 0 : i32
    %c0_i32_0 = arith.constant 0 : i32
    return %c0_i32, %arg0 : i32, i32
  }
  func.func @transform_2(%arg0: i32) -> (i32, i32) {
    %c0_i32 = arith.constant 0 : i32
    %c0_i32_0 = arith.constant 0 : i32
    return %c0_i32, %arg0 : i32, i32
  }
}

module attributes {stable_mosaic.version = 11 : i64} {
  func.func @_gemm_lrelu_kernel(%arg0: i32, %arg1: memref<16x200xbf16, #tpu.memory_space<vmem>>, %arg2: memref<200x512xbf16, #tpu.memory_space<vmem>>, %arg3: memref<16x512xbf16, #tpu.memory_space<vmem>>) attributes {dimension_semantics = [#tpu.dimension_semantics<parallel>], iteration_bounds = array<i64: 8>, scalar_prefetch = 0 : i64, scratch_operands = 0 : i64, tpu.core_type = #tpu.core_type<tc>, window_params = [{pipeline_mode = #tpu.pipeline_mode<synchronous>, transform_indices = @transform_0, window_bounds = array<i64: 16, 200>}, {transform_indices = @transform_1, window_bounds = array<i64: 200, 512>}, {transform_indices = @transform_2, window_bounds = array<i64: 16, 512>}]} {
    %c0 = arith.constant 0 : index
    %c0_0 = arith.constant 0 : index
    %0 = vector.load %arg1[%c0, %c0_0] : memref<16x200xbf16, #tpu.memory_space<vmem>>, vector<16x200xbf16>
    %c0_1 = arith.constant 0 : index
    %c0_2 = arith.constant 0 : index
    %1 = vector.load %arg2[%c0_1, %c0_2] : memref<200x512xbf16, #tpu.memory_space<vmem>>, vector<200x512xbf16>
    %cst = arith.constant dense<0.000000e+00> : vector<16x512xf32>
    %2 = tpu.matmul %0, %1, %cst {dimension_numbers = #tpu.dot_dimension_numbers<[1], [0], [0], [1], [0, 0, 1, 1], [], []>} : vector<16x200xbf16>, vector<200x512xbf16>, vector<16x512xf32> -> vector<16x512xf32>
    %cst_3 = arith.constant 0.000000e+00 : f32
    %3 = vector.broadcast %cst_3 : f32 to vector<16x512xf32>
    %4 = arith.cmpf oge, %2, %3 : vector<16x512xf32>
    %cst_4 = arith.constant 2.000000e-02 : f32
    %5 = vector.broadcast %cst_4 : f32 to vector<16x512xf32>
    %6 = arith.mulf %2, %5 : vector<16x512xf32>
    %7 = arith.select %4, %2, %6 : vector<16x512xi1>, vector<16x512xf32>
    %8 = arith.truncf %7 : vector<16x512xf32> to vector<16x512xbf16>
    %c0_5 = arith.constant 0 : index
    %c0_6 = arith.constant 0 : index
    %9 = vector.load %arg3[%c0_5, %c0_6] : memref<16x512xbf16, #tpu.memory_space<vmem>>, vector<16x512xbf16>
    tpu.vector_store %arg3[%c0_5, %c0_6], %8 {strides = array<i32>} : memref<16x512xbf16, #tpu.memory_space<vmem>>, vector<16x512xbf16>,
    return
  }
  func.func @transform_0(%arg0: i32) -> (i32, i32) {
    %c0_i32 = arith.constant 0 : i32
    %c0_i32_0 = arith.constant 0 : i32
    %c0_i32_1 = arith.constant 0 : i32
    return %c0_i32, %c0_i32_0 : i32, i32
  }
  func.func @transform_1(%arg0: i32) -> (i32, i32) {
    %c0_i32 = arith.constant 0 : i32
    %c0_i32_0 = arith.constant 0 : i32
    return %c0_i32, %arg0 : i32, i32
  }
  func.func @transform_2(%arg0: i32) -> (i32, i32) {
    %c0_i32 = arith.constant 0 : i32
    %c0_i32_0 = arith.constant 0 : i32
    return %c0_i32, %arg0 : i32, i32
  }
}

module attributes {stable_mosaic.version = 11 : i64} {
  func.func @_gemm_lrelu_kernel(%arg0: i32, %arg1: memref<32x400xbf16, #tpu.memory_space<vmem>>, %arg2: memref<400x512xbf16, #tpu.memory_space<vmem>>, %arg3: memref<32x512xbf16, #tpu.memory_space<vmem>>) attributes {dimension_semantics = [#tpu.dimension_semantics<parallel>], iteration_bounds = array<i64: 2>, scalar_prefetch = 0 : i64, scratch_operands = 0 : i64, tpu.core_type = #tpu.core_type<tc>, window_params = [{pipeline_mode = #tpu.pipeline_mode<synchronous>, transform_indices = @transform_0, window_bounds = array<i64: 32, 400>}, {transform_indices = @transform_1, window_bounds = array<i64: 400, 512>}, {transform_indices = @transform_2, window_bounds = array<i64: 32, 512>}]} {
    %c0 = arith.constant 0 : index
    %c0_0 = arith.constant 0 : index
    %0 = vector.load %arg1[%c0, %c0_0] : memref<32x400xbf16, #tpu.memory_space<vmem>>, vector<32x400xbf16>
    %c0_1 = arith.constant 0 : index
    %c0_2 = arith.constant 0 : index
    %1 = vector.load %arg2[%c0_1, %c0_2] : memref<400x512xbf16, #tpu.memory_space<vmem>>, vector<400x512xbf16>
    %cst = arith.constant dense<0.000000e+00> : vector<32x512xf32>
    %2 = tpu.matmul %0, %1, %cst {dimension_numbers = #tpu.dot_dimension_numbers<[1], [0], [0], [1], [0, 0, 1, 1], [], []>} : vector<32x400xbf16>, vector<400x512xbf16>, vector<32x512xf32> -> vector<32x512xf32>
    %cst_3 = arith.constant 0.000000e+00 : f32
    %3 = vector.broadcast %cst_3 : f32 to vector<32x512xf32>
    %4 = arith.cmpf oge, %2, %3 : vector<32x512xf32>
    %cst_4 = arith.constant 2.000000e-02 : f32
    %5 = vector.broadcast %cst_4 : f32 to vector<32x512xf32>
    %6 = arith.mulf %2, %5 : vector<32x512xf32>
    %7 = arith.select %4, %2, %6 : vector<32x512xi1>, vector<32x512xf32>
    %8 = arith.truncf %7 : vector<32x512xf32> to vector<32x512xbf16>
    %c0_5 = arith.constant 0 : index
    %c0_6 = arith.constant 0 : index
    %9 = vector.load %arg3[%c0_5, %c0_6] : memref<32x512xbf16, #tpu.memory_space<vmem>>, vector<32x512xbf16>
    tpu.vector_store %arg3[%c0_5, %c0_6], %8 {strides = array<i32>} : memref<32x512xbf16, #tpu.memory_space<vmem>>, vector<32x512xbf16>,
    return
  }
  func.func @transform_0(%arg0: i32) -> (i32, i32) {
    %c0_i32 = arith.constant 0 : i32
    %c0_i32_0 = arith.constant 0 : i32
    %c0_i32_1 = arith.constant 0 : i32
    return %c0_i32, %c0_i32_0 : i32, i32
  }
  func.func @transform_1(%arg0: i32) -> (i32, i32) {
    %c0_i32 = arith.constant 0 : i32
    %c0_i32_0 = arith.constant 0 : i32
    return %c0_i32, %arg0 : i32, i32
  }
  func.func @transform_2(%arg0: i32) -> (i32, i32) {
    %c0_i32 = arith.constant 0 : i32
    %c0_i32_0 = arith.constant 0 : i32
    return %c0_i32, %arg0 : i32, i32
  }
}

module attributes {stable_mosaic.version = 11 : i64} {
  func.func @_gemm_lrelu_kernel(%arg0: i32, %arg1: memref<64x800xbf16, #tpu.memory_space<vmem>>, %arg2: memref<800x162xbf16, #tpu.memory_space<vmem>>, %arg3: memref<64x162xbf16, #tpu.memory_space<vmem>>) attributes {dimension_semantics = [#tpu.dimension_semantics<parallel>], iteration_bounds = array<i64: 1>, scalar_prefetch = 0 : i64, scratch_operands = 0 : i64, tpu.core_type = #tpu.core_type<tc>, window_params = [{pipeline_mode = #tpu.pipeline_mode<synchronous>, transform_indices = @transform_0, window_bounds = array<i64: 64, 800>}, {transform_indices = @transform_1, window_bounds = array<i64: 800, 162>}, {transform_indices = @transform_2, window_bounds = array<i64: 64, 162>}]} {
    %c0 = arith.constant 0 : index
    %c0_0 = arith.constant 0 : index
    %0 = vector.load %arg1[%c0, %c0_0] : memref<64x800xbf16, #tpu.memory_space<vmem>>, vector<64x800xbf16>
    %c0_1 = arith.constant 0 : index
    %c0_2 = arith.constant 0 : index
    %1 = vector.load %arg2[%c0_1, %c0_2] : memref<800x162xbf16, #tpu.memory_space<vmem>>, vector<800x162xbf16>
    %cst = arith.constant dense<0.000000e+00> : vector<64x162xf32>
    %2 = tpu.matmul %0, %1, %cst {dimension_numbers = #tpu.dot_dimension_numbers<[1], [0], [0], [1], [0, 0, 1, 1], [], []>} : vector<64x800xbf16>, vector<800x162xbf16>, vector<64x162xf32> -> vector<64x162xf32>
    %cst_3 = arith.constant 0.000000e+00 : f32
    %3 = vector.broadcast %cst_3 : f32 to vector<64x162xf32>
    %4 = arith.cmpf oge, %2, %3 : vector<64x162xf32>
    %cst_4 = arith.constant 2.000000e-02 : f32
    %5 = vector.broadcast %cst_4 : f32 to vector<64x162xf32>
    %6 = arith.mulf %2, %5 : vector<64x162xf32>
    %7 = arith.select %4, %2, %6 : vector<64x162xi1>, vector<64x162xf32>
    %8 = arith.truncf %7 : vector<64x162xf32> to vector<64x162xbf16>
    %c0_5 = arith.constant 0 : index
    %c0_6 = arith.constant 0 : index
    %9 = vector.load %arg3[%c0_5, %c0_6] : memref<64x162xbf16, #tpu.memory_space<vmem>>, vector<64x162xbf16>
    tpu.vector_store %arg3[%c0_5, %c0_6], %8 {strides = array<i32>} : memref<64x162xbf16, #tpu.memory_space<vmem>>, vector<64x162xbf16>,
    return
  }
  func.func @transform_0(%arg0: i32) -> (i32, i32) {
    %c0_i32 = arith.constant 0 : i32
    %c0_i32_0 = arith.constant 0 : i32
    %c0_i32_1 = arith.constant 0 : i32
    return %c0_i32, %c0_i32_0 : i32, i32
  }
  func.func @transform_1(%arg0: i32) -> (i32, i32) {
    %c0_i32 = arith.constant 0 : i32
    %c0_i32_0 = arith.constant 0 : i32
    return %c0_i32, %arg0 : i32, i32
  }
  func.func @transform_2(%arg0: i32) -> (i32, i32) {
    %c0_i32 = arith.constant 0 : i32
    %c0_i32_0 = arith.constant 0 : i32
    return %c0_i32, %arg0 : i32, i32
  }
}

module attributes {stable_mosaic.version = 11 : i64} {
  func.func @_gemm_lrelu_kernel(%arg0: i32, %arg1: memref<128x1600xbf16, #tpu.memory_space<vmem>>, %arg2: memref<1600x18xbf16, #tpu.memory_space<vmem>>, %arg3: memref<128x18xbf16, #tpu.memory_space<vmem>>) attributes {dimension_semantics = [#tpu.dimension_semantics<parallel>], iteration_bounds = array<i64: 1>, scalar_prefetch = 0 : i64, scratch_operands = 0 : i64, tpu.core_type = #tpu.core_type<tc>, window_params = [{pipeline_mode = #tpu.pipeline_mode<synchronous>, transform_indices = @transform_0, window_bounds = array<i64: 128, 1600>}, {transform_indices = @transform_1, window_bounds = array<i64: 1600, 18>}, {transform_indices = @transform_2, window_bounds = array<i64: 128, 18>}]} {
    %c0 = arith.constant 0 : index
    %c0_0 = arith.constant 0 : index
    %0 = vector.load %arg1[%c0, %c0_0] : memref<128x1600xbf16, #tpu.memory_space<vmem>>, vector<128x1600xbf16>
    %c0_1 = arith.constant 0 : index
    %c0_2 = arith.constant 0 : index
    %1 = vector.load %arg2[%c0_1, %c0_2] : memref<1600x18xbf16, #tpu.memory_space<vmem>>, vector<1600x18xbf16>
    %cst = arith.constant dense<0.000000e+00> : vector<128x18xf32>
    %2 = tpu.matmul %0, %1, %cst {dimension_numbers = #tpu.dot_dimension_numbers<[1], [0], [0], [1], [0, 0, 1, 1], [], []>} : vector<128x1600xbf16>, vector<1600x18xbf16>, vector<128x18xf32> -> vector<128x18xf32>
    %cst_3 = arith.constant 0.000000e+00 : f32
    %3 = vector.broadcast %cst_3 : f32 to vector<128x18xf32>
    %4 = arith.cmpf oge, %2, %3 : vector<128x18xf32>
    %cst_4 = arith.constant 2.000000e-02 : f32
    %5 = vector.broadcast %cst_4 : f32 to vector<128x18xf32>
    %6 = arith.mulf %2, %5 : vector<128x18xf32>
    %7 = arith.select %4, %2, %6 : vector<128x18xi1>, vector<128x18xf32>
    %8 = arith.truncf %7 : vector<128x18xf32> to vector<128x18xbf16>
    %c0_5 = arith.constant 0 : index
    %c0_6 = arith.constant 0 : index
    %9 = vector.load %arg3[%c0_5, %c0_6] : memref<128x18xbf16, #tpu.memory_space<vmem>>, vector<128x18xbf16>
    tpu.vector_store %arg3[%c0_5, %c0_6], %8 {strides = array<i32>} : memref<128x18xbf16, #tpu.memory_space<vmem>>, vector<128x18xbf16>,
    return
  }
  func.func @transform_0(%arg0: i32) -> (i32, i32) {
    %c0_i32 = arith.constant 0 : i32
    %c0_i32_0 = arith.constant 0 : i32
    %c0_i32_1 = arith.constant 0 : i32
    return %c0_i32, %c0_i32_0 : i32, i32
  }
  func.func @transform_1(%arg0: i32) -> (i32, i32) {
    %c0_i32 = arith.constant 0 : i32
    %c0_i32_0 = arith.constant 0 : i32
    return %c0_i32, %arg0 : i32, i32
  }
  func.func @transform_2(%arg0: i32) -> (i32, i32) {
    %c0_i32 = arith.constant 0 : i32
    %c0_i32_0 = arith.constant 0 : i32
    return %c0_i32, %arg0 : i32, i32
  }
}

</mosaic_0001>

<bundles_post_ra>
// kernel: discriminator_forward.5
= control target key start
LH: loop header
LB: loop body
LE: loop exit
PB: predicated region body
PF: predicated region fallthrough
CT: control target
= control target key end

     0   :  { %s929_s9 = smov 0   ;;  %s931_s10 = smov 0   ;;  %s1134_s0 = inlined_call_operand.vmem [shape: bf16[8,75], index: 0, kind: input, shape index: {}]   ;;  %s1135_s1 = inlined_call_operand.vmem [shape: bf16[75,17298], index: 1, kind: input, shape index: {}]   ;;  %s1136_s2 = inlined_call_operand.vmem [shape: bf16[8,17298], index: 2, kind: output, shape index: {}]  }
   0x1   :  { %s933_s11 = smov 0  }
   0x2 LB: > { %s796_s12 = sadd.s32 4294967295, %s910_s11   ;;  %s946_s13 = sadd.s32 1, %s910_s11   ;;  %s910_s11 = sphi %s933_s11, %s1139_s11   ;;  %s906_s10 = sphi %s931_s10, %s1138_s10   ;;  %s902_s9 = sphi %s929_s9, %s1137_s9  }
   0x3   : > { %s37_s14 = ssub.s32 %s910_s11, %s946_s13  ;;  %s40_s15 = sadd.s32 1, %s906_s10 }
   0x4   : > { %p38_p0 = scmp.eq.s32.totalorder %s37_s14, 0  ;;  %p47_p1 = scmp.ne.s32.totalorder %s906_s10, %s902_s9 }
   0x5   : > { %p48_p2 = scmp.eq.s32.totalorder %s910_s11, 0  ;;  %p799_p4 = scmp.ge.s32.totalorder %s910_s11, 17 }
   0x6   : > { %s955_s16 = scalar_select %p38_p0, %s906_s10, %s40_s15  }
   0x7   : > { %p49_p3 = por %p48_p2, %p47_p1  ;;  %102 = sbr.rel (%p799_p4) target bundleno = 37 (0x25), region = 20 }
   0xc   : > { %105 = sbr.rel (!%p49_p3) target bundleno = 37 (0x25), region = 24  ;;  %s107_s17 = sand.u32 (%p49_p3), 1, %s906_s10  }
   0xd   : > { %s855_s18 = sshll.u32 (%p49_p3), %s910_s11, 5  ;;  %s860_s19 = smul.u32 (%p49_p3), 320, %s107_s17 }
   0xe   : > { %s963_s22 = scalar_lea.vmem (%p49_p3), %s1135_s1, %s855_s18 }
   0xf   : > { %v125_v0 = vld [vmem:[%s963_s22] sm:$0xff] (%p49_p3)  ;;  %v127_v1 = vld [vmem:[%s963_s22 + $0x8] sm:$0xff] (%p49_p3)  ;;  %v129_v2 = vld [vmem:[%s963_s22 + $0x10] sm:$0xff] (%p49_p3)  ;;  %s971_s23 = scalar_lea.vmem (%p49_p3), [#allocation2], %s860_s19 }
  0x10   : > { %v131_v3 = vld [vmem:[%s963_s22 + $0x18] sm:$0xff] (%p49_p3)  ;;  %v133_v4 = vld [vmem:[%s963_s22 + $0x220] sm:$0xff] (%p49_p3)  ;;  %v135_v5 = vld [vmem:[%s963_s22 + $0x228] sm:$0xff] (%p49_p3)  ;;  %126 = vst [vmem:[%s971_s23] sm:$0xff] (%p49_p3), %v125_v0 }
  0x11   : > { %128 = vst [vmem:[%s971_s23 + $0x8] sm:$0xff] %v127_v1  ;;  %130 = vst [vmem:[%s971_s23 + $0x10] sm:$0xff] %v129_v2  ;;  %v137_v6 = vld [vmem:[%s963_s22 + $0x230] sm:$0xff]  ;;  %v139_v7 = vld [vmem:[%s963_s22 + $0x238] sm:$0xff] }
  0x12   : > { %132 = vst [vmem:[%s971_s23 + $0x18] sm:$0xff] %v131_v3  ;;  %134 = vst [vmem:[%s971_s23 + $0x20] sm:$0xff] %v133_v4  ;;  %v141_v8 = vld [vmem:[%s963_s22 + $0x440] sm:$0xff]  ;;  %v143_v9 = vld [vmem:[%s963_s22 + $0x448] sm:$0xff] }
  0x13   : > { %136 = vst [vmem:[%s971_s23 + $0x28] sm:$0xff] %v135_v5  ;;  %138 = vst [vmem:[%s971_s23 + $0x30] sm:$0xff] %v137_v6  ;;  %v145_v10 = vld [vmem:[%s963_s22 + $0x450] sm:$0xff]  ;;  %v147_v11 = vld [vmem:[%s963_s22 + $0x458] sm:$0xff] }
  0x14   : > { %140 = vst [vmem:[%s971_s23 + $0x38] sm:$0xff] %v139_v7  ;;  %142 = vst [vmem:[%s971_s23 + $0x40] sm:$0xff] %v141_v8  ;;  %v149_v12 = vld [vmem:[%s963_s22 + $0x660] sm:$0xff]  ;;  %v151_v13 = vld [vmem:[%s963_s22 + $0x668] sm:$0xff] }
  0x15   : > { %144 = vst [vmem:[%s971_s23 + $0x48] sm:$0xff] %v143_v9  ;;  %146 = vst [vmem:[%s971_s23 + $0x50] sm:$0xff] %v145_v10  ;;  %v153_v14 = vld [vmem:[%s963_s22 + $0x670] sm:$0xff]  ;;  %v155_v15 = vld [vmem:[%s963_s22 + $0x678] sm:$0xff] }
  0x16   : > { %148 = vst [vmem:[%s971_s23 + $0x58] sm:$0xff] %v147_v11  ;;  %150 = vst [vmem:[%s971_s23 + $0x60] sm:$0xff] %v149_v12  ;;  %v157_v16 = vld [vmem:[%s963_s22 + $0x880] sm:$0xff]  ;;  %v159_v17 = vld [vmem:[%s963_s22 + $0x888] sm:$0xff] }
  0x17   : > { %152 = vst [vmem:[%s971_s23 + $0x68] sm:$0xff] %v151_v13  ;;  %154 = vst [vmem:[%s971_s23 + $0x70] sm:$0xff] %v153_v14  ;;  %v161_v18 = vld [vmem:[%s963_s22 + $0x890] sm:$0xff]  ;;  %v163_v19 = vld [vmem:[%s963_s22 + $0x898] sm:$0xff] }
  0x18   : > { %156 = vst [vmem:[%s971_s23 + $0x78] sm:$0xff] %v155_v15  ;;  %158 = vst [vmem:[%s971_s23 + $0x80] sm:$0xff] %v157_v16  ;;  %v165_v20 = vld [vmem:[%s963_s22 + $0xaa0] sm:$0xff]  ;;  %v167_v21 = vld [vmem:[%s963_s22 + $0xaa8] sm:$0xff] }
  0x19   : > { %160 = vst [vmem:[%s971_s23 + $0x88] sm:$0xff] %v159_v17  ;;  %162 = vst [vmem:[%s971_s23 + $0x90] sm:$0xff] %v161_v18  ;;  %v169_v22 = vld [vmem:[%s963_s22 + $0xab0] sm:$0xff]  ;;  %v171_v23 = vld [vmem:[%s963_s22 + $0xab8] sm:$0xff] }
  0x1a   : > { %164 = vst [vmem:[%s971_s23 + $0x98] sm:$0xff] %v163_v19  ;;  %166 = vst [vmem:[%s971_s23 + $0xa0] sm:$0xff] %v165_v20  ;;  %v173_v24 = vld [vmem:[%s963_s22 + $0xcc0] sm:$0xff]  ;;  %v175_v25 = vld [vmem:[%s963_s22 + $0xcc8] sm:$0xff] }
  0x1b   : > { %168 = vst [vmem:[%s971_s23 + $0xa8] sm:$0xff] %v167_v21  ;;  %170 = vst [vmem:[%s971_s23 + $0xb0] sm:$0xff] %v169_v22  ;;  %v177_v26 = vld [vmem:[%s963_s22 + $0xcd0] sm:$0xff]  ;;  %v179_v27 = vld [vmem:[%s963_s22 + $0xcd8] sm:$0xff] }
  0x1c   : > { %172 = vst [vmem:[%s971_s23 + $0xb8] sm:$0xff] %v171_v23  ;;  %174 = vst [vmem:[%s971_s23 + $0xc0] sm:$0xff] %v173_v24  ;;  %v181_v28 = vld [vmem:[%s963_s22 + $0xee0] sm:$0xff]  ;;  %v183_v29 = vld [vmem:[%s963_s22 + $0xee8] sm:$0xff] }
  0x1d   : > { %176 = vst [vmem:[%s971_s23 + $0xc8] sm:$0xff] %v175_v25  ;;  %178 = vst [vmem:[%s971_s23 + $0xd0] sm:$0xff] %v177_v26  ;;  %v185_v30 = vld [vmem:[%s963_s22 + $0xef0] sm:$0xff]  ;;  %v187_v31 = vld [vmem:[%s963_s22 + $0xef8] sm:$0xff] }
  0x1e   : > { %180 = vst [vmem:[%s971_s23 + $0xd8] sm:$0xff] %v179_v27  ;;  %182 = vst [vmem:[%s971_s23 + $0xe0] sm:$0xff] %v181_v28  ;;  %v189_v32 = vld [vmem:[%s963_s22 + $0x1100] sm:$0xff]  ;;  %v191_v33 = vld [vmem:[%s963_s22 + $0x1108] sm:$0xff] }
  0x1f   : > { %184 = vst [vmem:[%s971_s23 + $0xe8] sm:$0xff] %v183_v29  ;;  %186 = vst [vmem:[%s971_s23 + $0xf0] sm:$0xff] %v185_v30  ;;  %v193_v34 = vld [vmem:[%s963_s22 + $0x1110] sm:$0xff]  ;;  %v195_v35 = vld [vmem:[%s963_s22 + $0x1118] sm:$0xff] }
  0x20   : > { %188 = vst [vmem:[%s971_s23 + $0xf8] sm:$0xff] %v187_v31  ;;  %190 = vst [vmem:[%s971_s23 + $0x100] sm:$0xff] %v189_v32  ;;  %v197_v36 = vld [vmem:[%s963_s22 + $0x1320] sm:$0xff]  ;;  %v199_v37 = vld [vmem:[%s963_s22 + $0x1328] sm:$0xff] }
  0x21   : > { %192 = vst [vmem:[%s971_s23 + $0x108] sm:$0xff] %v191_v33  ;;  %194 = vst [vmem:[%s971_s23 + $0x110] sm:$0xff] %v193_v34  ;;  %v201_v38 = vld [vmem:[%s963_s22 + $0x1330] sm:$0xff]  ;;  %v203_v39 = vld [vmem:[%s963_s22 + $0x1338] sm:$0xff] }
  0x22   : > { %196 = vst [vmem:[%s971_s23 + $0x118] sm:$0xff] %v195_v35  ;;  %198 = vst [vmem:[%s971_s23 + $0x120] sm:$0xff] %v197_v36 }
  0x23   : > { %200 = vst [vmem:[%s971_s23 + $0x128] sm:$0xff] %v199_v37  ;;  %202 = vst [vmem:[%s971_s23 + $0x130] sm:$0xff] %v201_v38 }
  0x24   : > { %204 = vst [vmem:[%s971_s23 + $0x138] sm:$0xff] %v203_v39 }
  0x25 PF: > { %p802_p5 = scmp.ge.s32.totalorder %s910_s11, 1  ;;  %p209_p6 = scmp.lt.s32.totalorder %s910_s11, 18 }
  0x27   : > { %p210_p7 = pnand %p802_p5, %p209_p6 }
  0x28   : > { %s216_s24 = sand.u32 (!%p210_p7), 1, %s902_s9   ;;  %s803_s29 = sshll.u32 (!%p210_p7), %s796_s12, 3 }
  0x29   : > { %213 = sbr.rel (%p210_p7) target bundleno = 293 (0x125), region = 47  ;;  %p239_p8 = scmp.lt.s32.totalorder (!%p210_p7), %s803_s29, 135 }
  0x2a   : > { %s861_s25 = smul.u32 (!%p210_p7), 320, %s216_s24 }
  0x2c   : > { %s1052_s26 = scalar_lea.vmem (!%p210_p7), [#allocation2], %s861_s25 }
  0x2e   : > { %vm482_vm0 = vcmask 1044480   ;;  %vm483_vm1 = vcmask 1045504   ;;  %v912_v40 = vmov 65535   ;;  %v913_v42 = vmov 0   ;;  %v278_v43 = vld [vmem:[%s1052_s26 + $0x100] sm:$0xff]  ;;  %v279_v46 = vld [vmem:[%s1052_s26 + $0x108] sm:$0xff] }
  0x2f   : > { %v484_v41 = vsel %vm482_vm0, 4294967295, %v912_v40  ;;  %542 = vmatprep.mubr.bf16.mxu0 %v913_v42  ;;  %583 = vmatprep.mubr.bf16.mxu1 %v913_v42  ;;  %v282_v44 = vld [vmem:[%s1052_s26 + $0x120] sm:$0x33]  ;;  %v283_v48 = vld [vmem:[%s1052_s26 + $0x128] sm:$0x33]  ;;  %v280_v17 = vld [vmem:[%s1052_s26 + $0x110] sm:$0xff] }
  0x30   : > { %v1056_v45 = vsel %vm483_vm1, %v484_v41, 0  ;;  %v838_v47 = vcombine.high %v278_v43, %v282_v44  ;;  %v837_v49 = vcombine.low %v278_v43, %v282_v44  ;;  %v270_v50 = vld [vmem:[%s1052_s26 + $0xc0] sm:$0xff]  ;;  %v840_v52 = vcombine.high %v279_v46, %v283_v48  ;;  %v271_v54 = vld [vmem:[%s1052_s26 + $0xc8] sm:$0xff]  ;;  %v284_v18 = vld [vmem:[%s1052_s26 + $0x130] sm:$0x33]  ;;  %s1141_s29 = smov (!%p239_p8, %s803_s29), 135 }
  0x31   : > { %v274_v51 = vld [vmem:[%s1052_s26 + $0xe0] sm:$0xff]  ;;  %v839_v53 = vcombine.low %v279_v46, %v283_v48  ;;  %v275_v55 = vld [vmem:[%s1052_s26 + $0xe8] sm:$0xff]  ;;  %v281_v20 = vld [vmem:[%s1052_s26 + $0x118] sm:$0xff]  ;;  %v842_v25 = vcombine.high %v280_v17, %v284_v18  ;;  %v841_v29 = vcombine.low %v280_v17, %v284_v18  ;;  %vm478_vm2 = vcmask 613376   ;;  %s804_s30 = sshll.u32 %s1141_s29, 2 }
  0x32   : > { %v490_v56 = vand.u32 %v838_v47, %v1056_v45  ;;  %v487_v57 = vand.u32 %v837_v49, %v1056_v45  ;;  %v830_v58 = vcombine.high %v270_v50, %v274_v51  ;;  %v496_v59 = vand.u32 %v840_v52, %v1056_v45  ;;  %v262_v62 = vld [vmem:[%s1052_s26 + $0x80] sm:$0xff]  ;;  %v263_v0 = vld [vmem:[%s1052_s26 + $0x88] sm:$0xff]  ;;  %v285_v21 = vld [vmem:[%s1052_s26 + $0x138] sm:$0x33]  ;;  %s1118_s5 = scalar_lea.vmem %s1136_s2, %s804_s30 }
  0x33   : > { %v493_v60 = vand.u32 %v839_v53, %v1056_v45  ;;  %v832_v61 = vcombine.high %v271_v54, %v275_v55  ;;  %v266_v63 = vld [vmem:[%s1052_s26 + $0xa0] sm:$0xff]  ;;  %v267_v1 = vld [vmem:[%s1052_s26 + $0xa8] sm:$0xff]  ;;  %v829_v2 = vcombine.low %v270_v50, %v274_v51  ;;  %v831_v3 = vcombine.low %v271_v54, %v275_v55  ;;  %v272_v34 = vld [vmem:[%s1052_s26 + $0xd0] sm:$0xff] }
  0x34   : > { %516 = vmatprep.subr.bf16.mxu0 %v490_v56  ;;  %557 = vmatprep.subr.bf16.mxu1 %v496_v59  ;;  %v822_v4 = vcombine.high %v262_v62, %v266_v63  ;;  %v824_v5 = vcombine.high %v263_v0, %v267_v1  ;;  %v254_v6 = vld [vmem:[%s1052_s26 + $0x40] sm:$0xff]  ;;  %v255_v8 = vld [vmem:[%s1052_s26 + $0x48] sm:$0xff]  ;;  %v821_v10 = vcombine.low %v262_v62, %v266_v63  ;;  %v276_v35 = vld [vmem:[%s1052_s26 + $0xf0] sm:$0xff] }
  0x35   : > { %517 = vmatpush1.bf16.msra.mxu0 %v487_v57  ;;  %558 = vmatpush1.bf16.msra.mxu1 %v493_v60  ;;  %v258_v7 = vld [vmem:[%s1052_s26 + $0x60] sm:$0xff]  ;;  %v259_v9 = vld [vmem:[%s1052_s26 + $0x68] sm:$0xff]  ;;  %v823_v11 = vcombine.low %v263_v0, %v267_v1  ;;  %v844_v27 = vcombine.high %v281_v20, %v285_v21  ;;  %v502_v31 = vand.u32 %v842_v25, %v1056_v45  ;;  %v273_v36 = vld [vmem:[%s1052_s26 + $0xd8] sm:$0xff] }
  0x36   : > { %518 = vmatprep.subr.bf16.mxu0 %v830_v58  ;;  %559 = vmatprep.subr.bf16.mxu1 %v832_v61  ;;  %v814_v12 = vcombine.high %v254_v6, %v258_v7  ;;  %v246_v13 = vld [vmem:[%s1052_s26] sm:$0xff]  ;;  %v816_v15 = vcombine.high %v255_v8, %v259_v9  ;;  %v247_v16 = vld [vmem:[%s1052_s26 + $0x8] sm:$0xff]  ;;  %v813_v22 = vcombine.low %v254_v6, %v258_v7  ;;  %v277_v37 = vld [vmem:[%s1052_s26 + $0xf8] sm:$0xff] }
  0x37   : > { %v250_v14 = vld [vmem:[%s1052_s26 + $0x20] sm:$0xff]  ;;  %v251_v19 = vld [vmem:[%s1052_s26 + $0x28] sm:$0xff]  ;;  %v815_v23 = vcombine.low %v255_v8, %v259_v9  ;;  %v843_v32 = vcombine.low %v281_v20, %v285_v21  ;;  %v508_v33 = vand.u32 %v844_v27, %v1056_v45  ;;  %v499_v39 = vand.u32 %v841_v29, %v1056_v45  ;;  %v264_v44 = vld [vmem:[%s1052_s26 + $0x90] sm:$0xff] }
  0x38   : > { %v806_v24 = vcombine.high %v246_v13, %v250_v14  ;;  %v808_v26 = vcombine.high %v247_v16, %v251_v19  ;;  %v805_v28 = vcombine.low %v246_v13, %v250_v14  ;;  %v807_v30 = vcombine.low %v247_v16, %v251_v19  ;;  %v245_v38 = vld [vmem:[%s1134_s0] sm:$0xf]  ;;  %v268_v46 = vld [vmem:[%s1052_s26 + $0xb0] sm:$0xff]  ;;  %v265_v47 = vld [vmem:[%s1052_s26 + $0x98] sm:$0xff] }
  0x39   : > { %519 = vmatpush1.bf16.msra.mxu0 %v829_v2  ;;  %560 = vmatpush1.bf16.msra.mxu1 %v831_v3  ;;  %v505_v40 = vand.u32 %v843_v32, %v1056_v45  ;;  %v834_v41 = vcombine.high %v272_v34, %v276_v35  ;;  %v836_v43 = vcombine.high %v273_v36, %v277_v37  ;;  %v269_v48 = vld [vmem:[%s1052_s26 + $0xb8] sm:$0xff]  ;;  %v256_v52 = vld [vmem:[%s1052_s26 + $0x50] sm:$0xff] }
  0x3a   : > { %520 = vmatprep.subr.bf16.mxu0 %v822_v4  ;;  %561 = vmatprep.subr.bf16.mxu1 %v824_v5  ;;  %v833_v49 = vcombine.low %v272_v34, %v276_v35  ;;  %v835_v45 = vcombine.low %v273_v36, %v277_v37  ;;  %v826_v50 = vcombine.high %v264_v44, %v268_v46  ;;  %v260_v53 = vld [vmem:[%s1052_s26 + $0x70] sm:$0xff]  ;;  %v257_v54 = vld [vmem:[%s1052_s26 + $0x58] sm:$0xff] }
  0x3b   : > { %v828_v51 = vcombine.high %v265_v47, %v269_v48  ;;  %v261_v55 = vld [vmem:[%s1052_s26 + $0x78] sm:$0xff]  ;;  %v825_v56 = vcombine.low %v264_v44, %v268_v46  ;;  %v827_v57 = vcombine.low %v265_v47, %v269_v48  ;;  %v818_v58 = vcombine.high %v256_v52, %v260_v53  ;;  %v248_v60 = vld [vmem:[%s1052_s26 + $0x10] sm:$0xff] }
  0x3c   : > { %v820_v59 = vcombine.high %v257_v54, %v261_v55  ;;  %v252_v61 = vld [vmem:[%s1052_s26 + $0x30] sm:$0xff]  ;;  %v249_v62 = vld [vmem:[%s1052_s26 + $0x18] sm:$0xff]  ;;  %v817_v0 = vcombine.low %v256_v52, %v260_v53  ;;  %v819_v1 = vcombine.low %v257_v54, %v261_v55 }
  0x3d   : > { %521 = vmatpush1.bf16.msra.mxu0 %v821_v10  ;;  %562 = vmatpush1.bf16.msra.mxu1 %v823_v11  ;;  %v253_v63 = vld [vmem:[%s1052_s26 + $0x38] sm:$0xff]  ;;  %v810_v2 = vcombine.high %v248_v60, %v252_v61  ;;  %v809_v3 = vcombine.low %v248_v60, %v252_v61 }
  0x3e   : > { %522 = vmatprep.subr.bf16.mxu0 %v814_v12  ;;  %563 = vmatprep.subr.bf16.mxu1 %v816_v15  ;;  %v811_v4 = vcombine.low %v249_v62, %v253_v63 }
  0x41   : > { %523 = vmatpush1.bf16.msra.mxu0 %v813_v22  ;;  %564 = vmatpush1.bf16.msra.mxu1 %v815_v23 }
  0x42   : > { %524 = vmatprep.subr.bf16.mxu0 %v806_v24  ;;  %565 = vmatprep.subr.bf16.mxu1 %v808_v26 }
  0x45   : > { %525 = vmatpush1.bf16.msra.mxu0 %v805_v28  ;;  %566 = vmatpush1.bf16.msra.mxu1 %v807_v30 }
  0x46   : > { %598 = vmatprep.subr.bf16.mxu0 %v502_v31  ;;  %639 = vmatprep.subr.bf16.mxu1 %v508_v33 }
  0x48   : > { %845 = vmatmul.mubr.msk.bf16.vlgmr.msra.gmra.mxu0 %vm478_vm2, %v245_v38  ;;  %846 = vmatmul.mubr.msk.bf16.vlgmr.msra.gmra.mxu1 %vm478_vm2, %v245_v38 }
  0x49   : > { %599 = vmatpush1.bf16.msra.mxu0 %v499_v39  ;;  %640 = vmatpush1.bf16.msra.mxu1 %v505_v40 }
  0x4a   : > { %600 = vmatprep.subr.bf16.mxu0 %v834_v41  ;;  %641 = vmatprep.subr.bf16.mxu1 %v836_v43 }
  0x4b   : > { %624 = vmatprep.mubr.bf16.mxu0 %v913_v42  ;;  %665 = vmatprep.mubr.bf16.mxu1 %v913_v42  ;;  %v812_v42 = vcombine.high %v249_v62, %v253_v63 }
  0x4d   : > { %601 = vmatpush1.bf16.msra.mxu0 %v833_v49  ;;  %642 = vmatpush1.bf16.msra.mxu1 %v835_v45 }
  0x4e   : > { %602 = vmatprep.subr.bf16.mxu0 %v826_v50  ;;  %643 = vmatprep.subr.bf16.mxu1 %v828_v51 }
  0x51   : > { %603 = vmatpush1.bf16.msra.mxu0 %v825_v56  ;;  %644 = vmatpush1.bf16.msra.mxu1 %v827_v57 }
  0x52   : > { %604 = vmatprep.subr.bf16.mxu0 %v818_v58  ;;  %645 = vmatprep.subr.bf16.mxu1 %v820_v59 }
  0x55   : > { %605 = vmatpush1.bf16.msra.mxu0 %v817_v0  ;;  %646 = vmatpush1.bf16.msra.mxu1 %v819_v1 }
  0x56   : > { %606 = vmatprep.subr.bf16.mxu0 %v810_v2  ;;  %647 = vmatprep.subr.bf16.mxu1 %v812_v42 }
  0x59   : > { %607 = vmatpush1.bf16.msra.mxu0 %v809_v3  ;;  %648 = vmatpush1.bf16.msra.mxu1 %v811_v4 }
  0x5c   : > { %847 = vmatmul.mubr.msk.bf16.vlgmr.msra.gmra.mxu0 %vm478_vm2, %v245_v38  ;;  %848 = vmatmul.mubr.msk.bf16.vlgmr.msra.gmra.mxu1 %vm478_vm2, %v245_v38 }
 0x108   : > { %v544_v5 = vpop.f32.mrf.mxu0  ;;  %v585_v7 = vpop.f32.mrf.mxu1 }
 0x109   : > { %v682_v6 = vmul.f32 0.02, %v544_v5  ;;  %vm674_vm3 = vcmp.ge.f32.partialorder %v544_v5, 0.0  ;;  %v684_v8 = vmul.f32 0.02, %v585_v7  ;;  %vm676_vm4 = vcmp.ge.f32.partialorder %v585_v7, 0.0 }
 0x10a   : > { %v546_v9 = vpop.f32.mrf.mxu0  ;;  %v587_v11 = vpop.f32.mrf.mxu1 }
 0x10b   : > { %vm675_vm5 = vcmp.ge.f32.partialorder %v546_v9, 0.0  ;;  %v683_v10 = vmul.f32 0.02, %v546_v9  ;;  %vm677_vm6 = vcmp.ge.f32.partialorder %v587_v11, 0.0  ;;  %v685_v12 = vmul.f32 0.02, %v587_v11 }
 0x10c   : > { %v548_v13 = vpop.f32.mrf.mxu0  ;;  %v690_v14 = vsel %vm674_vm3, %v544_v5, %v682_v6  ;;  %v589_v16 = vpop.f32.mrf.mxu1  ;;  %v692_v17 = vsel %vm676_vm4, %v585_v7, %v684_v8 }
 0x10d   : > { %v691_v15 = vsel %vm675_vm5, %v546_v9, %v683_v10  ;;  %v693_v19 = vsel %vm677_vm6, %v587_v11, %v685_v12 }
 0x10e   : > { %v856_v18 = vpack.c.bf16 %v691_v15, %v690_v14  ;;  %v549_v20 = vpop.f32.mrf.mxu0  ;;  %v857_v21 = vpack.c.bf16 %v693_v19, %v692_v17  ;;  %v590_v22 = vpop.f32.mrf.mxu1 }
 0x110   : > { %730 = vst [vmem:[%s1118_s5] sm:$0xff] %v856_v18  ;;  %731 = vst [vmem:[%s1118_s5 + $0x8] sm:$0xff] %v857_v21 }
 0x11c   : > { %v626_v23 = vpop.f32.mrf.mxu0  ;;  %v667_v25 = vpop.f32.mrf.mxu1 }
 0x11d   : > { %v686_v24 = vmul.f32 0.02, %v626_v23  ;;  %vm678_vm7 = vcmp.ge.f32.partialorder %v626_v23, 0.0  ;;  %v688_v26 = vmul.f32 0.02, %v667_v25  ;;  %vm680_vm8 = vcmp.ge.f32.partialorder %v667_v25, 0.0 }
 0x11e   : > { %v628_v27 = vpop.f32.mrf.mxu0  ;;  %v669_v29 = vpop.f32.mrf.mxu1 }
 0x11f   : > { %vm679_vm9 = vcmp.ge.f32.partialorder %v628_v27, 0.0  ;;  %v687_v28 = vmul.f32 0.02, %v628_v27  ;;  %vm681_vm10 = vcmp.ge.f32.partialorder %v669_v29, 0.0  ;;  %v689_v30 = vmul.f32 0.02, %v669_v29 }
 0x120   : > { %v630_v31 = vpop.f32.mrf.mxu0  ;;  %v694_v32 = vsel %vm678_vm7, %v626_v23, %v686_v24  ;;  %v671_v34 = vpop.f32.mrf.mxu1  ;;  %v696_v35 = vsel %vm680_vm8, %v667_v25, %v688_v26 }
 0x121   : > { %v695_v33 = vsel %vm679_vm9, %v628_v27, %v687_v28  ;;  %v697_v37 = vsel %vm681_vm10, %v669_v29, %v689_v30 }
 0x122   : > { %v858_v36 = vpack.c.bf16 %v695_v33, %v694_v32  ;;  %v631_v38 = vpop.f32.mrf.mxu0  ;;  %v859_v39 = vpack.c.bf16 %v697_v37, %v696_v35  ;;  %v672_v40 = vpop.f32.mrf.mxu1 }
 0x124   : > { %732 = vst [vmem:[%s1118_s5 + $0x10] sm:$0xff] %v858_v36  ;;  %733 = vst [vmem:[%s1118_s5 + $0x18] sm:$0xff] %v859_v39 }
 0x125 PF: > { %p9_p9 = scmp.ge.s32.totalorder %s946_s13, 19   ;;  %s1137_s9 = smov %s906_s10 }
 0x126   : > { %s1138_s10 = smov %s955_s16  ;;  %s1139_s11 = smov %s946_s13 }
 0x127   :  { %11 = sbr.rel (!%p9_p9) target bundleno = 2 (0x2), region = 86 }

// kernel: discriminator_forward.6
= control target key start
LH: loop header
LB: loop body
LE: loop exit
PB: predicated region body
PF: predicated region fallthrough
CT: control target
= control target key end

     0   :  { %s1039_s9 = smov 0   ;;  %s1041_s10 = smov 0   ;;  %s1265_s0 = inlined_call_operand.vmem [shape: bf16[16,200], index: 0, kind: input, shape index: {}]   ;;  %s1266_s1 = inlined_call_operand.vmem [shape: bf16[200,4050], index: 1, kind: input, shape index: {}]   ;;  %s1267_s2 = inlined_call_operand.vmem [shape: bf16[16,4050], index: 2, kind: output, shape index: {}]  }
   0x1   :  { %s1043_s11 = smov 0  }
   0x2 LB: > { %s814_s12 = sadd.s32 4294967295, %s1022_s11   ;;  %s1056_s13 = sadd.s32 1, %s1022_s11   ;;  %s1022_s11 = sphi %s1043_s11, %s1271_s11   ;;  %s1018_s10 = sphi %s1041_s10, %s1270_s10   ;;  %s1014_s9 = sphi %s1039_s9, %s1269_s9  }
   0x3   : > { %s37_s14 = ssub.s32 %s1022_s11, %s1056_s13  ;;  %s40_s15 = sadd.s32 1, %s1018_s10 }
   0x4   : > { %p38_p0 = scmp.eq.s32.totalorder %s37_s14, 0  ;;  %p47_p1 = scmp.ne.s32.totalorder %s1018_s10, %s1014_s9 }
   0x5   : > { %p48_p2 = scmp.eq.s32.totalorder %s1022_s11, 0  ;;  %p77_p3 = scmp.eq.s32.totalorder %s814_s12, 7 }
   0x6   : > { %s1067_s16 = scalar_select %p38_p0, %s1018_s10, %s40_s15  }
   0x7   : > { %p49_p4 = por %p48_p2, %p47_p1  ;;  %p1069_p5 = por %p77_p3, %p47_p1 }
   0x8   : > { %p817_p6 = scmp.ge.s32.totalorder %s1022_s11, 8 }
   0xa   : > { %102 = sbr.rel (%p817_p6) target bundleno = 44 (0x2c), region = 20 }
   0xf   : > { %105 = sbr.rel (!%p49_p4) target bundleno = 44 (0x2c), region = 24  ;;  %s107_s18 = sand.u32 (%p49_p4), 1, %s1018_s10  }
  0x10   : > { %s889_s19 = sshll.u32 (%p49_p4), %s1022_s11, 4  ;;  %s895_s20 = smul.u32 (%p49_p4), 400, %s107_s18 }
  0x11   : > { %s1079_s23 = scalar_lea.vmem (%p49_p4), %s1266_s1, %s889_s19 }
  0x12   : > { %v125_v0 = vld [vmem:[%s1079_s23] sm:$0xff] (%p49_p4)  ;;  %v127_v1 = vld [vmem:[%s1079_s23 + $0x8] sm:$0xff] (%p49_p4)  ;;  %s1087_s24 = scalar_lea.vmem (%p49_p4), [#allocation2], %s895_s20 }
  0x13   : > { %v129_v2 = vld [vmem:[%s1079_s23 + $0x80] sm:$0xff] (%p49_p4)  ;;  %v131_v3 = vld [vmem:[%s1079_s23 + $0x88] sm:$0xff] (%p49_p4)  ;;  %126 = vst [vmem:[%s1087_s24] sm:$0xff] (%p49_p4), %v125_v0  ;;  %128 = vst [vmem:[%s1087_s24 + $0x8] sm:$0xff] (%p49_p4), %v127_v1 }
  0x14   : > { %v133_v4 = vld [vmem:[%s1079_s23 + $0x100] sm:$0xff]  ;;  %v135_v5 = vld [vmem:[%s1079_s23 + $0x108] sm:$0xff]  ;;  %130 = vst [vmem:[%s1087_s24 + $0x10] sm:$0xff] %v129_v2  ;;  %132 = vst [vmem:[%s1087_s24 + $0x18] sm:$0xff] %v131_v3 }
  0x15   : > { %134 = vst [vmem:[%s1087_s24 + $0x20] sm:$0xff] %v133_v4  ;;  %136 = vst [vmem:[%s1087_s24 + $0x28] sm:$0xff] %v135_v5  ;;  %v137_v6 = vld [vmem:[%s1079_s23 + $0x180] sm:$0xff]  ;;  %v139_v7 = vld [vmem:[%s1079_s23 + $0x188] sm:$0xff] }
  0x16   : > { %v141_v8 = vld [vmem:[%s1079_s23 + $0x200] sm:$0xff]  ;;  %138 = vst [vmem:[%s1087_s24 + $0x30] sm:$0xff] %v137_v6  ;;  %140 = vst [vmem:[%s1087_s24 + $0x38] sm:$0xff] %v139_v7  ;;  %v143_v9 = vld [vmem:[%s1079_s23 + $0x208] sm:$0xff] }
  0x17   : > { %142 = vst [vmem:[%s1087_s24 + $0x40] sm:$0xff] %v141_v8  ;;  %v145_v10 = vld [vmem:[%s1079_s23 + $0x280] sm:$0xff]  ;;  %v147_v11 = vld [vmem:[%s1079_s23 + $0x288] sm:$0xff]  ;;  %144 = vst [vmem:[%s1087_s24 + $0x48] sm:$0xff] %v143_v9 }
  0x18   : > { %146 = vst [vmem:[%s1087_s24 + $0x50] sm:$0xff] %v145_v10  ;;  %148 = vst [vmem:[%s1087_s24 + $0x58] sm:$0xff] %v147_v11  ;;  %v149_v12 = vld [vmem:[%s1079_s23 + $0x300] sm:$0xff]  ;;  %v151_v13 = vld [vmem:[%s1079_s23 + $0x308] sm:$0xff] }
  0x19   : > { %v153_v14 = vld [vmem:[%s1079_s23 + $0x380] sm:$0xff]  ;;  %150 = vst [vmem:[%s1087_s24 + $0x60] sm:$0xff] %v149_v12  ;;  %152 = vst [vmem:[%s1087_s24 + $0x68] sm:$0xff] %v151_v13  ;;  %v155_v15 = vld [vmem:[%s1079_s23 + $0x388] sm:$0xff] }
  0x1a   : > { %154 = vst [vmem:[%s1087_s24 + $0x70] sm:$0xff] %v153_v14  ;;  %v157_v16 = vld [vmem:[%s1079_s23 + $0x400] sm:$0xff]  ;;  %v159_v17 = vld [vmem:[%s1079_s23 + $0x408] sm:$0xff]  ;;  %156 = vst [vmem:[%s1087_s24 + $0x78] sm:$0xff] %v155_v15 }
  0x1b   : > { %158 = vst [vmem:[%s1087_s24 + $0x80] sm:$0xff] %v157_v16  ;;  %160 = vst [vmem:[%s1087_s24 + $0x88] sm:$0xff] %v159_v17  ;;  %v161_v18 = vld [vmem:[%s1079_s23 + $0x480] sm:$0xff]  ;;  %v163_v19 = vld [vmem:[%s1079_s23 + $0x488] sm:$0xff] }
  0x1c   : > { %v165_v20 = vld [vmem:[%s1079_s23 + $0x500] sm:$0xff]  ;;  %162 = vst [vmem:[%s1087_s24 + $0x90] sm:$0xff] %v161_v18  ;;  %164 = vst [vmem:[%s1087_s24 + $0x98] sm:$0xff] %v163_v19  ;;  %v167_v21 = vld [vmem:[%s1079_s23 + $0x508] sm:$0xff] }
  0x1d   : > { %166 = vst [vmem:[%s1087_s24 + $0xa0] sm:$0xff] %v165_v20  ;;  %v169_v22 = vld [vmem:[%s1079_s23 + $0x580] sm:$0xff]  ;;  %v171_v23 = vld [vmem:[%s1079_s23 + $0x588] sm:$0xff]  ;;  %168 = vst [vmem:[%s1087_s24 + $0xa8] sm:$0xff] %v167_v21 }
  0x1e   : > { %170 = vst [vmem:[%s1087_s24 + $0xb0] sm:$0xff] %v169_v22  ;;  %172 = vst [vmem:[%s1087_s24 + $0xb8] sm:$0xff] %v171_v23  ;;  %v173_v24 = vld [vmem:[%s1079_s23 + $0x600] sm:$0xff]  ;;  %v175_v25 = vld [vmem:[%s1079_s23 + $0x608] sm:$0xff] }
  0x1f   : > { %v177_v26 = vld [vmem:[%s1079_s23 + $0x680] sm:$0xff]  ;;  %174 = vst [vmem:[%s1087_s24 + $0xc0] sm:$0xff] %v173_v24  ;;  %176 = vst [vmem:[%s1087_s24 + $0xc8] sm:$0xff] %v175_v25  ;;  %v179_v27 = vld [vmem:[%s1079_s23 + $0x688] sm:$0xff] }
  0x20   : > { %178 = vst [vmem:[%s1087_s24 + $0xd0] sm:$0xff] %v177_v26  ;;  %v181_v28 = vld [vmem:[%s1079_s23 + $0x700] sm:$0xff]  ;;  %v183_v29 = vld [vmem:[%s1079_s23 + $0x708] sm:$0xff]  ;;  %180 = vst [vmem:[%s1087_s24 + $0xd8] sm:$0xff] %v179_v27 }
  0x21   : > { %182 = vst [vmem:[%s1087_s24 + $0xe0] sm:$0xff] %v181_v28  ;;  %184 = vst [vmem:[%s1087_s24 + $0xe8] sm:$0xff] %v183_v29  ;;  %v185_v30 = vld [vmem:[%s1079_s23 + $0x780] sm:$0xff]  ;;  %v187_v31 = vld [vmem:[%s1079_s23 + $0x788] sm:$0xff] }
  0x22   : > { %v189_v32 = vld [vmem:[%s1079_s23 + $0x800] sm:$0xff]  ;;  %186 = vst [vmem:[%s1087_s24 + $0xf0] sm:$0xff] %v185_v30  ;;  %188 = vst [vmem:[%s1087_s24 + $0xf8] sm:$0xff] %v187_v31  ;;  %v191_v33 = vld [vmem:[%s1079_s23 + $0x808] sm:$0xff] }
  0x23   : > { %190 = vst [vmem:[%s1087_s24 + $0x100] sm:$0xff] %v189_v32  ;;  %v193_v34 = vld [vmem:[%s1079_s23 + $0x880] sm:$0xff]  ;;  %v195_v35 = vld [vmem:[%s1079_s23 + $0x888] sm:$0xff]  ;;  %192 = vst [vmem:[%s1087_s24 + $0x108] sm:$0xff] %v191_v33 }
  0x24   : > { %194 = vst [vmem:[%s1087_s24 + $0x110] sm:$0xff] %v193_v34  ;;  %196 = vst [vmem:[%s1087_s24 + $0x118] sm:$0xff] %v195_v35  ;;  %v197_v36 = vld [vmem:[%s1079_s23 + $0x900] sm:$0xff]  ;;  %v199_v37 = vld [vmem:[%s1079_s23 + $0x908] sm:$0xff] }
  0x25   : > { %v201_v38 = vld [vmem:[%s1079_s23 + $0x980] sm:$0xff]  ;;  %198 = vst [vmem:[%s1087_s24 + $0x120] sm:$0xff] %v197_v36  ;;  %200 = vst [vmem:[%s1087_s24 + $0x128] sm:$0xff] %v199_v37  ;;  %v203_v39 = vld [vmem:[%s1079_s23 + $0x988] sm:$0xff] }
  0x26   : > { %202 = vst [vmem:[%s1087_s24 + $0x130] sm:$0xff] %v201_v38  ;;  %v205_v40 = vld [vmem:[%s1079_s23 + $0xa00] sm:$0xff]  ;;  %v207_v41 = vld [vmem:[%s1079_s23 + $0xa08] sm:$0xff]  ;;  %204 = vst [vmem:[%s1087_s24 + $0x138] sm:$0xff] %v203_v39 }
  0x27   : > { %206 = vst [vmem:[%s1087_s24 + $0x140] sm:$0xff] %v205_v40  ;;  %208 = vst [vmem:[%s1087_s24 + $0x148] sm:$0xff] %v207_v41  ;;  %v209_v42 = vld [vmem:[%s1079_s23 + $0xa80] sm:$0xff]  ;;  %v211_v43 = vld [vmem:[%s1079_s23 + $0xa88] sm:$0xff] }
  0x28   : > { %v213_v44 = vld [vmem:[%s1079_s23 + $0xb00] sm:$0xff]  ;;  %210 = vst [vmem:[%s1087_s24 + $0x150] sm:$0xff] %v209_v42  ;;  %212 = vst [vmem:[%s1087_s24 + $0x158] sm:$0xff] %v211_v43  ;;  %v215_v45 = vld [vmem:[%s1079_s23 + $0xb08] sm:$0xff] }
  0x29   : > { %214 = vst [vmem:[%s1087_s24 + $0x160] sm:$0xff] %v213_v44  ;;  %v217_v46 = vld [vmem:[%s1079_s23 + $0xb80] sm:$0xff]  ;;  %v219_v47 = vld [vmem:[%s1079_s23 + $0xb88] sm:$0xff]  ;;  %216 = vst [vmem:[%s1087_s24 + $0x168] sm:$0xff] %v215_v45 }
  0x2a   : > { %218 = vst [vmem:[%s1087_s24 + $0x170] sm:$0xff] %v217_v46  ;;  %220 = vst [vmem:[%s1087_s24 + $0x178] sm:$0xff] %v219_v47  ;;  %v221_v48 = vld [vmem:[%s1079_s23 + $0xc00] sm:$0xff]  ;;  %v223_v49 = vld [vmem:[%s1079_s23 + $0xc08] sm:$0xff] }
  0x2b   : > { %222 = vst [vmem:[%s1087_s24 + $0x180] sm:$0xff] %v221_v48  ;;  %224 = vst [vmem:[%s1087_s24 + $0x188] sm:$0xff] %v223_v49 }
  0x2c PF: > { %p820_p7 = scmp.ge.s32.totalorder %s1022_s11, 1  ;;  %p229_p8 = scmp.lt.s32.totalorder %s1022_s11, 9 }
  0x2e   : > { %p230_p9 = pnand %p820_p7, %p229_p8 }
  0x2f   : > { %s236_s25 = sand.u32 (!%p230_p9), 1, %s1014_s9  }
  0x30   : > { %233 = sbr.rel (%p230_p9) target bundleno = 320 (0x140), region = 47  ;;  %s821_s4 = sshll.u32 (!%p230_p9), %s236_s25, 5 }
  0x31   : > { %s896_s26 = smul.u32 (!%p230_p9), 400, %s236_s25  ;;  %s255_s5 = scalar_lea.vmem (!%p230_p9), [#allocation3], %s821_s4 }
  0x33   : > { %s1191_s29 = scalar_lea.vmem (!%p230_p9), [#allocation2], %s896_s26 }
  0x35   : > { %v999_v50 = vld [vmem:[%s1265_s0 + $0x4] ss:$8 sps:$4 sm:$0xff]   ;;  %vm570_vm0 = vcmask 588800   ;;  %v925_v53 = vld [vmem:[%s1191_s29 + $0xe0] ss:$16 sps:$4 sm:$0xff]   ;;  %vm574_vm1 = vcmask 1043456  }
  0x36   : > { %877 = vmatprep.mubr.msk.bf16.mxu0 %vm570_vm0, %v999_v50  ;;  %879 = vmatprep.mubr.msk.bf16.mxu1 %vm570_vm0, %v999_v50  ;;  %v921_v51 = vld [vmem:[%s1191_s29 + $0xe4] ss:$16 sps:$4 sm:$0xff]   ;;  %v923_v52 = vld [vmem:[%s1191_s29 + $0xec] ss:$16 sps:$4 sm:$0xff]   ;;  %v926_v54 = vld [vmem:[%s1191_s29 + $0xe8] ss:$16 sps:$4 sm:$0xff]  }
  0x37   : > { %587 = vmatprep.subr.bf16.mxu0 %v921_v51  ;;  %630 = vmatprep.subr.bf16.mxu1 %v923_v52  ;;  %v927_v55 = vld [vmem:[%s1191_s29 + $0xc4] ss:$16 sps:$4 sm:$0xff]   ;;  %v929_v56 = vld [vmem:[%s1191_s29 + $0xcc] ss:$16 sps:$4 sm:$0xff]   ;;  %v931_v57 = vld [vmem:[%s1191_s29 + $0xc0] ss:$16 sps:$4 sm:$0xff]  }
  0x38   : > { %588 = vmatpush1.bf16.msra.mxu0 %v925_v53  ;;  %631 = vmatpush1.bf16.msra.mxu1 %v926_v54  ;;  %v932_v58 = vld [vmem:[%s1191_s29 + $0xc8] ss:$16 sps:$4 sm:$0xff]   ;;  %v933_v59 = vld [vmem:[%s1191_s29 + $0xa4] ss:$16 sps:$4 sm:$0xff]   ;;  %v935_v60 = vld [vmem:[%s1191_s29 + $0xac] ss:$16 sps:$4 sm:$0xff]  }
  0x39   : > { %589 = vmatprep.subr.bf16.mxu0 %v927_v55  ;;  %632 = vmatprep.subr.bf16.mxu1 %v929_v56  ;;  %v937_v61 = vld [vmem:[%s1191_s29 + $0xa0] ss:$16 sps:$4 sm:$0xff]   ;;  %v938_v62 = vld [vmem:[%s1191_s29 + $0xa8] ss:$16 sps:$4 sm:$0xff]   ;;  %v939_v63 = vld [vmem:[%s1191_s29 + $0x84] ss:$16 sps:$4 sm:$0xff]  }
  0x3a   : > { %v941_v0 = vld [vmem:[%s1191_s29 + $0x8c] ss:$16 sps:$4 sm:$0xff]   ;;  %v943_v1 = vld [vmem:[%s1191_s29 + $0x80] ss:$16 sps:$4 sm:$0xff]   ;;  %v944_v2 = vld [vmem:[%s1191_s29 + $0x88] ss:$16 sps:$4 sm:$0xff]  }
  0x3b   : > { %v945_v3 = vld [vmem:[%s1191_s29 + $0x64] ss:$16 sps:$4 sm:$0xff]   ;;  %v947_v4 = vld [vmem:[%s1191_s29 + $0x6c] ss:$16 sps:$4 sm:$0xff]   ;;  %v949_v5 = vld [vmem:[%s1191_s29 + $0x60] ss:$16 sps:$4 sm:$0xff]  }
  0x3c   : > { %590 = vmatpush1.bf16.msra.mxu0 %v931_v57  ;;  %633 = vmatpush1.bf16.msra.mxu1 %v932_v58  ;;  %v950_v6 = vld [vmem:[%s1191_s29 + $0x68] ss:$16 sps:$4 sm:$0xff]   ;;  %v951_v7 = vld [vmem:[%s1191_s29 + $0x44] ss:$16 sps:$4 sm:$0xff]   ;;  %v953_v8 = vld [vmem:[%s1191_s29 + $0x4c] ss:$16 sps:$4 sm:$0xff]  }
  0x3d   : > { %591 = vmatprep.subr.bf16.mxu0 %v933_v59  ;;  %634 = vmatprep.subr.bf16.mxu1 %v935_v60  ;;  %v955_v9 = vld [vmem:[%s1191_s29 + $0x40] ss:$16 sps:$4 sm:$0xff]   ;;  %v956_v10 = vld [vmem:[%s1191_s29 + $0x48] ss:$16 sps:$4 sm:$0xff]   ;;  %v957_v11 = vld [vmem:[%s1191_s29 + $0x24] ss:$16 sps:$4 sm:$0xff]  }
  0x3e   : > { %v959_v12 = vld [vmem:[%s1191_s29 + $0x2c] ss:$16 sps:$4 sm:$0xff]   ;;  %v961_v13 = vld [vmem:[%s1191_s29 + $0x20] ss:$16 sps:$4 sm:$0xff]   ;;  %v962_v14 = vld [vmem:[%s1191_s29 + $0x28] ss:$16 sps:$4 sm:$0xff]  }
  0x3f   : > { %v963_v15 = vld [vmem:[%s1191_s29 + $0x4] ss:$16 sps:$4 sm:$0xff]   ;;  %v965_v16 = vld [vmem:[%s1191_s29 + $0xc] ss:$16 sps:$4 sm:$0xff]   ;;  %v967_v19 = vld [vmem:[%s1191_s29] ss:$16 sps:$4 sm:$0xff]  }
  0x40   : > { %592 = vmatpush1.bf16.msra.mxu0 %v937_v61  ;;  %635 = vmatpush1.bf16.msra.mxu1 %v938_v62  ;;  %v309_v17 = vld [vmem:[%s1191_s29 + $0x180] sm:$0xff]  ;;  %v310_v18 = vld [vmem:[%s1191_s29 + $0x188] sm:$0xff]  ;;  %s894_s6 = sshll.u32 (%p1069_p5), %s814_s12, 4 }
  0x41   : > { %593 = vmatprep.subr.bf16.mxu0 %v939_v63  ;;  %636 = vmatprep.subr.bf16.mxu1 %v941_v0  ;;  %v968_v20 = vld [vmem:[%s1191_s29 + $0x8] ss:$16 sps:$4 sm:$0xff]   ;;  %v873_v21 = vcombine.high %v309_v17, %v309_v17  ;;  %v875_v22 = vcombine.high %v310_v18, %v310_v18  ;;  %v872_v23 = vcombine.low %v309_v17, %v309_v17  ;;  %v973_v27 = vld [vmem:[%s1191_s29 + $0x164] ss:$16 sps:$4 sm:$0xff]   ;;  %v975_v28 = vld [vmem:[%s1191_s29 + $0x16c] ss:$16 sps:$4 sm:$0xff]   ;;  %s734_s9 = scalar_lea.vmem (%p1069_p5), %s1267_s2, %s894_s6 }
  0x42   : > { %v874_v24 = vcombine.low %v310_v18, %v310_v18  ;;  %v977_v29 = vld [vmem:[%s1191_s29 + $0x160] ss:$16 sps:$4 sm:$0xff]   ;;  %v978_v30 = vld [vmem:[%s1191_s29 + $0x168] ss:$16 sps:$4 sm:$0xff]   ;;  %v979_v31 = vld [vmem:[%s1191_s29 + $0x144] ss:$16 sps:$4 sm:$0xff]  }
  0x43   : > { %v576_v25 = vsel %vm574_vm1, %v872_v23, 0  ;;  %v981_v32 = vld [vmem:[%s1191_s29 + $0x14c] ss:$16 sps:$4 sm:$0xff]   ;;  %v983_v33 = vld [vmem:[%s1191_s29 + $0x140] ss:$16 sps:$4 sm:$0xff]  }
  0x44   : > { %594 = vmatpush1.bf16.msra.mxu0 %v943_v1  ;;  %637 = vmatpush1.bf16.msra.mxu1 %v944_v2  ;;  %v582_v26 = vsel %vm574_vm1, %v874_v24, 0  ;;  %v984_v34 = vld [vmem:[%s1191_s29 + $0x148] ss:$16 sps:$4 sm:$0xff]   ;;  %v985_v35 = vld [vmem:[%s1191_s29 + $0x124] ss:$16 sps:$4 sm:$0xff]  }
  0x45   : > { %595 = vmatprep.subr.bf16.mxu0 %v945_v3  ;;  %638 = vmatprep.subr.bf16.mxu1 %v947_v4  ;;  %v987_v36 = vld [vmem:[%s1191_s29 + $0x12c] ss:$16 sps:$4 sm:$0xff]   ;;  %v989_v37 = vld [vmem:[%s1191_s29 + $0x120] ss:$16 sps:$4 sm:$0xff]   ;;  %v990_v38 = vld [vmem:[%s1191_s29 + $0x128] ss:$16 sps:$4 sm:$0xff]  }
  0x46   : > { %v991_v39 = vld [vmem:[%s1191_s29 + $0x104] ss:$16 sps:$4 sm:$0xff]   ;;  %v993_v40 = vld [vmem:[%s1191_s29 + $0x10c] ss:$16 sps:$4 sm:$0xff]   ;;  %v995_v41 = vld [vmem:[%s1191_s29 + $0x100] ss:$16 sps:$4 sm:$0xff]  }
  0x47   : > { %v996_v42 = vld [vmem:[%s1191_s29 + $0x108] ss:$16 sps:$4 sm:$0xff]  }
  0x48   : > { %596 = vmatpush1.bf16.msra.mxu0 %v949_v5  ;;  %639 = vmatpush1.bf16.msra.mxu1 %v950_v6  ;;  %v997_v43 = vld [vmem:[%s1265_s0] ss:$8 sps:$4 sm:$0xff]  }
  0x49   : > { %597 = vmatprep.subr.bf16.mxu0 %v951_v7  ;;  %640 = vmatprep.subr.bf16.mxu1 %v953_v8 }
  0x4c   : > { %598 = vmatpush1.bf16.msra.mxu0 %v955_v9  ;;  %641 = vmatpush1.bf16.msra.mxu1 %v956_v10 }
  0x4d   : > { %599 = vmatprep.subr.bf16.mxu0 %v957_v11  ;;  %642 = vmatprep.subr.bf16.mxu1 %v959_v12 }
  0x50   : > { %600 = vmatpush1.bf16.msra.mxu0 %v961_v13  ;;  %643 = vmatpush1.bf16.msra.mxu1 %v962_v14 }
  0x51   : > { %601 = vmatprep.subr.bf16.mxu0 %v963_v15  ;;  %644 = vmatprep.subr.bf16.mxu1 %v965_v16 }
  0x54   : > { %602 = vmatpush1.bf16.msra.mxu0 %v967_v19  ;;  %645 = vmatpush1.bf16.msra.mxu1 %v968_v20 }
  0x55   : > { %876 = vmatprep.subr.msk.bf16.mxu0 %vm574_vm1, %v873_v21  ;;  %878 = vmatprep.subr.msk.bf16.mxu1 %vm574_vm1, %v875_v22 }
  0x58   : > { %610 = vmatpush2.bf16.msra.mxu0 %v576_v25  ;;  %653 = vmatpush2.bf16.msra.mxu1 %v582_v26 }
  0x59   : > { %611 = vmatprep.subr.bf16.mxu0 %v973_v27  ;;  %654 = vmatprep.subr.bf16.mxu1 %v975_v28 }
  0x5c   : > { %612 = vmatpush2.bf16.msra.mxu0 %v977_v29  ;;  %655 = vmatpush2.bf16.msra.mxu1 %v978_v30 }
  0x5d   : > { %613 = vmatprep.subr.bf16.mxu0 %v979_v31  ;;  %656 = vmatprep.subr.bf16.mxu1 %v981_v32 }
  0x60   : > { %614 = vmatpush2.bf16.msra.mxu0 %v983_v33  ;;  %657 = vmatpush2.bf16.msra.mxu1 %v984_v34 }
  0x61   : > { %615 = vmatprep.subr.bf16.mxu0 %v985_v35  ;;  %658 = vmatprep.subr.bf16.mxu1 %v987_v36 }
  0x64   : > { %616 = vmatpush2.bf16.msra.mxu0 %v989_v37  ;;  %659 = vmatpush2.bf16.msra.mxu1 %v990_v38 }
  0x65   : > { %617 = vmatprep.subr.bf16.mxu0 %v991_v39  ;;  %660 = vmatprep.subr.bf16.mxu1 %v993_v40 }
  0x68   : > { %618 = vmatpush2.bf16.msra.mxu0 %v995_v41  ;;  %661 = vmatpush2.bf16.msra.mxu1 %v996_v42 }
  0x6b   : > { %620 = vmatmul.mubr.bf16.vlgmr.msra.gmra.mxu0 %v997_v43  ;;  %663 = vmatmul.mubr.bf16.vlgmr.msra.gmra.mxu1 %v997_v43 }
 0x12b   : > { %v621_v44 = vpop.f32.mrf.mxu0  ;;  %v664_v45 = vpop.f32.mrf.mxu1 }
 0x12c   : > { %v681_v46 = vmul.f32 0.02, %v621_v44  ;;  %v683_v47 = vmul.f32 0.02, %v664_v45  ;;  %vm673_vm2 = vcmp.ge.f32.partialorder %v621_v44, 0.0  ;;  %vm675_vm3 = vcmp.ge.f32.partialorder %v664_v45, 0.0 }
 0x12d   : > { %v623_v48 = vpop.f32.mrf.mxu0  ;;  %v666_v49 = vpop.f32.mrf.mxu1 }
 0x12e   : > { %vm674_vm4 = vcmp.ge.f32.partialorder %v623_v48, 0.0  ;;  %v682_v50 = vmul.f32 0.02, %v623_v48  ;;  %vm676_vm5 = vcmp.ge.f32.partialorder %v666_v49, 0.0  ;;  %v684_v51 = vmul.f32 0.02, %v666_v49 }
 0x12f   : > { %v625_v52 = vpop.f32.mrf.mxu0  ;;  %v668_v53 = vpop.f32.mrf.mxu1  ;;  %v689_v54 = vsel %vm673_vm2, %v621_v44, %v681_v46  ;;  %v691_v55 = vsel %vm675_vm3, %v664_v45, %v683_v47 }
 0x130   : > { %v690_v56 = vsel %vm674_vm4, %v623_v48, %v682_v50  ;;  %v685_v57 = vmul.f32 0.02, %v625_v52  ;;  %v692_v59 = vsel %vm676_vm5, %v666_v49, %v684_v51  ;;  %vm677_vm6 = vcmp.ge.f32.partialorder %v625_v52, 0.0 }
 0x131   : > { %v890_v58 = vpack.c.bf16 %v690_v56, %v689_v54  ;;  %v687_v60 = vmul.f32 0.02, %v668_v53  ;;  %v627_v61 = vpop.f32.mrf.mxu0  ;;  %v670_v62 = vpop.f32.mrf.mxu1  ;;  %v891_v63 = vpack.c.bf16 %v692_v59, %v691_v55  ;;  %vm679_vm7 = vcmp.ge.f32.partialorder %v668_v53, 0.0 }
 0x132   : > { %vm678_vm8 = vcmp.ge.f32.partialorder %v627_v61, 0.0  ;;  %v686_v0 = vmul.f32 0.02, %v627_v61  ;;  %vm680_vm9 = vcmp.ge.f32.partialorder %v670_v62, 0.0  ;;  %v688_v1 = vmul.f32 0.02, %v670_v62 }
 0x133   : > { %721 = vst [vmem:[%s255_s5] sm:$0xff] %v890_v58  ;;  %722 = vst [vmem:[%s255_s5 + $0x8] sm:$0xff] %v891_v63  ;;  %v693_v2 = vsel %vm677_vm6, %v625_v52, %v685_v57  ;;  %v695_v4 = vsel %vm679_vm7, %v668_v53, %v687_v60  ;;  %731 = sbr.rel (!%p1069_p5) target bundleno = 320 (0x140), region = 55 }
 0x134   : > { %v694_v3 = vsel %vm678_vm8, %v627_v61, %v686_v0  ;;  %v696_v6 = vsel %vm680_vm9, %v670_v62, %v688_v1 }
 0x135   : > { %v892_v5 = vpack.c.bf16 %v694_v3, %v693_v2  ;;  %v893_v7 = vpack.c.bf16 %v696_v6, %v695_v4 }
 0x137   : > { %723 = vst [vmem:[%s255_s5 + $0x10] sm:$0xff] %v892_v5  ;;  %724 = vst [vmem:[%s255_s5 + $0x18] sm:$0xff] %v893_v7 }
 0x13a   : > { %v747_v8 = vld [vmem:[%s255_s5] sm:$0xff]  ;;  %v749_v9 = vld [vmem:[%s255_s5 + $0x8] sm:$0xff] }
 0x13b   : > { %748 = vst [vmem:[%s734_s9] sm:$0xff] %v747_v8  ;;  %750 = vst [vmem:[%s734_s9 + $0x8] sm:$0xff] %v749_v9 }
 0x13e   : > { %v751_v10 = vld [vmem:[%s255_s5 + $0x10] sm:$0xff]  ;;  %v753_v11 = vld [vmem:[%s255_s5 + $0x18] sm:$0xff] }
 0x13f   : > { %752 = vst [vmem:[%s734_s9 + $0x80] sm:$0xff] %v751_v10  ;;  %754 = vst [vmem:[%s734_s9 + $0x88] sm:$0xff] %v753_v11 }
 0x140 PF: > { %p9_p10 = scmp.ge.s32.totalorder %s1056_s13, 10   ;;  %s1269_s9 = smov %s1018_s10 }
 0x141   : > { %s1270_s10 = smov %s1067_s16  ;;  %s1271_s11 = smov %s1056_s13 }
 0x142   :  { %11 = sbr.rel (!%p9_p10) target bundleno = 2 (0x2), region = 109 }

// kernel: discriminator_forward.7
= control target key start
LH: loop header
LB: loop body
LE: loop exit
PB: predicated region body
PF: predicated region fallthrough
CT: control target
= control target key end

     0   :  { %s3676_s9 = smov 0   ;;  %s3678_s10 = smov 0   ;;  %s5619_s0 = inlined_call_operand.vmem [shape: bf16[32,400], index: 0, kind: input, shape index: {}]   ;;  %s5620_s1 = inlined_call_operand.vmem [shape: bf16[400,882], index: 1, kind: input, shape index: {}]   ;;  %s5621_s2 = inlined_call_operand.vmem [shape: bf16[32,882], index: 2, kind: output, shape index: {}]  }
   0x1   :  { %s3680_s11 = smov 0  }
   0x2 LB: > { %s3692_s12 = sadd.s32 4294967295, %s3527_s11   ;;  %s3695_s13 = sadd.s32 1, %s3527_s11   ;;  %s3527_s11 = sphi %s3680_s11, %s5658_s11   ;;  %s3523_s10 = sphi %s3678_s10, %s5657_s10   ;;  %s3519_s9 = sphi %s3676_s9, %s5656_s9  }
   0x3   : > { %s37_s14 = ssub.s32 %s3527_s11, %s3695_s13  ;;  %s40_s15 = sadd.s32 1, %s3523_s10 }
   0x4   : > { %p38_p0 = scmp.eq.s32.totalorder %s37_s14, 0  ;;  %p47_p1 = scmp.ne.s32.totalorder %s3523_s10, %s3519_s9 }
   0x5   : > { %p48_p2 = scmp.eq.s32.totalorder %s3527_s11, 0  ;;  %p77_p3 = scmp.eq.s32.totalorder %s3692_s12, 1 }
   0x6   : > { %s3705_s16 = scalar_select %p38_p0, %s3523_s10, %s40_s15  }
   0x7   : > { %p49_p4 = por %p48_p2, %p47_p1  ;;  %p3707_p5 = por %p77_p3, %p47_p1 }
   0x8   : > { %p2730_p6 = scmp.ge.s32.totalorder %s3527_s11, 2 }
   0xa   : > { %102 = sbr.rel (%p2730_p6) target bundleno = 337 (0x151), region = 20 }
   0xf   : > { %105 = sbr.rel (!%p49_p4) target bundleno = 337 (0x151), region = 24  ;;  %s107_s18 = sand.u32 (%p49_p4), 1, %s3523_s10  }
  0x10   : > { %s2731_s19 = sshll.u32 (%p49_p4), %s3527_s11, 2  ;;  %s2929_s20 = smul.u32 (%p49_p4), 800, %s107_s18 }
  0x11   : > { %s111_s21 = ssub.s32 (%p49_p4), 7, %s2731_s19  ;;  %s2911_s22 = sshll.u32 (%p49_p4), %s3527_s11, 4 }
  0x12   : > { %p112_p7 = scmp.lt.s32.totalorder (%p49_p4), %s111_s21, 4  ;;  %s3718_s25 = scalar_lea.vmem (%p49_p4), %s5620_s1, %s2911_s22  }
  0x13   : > { %s3722_s28 = scalar_lea.vmem (%p49_p4), [#allocation2], %s2929_s20  }
  0x14   : > { %s5660_s21 = smov (!%p112_p7, %s111_s21), 4 }
  0x15   : > { %s114_s26 = smul.u32 3200, %s5660_s21  ;;  %s3720_s27 = sshll.u32 %s5660_s21, 2 }
  0x17   : > { %p2735_p8 = scmp.eq.s32.totalorder %s114_s26, 0 }
  0x18   : > { %p122_p9 = scmp.lt.u32.totalorder (!%p2735_p8), %s3720_s27, 8 }
  0x19   : > { %121 = sbr.rel (%p2735_p8) target bundleno = 337 (0x151), region = 28 }
  0x1e   : > { %125 = sbr.rel (%p122_p9) target bundleno = 279 (0x117), region = 32  ;;  %s3726_s29 = sand.u32 (!%p122_p9), 7, %s3720_s27  }
  0x1f   : > { %p240_p10 = scmp.eq.s32.totalorder (!%p122_p9), %s3726_s29, 0  ;;  %p2736_p11 = scmp.ne.s32.totalorder (!%p122_p9), %s3726_s29, 0 }
  0x23   : > { %243 = sbr.rel (%p2736_p11) target bundleno = 130 (0x82), region = 47  ;;  %s244_s30 = sshrl.u32 (!%p2736_p11), %s3720_s27, 3 }
  0x24   : > { %s3733_s3 = sshrl.u32 (!%p2736_p11), %s244_s30, 1 }
  0x25   : > { %p2737_p12 = scmp.le.s32.totalorder (!%p2736_p11), %s3733_s3, 0 }
  0x28   : > { %2600 = sbr.rel (%p2737_p12) target bundleno = 96 (0x60), region = 225  ;;  %s5623_s4 = smov (!%p2737_p12), %s3722_s28 }
  0x29   : > { %s5624_s5 = smov (!%p2737_p12), %s3718_s25  ;;  %s3742_s6 = smov (!%p2737_p12), 0  }
  0x2a   : > { %s3744_s7 = smov (!%p2737_p12), 0  }
  0x2d LB: >> { %v257_v0 = vld [vmem:[%s3535_s5] sm:$0xff]  ;;  %v259_v1 = vld [vmem:[%s3535_s5 + $0x8] sm:$0xff]  ;;  %s457_s8 = sadd.s32 1, %s3539_s6  ;;  %v265_v4 = vld [vmem:[%s3535_s5 + $0x38] sm:$0xff]  ;;  %s251_s7 = sadd.s32 1, %s3543_s7   ;;  %s3543_s7 = sphi %s3744_s7, %s251_s7   ;;  %s3539_s6 = sphi %s3742_s6, %s5627_s6   ;;  %s3535_s5 = sphi %s5624_s5, %s5626_s5   ;;  %s3531_s4 = sphi %s5623_s4, %s5625_s4  }
  0x2e   : >> { %v261_v2 = vld [vmem:[%s3535_s5 + $0x1c] sm:$0xff]  ;;  %258 = vst [vmem:[%s3531_s4] sm:$0xff] %v257_v0  ;;  %260 = vst [vmem:[%s3531_s4 + $0x8] sm:$0xff] %v259_v1  ;;  %v263_v3 = vld [vmem:[%s3535_s5 + $0x24] sm:$0xff]  ;;  %p458_p13 = scmp.ge.s32.totalorder %s457_s8, %s3733_s3  ;;  %p250_p0 = scmp.ge.s32.totalorder %s251_s7, %s3733_s3 }
  0x2f   : >> { %262 = vst [vmem:[%s3531_s4 + $0x10] sm:$0xff] %v261_v2  ;;  %v267_v5 = vld [vmem:[%s3535_s5 + $0x40] sm:$0xff]  ;;  %264 = vst [vmem:[%s3531_s4 + $0x18] sm:$0xff] %v263_v3  ;;  %v269_v6 = vld [vmem:[%s3535_s5 + $0x54] sm:$0xff] }
  0x30   : >> { %266 = vst [vmem:[%s3531_s4 + $0x20] sm:$0xff] %v265_v4  ;;  %268 = vst [vmem:[%s3531_s4 + $0x28] sm:$0xff] %v267_v5  ;;  %v271_v7 = vld [vmem:[%s3535_s5 + $0x5c] sm:$0xff]  ;;  %v273_v8 = vld [vmem:[%s3535_s5 + $0x70] sm:$0xff]  ;;  %s5662_s8 = smov (%p458_p13, %s457_s8), 0 }
  0x31   : >> { %270 = vst [vmem:[%s3531_s4 + $0x30] sm:$0xff] %v269_v6  ;;  %272 = vst [vmem:[%s3531_s4 + $0x38] sm:$0xff] %v271_v7  ;;  %v275_v9 = vld [vmem:[%s3535_s5 + $0x78] sm:$0xff]  ;;  %v277_v10 = vld [vmem:[%s3535_s5 + $0x8c] sm:$0xff]  ;;  %s2738_s14 = sshll.u32 %s5662_s8, 4  ;;  %s5627_s6 = smov %s5662_s8 }
  0x32   : >> { %274 = vst [vmem:[%s3531_s4 + $0x40] sm:$0xff] %v273_v8  ;;  %v279_v11 = vld [vmem:[%s3535_s5 + $0x94] sm:$0xff]  ;;  %276 = vst [vmem:[%s3531_s4 + $0x48] sm:$0xff] %v275_v9  ;;  %v281_v12 = vld [vmem:[%s3535_s5 + $0xa8] sm:$0xff]  ;;  %s3800_s15 = scalar_lea.vmem %s3718_s25, %s2738_s14   ;;  %s3803_s18 = scalar_lea.vmem %s3722_s28, %s2738_s14 [#allocation2]  }
  0x33   : >> { %278 = vst [vmem:[%s3531_s4 + $0x50] sm:$0xff] %v277_v10  ;;  %280 = vst [vmem:[%s3531_s4 + $0x58] sm:$0xff] %v279_v11  ;;  %v283_v13 = vld [vmem:[%s3535_s5 + $0xb0] sm:$0xff]  ;;  %v285_v14 = vld [vmem:[%s3535_s5 + $0xc4] sm:$0xff] }
  0x34   : >> { %282 = vst [vmem:[%s3531_s4 + $0x60] sm:$0xff] %v281_v12  ;;  %284 = vst [vmem:[%s3531_s4 + $0x68] sm:$0xff] %v283_v13  ;;  %v287_v15 = vld [vmem:[%s3535_s5 + $0xcc] sm:$0xff]  ;;  %v289_v16 = vld [vmem:[%s3535_s5 + $0xe0] sm:$0xff] }
  0x35   : >> { %286 = vst [vmem:[%s3531_s4 + $0x70] sm:$0xff] %v285_v14  ;;  %v291_v17 = vld [vmem:[%s3535_s5 + $0xe8] sm:$0xff]  ;;  %288 = vst [vmem:[%s3531_s4 + $0x78] sm:$0xff] %v287_v15  ;;  %v293_v18 = vld [vmem:[%s3535_s5 + $0xfc] sm:$0xff] }
  0x36   : >> { %290 = vst [vmem:[%s3531_s4 + $0x80] sm:$0xff] %v289_v16  ;;  %292 = vst [vmem:[%s3531_s4 + $0x88] sm:$0xff] %v291_v17  ;;  %v295_v19 = vld [vmem:[%s3535_s5 + $0x104] sm:$0xff]  ;;  %v297_v20 = vld [vmem:[%s3535_s5 + $0x118] sm:$0xff] }
  0x37   : >> { %294 = vst [vmem:[%s3531_s4 + $0x90] sm:$0xff] %v293_v18  ;;  %296 = vst [vmem:[%s3531_s4 + $0x98] sm:$0xff] %v295_v19  ;;  %v299_v21 = vld [vmem:[%s3535_s5 + $0x120] sm:$0xff]  ;;  %v301_v22 = vld [vmem:[%s3535_s5 + $0x134] sm:$0xff] }
  0x38   : >> { %298 = vst [vmem:[%s3531_s4 + $0xa0] sm:$0xff] %v297_v20  ;;  %v303_v23 = vld [vmem:[%s3535_s5 + $0x13c] sm:$0xff]  ;;  %300 = vst [vmem:[%s3531_s4 + $0xa8] sm:$0xff] %v299_v21  ;;  %v305_v24 = vld [vmem:[%s3535_s5 + $0x150] sm:$0xff] }
  0x39   : >> { %302 = vst [vmem:[%s3531_s4 + $0xb0] sm:$0xff] %v301_v22  ;;  %304 = vst [vmem:[%s3531_s4 + $0xb8] sm:$0xff] %v303_v23  ;;  %v307_v25 = vld [vmem:[%s3535_s5 + $0x158] sm:$0xff]  ;;  %v309_v26 = vld [vmem:[%s3535_s5 + $0x16c] sm:$0xff] }
  0x3a   : >> { %306 = vst [vmem:[%s3531_s4 + $0xc0] sm:$0xff] %v305_v24  ;;  %308 = vst [vmem:[%s3531_s4 + $0xc8] sm:$0xff] %v307_v25  ;;  %v311_v27 = vld [vmem:[%s3535_s5 + $0x174] sm:$0xff]  ;;  %v313_v28 = vld [vmem:[%s3535_s5 + $0x188] sm:$0xff] }
  0x3b   : >> { %310 = vst [vmem:[%s3531_s4 + $0xd0] sm:$0xff] %v309_v26  ;;  %v315_v29 = vld [vmem:[%s3535_s5 + $0x190] sm:$0xff]  ;;  %312 = vst [vmem:[%s3531_s4 + $0xd8] sm:$0xff] %v311_v27  ;;  %v317_v30 = vld [vmem:[%s3535_s5 + $0x1a4] sm:$0xff] }
  0x3c   : >> { %314 = vst [vmem:[%s3531_s4 + $0xe0] sm:$0xff] %v313_v28  ;;  %316 = vst [vmem:[%s3531_s4 + $0xe8] sm:$0xff] %v315_v29  ;;  %v319_v31 = vld [vmem:[%s3535_s5 + $0x1ac] sm:$0xff]  ;;  %v321_v32 = vld [vmem:[%s3535_s5 + $0x1c0] sm:$0xff] }
  0x3d   : >> { %318 = vst [vmem:[%s3531_s4 + $0xf0] sm:$0xff] %v317_v30  ;;  %320 = vst [vmem:[%s3531_s4 + $0xf8] sm:$0xff] %v319_v31  ;;  %v323_v33 = vld [vmem:[%s3535_s5 + $0x1c8] sm:$0xff]  ;;  %v325_v34 = vld [vmem:[%s3535_s5 + $0x1dc] sm:$0xff] }
  0x3e   : >> { %322 = vst [vmem:[%s3531_s4 + $0x100] sm:$0xff] %v321_v32  ;;  %v327_v35 = vld [vmem:[%s3535_s5 + $0x1e4] sm:$0xff]  ;;  %324 = vst [vmem:[%s3531_s4 + $0x108] sm:$0xff] %v323_v33  ;;  %v329_v36 = vld [vmem:[%s3535_s5 + $0x1f8] sm:$0xff] }
  0x3f   : >> { %326 = vst [vmem:[%s3531_s4 + $0x110] sm:$0xff] %v325_v34  ;;  %328 = vst [vmem:[%s3531_s4 + $0x118] sm:$0xff] %v327_v35  ;;  %v331_v37 = vld [vmem:[%s3535_s5 + $0x200] sm:$0xff]  ;;  %v333_v38 = vld [vmem:[%s3535_s5 + $0x214] sm:$0xff] }
  0x40   : >> { %330 = vst [vmem:[%s3531_s4 + $0x120] sm:$0xff] %v329_v36  ;;  %332 = vst [vmem:[%s3531_s4 + $0x128] sm:$0xff] %v331_v37  ;;  %v335_v39 = vld [vmem:[%s3535_s5 + $0x21c] sm:$0xff]  ;;  %v337_v40 = vld [vmem:[%s3535_s5 + $0x230] sm:$0xff] }
  0x41   : >> { %334 = vst [vmem:[%s3531_s4 + $0x130] sm:$0xff] %v333_v38  ;;  %v339_v41 = vld [vmem:[%s3535_s5 + $0x238] sm:$0xff]  ;;  %336 = vst [vmem:[%s3531_s4 + $0x138] sm:$0xff] %v335_v39  ;;  %v341_v42 = vld [vmem:[%s3535_s5 + $0x24c] sm:$0xff] }
  0x42   : >> { %338 = vst [vmem:[%s3531_s4 + $0x140] sm:$0xff] %v337_v40  ;;  %340 = vst [vmem:[%s3531_s4 + $0x148] sm:$0xff] %v339_v41  ;;  %v343_v43 = vld [vmem:[%s3535_s5 + $0x254] sm:$0xff]  ;;  %v345_v44 = vld [vmem:[%s3535_s5 + $0x268] sm:$0xff] }
  0x43   : >> { %342 = vst [vmem:[%s3531_s4 + $0x150] sm:$0xff] %v341_v42  ;;  %344 = vst [vmem:[%s3531_s4 + $0x158] sm:$0xff] %v343_v43  ;;  %v347_v45 = vld [vmem:[%s3535_s5 + $0x270] sm:$0xff]  ;;  %v349_v46 = vld [vmem:[%s3535_s5 + $0x284] sm:$0xff] }
  0x44   : >> { %346 = vst [vmem:[%s3531_s4 + $0x160] sm:$0xff] %v345_v44  ;;  %v351_v47 = vld [vmem:[%s3535_s5 + $0x28c] sm:$0xff]  ;;  %348 = vst [vmem:[%s3531_s4 + $0x168] sm:$0xff] %v347_v45  ;;  %v353_v48 = vld [vmem:[%s3535_s5 + $0x2a0] sm:$0xff] }
  0x45   : >> { %350 = vst [vmem:[%s3531_s4 + $0x170] sm:$0xff] %v349_v46  ;;  %352 = vst [vmem:[%s3531_s4 + $0x178] sm:$0xff] %v351_v47  ;;  %v355_v49 = vld [vmem:[%s3535_s5 + $0x2a8] sm:$0xff]  ;;  %v357_v50 = vld [vmem:[%s3535_s5 + $0x2bc] sm:$0xff] }
  0x46   : >> { %354 = vst [vmem:[%s3531_s4 + $0x180] sm:$0xff] %v353_v48  ;;  %356 = vst [vmem:[%s3531_s4 + $0x188] sm:$0xff] %v355_v49  ;;  %v359_v51 = vld [vmem:[%s3535_s5 + $0x2c4] sm:$0xff]  ;;  %v361_v52 = vld [vmem:[%s3535_s5 + $0x2d8] sm:$0xff] }
  0x47   : >> { %358 = vst [vmem:[%s3531_s4 + $0x190] sm:$0xff] %v357_v50  ;;  %v363_v53 = vld [vmem:[%s3535_s5 + $0x2e0] sm:$0xff]  ;;  %360 = vst [vmem:[%s3531_s4 + $0x198] sm:$0xff] %v359_v51  ;;  %v365_v54 = vld [vmem:[%s3535_s5 + $0x2f4] sm:$0xff] }
  0x48   : >> { %362 = vst [vmem:[%s3531_s4 + $0x1a0] sm:$0xff] %v361_v52  ;;  %364 = vst [vmem:[%s3531_s4 + $0x1a8] sm:$0xff] %v363_v53  ;;  %v367_v55 = vld [vmem:[%s3535_s5 + $0x2fc] sm:$0xff]  ;;  %v369_v56 = vld [vmem:[%s3535_s5 + $0x310] sm:$0xff] }
  0x49   : >> { %366 = vst [vmem:[%s3531_s4 + $0x1b0] sm:$0xff] %v365_v54  ;;  %368 = vst [vmem:[%s3531_s4 + $0x1b8] sm:$0xff] %v367_v55  ;;  %v371_v57 = vld [vmem:[%s3535_s5 + $0x318] sm:$0xff]  ;;  %v373_v58 = vld [vmem:[%s3535_s5 + $0x32c] sm:$0xff] }
  0x4a   : >> { %370 = vst [vmem:[%s3531_s4 + $0x1c0] sm:$0xff] %v369_v56  ;;  %v375_v59 = vld [vmem:[%s3535_s5 + $0x334] sm:$0xff]  ;;  %372 = vst [vmem:[%s3531_s4 + $0x1c8] sm:$0xff] %v371_v57  ;;  %v377_v60 = vld [vmem:[%s3535_s5 + $0x348] sm:$0xff] }
  0x4b   : >> { %374 = vst [vmem:[%s3531_s4 + $0x1d0] sm:$0xff] %v373_v58  ;;  %376 = vst [vmem:[%s3531_s4 + $0x1d8] sm:$0xff] %v375_v59  ;;  %v379_v61 = vld [vmem:[%s3535_s5 + $0x350] sm:$0xff]  ;;  %v381_v62 = vld [vmem:[%s3535_s5 + $0x364] sm:$0xff] }
  0x4c   : >> { %378 = vst [vmem:[%s3531_s4 + $0x1e0] sm:$0xff] %v377_v60  ;;  %380 = vst [vmem:[%s3531_s4 + $0x1e8] sm:$0xff] %v379_v61  ;;  %v383_v63 = vld [vmem:[%s3535_s5 + $0x36c] sm:$0xff]  ;;  %v385_v0 = vld [vmem:[%s3535_s5 + $0x380] sm:$0xff] }
  0x4d   : >> { %382 = vst [vmem:[%s3531_s4 + $0x1f0] sm:$0xff] %v381_v62  ;;  %v387_v1 = vld [vmem:[%s3535_s5 + $0x388] sm:$0xff]  ;;  %384 = vst [vmem:[%s3531_s4 + $0x1f8] sm:$0xff] %v383_v63  ;;  %v389_v2 = vld [vmem:[%s3535_s5 + $0x39c] sm:$0xff] }
  0x4e   : >> { %386 = vst [vmem:[%s3531_s4 + $0x200] sm:$0xff] %v385_v0  ;;  %388 = vst [vmem:[%s3531_s4 + $0x208] sm:$0xff] %v387_v1  ;;  %v391_v3 = vld [vmem:[%s3535_s5 + $0x3a4] sm:$0xff]  ;;  %v393_v4 = vld [vmem:[%s3535_s5 + $0x3b8] sm:$0xff] }
  0x4f   : >> { %390 = vst [vmem:[%s3531_s4 + $0x210] sm:$0xff] %v389_v2  ;;  %392 = vst [vmem:[%s3531_s4 + $0x218] sm:$0xff] %v391_v3  ;;  %v395_v5 = vld [vmem:[%s3535_s5 + $0x3c0] sm:$0xff]  ;;  %v397_v6 = vld [vmem:[%s3535_s5 + $0x3d4] sm:$0xff] }
  0x50   : >> { %394 = vst [vmem:[%s3531_s4 + $0x220] sm:$0xff] %v393_v4  ;;  %v399_v7 = vld [vmem:[%s3535_s5 + $0x3dc] sm:$0xff]  ;;  %396 = vst [vmem:[%s3531_s4 + $0x228] sm:$0xff] %v395_v5  ;;  %v401_v8 = vld [vmem:[%s3535_s5 + $0x3f0] sm:$0xff] }
  0x51   : >> { %398 = vst [vmem:[%s3531_s4 + $0x230] sm:$0xff] %v397_v6  ;;  %400 = vst [vmem:[%s3531_s4 + $0x238] sm:$0xff] %v399_v7  ;;  %v403_v9 = vld [vmem:[%s3535_s5 + $0x3f8] sm:$0xff]  ;;  %v405_v10 = vld [vmem:[%s3535_s5 + $0x40c] sm:$0xff] }
  0x52   : >> { %402 = vst [vmem:[%s3531_s4 + $0x240] sm:$0xff] %v401_v8  ;;  %404 = vst [vmem:[%s3531_s4 + $0x248] sm:$0xff] %v403_v9  ;;  %v407_v11 = vld [vmem:[%s3535_s5 + $0x414] sm:$0xff]  ;;  %v409_v12 = vld [vmem:[%s3535_s5 + $0x428] sm:$0xff] }
  0x53   : >> { %406 = vst [vmem:[%s3531_s4 + $0x250] sm:$0xff] %v405_v10  ;;  %v411_v13 = vld [vmem:[%s3535_s5 + $0x430] sm:$0xff]  ;;  %408 = vst [vmem:[%s3531_s4 + $0x258] sm:$0xff] %v407_v11  ;;  %v413_v14 = vld [vmem:[%s3535_s5 + $0x444] sm:$0xff] }
  0x54   : >> { %410 = vst [vmem:[%s3531_s4 + $0x260] sm:$0xff] %v409_v12  ;;  %412 = vst [vmem:[%s3531_s4 + $0x268] sm:$0xff] %v411_v13  ;;  %v415_v15 = vld [vmem:[%s3535_s5 + $0x44c] sm:$0xff]  ;;  %v417_v16 = vld [vmem:[%s3535_s5 + $0x460] sm:$0xff] }
  0x55   : >> { %414 = vst [vmem:[%s3531_s4 + $0x270] sm:$0xff] %v413_v14  ;;  %416 = vst [vmem:[%s3531_s4 + $0x278] sm:$0xff] %v415_v15  ;;  %v419_v17 = vld [vmem:[%s3535_s5 + $0x468] sm:$0xff]  ;;  %v421_v18 = vld [vmem:[%s3535_s5 + $0x47c] sm:$0xff] }
  0x56   : >> { %418 = vst [vmem:[%s3531_s4 + $0x280] sm:$0xff] %v417_v16  ;;  %v423_v19 = vld [vmem:[%s3535_s5 + $0x484] sm:$0xff]  ;;  %420 = vst [vmem:[%s3531_s4 + $0x288] sm:$0xff] %v419_v17  ;;  %v425_v20 = vld [vmem:[%s3535_s5 + $0x498] sm:$0xff] }
  0x57   : >> { %422 = vst [vmem:[%s3531_s4 + $0x290] sm:$0xff] %v421_v18  ;;  %424 = vst [vmem:[%s3531_s4 + $0x298] sm:$0xff] %v423_v19  ;;  %v427_v21 = vld [vmem:[%s3535_s5 + $0x4a0] sm:$0xff]  ;;  %v429_v22 = vld [vmem:[%s3535_s5 + $0x4b4] sm:$0xff] }
  0x58   : >> { %426 = vst [vmem:[%s3531_s4 + $0x2a0] sm:$0xff] %v425_v20  ;;  %428 = vst [vmem:[%s3531_s4 + $0x2a8] sm:$0xff] %v427_v21  ;;  %v431_v23 = vld [vmem:[%s3535_s5 + $0x4bc] sm:$0xff]  ;;  %v433_v24 = vld [vmem:[%s3535_s5 + $0x4d0] sm:$0xff] }
  0x59   : >> { %430 = vst [vmem:[%s3531_s4 + $0x2b0] sm:$0xff] %v429_v22  ;;  %v435_v25 = vld [vmem:[%s3535_s5 + $0x4d8] sm:$0xff]  ;;  %432 = vst [vmem:[%s3531_s4 + $0x2b8] sm:$0xff] %v431_v23  ;;  %v437_v26 = vld [vmem:[%s3535_s5 + $0x4ec] sm:$0xff] }
  0x5a   : >> { %434 = vst [vmem:[%s3531_s4 + $0x2c0] sm:$0xff] %v433_v24  ;;  %436 = vst [vmem:[%s3531_s4 + $0x2c8] sm:$0xff] %v435_v25  ;;  %v439_v27 = vld [vmem:[%s3535_s5 + $0x4f4] sm:$0xff]  ;;  %v441_v28 = vld [vmem:[%s3535_s5 + $0x508] sm:$0xff] }
  0x5b   : >> { %438 = vst [vmem:[%s3531_s4 + $0x2d0] sm:$0xff] %v437_v26  ;;  %440 = vst [vmem:[%s3531_s4 + $0x2d8] sm:$0xff] %v439_v27  ;;  %v443_v29 = vld [vmem:[%s3535_s5 + $0x510] sm:$0xff]  ;;  %v445_v30 = vld [vmem:[%s3535_s5 + $0x524] sm:$0xff]  ;;  %253 = sbr.rel (!%p250_p0) target bundleno = 45 (0x2d), region = 231 }
  0x5c   : >> { %442 = vst [vmem:[%s3531_s4 + $0x2e0] sm:$0xff] %v441_v28  ;;  %v447_v31 = vld [vmem:[%s3535_s5 + $0x52c] sm:$0xff]  ;;  %444 = vst [vmem:[%s3531_s4 + $0x2e8] sm:$0xff] %v443_v29  ;;  %v449_v32 = vld [vmem:[%s3535_s5 + $0x540] sm:$0xff] }
  0x5d   : >> { %446 = vst [vmem:[%s3531_s4 + $0x2f0] sm:$0xff] %v445_v30  ;;  %448 = vst [vmem:[%s3531_s4 + $0x2f8] sm:$0xff] %v447_v31  ;;  %v451_v33 = vld [vmem:[%s3535_s5 + $0x548] sm:$0xff]  ;;  %v453_v34 = vld [vmem:[%s3535_s5 + $0x55c] sm:$0xff] }
  0x5e   : >> { %450 = vst [vmem:[%s3531_s4 + $0x300] sm:$0xff] %v449_v32  ;;  %452 = vst [vmem:[%s3531_s4 + $0x308] sm:$0xff] %v451_v33  ;;  %v455_v35 = vld [vmem:[%s3535_s5 + $0x564] sm:$0xff]  ;;  %s5626_s5 = smov %s3800_s15 }
  0x5f   : >> { %454 = vst [vmem:[%s3531_s4 + $0x310] sm:$0xff] %v453_v34  ;;  %456 = vst [vmem:[%s3531_s4 + $0x318] sm:$0xff] %v455_v35  ;;  %s5625_s4 = smov %s3803_s18 }
  0x60 PF: > { %s3981_s19 = sand.u32 1, %s244_s30   ;;  %s2912_s20 = sshll.u32 %s3733_s3, 8 }
  0x61   : > { %s468_s21 = sshra.s32 %s2912_s20, 4  ;;  %p2743_p1 = scmp.le.s32.totalorder %s3981_s19, 0 }
  0x62   : > { %s3985_s22 = scalar_lea.vmem %s3718_s25, %s468_s21   ;;  %s3988_s23 = scalar_lea.vmem %s3722_s28, %s468_s21 [#allocation2]  }
  0x63   : > { %2614 = sbr.rel (%p2743_p1) target bundleno = 130 (0x82), region = 236  ;;  %s5628_s24 = smov (!%p2743_p1), %s3988_s23 }
  0x64   : > { %s5629_s26 = smov (!%p2743_p1), %s3985_s22  ;;  %s3997_s4 = smov (!%p2743_p1), 0  }
  0x65   : > { %s3999_s5 = smov (!%p2743_p1), 0  }
  0x68 LB: >> { %v484_v36 = vld [vmem:[%s3551_s26] sm:$0xff]  ;;  %v488_v38 = vld [vmem:[%s3551_s26 + $0x38] sm:$0xff]  ;;  %s584_s30 = sadd.s32 1, %s3555_s4  ;;  %v492_v40 = vld [vmem:[%s3551_s26 + $0x70] sm:$0xff]  ;;  %s478_s5 = sadd.s32 1, %s3559_s5   ;;  %s3559_s5 = sphi %s3999_s5, %s478_s5   ;;  %s3555_s4 = sphi %s3997_s4, %s5632_s4   ;;  %s3551_s26 = sphi %s5629_s26, %s5631_s26   ;;  %s3547_s24 = sphi %s5628_s24, %s5630_s24  }
  0x69   : >> { %v486_v37 = vld [vmem:[%s3551_s26 + $0x1c] sm:$0xff]  ;;  %485 = vst [vmem:[%s3547_s24] sm:$0xff] %v484_v36  ;;  %489 = vst [vmem:[%s3547_s24 + $0x20] sm:$0xff] %v488_v38  ;;  %v490_v39 = vld [vmem:[%s3551_s26 + $0x54] sm:$0xff]  ;;  %p585_p2 = scmp.ge.s32.totalorder %s584_s30, %s3981_s19  ;;  %p477_p3 = scmp.ge.s32.totalorder %s478_s5, %s3981_s19 }
  0x6a   : >> { %487 = vst [vmem:[%s3547_s24 + $0x10] sm:$0xff] %v486_v37  ;;  %v494_v41 = vld [vmem:[%s3551_s26 + $0x8c] sm:$0xff]  ;;  %491 = vst [vmem:[%s3547_s24 + $0x30] sm:$0xff] %v490_v39  ;;  %v498_v43 = vld [vmem:[%s3551_s26 + $0xc4] sm:$0xff] }
  0x6b   : >> { %493 = vst [vmem:[%s3547_s24 + $0x40] sm:$0xff] %v492_v40  ;;  %495 = vst [vmem:[%s3547_s24 + $0x50] sm:$0xff] %v494_v41  ;;  %v496_v42 = vld [vmem:[%s3551_s26 + $0xa8] sm:$0xff]  ;;  %v500_v44 = vld [vmem:[%s3551_s26 + $0xe0] sm:$0xff]  ;;  %s5664_s30 = smov (%p585_p2, %s584_s30), 0 }
  0x6c   : >> { %497 = vst [vmem:[%s3547_s24 + $0x60] sm:$0xff] %v496_v42  ;;  %499 = vst [vmem:[%s3547_s24 + $0x70] sm:$0xff] %v498_v43  ;;  %v502_v45 = vld [vmem:[%s3551_s26 + $0xfc] sm:$0xff]  ;;  %v506_v47 = vld [vmem:[%s3551_s26 + $0x134] sm:$0xff]  ;;  %s2744_s3 = sshll.u32 %s5664_s30, 3  ;;  %s5632_s4 = smov %s5664_s30 }
  0x6d   : >> { %501 = vst [vmem:[%s3547_s24 + $0x80] sm:$0xff] %v500_v44  ;;  %v504_v46 = vld [vmem:[%s3551_s26 + $0x118] sm:$0xff]  ;;  %503 = vst [vmem:[%s3547_s24 + $0x90] sm:$0xff] %v502_v45  ;;  %v508_v48 = vld [vmem:[%s3551_s26 + $0x150] sm:$0xff]  ;;  %s4055_s6 = scalar_lea.vmem %s3985_s22, %s2744_s3   ;;  %s4058_s7 = scalar_lea.vmem %s3988_s23, %s2744_s3 [#allocation2]  }
  0x6e   : >> { %505 = vst [vmem:[%s3547_s24 + $0xa0] sm:$0xff] %v504_v46  ;;  %507 = vst [vmem:[%s3547_s24 + $0xb0] sm:$0xff] %v506_v47  ;;  %v510_v49 = vld [vmem:[%s3551_s26 + $0x16c] sm:$0xff]  ;;  %v514_v51 = vld [vmem:[%s3551_s26 + $0x1a4] sm:$0xff] }
  0x6f   : >> { %v512_v50 = vld [vmem:[%s3551_s26 + $0x188] sm:$0xff]  ;;  %509 = vst [vmem:[%s3547_s24 + $0xc0] sm:$0xff] %v508_v48  ;;  %511 = vst [vmem:[%s3547_s24 + $0xd0] sm:$0xff] %v510_v49  ;;  %v516_v52 = vld [vmem:[%s3551_s26 + $0x1c0] sm:$0xff] }
  0x70   : >> { %513 = vst [vmem:[%s3547_s24 + $0xe0] sm:$0xff] %v512_v50  ;;  %v518_v53 = vld [vmem:[%s3551_s26 + $0x1dc] sm:$0xff]  ;;  %515 = vst [vmem:[%s3547_s24 + $0xf0] sm:$0xff] %v514_v51  ;;  %v522_v55 = vld [vmem:[%s3551_s26 + $0x214] sm:$0xff] }
  0x71   : >> { %517 = vst [vmem:[%s3547_s24 + $0x100] sm:$0xff] %v516_v52  ;;  %519 = vst [vmem:[%s3547_s24 + $0x110] sm:$0xff] %v518_v53  ;;  %v520_v54 = vld [vmem:[%s3551_s26 + $0x1f8] sm:$0xff]  ;;  %v524_v56 = vld [vmem:[%s3551_s26 + $0x230] sm:$0xff] }
  0x72   : >> { %521 = vst [vmem:[%s3547_s24 + $0x120] sm:$0xff] %v520_v54  ;;  %523 = vst [vmem:[%s3547_s24 + $0x130] sm:$0xff] %v522_v55  ;;  %v526_v57 = vld [vmem:[%s3551_s26 + $0x24c] sm:$0xff]  ;;  %v530_v59 = vld [vmem:[%s3551_s26 + $0x284] sm:$0xff] }
  0x73   : >> { %525 = vst [vmem:[%s3547_s24 + $0x140] sm:$0xff] %v524_v56  ;;  %v528_v58 = vld [vmem:[%s3551_s26 + $0x268] sm:$0xff]  ;;  %527 = vst [vmem:[%s3547_s24 + $0x150] sm:$0xff] %v526_v57  ;;  %v532_v60 = vld [vmem:[%s3551_s26 + $0x2a0] sm:$0xff] }
  0x74   : >> { %529 = vst [vmem:[%s3547_s24 + $0x160] sm:$0xff] %v528_v58  ;;  %531 = vst [vmem:[%s3547_s24 + $0x170] sm:$0xff] %v530_v59  ;;  %v534_v61 = vld [vmem:[%s3551_s26 + $0x2bc] sm:$0xff]  ;;  %v538_v63 = vld [vmem:[%s3551_s26 + $0x2f4] sm:$0xff] }
  0x75   : >> { %v536_v62 = vld [vmem:[%s3551_s26 + $0x2d8] sm:$0xff]  ;;  %533 = vst [vmem:[%s3547_s24 + $0x180] sm:$0xff] %v532_v60  ;;  %535 = vst [vmem:[%s3547_s24 + $0x190] sm:$0xff] %v534_v61  ;;  %v540_v0 = vld [vmem:[%s3551_s26 + $0x310] sm:$0xff] }
  0x76   : >> { %537 = vst [vmem:[%s3547_s24 + $0x1a0] sm:$0xff] %v536_v62  ;;  %v542_v1 = vld [vmem:[%s3551_s26 + $0x32c] sm:$0xff]  ;;  %539 = vst [vmem:[%s3547_s24 + $0x1b0] sm:$0xff] %v538_v63  ;;  %v546_v3 = vld [vmem:[%s3551_s26 + $0x364] sm:$0xff] }
  0x77   : >> { %541 = vst [vmem:[%s3547_s24 + $0x1c0] sm:$0xff] %v540_v0  ;;  %543 = vst [vmem:[%s3547_s24 + $0x1d0] sm:$0xff] %v542_v1  ;;  %v544_v2 = vld [vmem:[%s3551_s26 + $0x348] sm:$0xff]  ;;  %v548_v4 = vld [vmem:[%s3551_s26 + $0x380] sm:$0xff] }
  0x78   : >> { %545 = vst [vmem:[%s3547_s24 + $0x1e0] sm:$0xff] %v544_v2  ;;  %547 = vst [vmem:[%s3547_s24 + $0x1f0] sm:$0xff] %v546_v3  ;;  %v550_v5 = vld [vmem:[%s3551_s26 + $0x39c] sm:$0xff]  ;;  %v554_v7 = vld [vmem:[%s3551_s26 + $0x3d4] sm:$0xff] }
  0x79   : >> { %549 = vst [vmem:[%s3547_s24 + $0x200] sm:$0xff] %v548_v4  ;;  %v552_v6 = vld [vmem:[%s3551_s26 + $0x3b8] sm:$0xff]  ;;  %551 = vst [vmem:[%s3547_s24 + $0x210] sm:$0xff] %v550_v5  ;;  %v556_v8 = vld [vmem:[%s3551_s26 + $0x3f0] sm:$0xff] }
  0x7a   : >> { %553 = vst [vmem:[%s3547_s24 + $0x220] sm:$0xff] %v552_v6  ;;  %555 = vst [vmem:[%s3547_s24 + $0x230] sm:$0xff] %v554_v7  ;;  %v558_v9 = vld [vmem:[%s3551_s26 + $0x40c] sm:$0xff]  ;;  %v562_v11 = vld [vmem:[%s3551_s26 + $0x444] sm:$0xff] }
  0x7b   : >> { %v560_v10 = vld [vmem:[%s3551_s26 + $0x428] sm:$0xff]  ;;  %557 = vst [vmem:[%s3547_s24 + $0x240] sm:$0xff] %v556_v8  ;;  %559 = vst [vmem:[%s3547_s24 + $0x250] sm:$0xff] %v558_v9  ;;  %v564_v12 = vld [vmem:[%s3551_s26 + $0x460] sm:$0xff] }
  0x7c   : >> { %561 = vst [vmem:[%s3547_s24 + $0x260] sm:$0xff] %v560_v10  ;;  %v566_v13 = vld [vmem:[%s3551_s26 + $0x47c] sm:$0xff]  ;;  %563 = vst [vmem:[%s3547_s24 + $0x270] sm:$0xff] %v562_v11  ;;  %v570_v15 = vld [vmem:[%s3551_s26 + $0x4b4] sm:$0xff] }
  0x7d   : >> { %565 = vst [vmem:[%s3547_s24 + $0x280] sm:$0xff] %v564_v12  ;;  %567 = vst [vmem:[%s3547_s24 + $0x290] sm:$0xff] %v566_v13  ;;  %v568_v14 = vld [vmem:[%s3551_s26 + $0x498] sm:$0xff]  ;;  %v572_v16 = vld [vmem:[%s3551_s26 + $0x4d0] sm:$0xff]  ;;  %480 = sbr.rel (!%p477_p3) target bundleno = 104 (0x68), region = 242 }
  0x7e   : >> { %569 = vst [vmem:[%s3547_s24 + $0x2a0] sm:$0xff] %v568_v14  ;;  %571 = vst [vmem:[%s3547_s24 + $0x2b0] sm:$0xff] %v570_v15  ;;  %v574_v17 = vld [vmem:[%s3551_s26 + $0x4ec] sm:$0xff]  ;;  %v578_v19 = vld [vmem:[%s3551_s26 + $0x524] sm:$0xff] }
  0x7f   : >> { %573 = vst [vmem:[%s3547_s24 + $0x2c0] sm:$0xff] %v572_v16  ;;  %v576_v18 = vld [vmem:[%s3551_s26 + $0x508] sm:$0xff]  ;;  %575 = vst [vmem:[%s3547_s24 + $0x2d0] sm:$0xff] %v574_v17  ;;  %v580_v20 = vld [vmem:[%s3551_s26 + $0x540] sm:$0xff] }
  0x80   : >> { %577 = vst [vmem:[%s3547_s24 + $0x2e0] sm:$0xff] %v576_v18  ;;  %579 = vst [vmem:[%s3547_s24 + $0x2f0] sm:$0xff] %v578_v19  ;;  %v582_v21 = vld [vmem:[%s3551_s26 + $0x55c] sm:$0xff]  ;;  %s5631_s26 = smov %s4055_s6 }
  0x81   : >> { %581 = vst [vmem:[%s3547_s24 + $0x300] sm:$0xff] %v580_v20  ;;  %583 = vst [vmem:[%s3547_s24 + $0x310] sm:$0xff] %v582_v21  ;;  %s5630_s24 = smov %s4058_s7 }
  0x82 PF: > { %593 = sbr.rel (%p240_p10) target bundleno = 279 (0x117), region = 65  ;;  %s595_s8 = ssub.s32 (!%p240_p10), %s3720_s27, %s3726_s29 }
  0x83   : > { %s599_s14 = sshrl.u32 (!%p240_p10), %s3720_s27, 3  ;;  %s4140_s15 = scalar_lea.vmem (!%p240_p10), %s3718_s25, %s595_s8 }
  0x84   : > { %s4143_s18 = scalar_lea.vmem (!%p240_p10), %s3722_s28, %s595_s8 [#allocation2]  ;;  %s4147_s20 = sshrl.u32 (!%p240_p10), %s599_s14, 1 }
  0x85   : > { %p2746_p4 = scmp.le.s32.totalorder (!%p240_p10), %s4147_s20, 0 }
  0x87   : > { %2628 = sbr.rel (%p2746_p4) target bundleno = 191 (0xbf), region = 247  ;;  %s5633_s19 = smov (!%p2746_p4), %s3722_s28 }
  0x88   : > { %s5634_s21 = smov (!%p2746_p4), %s3718_s25  ;;  %s4156_s22 = smov (!%p2746_p4), 0  }
  0x89   : > { %s4158_s23 = smov (!%p2746_p4), 0  }
  0x8c LB: >> { %v612_v22 = vld [vmem:[%s3567_s21] sm:$0xff]  ;;  %v614_v23 = vld [vmem:[%s3567_s21 + $0x8] sm:$0xff]  ;;  %s812_s24 = sadd.s32 1, %s3571_s22  ;;  %v620_v26 = vld [vmem:[%s3567_s21 + $0x38] sm:$0xff]  ;;  %s606_s23 = sadd.s32 1, %s3575_s23   ;;  %s3575_s23 = sphi %s4158_s23, %s606_s23   ;;  %s3571_s22 = sphi %s4156_s22, %s5637_s22   ;;  %s3567_s21 = sphi %s5634_s21, %s5636_s21   ;;  %s3563_s19 = sphi %s5633_s19, %s5635_s19  }
  0x8d   : >> { %v616_v24 = vld [vmem:[%s3567_s21 + $0x1c] sm:$0xff]  ;;  %613 = vst [vmem:[%s3563_s19] sm:$0xff] %v612_v22  ;;  %615 = vst [vmem:[%s3563_s19 + $0x8] sm:$0xff] %v614_v23  ;;  %v618_v25 = vld [vmem:[%s3567_s21 + $0x24] sm:$0xff]  ;;  %p813_p6 = scmp.ge.s32.totalorder %s812_s24, %s4147_s20  ;;  %p605_p7 = scmp.ge.s32.totalorder %s606_s23, %s4147_s20 }
  0x8e   : >> { %617 = vst [vmem:[%s3563_s19 + $0x10] sm:$0xff] %v616_v24  ;;  %v622_v27 = vld [vmem:[%s3567_s21 + $0x40] sm:$0xff]  ;;  %619 = vst [vmem:[%s3563_s19 + $0x18] sm:$0xff] %v618_v25  ;;  %v624_v28 = vld [vmem:[%s3567_s21 + $0x54] sm:$0xff] }
  0x8f   : >> { %621 = vst [vmem:[%s3563_s19 + $0x20] sm:$0xff] %v620_v26  ;;  %623 = vst [vmem:[%s3563_s19 + $0x28] sm:$0xff] %v622_v27  ;;  %v626_v29 = vld [vmem:[%s3567_s21 + $0x5c] sm:$0xff]  ;;  %v628_v30 = vld [vmem:[%s3567_s21 + $0x70] sm:$0xff]  ;;  %s5666_s24 = smov (%p813_p6, %s812_s24), 0 }
  0x90   : >> { %625 = vst [vmem:[%s3563_s19 + $0x30] sm:$0xff] %v624_v28  ;;  %627 = vst [vmem:[%s3563_s19 + $0x38] sm:$0xff] %v626_v29  ;;  %v630_v31 = vld [vmem:[%s3567_s21 + $0x78] sm:$0xff]  ;;  %v632_v32 = vld [vmem:[%s3567_s21 + $0x8c] sm:$0xff]  ;;  %s2747_s26 = sshll.u32 %s5666_s24, 4  ;;  %s5637_s22 = smov %s5666_s24 }
  0x91   : >> { %629 = vst [vmem:[%s3563_s19 + $0x40] sm:$0xff] %v628_v30  ;;  %v634_v33 = vld [vmem:[%s3567_s21 + $0x94] sm:$0xff]  ;;  %631 = vst [vmem:[%s3563_s19 + $0x48] sm:$0xff] %v630_v31  ;;  %v636_v34 = vld [vmem:[%s3567_s21 + $0xa8] sm:$0xff]  ;;  %s4214_s4 = scalar_lea.vmem %s3718_s25, %s2747_s26   ;;  %s4217_s5 = scalar_lea.vmem %s3722_s28, %s2747_s26 [#allocation2]  }
  0x92   : >> { %633 = vst [vmem:[%s3563_s19 + $0x50] sm:$0xff] %v632_v32  ;;  %635 = vst [vmem:[%s3563_s19 + $0x58] sm:$0xff] %v634_v33  ;;  %v638_v35 = vld [vmem:[%s3567_s21 + $0xb0] sm:$0xff]  ;;  %v640_v36 = vld [vmem:[%s3567_s21 + $0xc4] sm:$0xff] }
  0x93   : >> { %637 = vst [vmem:[%s3563_s19 + $0x60] sm:$0xff] %v636_v34  ;;  %639 = vst [vmem:[%s3563_s19 + $0x68] sm:$0xff] %v638_v35  ;;  %v642_v37 = vld [vmem:[%s3567_s21 + $0xcc] sm:$0xff]  ;;  %v644_v38 = vld [vmem:[%s3567_s21 + $0xe0] sm:$0xff] }
  0x94   : >> { %641 = vst [vmem:[%s3563_s19 + $0x70] sm:$0xff] %v640_v36  ;;  %v646_v39 = vld [vmem:[%s3567_s21 + $0xe8] sm:$0xff]  ;;  %643 = vst [vmem:[%s3563_s19 + $0x78] sm:$0xff] %v642_v37  ;;  %v648_v40 = vld [vmem:[%s3567_s21 + $0xfc] sm:$0xff] }
  0x95   : >> { %645 = vst [vmem:[%s3563_s19 + $0x80] sm:$0xff] %v644_v38  ;;  %647 = vst [vmem:[%s3563_s19 + $0x88] sm:$0xff] %v646_v39  ;;  %v650_v41 = vld [vmem:[%s3567_s21 + $0x104] sm:$0xff]  ;;  %v652_v42 = vld [vmem:[%s3567_s21 + $0x118] sm:$0xff] }
  0x96   : >> { %649 = vst [vmem:[%s3563_s19 + $0x90] sm:$0xff] %v648_v40  ;;  %651 = vst [vmem:[%s3563_s19 + $0x98] sm:$0xff] %v650_v41  ;;  %v654_v43 = vld [vmem:[%s3567_s21 + $0x120] sm:$0xff]  ;;  %v656_v44 = vld [vmem:[%s3567_s21 + $0x134] sm:$0xff] }
  0x97   : >> { %653 = vst [vmem:[%s3563_s19 + $0xa0] sm:$0xff] %v652_v42  ;;  %v658_v45 = vld [vmem:[%s3567_s21 + $0x13c] sm:$0xff]  ;;  %655 = vst [vmem:[%s3563_s19 + $0xa8] sm:$0xff] %v654_v43  ;;  %v660_v46 = vld [vmem:[%s3567_s21 + $0x150] sm:$0xff] }
  0x98   : >> { %657 = vst [vmem:[%s3563_s19 + $0xb0] sm:$0xff] %v656_v44  ;;  %659 = vst [vmem:[%s3563_s19 + $0xb8] sm:$0xff] %v658_v45  ;;  %v662_v47 = vld [vmem:[%s3567_s21 + $0x158] sm:$0xff]  ;;  %v664_v48 = vld [vmem:[%s3567_s21 + $0x16c] sm:$0xff] }
  0x99   : >> { %661 = vst [vmem:[%s3563_s19 + $0xc0] sm:$0xff] %v660_v46  ;;  %663 = vst [vmem:[%s3563_s19 + $0xc8] sm:$0xff] %v662_v47  ;;  %v666_v49 = vld [vmem:[%s3567_s21 + $0x174] sm:$0xff]  ;;  %v668_v50 = vld [vmem:[%s3567_s21 + $0x188] sm:$0xff] }
  0x9a   : >> { %665 = vst [vmem:[%s3563_s19 + $0xd0] sm:$0xff] %v664_v48  ;;  %v670_v51 = vld [vmem:[%s3567_s21 + $0x190] sm:$0xff]  ;;  %667 = vst [vmem:[%s3563_s19 + $0xd8] sm:$0xff] %v666_v49  ;;  %v672_v52 = vld [vmem:[%s3567_s21 + $0x1a4] sm:$0xff] }
  0x9b   : >> { %669 = vst [vmem:[%s3563_s19 + $0xe0] sm:$0xff] %v668_v50  ;;  %671 = vst [vmem:[%s3563_s19 + $0xe8] sm:$0xff] %v670_v51  ;;  %v674_v53 = vld [vmem:[%s3567_s21 + $0x1ac] sm:$0xff]  ;;  %v676_v54 = vld [vmem:[%s3567_s21 + $0x1c0] sm:$0xff] }
  0x9c   : >> { %673 = vst [vmem:[%s3563_s19 + $0xf0] sm:$0xff] %v672_v52  ;;  %675 = vst [vmem:[%s3563_s19 + $0xf8] sm:$0xff] %v674_v53  ;;  %v678_v55 = vld [vmem:[%s3567_s21 + $0x1c8] sm:$0xff]  ;;  %v680_v56 = vld [vmem:[%s3567_s21 + $0x1dc] sm:$0xff] }
  0x9d   : >> { %677 = vst [vmem:[%s3563_s19 + $0x100] sm:$0xff] %v676_v54  ;;  %v682_v57 = vld [vmem:[%s3567_s21 + $0x1e4] sm:$0xff]  ;;  %679 = vst [vmem:[%s3563_s19 + $0x108] sm:$0xff] %v678_v55  ;;  %v684_v58 = vld [vmem:[%s3567_s21 + $0x1f8] sm:$0xff] }
  0x9e   : >> { %681 = vst [vmem:[%s3563_s19 + $0x110] sm:$0xff] %v680_v56  ;;  %683 = vst [vmem:[%s3563_s19 + $0x118] sm:$0xff] %v682_v57  ;;  %v686_v59 = vld [vmem:[%s3567_s21 + $0x200] sm:$0xff]  ;;  %v688_v60 = vld [vmem:[%s3567_s21 + $0x214] sm:$0xff] }
  0x9f   : >> { %685 = vst [vmem:[%s3563_s19 + $0x120] sm:$0xff] %v684_v58  ;;  %687 = vst [vmem:[%s3563_s19 + $0x128] sm:$0xff] %v686_v59  ;;  %v690_v61 = vld [vmem:[%s3567_s21 + $0x21c] sm:$0xff]  ;;  %v692_v62 = vld [vmem:[%s3567_s21 + $0x230] sm:$0xff] }
  0xa0   : >> { %689 = vst [vmem:[%s3563_s19 + $0x130] sm:$0xff] %v688_v60  ;;  %v694_v63 = vld [vmem:[%s3567_s21 + $0x238] sm:$0xff]  ;;  %691 = vst [vmem:[%s3563_s19 + $0x138] sm:$0xff] %v690_v61  ;;  %v696_v0 = vld [vmem:[%s3567_s21 + $0x24c] sm:$0xff] }
  0xa1   : >> { %693 = vst [vmem:[%s3563_s19 + $0x140] sm:$0xff] %v692_v62  ;;  %695 = vst [vmem:[%s3563_s19 + $0x148] sm:$0xff] %v694_v63  ;;  %v698_v1 = vld [vmem:[%s3567_s21 + $0x254] sm:$0xff]  ;;  %v700_v2 = vld [vmem:[%s3567_s21 + $0x268] sm:$0xff] }
  0xa2   : >> { %697 = vst [vmem:[%s3563_s19 + $0x150] sm:$0xff] %v696_v0  ;;  %699 = vst [vmem:[%s3563_s19 + $0x158] sm:$0xff] %v698_v1  ;;  %v702_v3 = vld [vmem:[%s3567_s21 + $0x270] sm:$0xff]  ;;  %v704_v4 = vld [vmem:[%s3567_s21 + $0x284] sm:$0xff] }
  0xa3   : >> { %701 = vst [vmem:[%s3563_s19 + $0x160] sm:$0xff] %v700_v2  ;;  %v706_v5 = vld [vmem:[%s3567_s21 + $0x28c] sm:$0xff]  ;;  %703 = vst [vmem:[%s3563_s19 + $0x168] sm:$0xff] %v702_v3  ;;  %v708_v6 = vld [vmem:[%s3567_s21 + $0x2a0] sm:$0xff] }
  0xa4   : >> { %705 = vst [vmem:[%s3563_s19 + $0x170] sm:$0xff] %v704_v4  ;;  %707 = vst [vmem:[%s3563_s19 + $0x178] sm:$0xff] %v706_v5  ;;  %v710_v7 = vld [vmem:[%s3567_s21 + $0x2a8] sm:$0xff]  ;;  %v712_v8 = vld [vmem:[%s3567_s21 + $0x2bc] sm:$0xff] }
  0xa5   : >> { %709 = vst [vmem:[%s3563_s19 + $0x180] sm:$0xff] %v708_v6  ;;  %711 = vst [vmem:[%s3563_s19 + $0x188] sm:$0xff] %v710_v7  ;;  %v714_v9 = vld [vmem:[%s3567_s21 + $0x2c4] sm:$0xff]  ;;  %v716_v10 = vld [vmem:[%s3567_s21 + $0x2d8] sm:$0xff] }
  0xa6   : >> { %713 = vst [vmem:[%s3563_s19 + $0x190] sm:$0xff] %v712_v8  ;;  %v718_v11 = vld [vmem:[%s3567_s21 + $0x2e0] sm:$0xff]  ;;  %715 = vst [vmem:[%s3563_s19 + $0x198] sm:$0xff] %v714_v9  ;;  %v720_v12 = vld [vmem:[%s3567_s21 + $0x2f4] sm:$0xff] }
  0xa7   : >> { %717 = vst [vmem:[%s3563_s19 + $0x1a0] sm:$0xff] %v716_v10  ;;  %719 = vst [vmem:[%s3563_s19 + $0x1a8] sm:$0xff] %v718_v11  ;;  %v722_v13 = vld [vmem:[%s3567_s21 + $0x2fc] sm:$0xff]  ;;  %v724_v14 = vld [vmem:[%s3567_s21 + $0x310] sm:$0xff] }
  0xa8   : >> { %721 = vst [vmem:[%s3563_s19 + $0x1b0] sm:$0xff] %v720_v12  ;;  %723 = vst [vmem:[%s3563_s19 + $0x1b8] sm:$0xff] %v722_v13  ;;  %v726_v15 = vld [vmem:[%s3567_s21 + $0x318] sm:$0xff]  ;;  %v728_v16 = vld [vmem:[%s3567_s21 + $0x32c] sm:$0xff] }
  0xa9   : >> { %725 = vst [vmem:[%s3563_s19 + $0x1c0] sm:$0xff] %v724_v14  ;;  %v730_v17 = vld [vmem:[%s3567_s21 + $0x334] sm:$0xff]  ;;  %727 = vst [vmem:[%s3563_s19 + $0x1c8] sm:$0xff] %v726_v15  ;;  %v732_v18 = vld [vmem:[%s3567_s21 + $0x348] sm:$0xff] }
  0xaa   : >> { %729 = vst [vmem:[%s3563_s19 + $0x1d0] sm:$0xff] %v728_v16  ;;  %731 = vst [vmem:[%s3563_s19 + $0x1d8] sm:$0xff] %v730_v17  ;;  %v734_v19 = vld [vmem:[%s3567_s21 + $0x350] sm:$0xff]  ;;  %v736_v20 = vld [vmem:[%s3567_s21 + $0x364] sm:$0xff] }
  0xab   : >> { %733 = vst [vmem:[%s3563_s19 + $0x1e0] sm:$0xff] %v732_v18  ;;  %735 = vst [vmem:[%s3563_s19 + $0x1e8] sm:$0xff] %v734_v19  ;;  %v738_v21 = vld [vmem:[%s3567_s21 + $0x36c] sm:$0xff]  ;;  %v740_v22 = vld [vmem:[%s3567_s21 + $0x380] sm:$0xff] }
  0xac   : >> { %737 = vst [vmem:[%s3563_s19 + $0x1f0] sm:$0xff] %v736_v20  ;;  %v742_v23 = vld [vmem:[%s3567_s21 + $0x388] sm:$0xff]  ;;  %739 = vst [vmem:[%s3563_s19 + $0x1f8] sm:$0xff] %v738_v21  ;;  %v744_v24 = vld [vmem:[%s3567_s21 + $0x39c] sm:$0xff] }
  0xad   : >> { %741 = vst [vmem:[%s3563_s19 + $0x200] sm:$0xff] %v740_v22  ;;  %743 = vst [vmem:[%s3563_s19 + $0x208] sm:$0xff] %v742_v23  ;;  %v746_v25 = vld [vmem:[%s3567_s21 + $0x3a4] sm:$0xff]  ;;  %v748_v26 = vld [vmem:[%s3567_s21 + $0x3b8] sm:$0xff] }
  0xae   : >> { %745 = vst [vmem:[%s3563_s19 + $0x210] sm:$0xff] %v744_v24  ;;  %747 = vst [vmem:[%s3563_s19 + $0x218] sm:$0xff] %v746_v25  ;;  %v750_v27 = vld [vmem:[%s3567_s21 + $0x3c0] sm:$0xff]  ;;  %v752_v28 = vld [vmem:[%s3567_s21 + $0x3d4] sm:$0xff] }
  0xaf   : >> { %749 = vst [vmem:[%s3563_s19 + $0x220] sm:$0xff] %v748_v26  ;;  %v754_v29 = vld [vmem:[%s3567_s21 + $0x3dc] sm:$0xff]  ;;  %751 = vst [vmem:[%s3563_s19 + $0x228] sm:$0xff] %v750_v27  ;;  %v756_v30 = vld [vmem:[%s3567_s21 + $0x3f0] sm:$0xff] }
  0xb0   : >> { %753 = vst [vmem:[%s3563_s19 + $0x230] sm:$0xff] %v752_v28  ;;  %755 = vst [vmem:[%s3563_s19 + $0x238] sm:$0xff] %v754_v29  ;;  %v758_v31 = vld [vmem:[%s3567_s21 + $0x3f8] sm:$0xff]  ;;  %v760_v32 = vld [vmem:[%s3567_s21 + $0x40c] sm:$0xff] }
  0xb1   : >> { %757 = vst [vmem:[%s3563_s19 + $0x240] sm:$0xff] %v756_v30  ;;  %759 = vst [vmem:[%s3563_s19 + $0x248] sm:$0xff] %v758_v31  ;;  %v762_v33 = vld [vmem:[%s3567_s21 + $0x414] sm:$0xff]  ;;  %v764_v34 = vld [vmem:[%s3567_s21 + $0x428] sm:$0xff] }
  0xb2   : >> { %761 = vst [vmem:[%s3563_s19 + $0x250] sm:$0xff] %v760_v32  ;;  %v766_v35 = vld [vmem:[%s3567_s21 + $0x430] sm:$0xff]  ;;  %763 = vst [vmem:[%s3563_s19 + $0x258] sm:$0xff] %v762_v33  ;;  %v768_v36 = vld [vmem:[%s3567_s21 + $0x444] sm:$0xff] }
  0xb3   : >> { %765 = vst [vmem:[%s3563_s19 + $0x260] sm:$0xff] %v764_v34  ;;  %767 = vst [vmem:[%s3563_s19 + $0x268] sm:$0xff] %v766_v35  ;;  %v770_v37 = vld [vmem:[%s3567_s21 + $0x44c] sm:$0xff]  ;;  %v772_v38 = vld [vmem:[%s3567_s21 + $0x460] sm:$0xff] }
  0xb4   : >> { %769 = vst [vmem:[%s3563_s19 + $0x270] sm:$0xff] %v768_v36  ;;  %771 = vst [vmem:[%s3563_s19 + $0x278] sm:$0xff] %v770_v37  ;;  %v774_v39 = vld [vmem:[%s3567_s21 + $0x468] sm:$0xff]  ;;  %v776_v40 = vld [vmem:[%s3567_s21 + $0x47c] sm:$0xff] }
  0xb5   : >> { %773 = vst [vmem:[%s3563_s19 + $0x280] sm:$0xff] %v772_v38  ;;  %v778_v41 = vld [vmem:[%s3567_s21 + $0x484] sm:$0xff]  ;;  %775 = vst [vmem:[%s3563_s19 + $0x288] sm:$0xff] %v774_v39  ;;  %v780_v42 = vld [vmem:[%s3567_s21 + $0x498] sm:$0xff] }
  0xb6   : >> { %777 = vst [vmem:[%s3563_s19 + $0x290] sm:$0xff] %v776_v40  ;;  %779 = vst [vmem:[%s3563_s19 + $0x298] sm:$0xff] %v778_v41  ;;  %v782_v43 = vld [vmem:[%s3567_s21 + $0x4a0] sm:$0xff]  ;;  %v784_v44 = vld [vmem:[%s3567_s21 + $0x4b4] sm:$0xff] }
  0xb7   : >> { %781 = vst [vmem:[%s3563_s19 + $0x2a0] sm:$0xff] %v780_v42  ;;  %783 = vst [vmem:[%s3563_s19 + $0x2a8] sm:$0xff] %v782_v43  ;;  %v786_v45 = vld [vmem:[%s3567_s21 + $0x4bc] sm:$0xff]  ;;  %v788_v46 = vld [vmem:[%s3567_s21 + $0x4d0] sm:$0xff] }
  0xb8   : >> { %785 = vst [vmem:[%s3563_s19 + $0x2b0] sm:$0xff] %v784_v44  ;;  %v790_v47 = vld [vmem:[%s3567_s21 + $0x4d8] sm:$0xff]  ;;  %787 = vst [vmem:[%s3563_s19 + $0x2b8] sm:$0xff] %v786_v45  ;;  %v792_v48 = vld [vmem:[%s3567_s21 + $0x4ec] sm:$0xff] }
  0xb9   : >> { %789 = vst [vmem:[%s3563_s19 + $0x2c0] sm:$0xff] %v788_v46  ;;  %791 = vst [vmem:[%s3563_s19 + $0x2c8] sm:$0xff] %v790_v47  ;;  %v794_v49 = vld [vmem:[%s3567_s21 + $0x4f4] sm:$0xff]  ;;  %v796_v50 = vld [vmem:[%s3567_s21 + $0x508] sm:$0xff] }
  0xba   : >> { %793 = vst [vmem:[%s3563_s19 + $0x2d0] sm:$0xff] %v792_v48  ;;  %795 = vst [vmem:[%s3563_s19 + $0x2d8] sm:$0xff] %v794_v49  ;;  %v798_v51 = vld [vmem:[%s3567_s21 + $0x510] sm:$0xff]  ;;  %v800_v52 = vld [vmem:[%s3567_s21 + $0x524] sm:$0xff]  ;;  %608 = sbr.rel (!%p605_p7) target bundleno = 140 (0x8c), region = 253 }
  0xbb   : >> { %797 = vst [vmem:[%s3563_s19 + $0x2e0] sm:$0xff] %v796_v50  ;;  %v802_v53 = vld [vmem:[%s3567_s21 + $0x52c] sm:$0xff]  ;;  %799 = vst [vmem:[%s3563_s19 + $0x2e8] sm:$0xff] %v798_v51  ;;  %v804_v54 = vld [vmem:[%s3567_s21 + $0x540] sm:$0xff] }
  0xbc   : >> { %801 = vst [vmem:[%s3563_s19 + $0x2f0] sm:$0xff] %v800_v52  ;;  %803 = vst [vmem:[%s3563_s19 + $0x2f8] sm:$0xff] %v802_v53  ;;  %v806_v55 = vld [vmem:[%s3567_s21 + $0x548] sm:$0xff]  ;;  %v808_v56 = vld [vmem:[%s3567_s21 + $0x55c] sm:$0xff] }
  0xbd   : >> { %805 = vst [vmem:[%s3563_s19 + $0x300] sm:$0xff] %v804_v54  ;;  %807 = vst [vmem:[%s3563_s19 + $0x308] sm:$0xff] %v806_v55  ;;  %v810_v57 = vld [vmem:[%s3567_s21 + $0x564] sm:$0xff]  ;;  %s5636_s21 = smov %s4214_s4 }
  0xbe   : >> { %809 = vst [vmem:[%s3563_s19 + $0x310] sm:$0xff] %v808_v56  ;;  %811 = vst [vmem:[%s3563_s19 + $0x318] sm:$0xff] %v810_v57  ;;  %s5635_s19 = smov %s4217_s5 }
  0xbf PF: > { %s4395_s30 = sand.u32 1, %s599_s14   ;;  %s2914_s3 = sshll.u32 %s4147_s20, 8 }
  0xc0   : > { %s823_s6 = sshra.s32 %s2914_s3, 4  ;;  %p2752_p8 = scmp.le.s32.totalorder %s4395_s30, 0 }
  0xc1   : > { %s4399_s7 = scalar_lea.vmem %s3718_s25, %s823_s6   ;;  %s4402_s8 = scalar_lea.vmem %s3722_s28, %s823_s6 [#allocation2]  }
  0xc2   : > { %2642 = sbr.rel (%p2752_p8) target bundleno = 225 (0xe1), region = 258  ;;  %s5638_s19 = smov (!%p2752_p8), %s4402_s8 }
  0xc3   : > { %s5639_s21 = smov (!%p2752_p8), %s4399_s7  ;;  %s4411_s22 = smov (!%p2752_p8), 0  }
  0xc4   : > { %s4413_s23 = smov (!%p2752_p8), 0  }
  0xc7 LB: >> { %v839_v58 = vld [vmem:[%s3583_s21] sm:$0xff]  ;;  %v843_v60 = vld [vmem:[%s3583_s21 + $0x38] sm:$0xff]  ;;  %s939_s14 = sadd.s32 1, %s3587_s22  ;;  %v847_v62 = vld [vmem:[%s3583_s21 + $0x70] sm:$0xff]  ;;  %s833_s23 = sadd.s32 1, %s3591_s23   ;;  %s3591_s23 = sphi %s4413_s23, %s833_s23   ;;  %s3587_s22 = sphi %s4411_s22, %s5642_s22   ;;  %s3583_s21 = sphi %s5639_s21, %s5641_s21   ;;  %s3579_s19 = sphi %s5638_s19, %s5640_s19  }
  0xc8   : >> { %v841_v59 = vld [vmem:[%s3583_s21 + $0x1c] sm:$0xff]  ;;  %840 = vst [vmem:[%s3579_s19] sm:$0xff] %v839_v58  ;;  %844 = vst [vmem:[%s3579_s19 + $0x20] sm:$0xff] %v843_v60  ;;  %v845_v61 = vld [vmem:[%s3583_s21 + $0x54] sm:$0xff]  ;;  %p940_p9 = scmp.ge.s32.totalorder %s939_s14, %s4395_s30  ;;  %p832_p10 = scmp.ge.s32.totalorder %s833_s23, %s4395_s30 }
  0xc9   : >> { %842 = vst [vmem:[%s3579_s19 + $0x10] sm:$0xff] %v841_v59  ;;  %v849_v63 = vld [vmem:[%s3583_s21 + $0x8c] sm:$0xff]  ;;  %846 = vst [vmem:[%s3579_s19 + $0x30] sm:$0xff] %v845_v61  ;;  %v853_v1 = vld [vmem:[%s3583_s21 + $0xc4] sm:$0xff] }
  0xca   : >> { %848 = vst [vmem:[%s3579_s19 + $0x40] sm:$0xff] %v847_v62  ;;  %850 = vst [vmem:[%s3579_s19 + $0x50] sm:$0xff] %v849_v63  ;;  %v851_v0 = vld [vmem:[%s3583_s21 + $0xa8] sm:$0xff]  ;;  %v855_v2 = vld [vmem:[%s3583_s21 + $0xe0] sm:$0xff]  ;;  %s5668_s14 = smov (%p940_p9, %s939_s14), 0 }
  0xcb   : >> { %852 = vst [vmem:[%s3579_s19 + $0x60] sm:$0xff] %v851_v0  ;;  %854 = vst [vmem:[%s3579_s19 + $0x70] sm:$0xff] %v853_v1  ;;  %v857_v3 = vld [vmem:[%s3583_s21 + $0xfc] sm:$0xff]  ;;  %v861_v5 = vld [vmem:[%s3583_s21 + $0x134] sm:$0xff]  ;;  %s2753_s20 = sshll.u32 %s5668_s14, 3  ;;  %s5642_s22 = smov %s5668_s14 }
  0xcc   : >> { %856 = vst [vmem:[%s3579_s19 + $0x80] sm:$0xff] %v855_v2  ;;  %v859_v4 = vld [vmem:[%s3583_s21 + $0x118] sm:$0xff]  ;;  %858 = vst [vmem:[%s3579_s19 + $0x90] sm:$0xff] %v857_v3  ;;  %v863_v6 = vld [vmem:[%s3583_s21 + $0x150] sm:$0xff]  ;;  %s4469_s24 = scalar_lea.vmem %s4399_s7, %s2753_s20   ;;  %s4472_s26 = scalar_lea.vmem %s4402_s8, %s2753_s20 [#allocation2]  }
  0xcd   : >> { %860 = vst [vmem:[%s3579_s19 + $0xa0] sm:$0xff] %v859_v4  ;;  %862 = vst [vmem:[%s3579_s19 + $0xb0] sm:$0xff] %v861_v5  ;;  %v865_v7 = vld [vmem:[%s3583_s21 + $0x16c] sm:$0xff]  ;;  %v869_v9 = vld [vmem:[%s3583_s21 + $0x1a4] sm:$0xff] }
  0xce   : >> { %v867_v8 = vld [vmem:[%s3583_s21 + $0x188] sm:$0xff]  ;;  %864 = vst [vmem:[%s3579_s19 + $0xc0] sm:$0xff] %v863_v6  ;;  %866 = vst [vmem:[%s3579_s19 + $0xd0] sm:$0xff] %v865_v7  ;;  %v871_v10 = vld [vmem:[%s3583_s21 + $0x1c0] sm:$0xff] }
  0xcf   : >> { %868 = vst [vmem:[%s3579_s19 + $0xe0] sm:$0xff] %v867_v8  ;;  %v873_v11 = vld [vmem:[%s3583_s21 + $0x1dc] sm:$0xff]  ;;  %870 = vst [vmem:[%s3579_s19 + $0xf0] sm:$0xff] %v869_v9  ;;  %v877_v13 = vld [vmem:[%s3583_s21 + $0x214] sm:$0xff] }
  0xd0   : >> { %872 = vst [vmem:[%s3579_s19 + $0x100] sm:$0xff] %v871_v10  ;;  %874 = vst [vmem:[%s3579_s19 + $0x110] sm:$0xff] %v873_v11  ;;  %v875_v12 = vld [vmem:[%s3583_s21 + $0x1f8] sm:$0xff]  ;;  %v879_v14 = vld [vmem:[%s3583_s21 + $0x230] sm:$0xff] }
  0xd1   : >> { %876 = vst [vmem:[%s3579_s19 + $0x120] sm:$0xff] %v875_v12  ;;  %878 = vst [vmem:[%s3579_s19 + $0x130] sm:$0xff] %v877_v13  ;;  %v881_v15 = vld [vmem:[%s3583_s21 + $0x24c] sm:$0xff]  ;;  %v885_v17 = vld [vmem:[%s3583_s21 + $0x284] sm:$0xff] }
  0xd2   : >> { %880 = vst [vmem:[%s3579_s19 + $0x140] sm:$0xff] %v879_v14  ;;  %v883_v16 = vld [vmem:[%s3583_s21 + $0x268] sm:$0xff]  ;;  %882 = vst [vmem:[%s3579_s19 + $0x150] sm:$0xff] %v881_v15  ;;  %v887_v18 = vld [vmem:[%s3583_s21 + $0x2a0] sm:$0xff] }
  0xd3   : >> { %884 = vst [vmem:[%s3579_s19 + $0x160] sm:$0xff] %v883_v16  ;;  %886 = vst [vmem:[%s3579_s19 + $0x170] sm:$0xff] %v885_v17  ;;  %v889_v19 = vld [vmem:[%s3583_s21 + $0x2bc] sm:$0xff]  ;;  %v893_v21 = vld [vmem:[%s3583_s21 + $0x2f4] sm:$0xff] }
  0xd4   : >> { %v891_v20 = vld [vmem:[%s3583_s21 + $0x2d8] sm:$0xff]  ;;  %888 = vst [vmem:[%s3579_s19 + $0x180] sm:$0xff] %v887_v18  ;;  %890 = vst [vmem:[%s3579_s19 + $0x190] sm:$0xff] %v889_v19  ;;  %v895_v22 = vld [vmem:[%s3583_s21 + $0x310] sm:$0xff] }
  0xd5   : >> { %892 = vst [vmem:[%s3579_s19 + $0x1a0] sm:$0xff] %v891_v20  ;;  %v897_v23 = vld [vmem:[%s3583_s21 + $0x32c] sm:$0xff]  ;;  %894 = vst [vmem:[%s3579_s19 + $0x1b0] sm:$0xff] %v893_v21  ;;  %v901_v25 = vld [vmem:[%s3583_s21 + $0x364] sm:$0xff] }
  0xd6   : >> { %896 = vst [vmem:[%s3579_s19 + $0x1c0] sm:$0xff] %v895_v22  ;;  %898 = vst [vmem:[%s3579_s19 + $0x1d0] sm:$0xff] %v897_v23  ;;  %v899_v24 = vld [vmem:[%s3583_s21 + $0x348] sm:$0xff]  ;;  %v903_v26 = vld [vmem:[%s3583_s21 + $0x380] sm:$0xff] }
  0xd7   : >> { %900 = vst [vmem:[%s3579_s19 + $0x1e0] sm:$0xff] %v899_v24  ;;  %902 = vst [vmem:[%s3579_s19 + $0x1f0] sm:$0xff] %v901_v25  ;;  %v905_v27 = vld [vmem:[%s3583_s21 + $0x39c] sm:$0xff]  ;;  %v909_v29 = vld [vmem:[%s3583_s21 + $0x3d4] sm:$0xff] }
  0xd8   : >> { %904 = vst [vmem:[%s3579_s19 + $0x200] sm:$0xff] %v903_v26  ;;  %v907_v28 = vld [vmem:[%s3583_s21 + $0x3b8] sm:$0xff]  ;;  %906 = vst [vmem:[%s3579_s19 + $0x210] sm:$0xff] %v905_v27  ;;  %v911_v30 = vld [vmem:[%s3583_s21 + $0x3f0] sm:$0xff] }
  0xd9   : >> { %908 = vst [vmem:[%s3579_s19 + $0x220] sm:$0xff] %v907_v28  ;;  %910 = vst [vmem:[%s3579_s19 + $0x230] sm:$0xff] %v909_v29  ;;  %v913_v31 = vld [vmem:[%s3583_s21 + $0x40c] sm:$0xff]  ;;  %v917_v33 = vld [vmem:[%s3583_s21 + $0x444] sm:$0xff] }
  0xda   : >> { %v915_v32 = vld [vmem:[%s3583_s21 + $0x428] sm:$0xff]  ;;  %912 = vst [vmem:[%s3579_s19 + $0x240] sm:$0xff] %v911_v30  ;;  %914 = vst [vmem:[%s3579_s19 + $0x250] sm:$0xff] %v913_v31  ;;  %v919_v34 = vld [vmem:[%s3583_s21 + $0x460] sm:$0xff] }
  0xdb   : >> { %916 = vst [vmem:[%s3579_s19 + $0x260] sm:$0xff] %v915_v32  ;;  %v921_v35 = vld [vmem:[%s3583_s21 + $0x47c] sm:$0xff]  ;;  %918 = vst [vmem:[%s3579_s19 + $0x270] sm:$0xff] %v917_v33  ;;  %v925_v37 = vld [vmem:[%s3583_s21 + $0x4b4] sm:$0xff] }
  0xdc   : >> { %920 = vst [vmem:[%s3579_s19 + $0x280] sm:$0xff] %v919_v34  ;;  %922 = vst [vmem:[%s3579_s19 + $0x290] sm:$0xff] %v921_v35  ;;  %v923_v36 = vld [vmem:[%s3583_s21 + $0x498] sm:$0xff]  ;;  %v927_v38 = vld [vmem:[%s3583_s21 + $0x4d0] sm:$0xff]  ;;  %835 = sbr.rel (!%p832_p10) target bundleno = 199 (0xc7), region = 264 }
  0xdd   : >> { %924 = vst [vmem:[%s3579_s19 + $0x2a0] sm:$0xff] %v923_v36  ;;  %926 = vst [vmem:[%s3579_s19 + $0x2b0] sm:$0xff] %v925_v37  ;;  %v929_v39 = vld [vmem:[%s3583_s21 + $0x4ec] sm:$0xff]  ;;  %v933_v41 = vld [vmem:[%s3583_s21 + $0x524] sm:$0xff] }
  0xde   : >> { %928 = vst [vmem:[%s3579_s19 + $0x2c0] sm:$0xff] %v927_v38  ;;  %v931_v40 = vld [vmem:[%s3583_s21 + $0x508] sm:$0xff]  ;;  %930 = vst [vmem:[%s3579_s19 + $0x2d0] sm:$0xff] %v929_v39  ;;  %v935_v42 = vld [vmem:[%s3583_s21 + $0x540] sm:$0xff] }
  0xdf   : >> { %932 = vst [vmem:[%s3579_s19 + $0x2e0] sm:$0xff] %v931_v40  ;;  %934 = vst [vmem:[%s3579_s19 + $0x2f0] sm:$0xff] %v933_v41  ;;  %v937_v43 = vld [vmem:[%s3583_s21 + $0x55c] sm:$0xff]  ;;  %s5641_s21 = smov %s4469_s24 }
  0xe0   : >> { %936 = vst [vmem:[%s3579_s19 + $0x300] sm:$0xff] %v935_v42  ;;  %938 = vst [vmem:[%s3579_s19 + $0x310] sm:$0xff] %v937_v43  ;;  %s5640_s19 = smov %s4472_s26 }
  0xe1 PF: > { %s3657_s4 = smov 1  }
  0xe2   : > { %s946_s5 = sshll.u32 %s3657_s4, %s3726_s29 }
  0xe3   : > { %s4549_s3 = sadd.s32 4294967295, %s946_s5 }
  0xe4   : > { %v956_v44 = vld [vmem:[%s4140_s15] sm:%s4549_s3]  ;;  %v960_v46 = vld [vmem:[%s4140_s15 + $0x38] sm:%s4549_s3] }
  0xe5   : > { %v958_v45 = vld [vmem:[%s4140_s15 + $0x1c] sm:%s4549_s3]  ;;  %957 = vst [vmem:[%s4143_s18] sm:%s4549_s3] %v956_v44 }
  0xe6   : > { %959 = vst [vmem:[%s4143_s18 + $0x10] sm:%s4549_s3] %v958_v45  ;;  %v962_v47 = vld [vmem:[%s4140_s15 + $0x54] sm:%s4549_s3] }
  0xe7   : > { %961 = vst [vmem:[%s4143_s18 + $0x20] sm:%s4549_s3] %v960_v46  ;;  %963 = vst [vmem:[%s4143_s18 + $0x30] sm:%s4549_s3] %v962_v47 }
  0xe8   : > { %v964_v48 = vld [vmem:[%s4140_s15 + $0x70] sm:%s4549_s3]  ;;  %v968_v50 = vld [vmem:[%s4140_s15 + $0xa8] sm:%s4549_s3] }
  0xe9   : > { %v966_v49 = vld [vmem:[%s4140_s15 + $0x8c] sm:%s4549_s3]  ;;  %965 = vst [vmem:[%s4143_s18 + $0x40] sm:%s4549_s3] %v964_v48 }
  0xea   : > { %967 = vst [vmem:[%s4143_s18 + $0x50] sm:%s4549_s3] %v966_v49  ;;  %v970_v51 = vld [vmem:[%s4140_s15 + $0xc4] sm:%s4549_s3] }
  0xeb   : > { %969 = vst [vmem:[%s4143_s18 + $0x60] sm:%s4549_s3] %v968_v50  ;;  %971 = vst [vmem:[%s4143_s18 + $0x70] sm:%s4549_s3] %v970_v51 }
  0xec   : > { %v972_v52 = vld [vmem:[%s4140_s15 + $0xe0] sm:%s4549_s3]  ;;  %v976_v54 = vld [vmem:[%s4140_s15 + $0x118] sm:%s4549_s3] }
  0xed   : > { %v974_v53 = vld [vmem:[%s4140_s15 + $0xfc] sm:%s4549_s3]  ;;  %973 = vst [vmem:[%s4143_s18 + $0x80] sm:%s4549_s3] %v972_v52 }
  0xee   : > { %975 = vst [vmem:[%s4143_s18 + $0x90] sm:%s4549_s3] %v974_v53  ;;  %v978_v55 = vld [vmem:[%s4140_s15 + $0x134] sm:%s4549_s3] }
  0xef   : > { %977 = vst [vmem:[%s4143_s18 + $0xa0] sm:%s4549_s3] %v976_v54  ;;  %979 = vst [vmem:[%s4143_s18 + $0xb0] sm:%s4549_s3] %v978_v55 }
  0xf0   : > { %v980_v56 = vld [vmem:[%s4140_s15 + $0x150] sm:%s4549_s3]  ;;  %v984_v58 = vld [vmem:[%s4140_s15 + $0x188] sm:%s4549_s3] }
  0xf1   : > { %v982_v57 = vld [vmem:[%s4140_s15 + $0x16c] sm:%s4549_s3]  ;;  %981 = vst [vmem:[%s4143_s18 + $0xc0] sm:%s4549_s3] %v980_v56 }
  0xf2   : > { %983 = vst [vmem:[%s4143_s18 + $0xd0] sm:%s4549_s3] %v982_v57  ;;  %v986_v59 = vld [vmem:[%s4140_s15 + $0x1a4] sm:%s4549_s3] }
  0xf3   : > { %985 = vst [vmem:[%s4143_s18 + $0xe0] sm:%s4549_s3] %v984_v58  ;;  %987 = vst [vmem:[%s4143_s18 + $0xf0] sm:%s4549_s3] %v986_v59 }
  0xf4   : > { %v988_v60 = vld [vmem:[%s4140_s15 + $0x1c0] sm:%s4549_s3]  ;;  %v992_v62 = vld [vmem:[%s4140_s15 + $0x1f8] sm:%s4549_s3] }
  0xf5   : > { %v990_v61 = vld [vmem:[%s4140_s15 + $0x1dc] sm:%s4549_s3]  ;;  %989 = vst [vmem:[%s4143_s18 + $0x100] sm:%s4549_s3] %v988_v60 }
  0xf6   : > { %991 = vst [vmem:[%s4143_s18 + $0x110] sm:%s4549_s3] %v990_v61  ;;  %v994_v63 = vld [vmem:[%s4140_s15 + $0x214] sm:%s4549_s3] }
  0xf7   : > { %993 = vst [vmem:[%s4143_s18 + $0x120] sm:%s4549_s3] %v992_v62  ;;  %995 = vst [vmem:[%s4143_s18 + $0x130] sm:%s4549_s3] %v994_v63 }
  0xf8   : > { %v996_v0 = vld [vmem:[%s4140_s15 + $0x230] sm:%s4549_s3]  ;;  %v1000_v2 = vld [vmem:[%s4140_s15 + $0x268] sm:%s4549_s3] }
  0xf9   : > { %v998_v1 = vld [vmem:[%s4140_s15 + $0x24c] sm:%s4549_s3]  ;;  %997 = vst [vmem:[%s4143_s18 + $0x140] sm:%s4549_s3] %v996_v0 }
  0xfa   : > { %999 = vst [vmem:[%s4143_s18 + $0x150] sm:%s4549_s3] %v998_v1  ;;  %v1002_v3 = vld [vmem:[%s4140_s15 + $0x284] sm:%s4549_s3] }
  0xfb   : > { %1001 = vst [vmem:[%s4143_s18 + $0x160] sm:%s4549_s3] %v1000_v2  ;;  %1003 = vst [vmem:[%s4143_s18 + $0x170] sm:%s4549_s3] %v1002_v3 }
  0xfc   : > { %v1004_v4 = vld [vmem:[%s4140_s15 + $0x2a0] sm:%s4549_s3]  ;;  %v1008_v6 = vld [vmem:[%s4140_s15 + $0x2d8] sm:%s4549_s3] }
  0xfd   : > { %v1006_v5 = vld [vmem:[%s4140_s15 + $0x2bc] sm:%s4549_s3]  ;;  %1005 = vst [vmem:[%s4143_s18 + $0x180] sm:%s4549_s3] %v1004_v4 }
  0xfe   : > { %1007 = vst [vmem:[%s4143_s18 + $0x190] sm:%s4549_s3] %v1006_v5  ;;  %v1010_v7 = vld [vmem:[%s4140_s15 + $0x2f4] sm:%s4549_s3] }
  0xff   : > { %1009 = vst [vmem:[%s4143_s18 + $0x1a0] sm:%s4549_s3] %v1008_v6  ;;  %1011 = vst [vmem:[%s4143_s18 + $0x1b0] sm:%s4549_s3] %v1010_v7 }
 0x100   : > { %v1012_v8 = vld [vmem:[%s4140_s15 + $0x310] sm:%s4549_s3]  ;;  %v1016_v10 = vld [vmem:[%s4140_s15 + $0x348] sm:%s4549_s3] }
 0x101   : > { %v1014_v9 = vld [vmem:[%s4140_s15 + $0x32c] sm:%s4549_s3]  ;;  %1013 = vst [vmem:[%s4143_s18 + $0x1c0] sm:%s4549_s3] %v1012_v8 }
 0x102   : > { %1015 = vst [vmem:[%s4143_s18 + $0x1d0] sm:%s4549_s3] %v1014_v9  ;;  %v1018_v11 = vld [vmem:[%s4140_s15 + $0x364] sm:%s4549_s3] }
 0x103   : > { %1017 = vst [vmem:[%s4143_s18 + $0x1e0] sm:%s4549_s3] %v1016_v10  ;;  %1019 = vst [vmem:[%s4143_s18 + $0x1f0] sm:%s4549_s3] %v1018_v11 }
 0x104   : > { %v1020_v12 = vld [vmem:[%s4140_s15 + $0x380] sm:%s4549_s3]  ;;  %v1024_v14 = vld [vmem:[%s4140_s15 + $0x3b8] sm:%s4549_s3] }
 0x105   : > { %v1022_v13 = vld [vmem:[%s4140_s15 + $0x39c] sm:%s4549_s3]  ;;  %1021 = vst [vmem:[%s4143_s18 + $0x200] sm:%s4549_s3] %v1020_v12 }
 0x106   : > { %1023 = vst [vmem:[%s4143_s18 + $0x210] sm:%s4549_s3] %v1022_v13  ;;  %v1026_v15 = vld [vmem:[%s4140_s15 + $0x3d4] sm:%s4549_s3] }
 0x107   : > { %1025 = vst [vmem:[%s4143_s18 + $0x220] sm:%s4549_s3] %v1024_v14  ;;  %1027 = vst [vmem:[%s4143_s18 + $0x230] sm:%s4549_s3] %v1026_v15 }
 0x108   : > { %v1028_v16 = vld [vmem:[%s4140_s15 + $0x3f0] sm:%s4549_s3]  ;;  %v1032_v18 = vld [vmem:[%s4140_s15 + $0x428] sm:%s4549_s3] }
 0x109   : > { %v1030_v17 = vld [vmem:[%s4140_s15 + $0x40c] sm:%s4549_s3]  ;;  %1029 = vst [vmem:[%s4143_s18 + $0x240] sm:%s4549_s3] %v1028_v16 }
 0x10a   : > { %1031 = vst [vmem:[%s4143_s18 + $0x250] sm:%s4549_s3] %v1030_v17  ;;  %v1034_v19 = vld [vmem:[%s4140_s15 + $0x444] sm:%s4549_s3] }
 0x10b   : > { %1033 = vst [vmem:[%s4143_s18 + $0x260] sm:%s4549_s3] %v1032_v18  ;;  %1035 = vst [vmem:[%s4143_s18 + $0x270] sm:%s4549_s3] %v1034_v19 }
 0x10c   : > { %v1036_v20 = vld [vmem:[%s4140_s15 + $0x460] sm:%s4549_s3]  ;;  %v1040_v22 = vld [vmem:[%s4140_s15 + $0x498] sm:%s4549_s3] }
 0x10d   : > { %v1038_v21 = vld [vmem:[%s4140_s15 + $0x47c] sm:%s4549_s3]  ;;  %1037 = vst [vmem:[%s4143_s18 + $0x280] sm:%s4549_s3] %v1036_v20 }
 0x10e   : > { %1039 = vst [vmem:[%s4143_s18 + $0x290] sm:%s4549_s3] %v1038_v21  ;;  %v1042_v23 = vld [vmem:[%s4140_s15 + $0x4b4] sm:%s4549_s3] }
 0x10f   : > { %1041 = vst [vmem:[%s4143_s18 + $0x2a0] sm:%s4549_s3] %v1040_v22  ;;  %1043 = vst [vmem:[%s4143_s18 + $0x2b0] sm:%s4549_s3] %v1042_v23 }
 0x110   : > { %v1044_v24 = vld [vmem:[%s4140_s15 + $0x4d0] sm:%s4549_s3]  ;;  %v1048_v26 = vld [vmem:[%s4140_s15 + $0x508] sm:%s4549_s3] }
 0x111   : > { %v1046_v25 = vld [vmem:[%s4140_s15 + $0x4ec] sm:%s4549_s3]  ;;  %1045 = vst [vmem:[%s4143_s18 + $0x2c0] sm:%s4549_s3] %v1044_v24 }
 0x112   : > { %1047 = vst [vmem:[%s4143_s18 + $0x2d0] sm:%s4549_s3] %v1046_v25  ;;  %v1050_v27 = vld [vmem:[%s4140_s15 + $0x524] sm:%s4549_s3] }
 0x113   : > { %1049 = vst [vmem:[%s4143_s18 + $0x2e0] sm:%s4549_s3] %v1048_v26  ;;  %1051 = vst [vmem:[%s4143_s18 + $0x2f0] sm:%s4549_s3] %v1050_v27 }
 0x114   : > { %v1052_v28 = vld [vmem:[%s4140_s15 + $0x540] sm:%s4549_s3] }
 0x115   : > { %v1054_v29 = vld [vmem:[%s4140_s15 + $0x55c] sm:%s4549_s3]  ;;  %1053 = vst [vmem:[%s4143_s18 + $0x300] sm:%s4549_s3] %v1052_v28 }
 0x116   : > { %1055 = vst [vmem:[%s4143_s18 + $0x310] sm:%s4549_s3] %v1054_v29 }
 0x117 PF: > { %p2756_p11 = scmp.ge.u32.totalorder %s3720_s27, 8 }
 0x118   : > { %s3658_s29 = smov (!%p2756_p11), 1  }
 0x119   : > { %128 = sbr.rel (%p2756_p11) target bundleno = 337 (0x151), region = 36  ;;  %s129_s15 = sshll.u32 (!%p2756_p11), %s3658_s29, %s3720_s27 }
 0x11a   : > { %s4753_s18 = sadd.s32 (!%p2756_p11), 4294967295, %s129_s15 }
 0x11e   : > { %v139_v30 = vld [vmem:[%s3718_s25] sm:%s4753_s18]  ;;  %v143_v32 = vld [vmem:[%s3718_s25 + $0x38] sm:%s4753_s18] }
 0x11f   : > { %v141_v31 = vld [vmem:[%s3718_s25 + $0x1c] sm:%s4753_s18]  ;;  %140 = vst [vmem:[%s3722_s28] sm:%s4753_s18] %v139_v30 }
 0x120   : > { %142 = vst [vmem:[%s3722_s28 + $0x10] sm:%s4753_s18] %v141_v31  ;;  %v145_v33 = vld [vmem:[%s3718_s25 + $0x54] sm:%s4753_s18] }
 0x121   : > { %144 = vst [vmem:[%s3722_s28 + $0x20] sm:%s4753_s18] %v143_v32  ;;  %146 = vst [vmem:[%s3722_s28 + $0x30] sm:%s4753_s18] %v145_v33 }
 0x122   : > { %v147_v34 = vld [vmem:[%s3718_s25 + $0x70] sm:%s4753_s18]  ;;  %v151_v36 = vld [vmem:[%s3718_s25 + $0xa8] sm:%s4753_s18] }
 0x123   : > { %v149_v35 = vld [vmem:[%s3718_s25 + $0x8c] sm:%s4753_s18]  ;;  %148 = vst [vmem:[%s3722_s28 + $0x40] sm:%s4753_s18] %v147_v34 }
 0x124   : > { %150 = vst [vmem:[%s3722_s28 + $0x50] sm:%s4753_s18] %v149_v35  ;;  %v153_v37 = vld [vmem:[%s3718_s25 + $0xc4] sm:%s4753_s18] }
 0x125   : > { %152 = vst [vmem:[%s3722_s28 + $0x60] sm:%s4753_s18] %v151_v36  ;;  %154 = vst [vmem:[%s3722_s28 + $0x70] sm:%s4753_s18] %v153_v37 }
 0x126   : > { %v155_v38 = vld [vmem:[%s3718_s25 + $0xe0] sm:%s4753_s18]  ;;  %v159_v40 = vld [vmem:[%s3718_s25 + $0x118] sm:%s4753_s18] }
 0x127   : > { %v157_v39 = vld [vmem:[%s3718_s25 + $0xfc] sm:%s4753_s18]  ;;  %156 = vst [vmem:[%s3722_s28 + $0x80] sm:%s4753_s18] %v155_v38 }
 0x128   : > { %158 = vst [vmem:[%s3722_s28 + $0x90] sm:%s4753_s18] %v157_v39  ;;  %v161_v41 = vld [vmem:[%s3718_s25 + $0x134] sm:%s4753_s18] }
 0x129   : > { %160 = vst [vmem:[%s3722_s28 + $0xa0] sm:%s4753_s18] %v159_v40  ;;  %162 = vst [vmem:[%s3722_s28 + $0xb0] sm:%s4753_s18] %v161_v41 }
 0x12a   : > { %v163_v42 = vld [vmem:[%s3718_s25 + $0x150] sm:%s4753_s18]  ;;  %v167_v44 = vld [vmem:[%s3718_s25 + $0x188] sm:%s4753_s18] }
 0x12b   : > { %v165_v43 = vld [vmem:[%s3718_s25 + $0x16c] sm:%s4753_s18]  ;;  %164 = vst [vmem:[%s3722_s28 + $0xc0] sm:%s4753_s18] %v163_v42 }
 0x12c   : > { %166 = vst [vmem:[%s3722_s28 + $0xd0] sm:%s4753_s18] %v165_v43  ;;  %v169_v45 = vld [vmem:[%s3718_s25 + $0x1a4] sm:%s4753_s18] }
 0x12d   : > { %168 = vst [vmem:[%s3722_s28 + $0xe0] sm:%s4753_s18] %v167_v44  ;;  %170 = vst [vmem:[%s3722_s28 + $0xf0] sm:%s4753_s18] %v169_v45 }
 0x12e   : > { %v171_v46 = vld [vmem:[%s3718_s25 + $0x1c0] sm:%s4753_s18]  ;;  %v175_v48 = vld [vmem:[%s3718_s25 + $0x1f8] sm:%s4753_s18] }
 0x12f   : > { %v173_v47 = vld [vmem:[%s3718_s25 + $0x1dc] sm:%s4753_s18]  ;;  %172 = vst [vmem:[%s3722_s28 + $0x100] sm:%s4753_s18] %v171_v46 }
 0x130   : > { %174 = vst [vmem:[%s3722_s28 + $0x110] sm:%s4753_s18] %v173_v47  ;;  %v177_v49 = vld [vmem:[%s3718_s25 + $0x214] sm:%s4753_s18] }
 0x131   : > { %176 = vst [vmem:[%s3722_s28 + $0x120] sm:%s4753_s18] %v175_v48  ;;  %178 = vst [vmem:[%s3722_s28 + $0x130] sm:%s4753_s18] %v177_v49 }
 0x132   : > { %v179_v50 = vld [vmem:[%s3718_s25 + $0x230] sm:%s4753_s18]  ;;  %v183_v52 = vld [vmem:[%s3718_s25 + $0x268] sm:%s4753_s18] }
 0x133   : > { %v181_v51 = vld [vmem:[%s3718_s25 + $0x24c] sm:%s4753_s18]  ;;  %180 = vst [vmem:[%s3722_s28 + $0x140] sm:%s4753_s18] %v179_v50 }
 0x134   : > { %182 = vst [vmem:[%s3722_s28 + $0x150] sm:%s4753_s18] %v181_v51  ;;  %v185_v53 = vld [vmem:[%s3718_s25 + $0x284] sm:%s4753_s18] }
 0x135   : > { %184 = vst [vmem:[%s3722_s28 + $0x160] sm:%s4753_s18] %v183_v52  ;;  %186 = vst [vmem:[%s3722_s28 + $0x170] sm:%s4753_s18] %v185_v53 }
 0x136   : > { %v187_v54 = vld [vmem:[%s3718_s25 + $0x2a0] sm:%s4753_s18]  ;;  %v191_v56 = vld [vmem:[%s3718_s25 + $0x2d8] sm:%s4753_s18] }
 0x137   : > { %v189_v55 = vld [vmem:[%s3718_s25 + $0x2bc] sm:%s4753_s18]  ;;  %188 = vst [vmem:[%s3722_s28 + $0x180] sm:%s4753_s18] %v187_v54 }
 0x138   : > { %190 = vst [vmem:[%s3722_s28 + $0x190] sm:%s4753_s18] %v189_v55  ;;  %v193_v57 = vld [vmem:[%s3718_s25 + $0x2f4] sm:%s4753_s18] }
 0x139   : > { %192 = vst [vmem:[%s3722_s28 + $0x1a0] sm:%s4753_s18] %v191_v56  ;;  %194 = vst [vmem:[%s3722_s28 + $0x1b0] sm:%s4753_s18] %v193_v57 }
 0x13a   : > { %v195_v58 = vld [vmem:[%s3718_s25 + $0x310] sm:%s4753_s18]  ;;  %v199_v60 = vld [vmem:[%s3718_s25 + $0x348] sm:%s4753_s18] }
 0x13b   : > { %v197_v59 = vld [vmem:[%s3718_s25 + $0x32c] sm:%s4753_s18]  ;;  %196 = vst [vmem:[%s3722_s28 + $0x1c0] sm:%s4753_s18] %v195_v58 }
 0x13c   : > { %198 = vst [vmem:[%s3722_s28 + $0x1d0] sm:%s4753_s18] %v197_v59  ;;  %v201_v61 = vld [vmem:[%s3718_s25 + $0x364] sm:%s4753_s18] }
 0x13d   : > { %200 = vst [vmem:[%s3722_s28 + $0x1e0] sm:%s4753_s18] %v199_v60  ;;  %202 = vst [vmem:[%s3722_s28 + $0x1f0] sm:%s4753_s18] %v201_v61 }
 0x13e   : > { %v203_v62 = vld [vmem:[%s3718_s25 + $0x380] sm:%s4753_s18]  ;;  %v207_v0 = vld [vmem:[%s3718_s25 + $0x3b8] sm:%s4753_s18] }
 0x13f   : > { %v205_v63 = vld [vmem:[%s3718_s25 + $0x39c] sm:%s4753_s18]  ;;  %204 = vst [vmem:[%s3722_s28 + $0x200] sm:%s4753_s18] %v203_v62 }
 0x140   : > { %206 = vst [vmem:[%s3722_s28 + $0x210] sm:%s4753_s18] %v205_v63  ;;  %v209_v1 = vld [vmem:[%s3718_s25 + $0x3d4] sm:%s4753_s18] }
 0x141   : > { %208 = vst [vmem:[%s3722_s28 + $0x220] sm:%s4753_s18] %v207_v0  ;;  %210 = vst [vmem:[%s3722_s28 + $0x230] sm:%s4753_s18] %v209_v1 }
 0x142   : > { %v211_v2 = vld [vmem:[%s3718_s25 + $0x3f0] sm:%s4753_s18]  ;;  %v215_v4 = vld [vmem:[%s3718_s25 + $0x428] sm:%s4753_s18] }
 0x143   : > { %v213_v3 = vld [vmem:[%s3718_s25 + $0x40c] sm:%s4753_s18]  ;;  %212 = vst [vmem:[%s3722_s28 + $0x240] sm:%s4753_s18] %v211_v2 }
 0x144   : > { %214 = vst [vmem:[%s3722_s28 + $0x250] sm:%s4753_s18] %v213_v3  ;;  %v217_v5 = vld [vmem:[%s3718_s25 + $0x444] sm:%s4753_s18] }
 0x145   : > { %216 = vst [vmem:[%s3722_s28 + $0x260] sm:%s4753_s18] %v215_v4  ;;  %218 = vst [vmem:[%s3722_s28 + $0x270] sm:%s4753_s18] %v217_v5 }
 0x146   : > { %v219_v6 = vld [vmem:[%s3718_s25 + $0x460] sm:%s4753_s18]  ;;  %v223_v8 = vld [vmem:[%s3718_s25 + $0x498] sm:%s4753_s18] }
 0x147   : > { %v221_v7 = vld [vmem:[%s3718_s25 + $0x47c] sm:%s4753_s18]  ;;  %220 = vst [vmem:[%s3722_s28 + $0x280] sm:%s4753_s18] %v219_v6 }
 0x148   : > { %222 = vst [vmem:[%s3722_s28 + $0x290] sm:%s4753_s18] %v221_v7  ;;  %v225_v9 = vld [vmem:[%s3718_s25 + $0x4b4] sm:%s4753_s18] }
 0x149   : > { %224 = vst [vmem:[%s3722_s28 + $0x2a0] sm:%s4753_s18] %v223_v8  ;;  %226 = vst [vmem:[%s3722_s28 + $0x2b0] sm:%s4753_s18] %v225_v9 }
 0x14a   : > { %v227_v10 = vld [vmem:[%s3718_s25 + $0x4d0] sm:%s4753_s18]  ;;  %v231_v12 = vld [vmem:[%s3718_s25 + $0x508] sm:%s4753_s18] }
 0x14b   : > { %v229_v11 = vld [vmem:[%s3718_s25 + $0x4ec] sm:%s4753_s18]  ;;  %228 = vst [vmem:[%s3722_s28 + $0x2c0] sm:%s4753_s18] %v227_v10 }
 0x14c   : > { %230 = vst [vmem:[%s3722_s28 + $0x2d0] sm:%s4753_s18] %v229_v11  ;;  %v233_v13 = vld [vmem:[%s3718_s25 + $0x524] sm:%s4753_s18] }
 0x14d   : > { %232 = vst [vmem:[%s3722_s28 + $0x2e0] sm:%s4753_s18] %v231_v12  ;;  %234 = vst [vmem:[%s3722_s28 + $0x2f0] sm:%s4753_s18] %v233_v13 }
 0x14e   : > { %v235_v14 = vld [vmem:[%s3718_s25 + $0x540] sm:%s4753_s18] }
 0x14f   : > { %v237_v15 = vld [vmem:[%s3718_s25 + $0x55c] sm:%s4753_s18]  ;;  %236 = vst [vmem:[%s3722_s28 + $0x300] sm:%s4753_s18] %v235_v14 }
 0x150   : > { %238 = vst [vmem:[%s3722_s28 + $0x310] sm:%s4753_s18] %v237_v15 }
 0x151 PF: > { %p2758_p12 = scmp.ge.s32.totalorder %s3527_s11, 1  ;;  %p1058_p13 = scmp.lt.s32.totalorder %s3527_s11, 3 }
 0x153   : > { %p1059_p0 = pnand %p2758_p12, %p1058_p13 }
 0x154   : > { %s1065_s27 = sand.u32 (!%p1059_p0), 1, %s3519_s9  }
 0x155   : > { %1062 = sbr.rel (%p1059_p0) target bundleno = 814 (0x32e), region = 90  ;;  %s2759_s29 = sshll.u32 (!%p1059_p0), %s1065_s27, 6 }
 0x156   : > { %s2930_s30 = smul.u32 (!%p1059_p0), 800, %s1065_s27  ;;  %s5124_s15 = scalar_lea.vmem (!%p1059_p0), [#allocation3], %s2759_s29  }
 0x158   : > { %s4972_s11 = scalar_lea.vmem (!%p1059_p0), [#allocation2], %s2930_s30 }
 0x15a   : > { %vm1742_vm0 = vcmask 130048   ;;  %v4963_v16 = vld [vmem:[%s5619_s0 + $0xc] ss:$16 sps:$4 sm:$0xff]   ;;  %v4968_v17 = vld [vmem:[%s5619_s0 + $0x4] ss:$16 sps:$4 sm:$0xff]   ;;  %s2881_s9 = sshll.u32 (%p3707_p5), %s3692_s12, 2 }
 0x15b   : > { %2868 = vmatprep.mubr.msk.bf16.mxu1 %vm1742_vm0, %v4963_v16  ;;  %v3215_v18 = vld [vmem:[%s4972_s11 + $0xe4] ss:$16 sps:$4 sm:$0xff]   ;;  %1781 = vmatprep.mubr.bf16.mxu0 %v4968_v17  ;;  %v3219_v20 = vld [vmem:[%s4972_s11 + $0xe0] ss:$16 sps:$4 sm:$0xff]   ;;  %v3276_v55 = vld [vmem:[%s4972_s11 + $0xec] ss:$16 sps:$4 sm:$0xff]  }
 0x15c   : > { %v3217_v19 = vld [vmem:[%s4972_s11 + $0x2e4] ss:$16 sps:$4 sm:$0xff]   ;;  %1749 = vmatprep.subr.bf16.mxu0 %v3215_v18  ;;  %v3220_v21 = vld [vmem:[%s4972_s11 + $0x2e0] ss:$16 sps:$4 sm:$0xff]   ;;  %v5016_v56 = vld [vmem:[%s5619_s0 + $0x8] ss:$16 sps:$4 sm:$0xff]  }
 0x15d   : > { %1802 = vmatprep.subr.bf16.mxu1 %v3217_v19  ;;  %v3221_v22 = vld [vmem:[%s4972_s11 + $0xc4] ss:$16 sps:$4 sm:$0xff]   ;;  %1750 = vmatpush1.bf16.msra.mxu0 %v3219_v20  ;;  %v3225_v24 = vld [vmem:[%s4972_s11 + $0xc0] ss:$16 sps:$4 sm:$0xff]   ;;  %v3274_v57 = vld [vmem:[%s4972_s11 + $0xe8] ss:$16 sps:$4 sm:$0xff]  }
 0x15e   : > { %1803 = vmatpush1.bf16.msra.mxu1 %v3220_v21  ;;  %v3223_v23 = vld [vmem:[%s4972_s11 + $0x2c4] ss:$16 sps:$4 sm:$0xff]   ;;  %1751 = vmatprep.subr.bf16.mxu0 %v3221_v22  ;;  %v3226_v25 = vld [vmem:[%s4972_s11 + $0x2c0] ss:$16 sps:$4 sm:$0xff]   ;;  %v3282_v60 = vld [vmem:[%s4972_s11 + $0xcc] ss:$16 sps:$4 sm:$0xff]  }
 0x15f   : > { %1804 = vmatprep.subr.bf16.mxu1 %v3223_v23  ;;  %v3227_v26 = vld [vmem:[%s4972_s11 + $0xa4] ss:$16 sps:$4 sm:$0xff]   ;;  %v3231_v28 = vld [vmem:[%s4972_s11 + $0xa0] ss:$16 sps:$4 sm:$0xff]   ;;  %v3280_v61 = vld [vmem:[%s4972_s11 + $0xc8] ss:$16 sps:$4 sm:$0xff]  }
 0x160   : > { %v3229_v27 = vld [vmem:[%s4972_s11 + $0x2a4] ss:$16 sps:$4 sm:$0xff]   ;;  %v3232_v29 = vld [vmem:[%s4972_s11 + $0x2a0] ss:$16 sps:$4 sm:$0xff]   ;;  %v3288_v0 = vld [vmem:[%s4972_s11 + $0xac] ss:$16 sps:$4 sm:$0xff]  }
 0x161   : > { %1752 = vmatpush1.bf16.msra.mxu0 %v3225_v24  ;;  %v3233_v30 = vld [vmem:[%s4972_s11 + $0x84] ss:$16 sps:$4 sm:$0xff]   ;;  %v3237_v32 = vld [vmem:[%s4972_s11 + $0x80] ss:$16 sps:$4 sm:$0xff]   ;;  %v3286_v1 = vld [vmem:[%s4972_s11 + $0xa8] ss:$16 sps:$4 sm:$0xff]  }
 0x162   : > { %1805 = vmatpush1.bf16.msra.mxu1 %v3226_v25  ;;  %1753 = vmatprep.subr.bf16.mxu0 %v3227_v26  ;;  %v3235_v31 = vld [vmem:[%s4972_s11 + $0x284] ss:$16 sps:$4 sm:$0xff]   ;;  %v3238_v33 = vld [vmem:[%s4972_s11 + $0x280] ss:$16 sps:$4 sm:$0xff]   ;;  %v3294_v4 = vld [vmem:[%s4972_s11 + $0x8c] ss:$16 sps:$4 sm:$0xff]  }
 0x163   : > { %1806 = vmatprep.subr.bf16.mxu1 %v3229_v27  ;;  %v3239_v34 = vld [vmem:[%s4972_s11 + $0x64] ss:$16 sps:$4 sm:$0xff]   ;;  %v3243_v36 = vld [vmem:[%s4972_s11 + $0x60] ss:$16 sps:$4 sm:$0xff]   ;;  %v3292_v5 = vld [vmem:[%s4972_s11 + $0x88] ss:$16 sps:$4 sm:$0xff]  }
 0x164   : > { %v3241_v35 = vld [vmem:[%s4972_s11 + $0x264] ss:$16 sps:$4 sm:$0xff]   ;;  %v3244_v37 = vld [vmem:[%s4972_s11 + $0x260] ss:$16 sps:$4 sm:$0xff]   ;;  %v3300_v8 = vld [vmem:[%s4972_s11 + $0x6c] ss:$16 sps:$4 sm:$0xff]  }
 0x165   : > { %1754 = vmatpush1.bf16.msra.mxu0 %v3231_v28  ;;  %v3245_v38 = vld [vmem:[%s4972_s11 + $0x44] ss:$16 sps:$4 sm:$0xff]   ;;  %v3249_v40 = vld [vmem:[%s4972_s11 + $0x40] ss:$16 sps:$4 sm:$0xff]   ;;  %v3298_v9 = vld [vmem:[%s4972_s11 + $0x68] ss:$16 sps:$4 sm:$0xff]  }
 0x166   : > { %1807 = vmatpush1.bf16.msra.mxu1 %v3232_v29  ;;  %1755 = vmatprep.subr.bf16.mxu0 %v3233_v30  ;;  %v3247_v39 = vld [vmem:[%s4972_s11 + $0x244] ss:$16 sps:$4 sm:$0xff]   ;;  %v3250_v41 = vld [vmem:[%s4972_s11 + $0x240] ss:$16 sps:$4 sm:$0xff]   ;;  %v3306_v12 = vld [vmem:[%s4972_s11 + $0x4c] ss:$16 sps:$4 sm:$0xff]  }
 0x167   : > { %1808 = vmatprep.subr.bf16.mxu1 %v3235_v31  ;;  %v3251_v42 = vld [vmem:[%s4972_s11 + $0x24] ss:$16 sps:$4 sm:$0xff]   ;;  %v3255_v44 = vld [vmem:[%s4972_s11 + $0x20] ss:$16 sps:$4 sm:$0xff]   ;;  %v3304_v13 = vld [vmem:[%s4972_s11 + $0x48] ss:$16 sps:$4 sm:$0xff]  }
 0x168   : > { %v3253_v43 = vld [vmem:[%s4972_s11 + $0x224] ss:$16 sps:$4 sm:$0xff]   ;;  %v3256_v45 = vld [vmem:[%s4972_s11 + $0x220] ss:$16 sps:$4 sm:$0xff]   ;;  %v3312_v18 = vld [vmem:[%s4972_s11 + $0x2c] ss:$16 sps:$4 sm:$0xff]  }
 0x169   : > { %1756 = vmatpush1.bf16.msra.mxu0 %v3237_v32  ;;  %v3257_v46 = vld [vmem:[%s4972_s11 + $0x4] ss:$16 sps:$4 sm:$0xff]   ;;  %v3261_v48 = vld [vmem:[%s4972_s11] ss:$16 sps:$4 sm:$0xff]   ;;  %v5046_v19 = vld [vmem:[%s5619_s0 + $0x2c] ss:$16 sps:$4 sm:$0xff]  }
 0x16a   : > { %1809 = vmatpush1.bf16.msra.mxu1 %v3238_v33  ;;  %1757 = vmatprep.subr.bf16.mxu0 %v3239_v34  ;;  %v3259_v47 = vld [vmem:[%s4972_s11 + $0x204] ss:$16 sps:$4 sm:$0xff]   ;;  %v3262_v49 = vld [vmem:[%s4972_s11 + $0x200] ss:$16 sps:$4 sm:$0xff]   ;;  %v5051_v20 = vld [vmem:[%s5619_s0 + $0x28] ss:$16 sps:$4 sm:$0xff]  }
 0x16b   : > { %1810 = vmatprep.subr.bf16.mxu1 %v3241_v35  ;;  %v3263_v50 = vld [vmem:[%s4972_s11 + $0x1e4] ss:$16 sps:$4 sm:$0xff]   ;;  %v3267_v52 = vld [vmem:[%s4972_s11 + $0x1e0] ss:$16 sps:$4 sm:$0xff]   ;;  %v3310_v21 = vld [vmem:[%s4972_s11 + $0x28] ss:$16 sps:$4 sm:$0xff]  }
 0x16c   : > { %v3265_v51 = vld [vmem:[%s4972_s11 + $0x304] ss:$16 sps:$4 sm:$0xff]   ;;  %v3268_v53 = vld [vmem:[%s4972_s11 + $0x300] ss:$16 sps:$4 sm:$0xff]   ;;  %v3319_v23 = vld [vmem:[%s4972_s11 + $0xc] ss:$16 sps:$4 sm:$0xff]  }
 0x16d   : > { %1758 = vmatpush1.bf16.msra.mxu0 %v3243_v36  ;;  %v3272_v54 = vld [vmem:[%s4972_s11 + $0x1c4] ss:$16 sps:$4 sm:$0xff]   ;;  %v3277_v58 = vld [vmem:[%s4972_s11 + $0x1c0] ss:$16 sps:$4 sm:$0xff]   ;;  %v3322_v24 = vld [vmem:[%s4972_s11 + $0x2ec] ss:$16 sps:$4 sm:$0xff]  }
 0x16e   : > { %1811 = vmatpush1.bf16.msra.mxu1 %v3244_v37  ;;  %1759 = vmatprep.subr.bf16.mxu0 %v3245_v38  ;;  %v3278_v59 = vld [vmem:[%s4972_s11 + $0x1a4] ss:$16 sps:$4 sm:$0xff]   ;;  %v3283_v62 = vld [vmem:[%s4972_s11 + $0x1a0] ss:$16 sps:$4 sm:$0xff]   ;;  %v3317_v26 = vld [vmem:[%s4972_s11 + $0x8] ss:$16 sps:$4 sm:$0xff]  }
 0x16f   : > { %1812 = vmatprep.subr.bf16.mxu1 %v3247_v39  ;;  %v3284_v63 = vld [vmem:[%s4972_s11 + $0x184] ss:$16 sps:$4 sm:$0xff]   ;;  %v3289_v2 = vld [vmem:[%s4972_s11 + $0x180] ss:$16 sps:$4 sm:$0xff]   ;;  %v3320_v27 = vld [vmem:[%s4972_s11 + $0x2e8] ss:$16 sps:$4 sm:$0xff]  }
 0x170   : > { %v3290_v3 = vld [vmem:[%s4972_s11 + $0x164] ss:$16 sps:$4 sm:$0xff]   ;;  %v3295_v6 = vld [vmem:[%s4972_s11 + $0x160] ss:$16 sps:$4 sm:$0xff]   ;;  %v3325_v28 = vld [vmem:[%s4972_s11 + $0x1ec] ss:$16 sps:$4 sm:$0xff]  }
 0x171   : > { %1760 = vmatpush1.bf16.msra.mxu0 %v3249_v40  ;;  %v3296_v7 = vld [vmem:[%s4972_s11 + $0x144] ss:$16 sps:$4 sm:$0xff]   ;;  %v3301_v10 = vld [vmem:[%s4972_s11 + $0x140] ss:$16 sps:$4 sm:$0xff]   ;;  %v3328_v29 = vld [vmem:[%s4972_s11 + $0x2cc] ss:$16 sps:$4 sm:$0xff]  }
 0x172   : > { %1813 = vmatpush1.bf16.msra.mxu1 %v3250_v41  ;;  %1761 = vmatprep.subr.bf16.mxu0 %v3251_v42  ;;  %v3302_v11 = vld [vmem:[%s4972_s11 + $0x124] ss:$16 sps:$4 sm:$0xff]   ;;  %v3307_v14 = vld [vmem:[%s4972_s11 + $0x120] ss:$16 sps:$4 sm:$0xff]   ;;  %v3326_v31 = vld [vmem:[%s4972_s11 + $0x2c8] ss:$16 sps:$4 sm:$0xff]  }
 0x173   : > { %1814 = vmatprep.subr.bf16.mxu1 %v3253_v43  ;;  %v3308_v15 = vld [vmem:[%s4972_s11 + $0x104] ss:$16 sps:$4 sm:$0xff]   ;;  %v3313_v22 = vld [vmem:[%s4972_s11 + $0x100] ss:$16 sps:$4 sm:$0xff]   ;;  %v3331_v32 = vld [vmem:[%s4972_s11 + $0x1cc] ss:$16 sps:$4 sm:$0xff]  }
 0x174   : > { %v5063_v25 = vld [vmem:[%s5619_s0] ss:$16 sps:$4 sm:$0xff]   ;;  %v5073_v30 = vld [vmem:[%s5619_s0 + $0x24] ss:$16 sps:$4 sm:$0xff]   ;;  %v3334_v33 = vld [vmem:[%s4972_s11 + $0x2ac] ss:$16 sps:$4 sm:$0xff]  }
 0x175   : > { %1762 = vmatpush1.bf16.msra.mxu0 %v3255_v44  ;;  %v5084_v34 = vld [vmem:[%s5619_s0 + $0x20] ss:$16 sps:$4 sm:$0xff]   ;;  %v3329_v35 = vld [vmem:[%s4972_s11 + $0x1c8] ss:$16 sps:$4 sm:$0xff]   ;;  %v3337_v37 = vld [vmem:[%s4972_s11 + $0x1ac] ss:$16 sps:$4 sm:$0xff]  }
 0x176   : > { %1815 = vmatpush1.bf16.msra.mxu1 %v3256_v45  ;;  %1763 = vmatprep.subr.bf16.mxu0 %v3257_v46  ;;  %v3332_v36 = vld [vmem:[%s4972_s11 + $0x2a8] ss:$16 sps:$4 sm:$0xff]   ;;  %v3340_v38 = vld [vmem:[%s4972_s11 + $0x28c] ss:$16 sps:$4 sm:$0xff]   ;;  %s2924_s18 = sshll.u32 (%p3707_p5), %s3692_s12, 4  ;;  %s2073_s27 = ssub.s32 (%p3707_p5), 7, %s2881_s9 }
 0x177   : > { %1816 = vmatprep.subr.bf16.mxu1 %v3259_v47  ;;  %v3335_v39 = vld [vmem:[%s4972_s11 + $0x1a8] ss:$16 sps:$4 sm:$0xff]   ;;  %v3343_v41 = vld [vmem:[%s4972_s11 + $0x18c] ss:$16 sps:$4 sm:$0xff]   ;;  %s5141_s25 = scalar_lea.vmem (%p3707_p5), %s5621_s2, %s2924_s18   ;;  %p2074_p1 = scmp.lt.s32.totalorder (%p3707_p5), %s2073_s27, 4 }
 0x178   : > { %v3338_v40 = vld [vmem:[%s4972_s11 + $0x288] ss:$16 sps:$4 sm:$0xff]   ;;  %v3346_v42 = vld [vmem:[%s4972_s11 + $0x26c] ss:$16 sps:$4 sm:$0xff]  }
 0x179   : > { %1764 = vmatpush1.bf16.msra.mxu0 %v3261_v48  ;;  %v3341_v43 = vld [vmem:[%s4972_s11 + $0x188] ss:$16 sps:$4 sm:$0xff]   ;;  %v3355_v45 = vld [vmem:[%s4972_s11 + $0x16c] ss:$16 sps:$4 sm:$0xff]  }
 0x17a   : > { %1817 = vmatpush1.bf16.msra.mxu1 %v3262_v49  ;;  %1765 = vmatprep.subr.bf16.mxu0 %v3263_v50  ;;  %v3344_v44 = vld [vmem:[%s4972_s11 + $0x268] ss:$16 sps:$4 sm:$0xff]   ;;  %v3358_v46 = vld [vmem:[%s4972_s11 + $0x24c] ss:$16 sps:$4 sm:$0xff]  }
 0x17b   : > { %1832 = vmatprep.subr.bf16.mxu1 %v3265_v51  ;;  %v3353_v47 = vld [vmem:[%s4972_s11 + $0x168] ss:$16 sps:$4 sm:$0xff]   ;;  %v3364_v49 = vld [vmem:[%s4972_s11 + $0x22c] ss:$16 sps:$4 sm:$0xff]  }
 0x17c   : > { %v3356_v48 = vld [vmem:[%s4972_s11 + $0x248] ss:$16 sps:$4 sm:$0xff]  }
 0x17d   : > { %1766 = vmatpush2.bf16.msra.mxu0 %v3267_v52  ;;  %v3359_v50 = vld [vmem:[%s4972_s11 + $0x148] ss:$16 sps:$4 sm:$0xff]   ;;  %v3367_v52 = vld [vmem:[%s4972_s11 + $0x12c] ss:$16 sps:$4 sm:$0xff]  }
 0x17e   : > { %1833 = vmatpush2.bf16.msra.mxu1 %v3268_v53  ;;  %1767 = vmatprep.subr.bf16.mxu0 %v3272_v54  ;;  %v3362_v51 = vld [vmem:[%s4972_s11 + $0x228] ss:$16 sps:$4 sm:$0xff]   ;;  %v3370_v53 = vld [vmem:[%s4972_s11 + $0x20c] ss:$16 sps:$4 sm:$0xff]  }
 0x17f   : > { %1855 = vmatprep.subr.bf16.mxu1 %v3276_v55  ;;  %v3365_v54 = vld [vmem:[%s4972_s11 + $0x128] ss:$16 sps:$4 sm:$0xff]  }
 0x180   : > { %v3368_v55 = vld [vmem:[%s4972_s11 + $0x208] ss:$16 sps:$4 sm:$0xff]  }
 0x181   : > { %1835 = vmatmul.mubr.bf16.vlgmr.msra.gmra.mxu1 %v5016_v56  ;;  %1768 = vmatpush2.bf16.msra.mxu0 %v3277_v58  ;;  %v3376_v58 = vld [vmem:[%s4972_s11 + $0x30c] ss:$16 sps:$4 sm:$0xff]  }
 0x182   : > { %1856 = vmatpush1.bf16.msra.mxu1 %v3274_v57  ;;  %1769 = vmatprep.subr.bf16.mxu0 %v3278_v59  ;;  %v3373_v57 = vld [vmem:[%s4972_s11 + $0x10c] ss:$16 sps:$4 sm:$0xff]   ;;  %v3371_v59 = vld [vmem:[%s4972_s11 + $0x108] ss:$16 sps:$4 sm:$0xff]  }
 0x183   : > { %1857 = vmatprep.subr.bf16.mxu1 %v3282_v60  ;;  %2869 = vmatprep.mubr.msk.bf16.mxu1 %vm1742_vm0, %v5046_v19  ;;  %v3374_v60 = vld [vmem:[%s4972_s11 + $0x308] ss:$16 sps:$4 sm:$0xff]  }
 0x185   : > { %1770 = vmatpush2.bf16.msra.mxu0 %v3283_v62 }
 0x186   : > { %1858 = vmatpush1.bf16.msra.mxu1 %v3280_v61  ;;  %1771 = vmatprep.subr.bf16.mxu0 %v3284_v63 }
 0x187   : > { %1859 = vmatprep.subr.bf16.mxu1 %v3288_v0 }
 0x189   : > { %1772 = vmatpush2.bf16.msra.mxu0 %v3289_v2  ;;  %1845 = vmatmul.mubr.bf16.gmra.mxu1 %v5051_v20 }
 0x18a   : > { %1860 = vmatpush1.bf16.msra.mxu1 %v3286_v1  ;;  %1773 = vmatprep.subr.bf16.mxu0 %v3290_v3 }
 0x18b   : > { %1861 = vmatprep.subr.bf16.mxu1 %v3294_v4  ;;  %1887 = vmatprep.mubr.bf16.mxu1 %v4968_v17  ;;  %v3323_v17 = vld [vmem:[%s4972_s11 + $0x1e8] ss:$16 sps:$4 sm:$0xff]  }
 0x18d   : > { %1774 = vmatpush2.bf16.msra.mxu0 %v3295_v6 }
 0x18e   : > { %1862 = vmatpush1.bf16.msra.mxu1 %v3292_v5  ;;  %1775 = vmatprep.subr.bf16.mxu0 %v3296_v7 }
 0x18f   : > { %1863 = vmatprep.subr.bf16.mxu1 %v3300_v8 }
 0x191   : > { %1776 = vmatpush2.bf16.msra.mxu0 %v3301_v10 }
 0x192   : > { %1864 = vmatpush1.bf16.msra.mxu1 %v3298_v9  ;;  %1777 = vmatprep.subr.bf16.mxu0 %v3302_v11 }
 0x193   : > { %1865 = vmatprep.subr.bf16.mxu1 %v3306_v12 }
 0x195   : > { %1778 = vmatpush2.bf16.msra.mxu0 %v3307_v14 }
 0x196   : > { %1866 = vmatpush1.bf16.msra.mxu1 %v3304_v13  ;;  %1779 = vmatprep.subr.bf16.mxu0 %v3308_v15 }
 0x197   : > { %1867 = vmatprep.subr.bf16.mxu1 %v3312_v18 }
 0x199   : > { %1780 = vmatpush2.bf16.msra.mxu0 %v3313_v22 }
 0x19a   : > { %1868 = vmatpush1.bf16.msra.mxu1 %v3310_v21  ;;  %1908 = vmatprep.subr.bf16.mxu0 %v3322_v24 }
 0x19b   : > { %1869 = vmatprep.subr.bf16.mxu1 %v3319_v23 }
 0x19c   : > { %1782 = vmatmul.mubr.bf16.vlgmr.msra.gmra.mxu0 %v5063_v25 }
 0x19d   : > { %1909 = vmatpush1.bf16.msra.mxu0 %v3320_v27  ;;  %1791 = vmatprep.mubr.bf16.mxu0 %v5073_v30 }
 0x19e   : > { %1870 = vmatpush1.bf16.msra.mxu1 %v3317_v26  ;;  %1910 = vmatprep.subr.bf16.mxu0 %v3328_v29 }
 0x19f   : > { %1871 = vmatprep.subr.bf16.mxu1 %v3325_v28 }
 0x1a1   : > { %1911 = vmatpush1.bf16.msra.mxu0 %v3326_v31 }
 0x1a2   : > { %1872 = vmatpush2.bf16.msra.mxu1 %v3323_v17  ;;  %1912 = vmatprep.subr.bf16.mxu0 %v3334_v33 }
 0x1a3   : > { %1873 = vmatprep.subr.bf16.mxu1 %v3331_v32 }
 0x1a4   : > { %1792 = vmatmul.mubr.bf16.gmra.mxu0 %v5084_v34 }
 0x1a5   : > { %1913 = vmatpush1.bf16.msra.mxu0 %v3332_v36  ;;  %2870 = vmatprep.mubr.msk.bf16.mxu0 %vm1742_vm0, %v4963_v16  ;;  %v3361_v16 = vld [vmem:[%s4972_s11 + $0x14c] ss:$16 sps:$4 sm:$0xff]  }
 0x1a6   : > { %1874 = vmatpush2.bf16.msra.mxu1 %v3329_v35  ;;  %1914 = vmatprep.subr.bf16.mxu0 %v3340_v38 }
 0x1a7   : > { %1875 = vmatprep.subr.bf16.mxu1 %v3337_v37 }
 0x1a9   : > { %1915 = vmatpush1.bf16.msra.mxu0 %v3338_v40 }
 0x1aa   : > { %1876 = vmatpush2.bf16.msra.mxu1 %v3335_v39  ;;  %1916 = vmatprep.subr.bf16.mxu0 %v3346_v42 }
 0x1ab   : > { %1877 = vmatprep.subr.bf16.mxu1 %v3343_v41 }
 0x1ad   : > { %1917 = vmatpush1.bf16.msra.mxu0 %v3344_v44 }
 0x1ae   : > { %1878 = vmatpush2.bf16.msra.mxu1 %v3341_v43  ;;  %1918 = vmatprep.subr.bf16.mxu0 %v3358_v46 }
 0x1af   : > { %1879 = vmatprep.subr.bf16.mxu1 %v3355_v45 }
 0x1b1   : > { %1919 = vmatpush1.bf16.msra.mxu0 %v3356_v48 }
 0x1b2   : > { %1880 = vmatpush2.bf16.msra.mxu1 %v3353_v47  ;;  %1920 = vmatprep.subr.bf16.mxu0 %v3364_v49 }
 0x1b3   : > { %1881 = vmatprep.subr.bf16.mxu1 %v3361_v16 }
 0x1b5   : > { %1921 = vmatpush1.bf16.msra.mxu0 %v3362_v51 }
 0x1b6   : > { %1882 = vmatpush2.bf16.msra.mxu1 %v3359_v50  ;;  %1922 = vmatprep.subr.bf16.mxu0 %v3370_v53 }
 0x1b7   : > { %1883 = vmatprep.subr.bf16.mxu1 %v3367_v52 }
 0x1b9   : > { %1923 = vmatpush1.bf16.msra.mxu0 %v3368_v55 }
 0x1ba   : > { %1884 = vmatpush2.bf16.msra.mxu1 %v3365_v54  ;;  %1938 = vmatprep.subr.bf16.mxu0 %v3376_v58 }
 0x1bb   : > { %1885 = vmatprep.subr.bf16.mxu1 %v3373_v57 }
 0x1bd   : > { %1939 = vmatpush2.bf16.msra.mxu0 %v3374_v60 }
 0x1be   : > { %1886 = vmatpush2.bf16.msra.mxu1 %v3371_v59 }
 0x1c0   : > { %1941 = vmatmul.mubr.bf16.vlgmr.msra.gmra.mxu0 %v5016_v56 }
 0x1c1   : > { %1888 = vmatmul.mubr.bf16.vlgmr.msra.gmra.mxu1 %v5063_v25  ;;  %2871 = vmatprep.mubr.msk.bf16.mxu0 %vm1742_vm0, %v5046_v19 }
 0x1c2   : > { %1897 = vmatprep.mubr.bf16.mxu1 %v5073_v30 }
 0x1c8   : > { %1951 = vmatmul.mubr.bf16.gmra.mxu0 %v5051_v20 }
 0x1c9   : > { %1898 = vmatmul.mubr.bf16.gmra.mxu1 %v5084_v34 }
 0x241   : > { %v1836_v61 = vpop.f32.mrf.mxu1 }
 0x243   : > { %v1838_v62 = vpop.f32.mrf.mxu1 }
 0x245   : > { %v1840_v63 = vpop.f32.mrf.mxu1 }
 0x247   : > { %v1842_v0 = vpop.f32.mrf.mxu1 }
 0x249   : > { %v1846_v2 = vpop.f32.mrf.mxu1 }
 0x24b   : > { %v1848_v7 = vpop.f32.mrf.mxu1 }
 0x24d   : > { %v1850_v19 = vpop.f32.mrf.mxu1 }
 0x24f   : > { %v1852_v29 = vpop.f32.mrf.mxu1 }
 0x25c   : > { %v1783_v1 = vpop.f32.mrf.mxu0 }
 0x25d   : > { %v1837_v3 = vadd.f32 %v1836_v61, %v1783_v1 }
 0x25e   : > { %v1785_v4 = vpop.f32.mrf.mxu0 }
 0x25f   : > { %vm1961_vm1 = vcmp.ge.f32.partialorder %v1837_v3, 0.0  ;;  %v1977_v56 = vmul.f32 0.02, %v1837_v3  ;;  %v1839_v5 = vadd.f32 %v1838_v62, %v1785_v4 }
 0x260   : > { %v1787_v6 = vpop.f32.mrf.mxu0 }
 0x261   : > { %vm1962_vm2 = vcmp.ge.f32.partialorder %v1839_v5, 0.0  ;;  %v1978_v8 = vmul.f32 0.02, %v1839_v5  ;;  %v1841_v9 = vadd.f32 %v1840_v63, %v1787_v6  ;;  %v1993_v10 = vsel %vm1961_vm1, %v1837_v3, %v1977_v56 }
 0x262   : > { %v1789_v11 = vpop.f32.mrf.mxu0 }
 0x263   : > { %v1994_v12 = vsel %vm1962_vm2, %v1839_v5, %v1978_v8  ;;  %vm1965_vm3 = vcmp.ge.f32.partialorder %v1841_v9, 0.0  ;;  %v1981_v13 = vmul.f32 0.02, %v1841_v9  ;;  %v1843_v14 = vadd.f32 %v1842_v0, %v1789_v11 }
 0x264   : > { %v2916_v15 = vpack.c.bf16 %v1994_v12, %v1993_v10  ;;  %v1793_v18 = vpop.f32.mrf.mxu0 }
 0x265   : > { %vm1966_vm4 = vcmp.ge.f32.partialorder %v1843_v14, 0.0  ;;  %v1982_v20 = vmul.f32 0.02, %v1843_v14  ;;  %v1847_v21 = vadd.f32 %v1846_v2, %v1793_v18  ;;  %v1997_v22 = vsel %vm1965_vm3, %v1841_v9, %v1981_v13 }
 0x266   : > { %2057 = vst [vmem:[%s5124_s15] sm:$0xff] %v2916_v15  ;;  %v1795_v23 = vpop.f32.mrf.mxu0 }
 0x267   : > { %v1998_v24 = vsel %vm1966_vm4, %v1843_v14, %v1982_v20  ;;  %vm1969_vm5 = vcmp.ge.f32.partialorder %v1847_v21, 0.0  ;;  %v1985_v25 = vmul.f32 0.02, %v1847_v21  ;;  %v1849_v26 = vadd.f32 %v1848_v7, %v1795_v23 }
 0x268   : > { %v2918_v27 = vpack.c.bf16 %v1998_v24, %v1997_v22  ;;  %v1797_v28 = vpop.f32.mrf.mxu0 }
 0x269   : > { %v2001_v30 = vsel %vm1969_vm5, %v1847_v21, %v1985_v25  ;;  %vm1970_vm6 = vcmp.ge.f32.partialorder %v1849_v26, 0.0  ;;  %v1986_v17 = vmul.f32 0.02, %v1849_v26  ;;  %v1851_v31 = vadd.f32 %v1850_v19, %v1797_v28 }
 0x26a   : > { %2059 = vst [vmem:[%s5124_s15 + $0x10] sm:$0xff] %v2918_v27  ;;  %v1799_v32 = vpop.f32.mrf.mxu0 }
 0x26b   : > { %v2002_v33 = vsel %vm1970_vm6, %v1849_v26, %v1986_v17  ;;  %vm1973_vm7 = vcmp.ge.f32.partialorder %v1851_v31, 0.0  ;;  %v1989_v34 = vmul.f32 0.02, %v1851_v31  ;;  %v1853_v35 = vadd.f32 %v1852_v29, %v1799_v32 }
 0x26c   : > { %v2920_v36 = vpack.c.bf16 %v2002_v33, %v2001_v30 }
 0x26d   : > { %v2005_v37 = vsel %vm1973_vm7, %v1851_v31, %v1989_v34  ;;  %vm1974_vm8 = vcmp.ge.f32.partialorder %v1853_v35, 0.0  ;;  %v1990_v38 = vmul.f32 0.02, %v1853_v35 }
 0x26e   : > { %2061 = vst [vmem:[%s5124_s15 + $0x20] sm:$0xff] %v2920_v36 }
 0x26f   : > { %v2006_v39 = vsel %vm1974_vm8, %v1853_v35, %v1990_v38 }
 0x270   : > { %v2922_v40 = vpack.c.bf16 %v2006_v39, %v2005_v37 }
 0x272   : > { %2063 = vst [vmem:[%s5124_s15 + $0x30] sm:$0xff] %v2922_v40 }
 0x280   : > { %v1942_v42 = vpop.f32.mrf.mxu0 }
 0x281   : > { %v1889_v41 = vpop.f32.mrf.mxu1 }
 0x282   : > { %v1943_v43 = vadd.f32 %v1942_v42, %v1889_v41  ;;  %v1944_v45 = vpop.f32.mrf.mxu0 }
 0x283   : > { %v1891_v44 = vpop.f32.mrf.mxu1 }
 0x284   : > { %v1979_v46 = vmul.f32 0.02, %v1943_v43  ;;  %v1945_v47 = vadd.f32 %v1944_v45, %v1891_v44  ;;  %vm1963_vm9 = vcmp.ge.f32.partialorder %v1943_v43, 0.0  ;;  %v1946_v16 = vpop.f32.mrf.mxu0 }
 0x285   : > { %v1893_v48 = vpop.f32.mrf.mxu1 }
 0x286   : > { %vm1964_vm10 = vcmp.ge.f32.partialorder %v1945_v47, 0.0  ;;  %v1980_v49 = vmul.f32 0.02, %v1945_v47  ;;  %v1947_v50 = vadd.f32 %v1946_v16, %v1893_v48  ;;  %v1948_v52 = vpop.f32.mrf.mxu0  ;;  %v1995_v53 = vsel %vm1963_vm9, %v1943_v43, %v1979_v46 }
 0x287   : > { %v1895_v51 = vpop.f32.mrf.mxu1 }
 0x288   : > { %v1996_v54 = vsel %vm1964_vm10, %v1945_v47, %v1980_v49  ;;  %v1983_v55 = vmul.f32 0.02, %v1947_v50  ;;  %v1949_v57 = vadd.f32 %v1948_v52, %v1895_v51  ;;  %vm1967_vm11 = vcmp.ge.f32.partialorder %v1947_v50, 0.0  ;;  %v1952_v60 = vpop.f32.mrf.mxu0 }
 0x289   : > { %v2917_v58 = vpack.c.bf16 %v1996_v54, %v1995_v53  ;;  %v1899_v59 = vpop.f32.mrf.mxu1 }
 0x28a   : > { %vm1968_vm12 = vcmp.ge.f32.partialorder %v1949_v57, 0.0  ;;  %v1984_v61 = vmul.f32 0.02, %v1949_v57  ;;  %v1953_v62 = vadd.f32 %v1952_v60, %v1899_v59  ;;  %v1954_v0 = vpop.f32.mrf.mxu0  ;;  %v1999_v1 = vsel %vm1967_vm11, %v1947_v50, %v1983_v55 }
 0x28b   : > { %2058 = vst [vmem:[%s5124_s15 + $0x8] sm:$0xff] %v2917_v58  ;;  %v1901_v63 = vpop.f32.mrf.mxu1 }
 0x28c   : > { %v2000_v2 = vsel %vm1968_vm12, %v1949_v57, %v1984_v61  ;;  %v1987_v3 = vmul.f32 0.02, %v1953_v62  ;;  %v1955_v4 = vadd.f32 %v1954_v0, %v1901_v63  ;;  %vm1971_vm13 = vcmp.ge.f32.partialorder %v1953_v62, 0.0  ;;  %v1956_v6 = vpop.f32.mrf.mxu0 }
 0x28d   : > { %v2919_v56 = vpack.c.bf16 %v2000_v2, %v1999_v1  ;;  %v1903_v5 = vpop.f32.mrf.mxu1 }
 0x28e   : > { %vm1972_vm14 = vcmp.ge.f32.partialorder %v1955_v4, 0.0  ;;  %v1988_v7 = vmul.f32 0.02, %v1955_v4  ;;  %v1957_v8 = vadd.f32 %v1956_v6, %v1903_v5  ;;  %v1958_v10 = vpop.f32.mrf.mxu0  ;;  %v2003_v11 = vsel %vm1971_vm13, %v1953_v62, %v1987_v3 }
 0x28f   : > { %2060 = vst [vmem:[%s5124_s15 + $0x18] sm:$0xff] %v2919_v56  ;;  %v1905_v9 = vpop.f32.mrf.mxu1 }
 0x290   : > { %v2004_v12 = vsel %vm1972_vm14, %v1955_v4, %v1988_v7  ;;  %v1991_v13 = vmul.f32 0.02, %v1957_v8  ;;  %v1959_v14 = vadd.f32 %v1958_v10, %v1905_v9  ;;  %vm1975_vm15 = vcmp.ge.f32.partialorder %v1957_v8, 0.0 }
 0x291   : > { %v2921_v15 = vpack.c.bf16 %v2004_v12, %v2003_v11 }
 0x292   : > { %vm1976_vm0 = vcmp.ge.f32.partialorder %v1959_v14, 0.0  ;;  %v1992_v18 = vmul.f32 0.02, %v1959_v14  ;;  %v2007_v19 = vsel %vm1975_vm15, %v1957_v8, %v1991_v13 }
 0x293   : > { %2062 = vst [vmem:[%s5124_s15 + $0x28] sm:$0xff] %v2921_v15  ;;  %2071 = sbr.rel (!%p3707_p5) target bundleno = 814 (0x32e), region = 98 }
 0x294   : > { %v2008_v20 = vsel %vm1976_vm0, %v1959_v14, %v1992_v18 }
 0x295   : > { %v2923_v21 = vpack.c.bf16 %v2008_v20, %v2007_v19 }
 0x297   : > { %2064 = vst [vmem:[%s5124_s15 + $0x38] sm:$0xff] %v2923_v21 }
 0x298   : > { %s5670_s27 = smov (!%p2074_p1, %s2073_s27), 4 }
 0x299   : > { %s2882_s28 = sshll.u32 %s5670_s27, 8  ;;  %s5143_s7 = sshll.u32 %s5670_s27, 2 }
 0x29a   : > { %p2886_p2 = scmp.eq.s32.totalorder %s2882_s28, 0 }
 0x29b   : > { %p2084_p3 = scmp.lt.u32.totalorder (!%p2886_p2), %s5143_s7, 8 }
 0x29c   : > { %2083 = sbr.rel (%p2886_p2) target bundleno = 814 (0x32e), region = 102 }
 0x2a1   : > { %2087 = sbr.rel (%p2084_p3) target bundleno = 803 (0x323), region = 106  ;;  %s5147_s17 = sand.u32 (!%p2084_p3), 7, %s5143_s7  }
 0x2a2   : > { %p2110_p5 = scmp.eq.s32.totalorder (!%p2084_p3), %s5147_s17, 0  ;;  %p2887_p4 = scmp.ne.s32.totalorder (!%p2084_p3), %s5147_s17, 0 }
 0x2a6   : > { %2113 = sbr.rel (%p2887_p4) target bundleno = 737 (0x2e1), region = 121  ;;  %s2114_s12 = sshrl.u32 (!%p2887_p4), %s5143_s7, 3 }
 0x2a7   : > { %s5154_s11 = sshrl.u32 (!%p2887_p4), %s2114_s12, 4 }
 0x2a8   : > { %p2888_p6 = scmp.le.s32.totalorder (!%p2887_p4), %s5154_s11, 0 }
 0x2ab   : > { %2656 = sbr.rel (%p2888_p6) target bundleno = 721 (0x2d1), region = 269  ;;  %s5643_s8 = smov (!%p2888_p6), %s5141_s25 }
 0x2ac   : > { %s5644_s19 = smov (!%p2888_p6), %s5124_s15  ;;  %s5163_s21 = smov (!%p2888_p6), 0  }
 0x2ad   : > { %s5165_s22 = smov (!%p2888_p6), 0  }
 0x2b0 LB: >> { %v5180_v22 = vld [vmem:[%s3599_s19 + $0x48] sm:$0xff]  ;;  %v5183_v23 = vld [vmem:[%s3599_s19 + $0x50] sm:$0xff]  ;;  %v5186_v24 = vld [vmem:[%s3599_s19 + $0x58] sm:$0xff]  ;;  %s2255_s23 = sadd.s32 1, %s3603_s21  ;;  %s2121_s22 = sadd.s32 1, %s3607_s22   ;;  %s3607_s22 = sphi %s5165_s22, %s2121_s22   ;;  %s3603_s21 = sphi %s5163_s21, %s5646_s21   ;;  %s3599_s19 = sphi %s5644_s19, %s2260_s19   ;;  %s3595_s8 = sphi %s5643_s8, %s2261_s8  }
 0x2b1   : >> { %2146 = vst [vmem:[%s3595_s8 + $0x48] sm:$0xff] %v5180_v22  ;;  %2148 = vst [vmem:[%s3595_s8 + $0x50] sm:$0xff] %v5183_v23  ;;  %v5195_v25 = vld [vmem:[%s3599_s19 + $0x60] sm:$0xff]  ;;  %v5198_v26 = vld [vmem:[%s3599_s19 + $0x68] sm:$0xff]  ;;  %p5235_p7 = scmp.ge.s32.totalorder %s2255_s23, %s5154_s11  ;;  %p2120_p8 = scmp.ge.s32.totalorder %s2121_s22, %s5154_s11 }
 0x2b2   : >> { %2150 = vst [vmem:[%s3595_s8 + $0x58] sm:$0xff] %v5186_v24  ;;  %v5201_v27 = vld [vmem:[%s3599_s19 + $0x70] sm:$0xff]  ;;  %2152 = vst [vmem:[%s3595_s8 + $0x60] sm:$0xff] %v5195_v25  ;;  %v5210_v28 = vld [vmem:[%s3599_s19 + $0x78] sm:$0xff] }
 0x2b3   : >> { %2154 = vst [vmem:[%s3595_s8 + $0x68] sm:$0xff] %v5198_v26  ;;  %2156 = vst [vmem:[%s3595_s8 + $0x70] sm:$0xff] %v5201_v27  ;;  %v2139_v29 = vld [vmem:[%s3599_s19 + $0x30] sm:$0xff]  ;;  %v2141_v30 = vld [vmem:[%s3599_s19 + $0x38] sm:$0xff]  ;;  %s5672_s23 = smov (%p5235_p7, %s2255_s23), 0 }
 0x2b4   : >> { %2174 = vst [vmem:[%s3595_s8 + $0x54] sm:$0xff] %v5180_v22  ;;  %2158 = vst [vmem:[%s3595_s8 + $0x78] sm:$0xff] %v5210_v28  ;;  %v2143_v17 = vld [vmem:[%s3599_s19 + $0x40] sm:$0xff]  ;;  %v2189_v32 = vld [vmem:[%s3599_s19 + $0x88] sm:$0xff]  ;;  %s2889_s20 = sshll.u32 %s5672_s23, 7  ;;  %s5646_s21 = smov %s5672_s23 }
 0x2b5   : >> { %2140 = vst [vmem:[%s3595_s8 + $0x30] sm:$0xff] %v2139_v29  ;;  %2142 = vst [vmem:[%s3595_s8 + $0x38] sm:$0xff] %v2141_v30  ;;  %v2187_v31 = vld [vmem:[%s3599_s19 + $0x80] sm:$0xff]  ;;  %v2133_v33 = vld [vmem:[%s3599_s19 + $0x18] sm:$0xff] }
 0x2b6   : >> { %2176 = vst [vmem:[%s3595_s8 + $0x5c] sm:$0xff] %v5183_v23  ;;  %2178 = vst [vmem:[%s3595_s8 + $0x64] sm:$0xff] %v5186_v24  ;;  %v2135_v34 = vld [vmem:[%s3599_s19 + $0x20] sm:$0xff]  ;;  %v2137_v35 = vld [vmem:[%s3599_s19 + $0x28] sm:$0xff] }
 0x2b7   : >> { %2180 = vst [vmem:[%s3595_s8 + $0x6c] sm:$0xff] %v5195_v25  ;;  %2186 = vst [vmem:[%s3595_s8 + $0x84] sm:$0xff] %v5210_v28  ;;  %v2219_v36 = vld [vmem:[%s3599_s19 + $0x90] sm:$0xff]  ;;  %v2221_v37 = vld [vmem:[%s3599_s19 + $0x98] sm:$0xff] }
 0x2b8   : >> { %2144 = vst [vmem:[%s3595_s8 + $0x40] sm:$0xff] %v2143_v17  ;;  %2172 = vst [vmem:[%s3595_s8 + $0x4c] sm:$0xff] %v2143_v17  ;;  %v2127_v38 = vld [vmem:[%s3599_s19] sm:$0xff]  ;;  %v2129_v39 = vld [vmem:[%s3599_s19 + $0x8] sm:$0xff] }
 0x2b9   : >> { %2182 = vst [vmem:[%s3595_s8 + $0x74] sm:$0xff] %v5198_v26  ;;  %2184 = vst [vmem:[%s3595_s8 + $0x7c] sm:$0xff] %v5201_v27  ;;  %v2131_v40 = vld [vmem:[%s3599_s19 + $0x10] sm:$0xff]  ;;  %v2251_v41 = vld [vmem:[%s3599_s19 + $0xa0] sm:$0xff] }
 0x2ba   : >> { %2188 = vst [vmem:[%s3595_s8 + $0x8c] sm:$0xff] %v2187_v31  ;;  %2190 = vst [vmem:[%s3595_s8 + $0x94] sm:$0xff] %v2189_v32  ;;  %v2253_v42 = vld [vmem:[%s3599_s19 + $0xa8] sm:$0xff]  ;;  %s2260_s19 = scalar_lea.vmem %s5124_s15, %s2889_s20 [#allocation3]  }
 0x2bb   : >> { %2200 = vst [vmem:[%s3595_s8 + $0x58] sm:$0xff] %v2143_v17  ;;  %2202 = vst [vmem:[%s3595_s8 + $0x60] sm:$0xff] %v5180_v22 }
 0x2bc   : >> { %2204 = vst [vmem:[%s3595_s8 + $0x68] sm:$0xff] %v5183_v23  ;;  %2218 = vst [vmem:[%s3595_s8 + $0xa0] sm:$0xff] %v2189_v32 }
 0x2bd   : >> { %2134 = vst [vmem:[%s3595_s8 + $0x18] sm:$0xff] %v2133_v33  ;;  %2136 = vst [vmem:[%s3595_s8 + $0x20] sm:$0xff] %v2135_v34 }
 0x2be   : >> { %2138 = vst [vmem:[%s3595_s8 + $0x28] sm:$0xff] %v2137_v35  ;;  %2166 = vst [vmem:[%s3595_s8 + $0x34] sm:$0xff] %v2137_v35 }
 0x2bf   : >> { %2168 = vst [vmem:[%s3595_s8 + $0x3c] sm:$0xff] %v2139_v29  ;;  %2170 = vst [vmem:[%s3595_s8 + $0x44] sm:$0xff] %v2141_v30 }
 0x2c0   : >> { %2198 = vst [vmem:[%s3595_s8 + $0x50] sm:$0xff] %v2141_v30  ;;  %2206 = vst [vmem:[%s3595_s8 + $0x70] sm:$0xff] %v5186_v24 }
 0x2c1   : >> { %2208 = vst [vmem:[%s3595_s8 + $0x78] sm:$0xff] %v5195_v25  ;;  %2210 = vst [vmem:[%s3595_s8 + $0x80] sm:$0xff] %v5198_v26 }
 0x2c2   : >> { %2212 = vst [vmem:[%s3595_s8 + $0x88] sm:$0xff] %v5201_v27  ;;  %2214 = vst [vmem:[%s3595_s8 + $0x90] sm:$0xff] %v5210_v28 }
 0x2c3   : >> { %2216 = vst [vmem:[%s3595_s8 + $0x98] sm:$0xff] %v2187_v31  ;;  %2226 = vst [vmem:[%s3595_s8 + $0x5c] sm:$0xff] %v2141_v30 }
 0x2c4   : >> { %2228 = vst [vmem:[%s3595_s8 + $0x64] sm:$0xff] %v2143_v17  ;;  %2220 = vst [vmem:[%s3595_s8 + $0xa8] sm:$0xff] %v2219_v36 }
 0x2c5   : >> { %2222 = vst [vmem:[%s3595_s8 + $0xb0] sm:$0xff] %v2221_v37  ;;  %2128 = vst [vmem:[%s3595_s8] sm:$0xff] %v2127_v38 }
 0x2c6   : >> { %2162 = vst [vmem:[%s3595_s8 + $0x24] sm:$0xff] %v2133_v33  ;;  %2164 = vst [vmem:[%s3595_s8 + $0x2c] sm:$0xff] %v2135_v34 }
 0x2c7   : >> { %2192 = vst [vmem:[%s3595_s8 + $0x38] sm:$0xff] %v2135_v34  ;;  %2194 = vst [vmem:[%s3595_s8 + $0x40] sm:$0xff] %v2137_v35 }
 0x2c8   : >> { %2196 = vst [vmem:[%s3595_s8 + $0x48] sm:$0xff] %v2139_v29  ;;  %2224 = vst [vmem:[%s3595_s8 + $0x54] sm:$0xff] %v2139_v29 }
 0x2c9   : >> { %2230 = vst [vmem:[%s3595_s8 + $0x6c] sm:$0xff] %v5180_v22  ;;  %2232 = vst [vmem:[%s3595_s8 + $0x74] sm:$0xff] %v5183_v23 }
 0x2ca   : >> { %2234 = vst [vmem:[%s3595_s8 + $0x7c] sm:$0xff] %v5186_v24  ;;  %2236 = vst [vmem:[%s3595_s8 + $0x84] sm:$0xff] %v5195_v25 }
 0x2cb   : >> { %2238 = vst [vmem:[%s3595_s8 + $0x8c] sm:$0xff] %v5198_v26  ;;  %2240 = vst [vmem:[%s3595_s8 + $0x94] sm:$0xff] %v5201_v27 }
 0x2cc   : >> { %2242 = vst [vmem:[%s3595_s8 + $0x9c] sm:$0xff] %v5210_v28  ;;  %2250 = vst [vmem:[%s3595_s8 + $0xbc] sm:$0xff] %v2221_v37  ;;  %2123 = sbr.rel (!%p2120_p8) target bundleno = 688 (0x2b0), region = 275 }
 0x2cd   : >> { %2130 = vst [vmem:[%s3595_s8 + $0x8] sm:$0xff] %v2129_v39  ;;  %2132 = vst [vmem:[%s3595_s8 + $0x10] sm:$0xff] %v2131_v40 }
 0x2ce   : >> { %2160 = vst [vmem:[%s3595_s8 + $0x1c] sm:$0xff] %v2131_v40  ;;  %2244 = vst [vmem:[%s3595_s8 + $0xa4] sm:$0xff] %v2187_v31 }
 0x2cf   : >> { %2246 = vst [vmem:[%s3595_s8 + $0xac] sm:$0xff] %v2189_v32  ;;  %2248 = vst [vmem:[%s3595_s8 + $0xb4] sm:$0xff] %v2219_v36 }
 0x2d0   : >> { %2252 = vst [vmem:[%s3595_s8 + $0xc4] sm:$0xff] %v2251_v41  ;;  %2254 = vst [vmem:[%s3595_s8 + $0xcc] sm:$0xff] %v2253_v42  ;;  %s2261_s8 = scalar_lea.vmem %s5141_s25, %s2889_s20  }
 0x2d1 PF: > { %s5337_s24 = sand.u32 15, %s2114_s12   ;;  %s2925_s26 = sshll.u32 %s5154_s11, 11 }
 0x2d2   : > { %s2266_s4 = sshra.s32 %s2925_s26, 4  ;;  %p2894_p9 = scmp.le.s32.totalorder %s5337_s24, 0 }
 0x2d3   : > { %s5341_s5 = scalar_lea.vmem %s5124_s15, %s2266_s4 [#allocation3]   ;;  %s5344_s3 = scalar_lea.vmem %s5141_s25, %s2266_s4  }
 0x2d4   : > { %2670 = sbr.rel (%p2894_p9) target bundleno = 737 (0x2e1), region = 280  ;;  %s5647_s29 = smov (!%p2894_p9), %s5344_s3 }
 0x2d5   : > { %s5648_s9 = smov (!%p2894_p9), %s5341_s5  ;;  %s5353_s18 = smov (!%p2894_p9), 0  }
 0x2d6   : > { %s3621_s27 = smov (!%p2894_p9), 0  }
 0x2d9 LB: >> { %v2282_v43 = vld [vmem:[%s3615_s9] sm:$0xff]  ;;  %v2284_v44 = vld [vmem:[%s3615_s9 + $0x10] sm:$0xff]  ;;  %s2290_s30 = sadd.s32 1, %s3619_s18  ;;  %s2276_s27 = sadd.s32 1, %s3623_s27   ;;  %s3623_s27 = sphi %s3621_s27, %s2276_s27   ;;  %s3619_s18 = sphi %s5353_s18, %s5649_s18   ;;  %s3615_s9 = sphi %s5648_s9, %s2295_s9   ;;  %s3611_s29 = sphi %s5647_s29, %s2296_s29  }
 0x2da   : >> { %v2286_v45 = vld [vmem:[%s3615_s9 + $0x20] sm:$0xff]  ;;  %2283 = vst [vmem:[%s3611_s29] sm:$0xff] %v2282_v43  ;;  %2285 = vst [vmem:[%s3611_s29 + $0x1c] sm:$0xff] %v2284_v44  ;;  %v2288_v46 = vld [vmem:[%s3615_s9 + $0x30] sm:$0xff]  ;;  %p2291_p10 = scmp.ge.s32.totalorder %s2290_s30, %s5337_s24  ;;  %p2275_p11 = scmp.ge.s32.totalorder %s2276_s27, %s5337_s24 }
 0x2db   : >> { %2287 = vst [vmem:[%s3611_s29 + $0x38] sm:$0xff] %v2286_v45  ;;  %2289 = vst [vmem:[%s3611_s29 + $0x54] sm:$0xff] %v2288_v46 }
 0x2dc   : >> { %s5674_s30 = smov (%p2291_p10, %s2290_s30), 0  ;;  %2278 = sbr.rel (!%p2275_p11) target bundleno = 729 (0x2d9), region = 286 }
 0x2dd   : >> { %s2895_s6 = sshll.u32 %s5674_s30, 3  ;;  %s5649_s18 = smov %s5674_s30 }
 0x2de   : >> { %s2295_s9 = scalar_lea.vmem %s5341_s5, %s2895_s6 [#allocation3]   ;;  %s2296_s29 = scalar_lea.vmem %s5344_s3, %s2895_s6  }
 0x2e1 PF: > { %2299 = sbr.rel (%p2110_p5) target bundleno = 803 (0x323), region = 139  ;;  %s2301_s28 = ssub.s32 (!%p2110_p5), %s5143_s7, %s5147_s17 }
 0x2e2   : > { %s2305_s12 = sshrl.u32 (!%p2110_p5), %s5143_s7, 3  ;;  %s5374_s11 = scalar_lea.vmem (!%p2110_p5), %s5124_s15, %s2301_s28 [#allocation3] }
 0x2e3   : > { %s5377_s8 = scalar_lea.vmem (!%p2110_p5), %s5141_s25, %s2301_s28  ;;  %s5381_s19 = sshrl.u32 (!%p2110_p5), %s2305_s12, 4 }
 0x2e4   : > { %p2897_p12 = scmp.le.s32.totalorder (!%p2110_p5), %s5381_s19, 0 }
 0x2e6   : > { %2684 = sbr.rel (%p2897_p12) target bundleno = 780 (0x30c), region = 291  ;;  %s5650_s21 = smov (!%p2897_p12), %s5141_s25 }
 0x2e7   : > { %s5651_s22 = smov (!%p2897_p12), %s5124_s15  ;;  %s5390_s23 = smov (!%p2897_p12), 0  }
 0x2e8   : > { %s5392_s14 = smov (!%p2897_p12), 0  }
 0x2eb LB: >> { %v5407_v47 = vld [vmem:[%s3631_s22 + $0x48] sm:$0xff]  ;;  %v5410_v48 = vld [vmem:[%s3631_s22 + $0x50] sm:$0xff]  ;;  %v5413_v16 = vld [vmem:[%s3631_s22 + $0x58] sm:$0xff]  ;;  %s2446_s20 = sadd.s32 1, %s3635_s23  ;;  %s2312_s14 = sadd.s32 1, %s3639_s14   ;;  %s3639_s14 = sphi %s5392_s14, %s2312_s14   ;;  %s3635_s23 = sphi %s5390_s23, %s5653_s23   ;;  %s3631_s22 = sphi %s5651_s22, %s2451_s22   ;;  %s3627_s21 = sphi %s5650_s21, %s2452_s21  }
 0x2ec   : >> { %2337 = vst [vmem:[%s3627_s21 + $0x48] sm:$0xff] %v5407_v47  ;;  %2339 = vst [vmem:[%s3627_s21 + $0x50] sm:$0xff] %v5410_v48  ;;  %v5422_v49 = vld [vmem:[%s3631_s22 + $0x60] sm:$0xff]  ;;  %v5425_v50 = vld [vmem:[%s3631_s22 + $0x68] sm:$0xff]  ;;  %p5462_p13 = scmp.ge.s32.totalorder %s2446_s20, %s5381_s19  ;;  %p2311_p0 = scmp.ge.s32.totalorder %s2312_s14, %s5381_s19 }
 0x2ed   : >> { %2341 = vst [vmem:[%s3627_s21 + $0x58] sm:$0xff] %v5413_v16  ;;  %v5428_v51 = vld [vmem:[%s3631_s22 + $0x70] sm:$0xff]  ;;  %2343 = vst [vmem:[%s3627_s21 + $0x60] sm:$0xff] %v5422_v49  ;;  %v5437_v52 = vld [vmem:[%s3631_s22 + $0x78] sm:$0xff] }
 0x2ee   : >> { %2345 = vst [vmem:[%s3627_s21 + $0x68] sm:$0xff] %v5425_v50  ;;  %2347 = vst [vmem:[%s3627_s21 + $0x70] sm:$0xff] %v5428_v51  ;;  %v2330_v53 = vld [vmem:[%s3631_s22 + $0x30] sm:$0xff]  ;;  %v2332_v54 = vld [vmem:[%s3631_s22 + $0x38] sm:$0xff]  ;;  %s5676_s20 = smov (%p5462_p13, %s2446_s20), 0 }
 0x2ef   : >> { %2365 = vst [vmem:[%s3627_s21 + $0x54] sm:$0xff] %v5407_v47  ;;  %2349 = vst [vmem:[%s3627_s21 + $0x78] sm:$0xff] %v5437_v52  ;;  %v2334_v55 = vld [vmem:[%s3631_s22 + $0x40] sm:$0xff]  ;;  %v2380_v58 = vld [vmem:[%s3631_s22 + $0x88] sm:$0xff]  ;;  %s2898_s26 = sshll.u32 %s5676_s20, 7  ;;  %s5653_s23 = smov %s5676_s20 }
 0x2f0   : >> { %2331 = vst [vmem:[%s3627_s21 + $0x30] sm:$0xff] %v2330_v53  ;;  %2333 = vst [vmem:[%s3627_s21 + $0x38] sm:$0xff] %v2332_v54  ;;  %v2378_v57 = vld [vmem:[%s3631_s22 + $0x80] sm:$0xff]  ;;  %v2324_v59 = vld [vmem:[%s3631_s22 + $0x18] sm:$0xff] }
 0x2f1   : >> { %2367 = vst [vmem:[%s3627_s21 + $0x5c] sm:$0xff] %v5410_v48  ;;  %2369 = vst [vmem:[%s3627_s21 + $0x64] sm:$0xff] %v5413_v16  ;;  %v2326_v60 = vld [vmem:[%s3631_s22 + $0x20] sm:$0xff]  ;;  %v2328_v61 = vld [vmem:[%s3631_s22 + $0x28] sm:$0xff] }
 0x2f2   : >> { %2371 = vst [vmem:[%s3627_s21 + $0x6c] sm:$0xff] %v5422_v49  ;;  %2377 = vst [vmem:[%s3627_s21 + $0x84] sm:$0xff] %v5437_v52  ;;  %v2410_v62 = vld [vmem:[%s3631_s22 + $0x90] sm:$0xff]  ;;  %v2412_v63 = vld [vmem:[%s3631_s22 + $0x98] sm:$0xff] }
 0x2f3   : >> { %2335 = vst [vmem:[%s3627_s21 + $0x40] sm:$0xff] %v2334_v55  ;;  %2363 = vst [vmem:[%s3627_s21 + $0x4c] sm:$0xff] %v2334_v55  ;;  %v2318_v0 = vld [vmem:[%s3631_s22] sm:$0xff]  ;;  %v2320_v1 = vld [vmem:[%s3631_s22 + $0x8] sm:$0xff] }
 0x2f4   : >> { %2373 = vst [vmem:[%s3627_s21 + $0x74] sm:$0xff] %v5425_v50  ;;  %2375 = vst [vmem:[%s3627_s21 + $0x7c] sm:$0xff] %v5428_v51  ;;  %v2322_v2 = vld [vmem:[%s3631_s22 + $0x10] sm:$0xff]  ;;  %v2442_v3 = vld [vmem:[%s3631_s22 + $0xa0] sm:$0xff] }
 0x2f5   : >> { %2379 = vst [vmem:[%s3627_s21 + $0x8c] sm:$0xff] %v2378_v57  ;;  %2381 = vst [vmem:[%s3627_s21 + $0x94] sm:$0xff] %v2380_v58  ;;  %v2444_v4 = vld [vmem:[%s3631_s22 + $0xa8] sm:$0xff]  ;;  %s2451_s22 = scalar_lea.vmem %s5124_s15, %s2898_s26 [#allocation3]  }
 0x2f6   : >> { %2391 = vst [vmem:[%s3627_s21 + $0x58] sm:$0xff] %v2334_v55  ;;  %2393 = vst [vmem:[%s3627_s21 + $0x60] sm:$0xff] %v5407_v47 }
 0x2f7   : >> { %2395 = vst [vmem:[%s3627_s21 + $0x68] sm:$0xff] %v5410_v48  ;;  %2409 = vst [vmem:[%s3627_s21 + $0xa0] sm:$0xff] %v2380_v58 }
 0x2f8   : >> { %2325 = vst [vmem:[%s3627_s21 + $0x18] sm:$0xff] %v2324_v59  ;;  %2327 = vst [vmem:[%s3627_s21 + $0x20] sm:$0xff] %v2326_v60 }
 0x2f9   : >> { %2329 = vst [vmem:[%s3627_s21 + $0x28] sm:$0xff] %v2328_v61  ;;  %2357 = vst [vmem:[%s3627_s21 + $0x34] sm:$0xff] %v2328_v61 }
 0x2fa   : >> { %2359 = vst [vmem:[%s3627_s21 + $0x3c] sm:$0xff] %v2330_v53  ;;  %2361 = vst [vmem:[%s3627_s21 + $0x44] sm:$0xff] %v2332_v54 }
 0x2fb   : >> { %2389 = vst [vmem:[%s3627_s21 + $0x50] sm:$0xff] %v2332_v54  ;;  %2397 = vst [vmem:[%s3627_s21 + $0x70] sm:$0xff] %v5413_v16 }
 0x2fc   : >> { %2399 = vst [vmem:[%s3627_s21 + $0x78] sm:$0xff] %v5422_v49  ;;  %2401 = vst [vmem:[%s3627_s21 + $0x80] sm:$0xff] %v5425_v50 }
 0x2fd   : >> { %2403 = vst [vmem:[%s3627_s21 + $0x88] sm:$0xff] %v5428_v51  ;;  %2405 = vst [vmem:[%s3627_s21 + $0x90] sm:$0xff] %v5437_v52 }
 0x2fe   : >> { %2407 = vst [vmem:[%s3627_s21 + $0x98] sm:$0xff] %v2378_v57  ;;  %2417 = vst [vmem:[%s3627_s21 + $0x5c] sm:$0xff] %v2332_v54 }
 0x2ff   : >> { %2419 = vst [vmem:[%s3627_s21 + $0x64] sm:$0xff] %v2334_v55  ;;  %2411 = vst [vmem:[%s3627_s21 + $0xa8] sm:$0xff] %v2410_v62 }
 0x300   : >> { %2413 = vst [vmem:[%s3627_s21 + $0xb0] sm:$0xff] %v2412_v63  ;;  %2319 = vst [vmem:[%s3627_s21] sm:$0xff] %v2318_v0 }
 0x301   : >> { %2353 = vst [vmem:[%s3627_s21 + $0x24] sm:$0xff] %v2324_v59  ;;  %2355 = vst [vmem:[%s3627_s21 + $0x2c] sm:$0xff] %v2326_v60 }
 0x302   : >> { %2383 = vst [vmem:[%s3627_s21 + $0x38] sm:$0xff] %v2326_v60  ;;  %2385 = vst [vmem:[%s3627_s21 + $0x40] sm:$0xff] %v2328_v61 }
 0x303   : >> { %2387 = vst [vmem:[%s3627_s21 + $0x48] sm:$0xff] %v2330_v53  ;;  %2415 = vst [vmem:[%s3627_s21 + $0x54] sm:$0xff] %v2330_v53 }
 0x304   : >> { %2421 = vst [vmem:[%s3627_s21 + $0x6c] sm:$0xff] %v5407_v47  ;;  %2423 = vst [vmem:[%s3627_s21 + $0x74] sm:$0xff] %v5410_v48 }
 0x305   : >> { %2425 = vst [vmem:[%s3627_s21 + $0x7c] sm:$0xff] %v5413_v16  ;;  %2427 = vst [vmem:[%s3627_s21 + $0x84] sm:$0xff] %v5422_v49 }
 0x306   : >> { %2429 = vst [vmem:[%s3627_s21 + $0x8c] sm:$0xff] %v5425_v50  ;;  %2431 = vst [vmem:[%s3627_s21 + $0x94] sm:$0xff] %v5428_v51 }
 0x307   : >> { %2433 = vst [vmem:[%s3627_s21 + $0x9c] sm:$0xff] %v5437_v52  ;;  %2441 = vst [vmem:[%s3627_s21 + $0xbc] sm:$0xff] %v2412_v63  ;;  %2314 = sbr.rel (!%p2311_p0) target bundleno = 747 (0x2eb), region = 297 }
 0x308   : >> { %2321 = vst [vmem:[%s3627_s21 + $0x8] sm:$0xff] %v2320_v1  ;;  %2323 = vst [vmem:[%s3627_s21 + $0x10] sm:$0xff] %v2322_v2 }
 0x309   : >> { %2351 = vst [vmem:[%s3627_s21 + $0x1c] sm:$0xff] %v2322_v2  ;;  %2435 = vst [vmem:[%s3627_s21 + $0xa4] sm:$0xff] %v2378_v57 }
 0x30a   : >> { %2437 = vst [vmem:[%s3627_s21 + $0xac] sm:$0xff] %v2380_v58  ;;  %2439 = vst [vmem:[%s3627_s21 + $0xb4] sm:$0xff] %v2410_v62 }
 0x30b   : >> { %2443 = vst [vmem:[%s3627_s21 + $0xc4] sm:$0xff] %v2442_v3  ;;  %2445 = vst [vmem:[%s3627_s21 + $0xcc] sm:$0xff] %v2444_v4  ;;  %s2452_s21 = scalar_lea.vmem %s5141_s25, %s2898_s26  }
 0x30c PF: > { %s5564_s4 = sand.u32 15, %s2305_s12   ;;  %s2927_s5 = sshll.u32 %s5381_s19, 11 }
 0x30d   : > { %s2457_s3 = sshra.s32 %s2927_s5, 4  ;;  %p2903_p1 = scmp.le.s32.totalorder %s5564_s4, 0 }
 0x30e   : > { %s5568_s29 = scalar_lea.vmem %s5124_s15, %s2457_s3 [#allocation3]   ;;  %s5571_s9 = scalar_lea.vmem %s5141_s25, %s2457_s3  }
 0x30f   : > { %2698 = sbr.rel (%p2903_p1) target bundleno = 796 (0x31c), region = 302  ;;  %s5654_s18 = smov (!%p2903_p1), %s5571_s9 }
 0x310   : > { %s5655_s27 = smov (!%p2903_p1), %s5568_s29  ;;  %s3649_s30 = smov (!%p2903_p1), 0  }
 0x311   : > { %s3653_s6 = smov (!%p2903_p1), 0  }
 0x314 LB: >> { %v2473_v56 = vld [vmem:[%s3647_s27] sm:$0xff]  ;;  %v2475_v5 = vld [vmem:[%s3647_s27 + $0x10] sm:$0xff]  ;;  %s2481_s28 = sadd.s32 1, %s3651_s30  ;;  %s2467_s6 = sadd.s32 1, %s3655_s6   ;;  %s3655_s6 = sphi %s3653_s6, %s2467_s6   ;;  %s3651_s30 = sphi %s3649_s30, %s3650_s30   ;;  %s3647_s27 = sphi %s5655_s27, %s2486_s27   ;;  %s3643_s18 = sphi %s5654_s18, %s2487_s18  }
 0x315   : >> { %v2477_v6 = vld [vmem:[%s3647_s27 + $0x20] sm:$0xff]  ;;  %2474 = vst [vmem:[%s3643_s18] sm:$0xff] %v2473_v56  ;;  %2476 = vst [vmem:[%s3643_s18 + $0x1c] sm:$0xff] %v2475_v5  ;;  %v2479_v7 = vld [vmem:[%s3647_s27 + $0x30] sm:$0xff]  ;;  %p2482_p2 = scmp.ge.s32.totalorder %s2481_s28, %s5564_s4  ;;  %p2466_p3 = scmp.ge.s32.totalorder %s2467_s6, %s5564_s4 }
 0x316   : >> { %2478 = vst [vmem:[%s3643_s18 + $0x38] sm:$0xff] %v2477_v6  ;;  %2480 = vst [vmem:[%s3643_s18 + $0x54] sm:$0xff] %v2479_v7 }
 0x317   : >> { %s5678_s28 = smov (%p2482_p2, %s2481_s28), 0  ;;  %2469 = sbr.rel (!%p2466_p3) target bundleno = 788 (0x314), region = 308 }
 0x318   : >> { %s2904_s12 = sshll.u32 %s5678_s28, 3  ;;  %s3650_s30 = smov %s5678_s28  }
 0x319   : >> { %s2486_s27 = scalar_lea.vmem %s5568_s29, %s2904_s12 [#allocation3]   ;;  %s2487_s18 = scalar_lea.vmem %s5571_s9, %s2904_s12  }
 0x31c PF: > { %s3659_s19 = smov 1  }
 0x31d   : > { %s2488_s21 = sshll.u32 %s3659_s19, %s5147_s17 }
 0x31e   : > { %s2906_s22 = sadd.s32 4294967295, %s2488_s21 }
 0x31f   : > { %v2498_v8 = vld [vmem:[%s5374_s11] sm:%s2906_s22]  ;;  %v2500_v9 = vld [vmem:[%s5374_s11 + $0x10] sm:%s2906_s22] }
 0x320   : > { %2499 = vst [vmem:[%s5377_s8] sm:%s2906_s22] %v2498_v8  ;;  %2501 = vst [vmem:[%s5377_s8 + $0x1c] sm:%s2906_s22] %v2500_v9 }
 0x321   : > { %v2502_v10 = vld [vmem:[%s5374_s11 + $0x20] sm:%s2906_s22]  ;;  %v2504_v11 = vld [vmem:[%s5374_s11 + $0x30] sm:%s2906_s22] }
 0x322   : > { %2503 = vst [vmem:[%s5377_s8 + $0x38] sm:%s2906_s22] %v2502_v10  ;;  %2505 = vst [vmem:[%s5377_s8 + $0x54] sm:%s2906_s22] %v2504_v11 }
 0x323 PF: > { %p2907_p5 = scmp.ge.u32.totalorder %s5143_s7, 8 }
 0x324   : > { %s3660_s23 = smov (!%p2907_p5), 1  }
 0x325   : > { %2090 = sbr.rel (%p2907_p5) target bundleno = 814 (0x32e), region = 110  ;;  %s2091_s17 = sshll.u32 (!%p2907_p5), %s3660_s23, %s5143_s7 }
 0x326   : > { %s2908_s14 = sadd.s32 (!%p2907_p5), 4294967295, %s2091_s17 }
 0x32a   : > { %v2101_v12 = vld [vmem:[%s5124_s15] sm:%s2908_s14]  ;;  %v2103_v13 = vld [vmem:[%s5124_s15 + $0x10] sm:%s2908_s14] }
 0x32b   : > { %2102 = vst [vmem:[%s5141_s25] sm:%s2908_s14] %v2101_v12  ;;  %2104 = vst [vmem:[%s5141_s25 + $0x1c] sm:%s2908_s14] %v2103_v13 }
 0x32c   : > { %v2105_v14 = vld [vmem:[%s5124_s15 + $0x20] sm:%s2908_s14]  ;;  %v2107_v15 = vld [vmem:[%s5124_s15 + $0x30] sm:%s2908_s14] }
 0x32d   : > { %2106 = vst [vmem:[%s5141_s25 + $0x38] sm:%s2908_s14] %v2105_v14  ;;  %2108 = vst [vmem:[%s5141_s25 + $0x54] sm:%s2908_s14] %v2107_v15 }
 0x32e PF: > { %p9_p4 = scmp.ge.s32.totalorder %s3695_s13, 4   ;;  %s5656_s9 = smov %s3523_s10 }
 0x32f   : > { %s5657_s10 = smov %s3705_s16  ;;  %s5658_s11 = smov %s3695_s13 }
 0x330   :  { %11 = sbr.rel (!%p9_p4) target bundleno = 2 (0x2), region = 319 }

// kernel: discriminator_forward.8
= control target key start
LH: loop header
LB: loop body
LE: loop exit
PB: predicated region body
PF: predicated region fallthrough
CT: control target
= control target key end

     0   :  { %vm784_vm0 = vcmask 261120   ;;  %vm1185_vm2 = vcmask 1043456   ;;  %vm1186_vm3 = vcmask 277508   ;;  %s2047_s1 = inlined_call_operand.vmem [shape: bf16[800,162], index: 1, kind: input, shape index: {}]   ;;  %s2048_s0 = inlined_call_operand.vmem [shape: bf16[64,800], index: 0, kind: input, shape index: {}]   ;;  %s2049_s2 = inlined_call_operand.vmem [shape: bf16[64,162], index: 2, kind: output, shape index: {}]  }
   0x1   :  { %v1349_v0 = vld [vmem:[%s2047_s1 + $0x74] ss:$8 sps:$4 sm:$0xff]   ;;  %v1353_v2 = vld [vmem:[%s2047_s1 + $0x70] ss:$8 sps:$4 sm:$0xff]   ;;  %v1355_v4 = vld [vmem:[%s2047_s1 + $0x64] ss:$8 sps:$4 sm:$0xff]  }
   0x2   :  { %v1351_v1 = vld [vmem:[%s2047_s1 + $0x174] ss:$8 sps:$4 sm:$0xff]   ;;  %797 = vmatprep.subr.bf16.mxu0 %v1349_v0  ;;  %v1354_v3 = vld [vmem:[%s2047_s1 + $0x170] ss:$8 sps:$4 sm:$0xff]   ;;  %v1357_v5 = vld [vmem:[%s2047_s1 + $0x164] ss:$8 sps:$4 sm:$0xff]  }
   0x3   :  { %870 = vmatprep.subr.bf16.mxu1 %v1351_v1  ;;  %798 = vmatpush1.bf16.msra.mxu0 %v1353_v2  ;;  %v1359_v6 = vld [vmem:[%s2047_s1 + $0x60] ss:$8 sps:$4 sm:$0xff]   ;;  %v1361_v8 = vld [vmem:[%s2047_s1 + $0x54] ss:$8 sps:$4 sm:$0xff]   ;;  %v1365_v10 = vld [vmem:[%s2047_s1 + $0x50] ss:$8 sps:$4 sm:$0xff]  }
   0x4   :  { %871 = vmatpush1.bf16.msra.mxu1 %v1354_v3  ;;  %799 = vmatprep.subr.bf16.mxu0 %v1355_v4  ;;  %v1360_v7 = vld [vmem:[%s2047_s1 + $0x160] ss:$8 sps:$4 sm:$0xff]   ;;  %v1363_v9 = vld [vmem:[%s2047_s1 + $0x154] ss:$8 sps:$4 sm:$0xff]   ;;  %v1366_v11 = vld [vmem:[%s2047_s1 + $0x150] ss:$8 sps:$4 sm:$0xff]  }
   0x5   :  { %872 = vmatprep.subr.bf16.mxu1 %v1357_v5  ;;  %v1367_v12 = vld [vmem:[%s2047_s1 + $0x44] ss:$8 sps:$4 sm:$0xff]   ;;  %v1371_v14 = vld [vmem:[%s2047_s1 + $0x40] ss:$8 sps:$4 sm:$0xff]   ;;  %v1373_v16 = vld [vmem:[%s2047_s1 + $0x34] ss:$8 sps:$4 sm:$0xff]  }
   0x6   :  { %v1369_v13 = vld [vmem:[%s2047_s1 + $0x144] ss:$8 sps:$4 sm:$0xff]   ;;  %v1372_v15 = vld [vmem:[%s2047_s1 + $0x140] ss:$8 sps:$4 sm:$0xff]   ;;  %v1375_v17 = vld [vmem:[%s2047_s1 + $0x134] ss:$8 sps:$4 sm:$0xff]  }
   0x7   :  { %800 = vmatpush1.bf16.msra.mxu0 %v1359_v6  ;;  %v1377_v18 = vld [vmem:[%s2047_s1 + $0x30] ss:$8 sps:$4 sm:$0xff]   ;;  %v1379_v20 = vld [vmem:[%s2047_s1 + $0x24] ss:$8 sps:$4 sm:$0xff]   ;;  %v1383_v22 = vld [vmem:[%s2047_s1 + $0x20] ss:$8 sps:$4 sm:$0xff]  }
   0x8   :  { %873 = vmatpush1.bf16.msra.mxu1 %v1360_v7  ;;  %801 = vmatprep.subr.bf16.mxu0 %v1361_v8  ;;  %v1378_v19 = vld [vmem:[%s2047_s1 + $0x130] ss:$8 sps:$4 sm:$0xff]   ;;  %v1381_v21 = vld [vmem:[%s2047_s1 + $0x124] ss:$8 sps:$4 sm:$0xff]   ;;  %v1384_v23 = vld [vmem:[%s2047_s1 + $0x120] ss:$8 sps:$4 sm:$0xff]  }
   0x9   :  { %874 = vmatprep.subr.bf16.mxu1 %v1363_v9  ;;  %v1385_v24 = vld [vmem:[%s2047_s1 + $0x14] ss:$8 sps:$4 sm:$0xff]   ;;  %v1389_v26 = vld [vmem:[%s2047_s1 + $0x10] ss:$8 sps:$4 sm:$0xff]   ;;  %v1391_v28 = vld [vmem:[%s2047_s1 + $0x4] ss:$8 sps:$4 sm:$0xff]  }
   0xa   :  { %v1387_v25 = vld [vmem:[%s2047_s1 + $0x114] ss:$8 sps:$4 sm:$0xff]   ;;  %v1390_v27 = vld [vmem:[%s2047_s1 + $0x110] ss:$8 sps:$4 sm:$0xff]   ;;  %v1393_v29 = vld [vmem:[%s2047_s1 + $0x104] ss:$8 sps:$4 sm:$0xff]  }
   0xb   :  { %802 = vmatpush1.bf16.msra.mxu0 %v1365_v10  ;;  %v1395_v30 = vld [vmem:[%s2047_s1] ss:$8 sps:$4 sm:$0xff]   ;;  %v1397_v32 = vld [vmem:[%s2047_s1 + $0xf4] ss:$8 sps:$4 sm:$0xff]   ;;  %v1401_v34 = vld [vmem:[%s2047_s1 + $0xf0] ss:$8 sps:$4 sm:$0xff]  }
   0xc   :  { %875 = vmatpush1.bf16.msra.mxu1 %v1366_v11  ;;  %803 = vmatprep.subr.bf16.mxu0 %v1367_v12  ;;  %v1396_v31 = vld [vmem:[%s2047_s1 + $0x100] ss:$8 sps:$4 sm:$0xff]   ;;  %v1399_v33 = vld [vmem:[%s2047_s1 + $0x1f4] ss:$8 sps:$4 sm:$0xff]   ;;  %v1402_v35 = vld [vmem:[%s2047_s1 + $0x1f0] ss:$8 sps:$4 sm:$0xff]  }
   0xd   :  { %876 = vmatprep.subr.bf16.mxu1 %v1369_v13  ;;  %v1403_v36 = vld [vmem:[%s2047_s1 + $0xe4] ss:$8 sps:$4 sm:$0xff]   ;;  %v1407_v38 = vld [vmem:[%s2047_s1 + $0xe0] ss:$8 sps:$4 sm:$0xff]   ;;  %v1409_v40 = vld [vmem:[%s2047_s1 + $0xd4] ss:$8 sps:$4 sm:$0xff]  }
   0xe   :  { %v1405_v37 = vld [vmem:[%s2047_s1 + $0x1e4] ss:$8 sps:$4 sm:$0xff]   ;;  %v1408_v39 = vld [vmem:[%s2047_s1 + $0x1e0] ss:$8 sps:$4 sm:$0xff]   ;;  %v1411_v41 = vld [vmem:[%s2047_s1 + $0x1d4] ss:$8 sps:$4 sm:$0xff]  }
   0xf   :  { %804 = vmatpush1.bf16.msra.mxu0 %v1371_v14  ;;  %v1413_v42 = vld [vmem:[%s2047_s1 + $0xd0] ss:$8 sps:$4 sm:$0xff]   ;;  %v1415_v44 = vld [vmem:[%s2047_s1 + $0xc4] ss:$8 sps:$4 sm:$0xff]   ;;  %v1419_v46 = vld [vmem:[%s2047_s1 + $0xc0] ss:$8 sps:$4 sm:$0xff]  }
  0x10   :  { %877 = vmatpush1.bf16.msra.mxu1 %v1372_v15  ;;  %805 = vmatprep.subr.bf16.mxu0 %v1373_v16  ;;  %v1414_v43 = vld [vmem:[%s2047_s1 + $0x1d0] ss:$8 sps:$4 sm:$0xff]   ;;  %v1417_v45 = vld [vmem:[%s2047_s1 + $0x1c4] ss:$8 sps:$4 sm:$0xff]   ;;  %v1420_v47 = vld [vmem:[%s2047_s1 + $0x1c0] ss:$8 sps:$4 sm:$0xff]  }
  0x11   :  { %878 = vmatprep.subr.bf16.mxu1 %v1375_v17  ;;  %v1421_v48 = vld [vmem:[%s2047_s1 + $0xb4] ss:$8 sps:$4 sm:$0xff]   ;;  %v1447_v49 = vld [vmem:[%s2048_s0 + $0x4] ss:$28 sps:$4 sm:$0xff]   ;;  %v1450_v51 = vld [vmem:[%s2048_s0 + $0xc] ss:$28 sps:$4 sm:$0xff]  }
  0x12   :  { %v1423_v50 = vld [vmem:[%s2047_s1 + $0x1b4] ss:$8 sps:$4 sm:$0xff]   ;;  %829 = vmatprep.mubr.bf16.mxu0 %v1447_v49  ;;  %v1425_v52 = vld [vmem:[%s2047_s1 + $0xb0] ss:$8 sps:$4 sm:$0xff]   ;;  %902 = vmatprep.mubr.bf16.mxu1 %v1450_v51  ;;  %v1427_v54 = vld [vmem:[%s2047_s1 + $0xa4] ss:$8 sps:$4 sm:$0xff]  }
  0x13   :  { %806 = vmatpush1.bf16.msra.mxu0 %v1377_v18  ;;  %v1426_v53 = vld [vmem:[%s2047_s1 + $0x1b0] ss:$8 sps:$4 sm:$0xff]   ;;  %v1429_v55 = vld [vmem:[%s2047_s1 + $0x1a4] ss:$8 sps:$4 sm:$0xff]   ;;  %v1431_v56 = vld [vmem:[%s2047_s1 + $0xa0] ss:$8 sps:$4 sm:$0xff]  }
  0x14   :  { %879 = vmatpush1.bf16.msra.mxu1 %v1378_v19  ;;  %807 = vmatprep.subr.bf16.mxu0 %v1379_v20  ;;  %v1432_v57 = vld [vmem:[%s2047_s1 + $0x1a0] ss:$8 sps:$4 sm:$0xff]   ;;  %v1433_v58 = vld [vmem:[%s2047_s1 + $0x94] ss:$8 sps:$4 sm:$0xff]   ;;  %v1437_v60 = vld [vmem:[%s2047_s1 + $0x90] ss:$8 sps:$4 sm:$0xff]  }
  0x15   :  { %880 = vmatprep.subr.bf16.mxu1 %v1381_v21  ;;  %v1435_v59 = vld [vmem:[%s2047_s1 + $0x194] ss:$8 sps:$4 sm:$0xff]   ;;  %v1438_v61 = vld [vmem:[%s2047_s1 + $0x190] ss:$8 sps:$4 sm:$0xff]   ;;  %v1439_v62 = vld [vmem:[%s2047_s1 + $0x84] ss:$8 sps:$4 sm:$0xff]  }
  0x16   :  { %v1441_v63 = vld [vmem:[%s2047_s1 + $0x184] ss:$8 sps:$4 sm:$0xff]   ;;  %v1443_v0 = vld [vmem:[%s2047_s1 + $0x80] ss:$8 sps:$4 sm:$0xff]   ;;  %v1453_v2 = vld [vmem:[%s2047_s1 + $0x274] ss:$8 sps:$4 sm:$0xff]  }
  0x17   :  { %808 = vmatpush1.bf16.msra.mxu0 %v1383_v22  ;;  %v1444_v1 = vld [vmem:[%s2047_s1 + $0x180] ss:$8 sps:$4 sm:$0xff]   ;;  %v1484_v3 = vld [vmem:[%s2047_s1 + $0x314] ss:$8 sps:$4 sm:$0xff]   ;;  %v1451_v6 = vld [vmem:[%s2047_s1 + $0x270] ss:$8 sps:$4 sm:$0xff]  }
  0x18   :  { %881 = vmatpush1.bf16.msra.mxu1 %v1384_v23  ;;  %809 = vmatprep.subr.bf16.mxu0 %v1385_v24  ;;  %v1445_v4 = vld [vmem:[%s2048_s0] ss:$28 sps:$4 sm:$0xff]   ;;  %v1448_v5 = vld [vmem:[%s2048_s0 + $0x8] ss:$28 sps:$4 sm:$0xff]   ;;  %v1482_v10 = vld [vmem:[%s2047_s1 + $0x310] ss:$8 sps:$4 sm:$0xff]  }
  0x19   :  { %882 = vmatprep.subr.bf16.mxu1 %v1387_v25  ;;  %v1456_v7 = vld [vmem:[%s2047_s1 + $0x264] ss:$8 sps:$4 sm:$0xff]   ;;  %v1478_v8 = vld [vmem:[%s2048_s0 + $0x3c] ss:$28 sps:$4 sm:$0xff]   ;;  %v1454_v11 = vld [vmem:[%s2047_s1 + $0x260] ss:$8 sps:$4 sm:$0xff]  }
  0x1a   :  { %v1480_v9 = vld [vmem:[%s2048_s0 + $0x44] ss:$28 sps:$4 sm:$0xff]   ;;  %v1459_v12 = vld [vmem:[%s2047_s1 + $0x254] ss:$8 sps:$4 sm:$0xff]   ;;  %v1457_v13 = vld [vmem:[%s2047_s1 + $0x250] ss:$8 sps:$4 sm:$0xff]  }
  0x1b   :  { %810 = vmatpush1.bf16.msra.mxu0 %v1389_v26  ;;  %v1485_v14 = vld [vmem:[%s2048_s0 + $0x38] ss:$28 sps:$4 sm:$0xff]   ;;  %v1486_v15 = vld [vmem:[%s2048_s0 + $0x40] ss:$28 sps:$4 sm:$0xff]   ;;  %v1462_v16 = vld [vmem:[%s2047_s1 + $0x244] ss:$8 sps:$4 sm:$0xff]  }
  0x1c   :  { %883 = vmatpush1.bf16.msra.mxu1 %v1390_v27  ;;  %811 = vmatprep.subr.bf16.mxu0 %v1391_v28  ;;  %v1493_v17 = vld [vmem:[%s2048_s0 + $0x74] ss:$28 sps:$4 sm:$0xff]   ;;  %v1511_v18 = vld [vmem:[%s2047_s1 + $0x304] ss:$8 sps:$4 sm:$0xff]   ;;  %v1495_v19 = vld [vmem:[%s2048_s0 + $0x7c] ss:$28 sps:$4 sm:$0xff]  }
  0x1d   :  { %884 = vmatprep.subr.bf16.mxu1 %v1393_v29  ;;  %v1509_v20 = vld [vmem:[%s2047_s1 + $0x300] ss:$8 sps:$4 sm:$0xff]   ;;  %v1465_v22 = vld [vmem:[%s2047_s1 + $0x234] ss:$8 sps:$4 sm:$0xff]   ;;  %v1463_v23 = vld [vmem:[%s2047_s1 + $0x230] ss:$8 sps:$4 sm:$0xff]  }
  0x1e   :  { %v1460_v21 = vld [vmem:[%s2047_s1 + $0x240] ss:$8 sps:$4 sm:$0xff]   ;;  %v1497_v24 = vld [vmem:[%s2048_s0 + $0x70] ss:$28 sps:$4 sm:$0xff]   ;;  %v1498_v25 = vld [vmem:[%s2048_s0 + $0x78] ss:$28 sps:$4 sm:$0xff]  }
  0x1f   :  { %812 = vmatpush1.bf16.msra.mxu0 %v1395_v30  ;;  %v1505_v26 = vld [vmem:[%s2048_s0 + $0xac] ss:$28 sps:$4 sm:$0xff]   ;;  %v1507_v28 = vld [vmem:[%s2048_s0 + $0xb4] ss:$28 sps:$4 sm:$0xff]   ;;  %vm1983_vm5 = vmor %vm1186_vm3, %vm1185_vm2 }
  0x20   :  { %885 = vmatpush1.bf16.msra.mxu1 %v1396_v31  ;;  %813 = vmatprep.subr.bf16.mxu0 %v1397_v32  ;;  %v1468_v27 = vld [vmem:[%s2047_s1 + $0x224] ss:$8 sps:$4 sm:$0xff]   ;;  %v1466_v29 = vld [vmem:[%s2047_s1 + $0x220] ss:$8 sps:$4 sm:$0xff]   ;;  %v1471_v30 = vld [vmem:[%s2047_s1 + $0x214] ss:$8 sps:$4 sm:$0xff]  }
  0x21   :  { %886 = vmatprep.subr.bf16.mxu1 %v1399_v33  ;;  %v1512_v31 = vld [vmem:[%s2048_s0 + $0xa8] ss:$28 sps:$4 sm:$0xff]   ;;  %v1513_v32 = vld [vmem:[%s2048_s0 + $0xb0] ss:$28 sps:$4 sm:$0xff]  }
  0x22   :  { %v1469_v33 = vld [vmem:[%s2047_s1 + $0x210] ss:$8 sps:$4 sm:$0xff]   ;;  %v1531_v49 = vld [vmem:[%s2048_s0 + $0x88] ss:$28 sps:$4 sm:$0xff]  }
  0x23   :  { %814 = vmatpush2.bf16.msra.mxu0 %v1401_v34  ;;  %v1474_v34 = vld [vmem:[%s2047_s1 + $0x204] ss:$8 sps:$4 sm:$0xff]  }
  0x24   :  { %887 = vmatpush2.bf16.msra.mxu1 %v1402_v35  ;;  %815 = vmatprep.subr.bf16.mxu0 %v1403_v36  ;;  %v1526_v35 = vld [vmem:[%s2048_s0 + $0x14] ss:$28 sps:$4 sm:$0xff]   ;;  %v1472_v36 = vld [vmem:[%s2047_s1 + $0x200] ss:$8 sps:$4 sm:$0xff]   ;;  %v1516_v51 = vld [vmem:[%s2047_s1 + $0x2a4] ss:$8 sps:$4 sm:$0xff]  }
  0x25   :  { %888 = vmatprep.subr.bf16.mxu1 %v1405_v37  ;;  %v1539_v37 = vmov 0  }
  0x27   :  { %816 = vmatpush2.bf16.msra.mxu0 %v1407_v38  ;;  %v1477_v38 = vld [vmem:[%s2047_s1 + $0x2f4] ss:$8 sps:$4 sm:$0xff]  }
  0x28   :  { %889 = vmatpush2.bf16.msra.mxu1 %v1408_v39  ;;  %817 = vmatprep.subr.bf16.mxu0 %v1409_v40  ;;  %v1523_v39 = vld [vmem:[%s2048_s0 + $0x18] ss:$28 sps:$4 sm:$0xff]  }
  0x29   :  { %890 = vmatprep.subr.bf16.mxu1 %v1411_v41  ;;  %v1475_v40 = vld [vmem:[%s2047_s1 + $0x2f0] ss:$8 sps:$4 sm:$0xff]   ;;  %v1489_v41 = vld [vmem:[%s2047_s1 + $0x2e4] ss:$8 sps:$4 sm:$0xff]  }
  0x2b   :  { %818 = vmatpush2.bf16.msra.mxu0 %v1413_v42  ;;  %v1487_v42 = vld [vmem:[%s2047_s1 + $0x2e0] ss:$8 sps:$4 sm:$0xff]  }
  0x2c   :  { %891 = vmatpush2.bf16.msra.mxu1 %v1414_v43  ;;  %819 = vmatprep.subr.bf16.mxu0 %v1415_v44  ;;  %v1492_v43 = vld [vmem:[%s2047_s1 + $0x2d4] ss:$8 sps:$4 sm:$0xff]   ;;  %v1527_v44 = vld [vmem:[%s2048_s0 + $0x50] ss:$28 sps:$4 sm:$0xff]  }
  0x2d   :  { %892 = vmatprep.subr.bf16.mxu1 %v1417_v45  ;;  %v1490_v45 = vld [vmem:[%s2047_s1 + $0x2d0] ss:$8 sps:$4 sm:$0xff]  }
  0x2f   :  { %820 = vmatpush2.bf16.msra.mxu0 %v1419_v46  ;;  %v1501_v46 = vld [vmem:[%s2047_s1 + $0x2c4] ss:$8 sps:$4 sm:$0xff]  }
  0x30   :  { %893 = vmatpush2.bf16.msra.mxu1 %v1420_v47  ;;  %821 = vmatprep.subr.bf16.mxu0 %v1421_v48  ;;  %v1499_v47 = vld [vmem:[%s2047_s1 + $0x2c0] ss:$8 sps:$4 sm:$0xff]   ;;  %v1504_v48 = vld [vmem:[%s2047_s1 + $0x2b4] ss:$8 sps:$4 sm:$0xff]  }
  0x31   :  { %894 = vmatprep.subr.bf16.mxu1 %v1423_v50  ;;  %v1502_v50 = vld [vmem:[%s2047_s1 + $0x2b0] ss:$8 sps:$4 sm:$0xff]  }
  0x33   :  { %822 = vmatpush2.bf16.msra.mxu0 %v1425_v52  ;;  %v1514_v52 = vld [vmem:[%s2047_s1 + $0x2a0] ss:$8 sps:$4 sm:$0xff]  }
  0x34   :  { %895 = vmatpush2.bf16.msra.mxu1 %v1426_v53  ;;  %823 = vmatprep.subr.bf16.mxu0 %v1427_v54  ;;  %v1519_v53 = vld [vmem:[%s2047_s1 + $0x294] ss:$8 sps:$4 sm:$0xff]  }
  0x35   :  { %896 = vmatprep.subr.bf16.mxu1 %v1429_v55  ;;  %v1535_v54 = vld [vmem:[%s2048_s0 + $0xc0] ss:$28 sps:$4 sm:$0xff]   ;;  %v1517_v55 = vld [vmem:[%s2047_s1 + $0x290] ss:$8 sps:$4 sm:$0xff]  }
  0x37   :  { %824 = vmatpush2.bf16.msra.mxu0 %v1431_v56  ;;  %v1522_v56 = vld [vmem:[%s2047_s1 + $0x284] ss:$8 sps:$4 sm:$0xff]  }
  0x38   :  { %897 = vmatpush2.bf16.msra.mxu1 %v1432_v57  ;;  %825 = vmatprep.subr.bf16.mxu0 %v1433_v58  ;;  %v1520_v57 = vld [vmem:[%s2047_s1 + $0x280] ss:$8 sps:$4 sm:$0xff]   ;;  %v1524_v58 = vld [vmem:[%s2048_s0 + $0x10] ss:$28 sps:$4 sm:$0xff]  }
  0x39   :  { %898 = vmatprep.subr.bf16.mxu1 %v1435_v59  ;;  %v1528_v59 = vld [vmem:[%s2048_s0 + $0x4c] ss:$28 sps:$4 sm:$0xff]  }
  0x3b   :  { %826 = vmatpush2.bf16.msra.mxu0 %v1437_v60  ;;  %v1530_v60 = vld [vmem:[%s2048_s0 + $0x48] ss:$28 sps:$4 sm:$0xff]  }
  0x3c   :  { %899 = vmatpush2.bf16.msra.mxu1 %v1438_v61  ;;  %827 = vmatprep.subr.bf16.mxu0 %v1439_v62  ;;  %v1532_v61 = vld [vmem:[%s2048_s0 + $0x84] ss:$28 sps:$4 sm:$0xff]  }
  0x3d   :  { %900 = vmatprep.subr.bf16.mxu1 %v1441_v63  ;;  %v1534_v62 = vld [vmem:[%s2048_s0 + $0x80] ss:$28 sps:$4 sm:$0xff]  }
  0x3e   :  { %v1536_v63 = vld [vmem:[%s2048_s0 + $0xbc] ss:$28 sps:$4 sm:$0xff]  }
  0x3f   :  { %828 = vmatpush2.bf16.msra.mxu0 %v1443_v0  ;;  %v1538_v0 = vld [vmem:[%s2048_s0 + $0xb8] ss:$28 sps:$4 sm:$0xff]  }
  0x40   :  { %901 = vmatpush2.bf16.msra.mxu1 %v1444_v1  ;;  %943 = vmatprep.subr.bf16.mxu0 %v1453_v2 }
  0x41   :  { %1028 = vmatprep.subr.bf16.mxu1 %v1484_v3 }
  0x42   :  { %830 = vmatmul.mubr.bf16.vlgmr.msra.gmra.mxu0 %v1445_v4 }
  0x43   :  { %903 = vmatmul.mubr.bf16.vlgmr.msra.gmra.mxu1 %v1448_v5  ;;  %944 = vmatpush1.bf16.msra.mxu0 %v1451_v6 }
  0x44   :  { %839 = vmatprep.mubr.bf16.mxu0 %v1478_v8  ;;  %945 = vmatprep.subr.bf16.mxu0 %v1456_v7 }
  0x45   :  { %912 = vmatprep.mubr.bf16.mxu1 %v1480_v9  ;;  %1029 = vmatpush1.bf16.msra.mxu1 %v1482_v10 }
  0x46   :  { %1030 = vmatprep.subr.bf16.mxu1 %v1511_v18 }
  0x47   :  { %946 = vmatpush1.bf16.msra.mxu0 %v1454_v11 }
  0x48   :  { %947 = vmatprep.subr.bf16.mxu0 %v1459_v12 }
  0x49   :  { %1031 = vmatpush1.bf16.msra.mxu1 %v1509_v20 }
  0x4a   :  { %840 = vmatmul.mubr.bf16.gmra.mxu0 %v1485_v14 }
  0x4b   :  { %913 = vmatmul.mubr.bf16.gmra.mxu1 %v1486_v15  ;;  %948 = vmatpush1.bf16.msra.mxu0 %v1457_v13 }
  0x4c   :  { %849 = vmatprep.mubr.bf16.mxu0 %v1493_v17  ;;  %949 = vmatprep.subr.bf16.mxu0 %v1462_v16 }
  0x4d   :  { %922 = vmatprep.mubr.bf16.mxu1 %v1495_v19 }
  0x4f   :  { %950 = vmatpush1.bf16.msra.mxu0 %v1460_v21 }
  0x50   :  { %951 = vmatprep.subr.bf16.mxu0 %v1465_v22 }
  0x52   :  { %850 = vmatmul.mubr.bf16.gmra.mxu0 %v1497_v24 }
  0x53   :  { %923 = vmatmul.mubr.bf16.gmra.mxu1 %v1498_v25  ;;  %952 = vmatpush1.bf16.msra.mxu0 %v1463_v23 }
  0x54   :  { %859 = vmatprep.mubr.bf16.mxu0 %v1505_v26  ;;  %953 = vmatprep.subr.bf16.mxu0 %v1468_v27 }
  0x55   :  { %932 = vmatprep.mubr.bf16.mxu1 %v1507_v28 }
  0x57   :  { %954 = vmatpush1.bf16.msra.mxu0 %v1466_v29 }
  0x58   :  { %955 = vmatprep.subr.bf16.mxu0 %v1471_v30 }
  0x5a   :  { %860 = vmatmul.mubr.bf16.gmra.mxu0 %v1512_v31 }
  0x5b   :  { %933 = vmatmul.mubr.bf16.gmra.mxu1 %v1513_v32  ;;  %956 = vmatpush1.bf16.msra.mxu0 %v1469_v33 }
  0x5c   :  { %1048 = vmatprep.mubr.bf16.mxu1 %v1539_v37  ;;  %957 = vmatprep.subr.bf16.mxu0 %v1474_v34 }
  0x5d   :  { %975 = vmatprep.mubr.bf16.mxu0 %v1526_v35 }
  0x5f   :  { %958 = vmatpush1.bf16.msra.mxu0 %v1472_v36 }
  0x60   :  { %959 = vmatprep.subr.bf16.mxu0 %v1477_v38 }
  0x63   :  { %1328 = vmatmul.mubr.msk.bf16.vlgmr.msra.gmra.mxu1 %vm784_vm0, %v1523_v39  ;;  %960 = vmatpush2.bf16.msra.mxu0 %v1475_v40 }
  0x64   :  { %1058 = vmatprep.mubr.bf16.mxu1 %v1539_v37  ;;  %961 = vmatprep.subr.bf16.mxu0 %v1489_v41 }
  0x67   :  { %962 = vmatpush2.bf16.msra.mxu0 %v1487_v42 }
  0x68   :  { %963 = vmatprep.subr.bf16.mxu0 %v1492_v43 }
  0x6b   :  { %1329 = vmatmul.mubr.msk.bf16.gmra.mxu1 %vm784_vm0, %v1527_v44  ;;  %964 = vmatpush2.bf16.msra.mxu0 %v1490_v45 }
  0x6c   :  { %1068 = vmatprep.mubr.bf16.mxu1 %v1539_v37  ;;  %965 = vmatprep.subr.bf16.mxu0 %v1501_v46 }
  0x6f   :  { %966 = vmatpush2.bf16.msra.mxu0 %v1499_v47 }
  0x70   :  { %967 = vmatprep.subr.bf16.mxu0 %v1504_v48 }
  0x73   :  { %1330 = vmatmul.mubr.msk.bf16.gmra.mxu1 %vm784_vm0, %v1531_v49  ;;  %968 = vmatpush2.bf16.msra.mxu0 %v1502_v50 }
  0x74   :  { %1078 = vmatprep.mubr.bf16.mxu1 %v1539_v37  ;;  %969 = vmatprep.subr.bf16.mxu0 %v1516_v51 }
  0x77   :  { %970 = vmatpush2.bf16.msra.mxu0 %v1514_v52 }
  0x78   :  { %971 = vmatprep.subr.bf16.mxu0 %v1519_v53 }
  0x7b   :  { %1331 = vmatmul.mubr.msk.bf16.gmra.mxu1 %vm784_vm0, %v1535_v54  ;;  %972 = vmatpush2.bf16.msra.mxu0 %v1517_v55 }
  0x7c   :  { %973 = vmatprep.subr.bf16.mxu0 %v1522_v56 }
  0x7f   :  { %974 = vmatpush2.bf16.msra.mxu0 %v1520_v57 }
  0x82   :  { %976 = vmatmul.mubr.bf16.vlgmr.msra.gmra.mxu0 %v1524_v58 }
  0x83   :  { %985 = vmatprep.mubr.bf16.mxu0 %v1528_v59 }
  0x8a   :  { %986 = vmatmul.mubr.bf16.gmra.mxu0 %v1530_v60 }
  0x8b   :  { %995 = vmatprep.mubr.bf16.mxu0 %v1532_v61 }
  0x92   :  { %996 = vmatmul.mubr.bf16.gmra.mxu0 %v1534_v62 }
  0x93   :  { %1005 = vmatprep.mubr.bf16.mxu0 %v1536_v63 }
  0x9a   :  { %1006 = vmatmul.mubr.bf16.gmra.mxu0 %v1538_v0 }
 0x102   :  { %v831_v3 = vpop.f32.mrf.mxu0 }
 0x103   :  { %v904_v1 = vpop.f32.mrf.mxu1 }
 0x104   :  { %v833_v6 = vpop.f32.mrf.mxu0  ;;  %v905_v40 = vadd.f32 %v904_v1, %v831_v3 }
 0x105   :  { %v906_v2 = vpop.f32.mrf.mxu1 }
 0x106   :  { %v835_v9 = vpop.f32.mrf.mxu0  ;;  %v907_v42 = vadd.f32 %v906_v2, %v833_v6 }
 0x107   :  { %v908_v4 = vpop.f32.mrf.mxu1 }
 0x108   :  { %v837_v12 = vpop.f32.mrf.mxu0  ;;  %v909_v46 = vadd.f32 %v908_v4, %v835_v9 }
 0x109   :  { %v910_v5 = vpop.f32.mrf.mxu1 }
 0x10a   :  { %v841_v14 = vpop.f32.mrf.mxu0  ;;  %v911_v54 = vadd.f32 %v910_v5, %v837_v12 }
 0x10b   :  { %v914_v7 = vpop.f32.mrf.mxu1 }
 0x10c   :  { %v843_v17 = vpop.f32.mrf.mxu0  ;;  %v915_v56 = vadd.f32 %v914_v7, %v841_v14 }
 0x10d   :  { %v916_v8 = vpop.f32.mrf.mxu1 }
 0x10e   :  { %v845_v20 = vpop.f32.mrf.mxu0  ;;  %v917_v61 = vadd.f32 %v916_v8, %v843_v17 }
 0x10f   :  { %v1943_v10 = vpop.f32.mrf.mxu1 }
 0x110   :  { %v1959_v22 = vpop.f32.mrf.mxu0  ;;  %v919_v7 = vadd.f32 %v1943_v10, %v845_v20 }
 0x111   :  { %v1945_v11 = vpop.f32.mrf.mxu1 }
 0x112   :  { %v1963_v24 = vpop.f32.mrf.mxu0 }
 0x113   :  { %v1947_v13 = vpop.f32.mrf.mxu1 }
 0x114   :  { %v1967_v27 = vpop.f32.mrf.mxu0 }
 0x115   :  { %v1949_v15 = vpop.f32.mrf.mxu1 }
 0x116   :  { %v1969_v29 = vpop.f32.mrf.mxu0 }
 0x117   :  { %v1951_v16 = vpop.f32.mrf.mxu1 }
 0x118   :  { %v1971_v31 = vpop.f32.mrf.mxu0 }
 0x119   :  { %v1953_v18 = vpop.f32.mrf.mxu1 }
 0x11a   :  { %v1973_v33 = vpop.f32.mrf.mxu0 }
 0x11b   :  { %v1955_v19 = vpop.f32.mrf.mxu1 }
 0x11c   :  { %v1975_v35 = vpop.f32.mrf.mxu0 }
 0x11d   :  { %v1957_v21 = vpop.f32.mrf.mxu1 }
 0x11e   :  { %v1977_v37 = vpop.f32.mrf.mxu0 }
 0x11f   :  { %v1961_v23 = vpop.f32.mrf.mxu1 }
 0x120   :  { %v1979_v39 = vpop.f32.mrf.mxu0 }
 0x121   :  { %v1965_v25 = vpop.f32.mrf.mxu1 }
 0x123   :  { %v1050_v26 = vpop.f32.mrf.mxu1 }
 0x125   :  { %v1052_v28 = vpop.f32.mrf.mxu1 }
 0x127   :  { %v1054_v30 = vpop.f32.mrf.mxu1 }
 0x129   :  { %v1056_v32 = vpop.f32.mrf.mxu1 }
 0x12b   :  { %v1060_v34 = vpop.f32.mrf.mxu1 }
 0x12d   :  { %v1062_v36 = vpop.f32.mrf.mxu1 }
 0x12f   :  { %v1064_v38 = vpop.f32.mrf.mxu1 }
 0x131   :  { %v1981_v44 = vpop.f32.mrf.mxu1 }
 0x133   :  { %v1070_v53 = vpop.f32.mrf.mxu1 }
 0x135   :  { %v1072_v2 = vpop.f32.mrf.mxu1 }
 0x142   :  { %v977_v41 = vpop.f32.mrf.mxu0 }
 0x143   :  { %v978_v43 = vadd.f32 %v977_v41, %v905_v40  ;;  %v925_v40 = vadd.f32 %v1947_v13, %v1963_v24 }
 0x144   :  { %v979_v45 = vpop.f32.mrf.mxu0 }
 0x145   :  { %v1051_v47 = vadd.f32 %v1050_v26, %v978_v43  ;;  %v980_v48 = vadd.f32 %v979_v45, %v907_v42 }
 0x146   :  { %v981_v49 = vpop.f32.mrf.mxu0 }
 0x147   :  { %v1105_v50 = vmul.f32 0.02, %v1051_v47  ;;  %v1053_v51 = vadd.f32 %v1052_v28, %v980_v48  ;;  %v982_v52 = vadd.f32 %v981_v49, %v909_v46  ;;  %vm1089_vm1 = vcmp.ge.f32.partialorder %v1051_v47, 0.0 }
 0x148   :  { %v983_v55 = vpop.f32.mrf.mxu0 }
 0x149   :  { %vm1090_vm4 = vcmp.ge.f32.partialorder %v1053_v51, 0.0  ;;  %v1106_v57 = vmul.f32 0.02, %v1053_v51  ;;  %v1055_v58 = vadd.f32 %v1054_v30, %v982_v52  ;;  %v984_v59 = vadd.f32 %v983_v55, %v911_v54  ;;  %v1074_v30 = vpop.f32.mrf.mxu1 }
 0x14a   :  { %v987_v60 = vpop.f32.mrf.mxu0  ;;  %v1121_v62 = vsel %vm1089_vm1, %v1051_v47, %v1105_v50  ;;  %v929_v50 = vadd.f32 %v1951_v16, %v1969_v29 }
 0x14b   :  { %v1122_v63 = vsel %vm1090_vm4, %v1053_v51, %v1106_v57  ;;  %v988_v1 = vadd.f32 %v987_v60, %v915_v56  ;;  %v1107_v4 = vmul.f32 0.02, %v1055_v58  ;;  %v1057_v5 = vadd.f32 %v1056_v32, %v984_v59  ;;  %v1076_v48 = vpop.f32.mrf.mxu1 }
 0x14c   :  { %v1340_v3 = vpack.c.bf16 %v1122_v63, %v1121_v62  ;;  %v989_v6 = vpop.f32.mrf.mxu0  ;;  %vm1091_vm6 = vcmp.ge.f32.partialorder %v1055_v58, 0.0  ;;  %v921_v32 = vadd.f32 %v1945_v11, %v1959_v22  ;;  %v931_v57 = vadd.f32 %v1953_v18, %v1971_v31 }
 0x14d   :  { %v1061_v9 = vadd.f32 %v1060_v34, %v988_v1  ;;  %v990_v12 = vadd.f32 %v989_v6, %v917_v61  ;;  %vm1092_vm7 = vcmp.ge.f32.partialorder %v1057_v5, 0.0  ;;  %v1108_v8 = vmul.f32 0.02, %v1057_v5 }
 0x14e   :  { %1188 = vst.msk [vmem:[%s2049_s2] sm:$0xff] %vm1983_vm5, %v1340_v3  ;;  %v991_v14 = vpop.f32.mrf.mxu0  ;;  %v1123_v10 = vsel %vm1091_vm6, %v1055_v58, %v1107_v4  ;;  %v935_v58 = vadd.f32 %v1955_v19, %v1973_v33  ;;  %v937_v1 = vadd.f32 %v1957_v21, %v1975_v35  ;;  %v939_v6 = vadd.f32 %v1961_v23, %v1977_v37 }
 0x14f   :  { %v1109_v17 = vmul.f32 0.02, %v1061_v9  ;;  %v1063_v26 = vadd.f32 %v1062_v36, %v990_v12  ;;  %v992_v28 = vadd.f32 %v991_v14, %v919_v7  ;;  %v1124_v20 = vsel %vm1092_vm7, %v1057_v5, %v1108_v8 }
 0x150   :  { %vm1093_vm8 = vcmp.ge.f32.partialorder %v1061_v9, 0.0  ;;  %v993_v34 = vpop.f32.mrf.mxu0  ;;  %v1341_v41 = vpack.c.bf16 %v1124_v20, %v1123_v10  ;;  %v927_v36 = vadd.f32 %v1949_v15, %v1967_v27 }
 0x151   :  { %vm1094_vm9 = vcmp.ge.f32.partialorder %v1063_v26, 0.0  ;;  %v1110_v42 = vmul.f32 0.02, %v1063_v26  ;;  %v1065_v43 = vadd.f32 %v1064_v38, %v992_v28  ;;  %v994_v45 = vadd.f32 %v993_v34, %v921_v32 }
 0x152   :  { %v997_v46 = vpop.f32.mrf.mxu0  ;;  %1189 = vst.msk [vmem:[%s2049_s2 + $0x8] sm:$0xff] %vm1983_vm5, %v1341_v41  ;;  %v1125_v11 = vsel %vm1093_vm8, %v1061_v9, %v1109_v17 }
 0x153   :  { %v1126_v22 = vsel %vm1094_vm9, %v1063_v26, %v1110_v42  ;;  %v998_v47 = vadd.f32 %v997_v46, %v925_v40  ;;  %v1111_v24 = vmul.f32 0.02, %v1065_v43  ;;  %v1067_v49 = vadd.f32 %v1981_v44, %v994_v45  ;;  %v1080_v44 = vpop.f32.mrf.mxu1 }
 0x154   :  { %v1342_v13 = vpack.c.bf16 %v1126_v22, %v1125_v11  ;;  %v999_v38 = vpop.f32.mrf.mxu0  ;;  %vm1095_vm10 = vcmp.ge.f32.partialorder %v1065_v43, 0.0  ;;  %v941_v26 = vadd.f32 %v1965_v25, %v1979_v39 }
 0x155   :  { %v1071_v15 = vadd.f32 %v1070_v53, %v998_v47  ;;  %v1000_v27 = vadd.f32 %v999_v38, %v927_v36  ;;  %vm1096_vm11 = vcmp.ge.f32.partialorder %v1067_v49, 0.0  ;;  %v1112_v51 = vmul.f32 0.02, %v1067_v49 }
 0x156   :  { %1190 = vst.msk [vmem:[%s2049_s2 + $0x10] sm:$0xff] %vm1983_vm5, %v1342_v13  ;;  %v1001_v52 = vpop.f32.mrf.mxu0  ;;  %v1127_v16 = vsel %vm1095_vm10, %v1065_v43, %v1111_v24 }
 0x157   :  { %v1113_v54 = vmul.f32 0.02, %v1071_v15  ;;  %v1073_v55 = vadd.f32 %v1072_v2, %v1000_v27  ;;  %v1002_v56 = vadd.f32 %v1001_v52, %v929_v50  ;;  %v1128_v29 = vsel %vm1096_vm11, %v1067_v49, %v1112_v51  ;;  %v1082_v2 = vpop.f32.mrf.mxu1 }
 0x158   :  { %vm1097_vm12 = vcmp.ge.f32.partialorder %v1071_v15, 0.0  ;;  %v1003_v53 = vpop.f32.mrf.mxu0  ;;  %v1343_v59 = vpack.c.bf16 %v1128_v29, %v1127_v16 }
 0x159   :  { %vm1098_vm13 = vcmp.ge.f32.partialorder %v1073_v55, 0.0  ;;  %v1114_v60 = vmul.f32 0.02, %v1073_v55  ;;  %v1075_v61 = vadd.f32 %v1074_v30, %v1002_v56  ;;  %v1004_v62 = vadd.f32 %v1003_v53, %v931_v57  ;;  %v1084_v8 = vpop.f32.mrf.mxu1 }
 0x15a   :  { %v1007_v63 = vpop.f32.mrf.mxu0  ;;  %1191 = vst.msk [vmem:[%s2049_s2 + $0x18] sm:$0xff] %vm1983_vm5, %v1343_v59  ;;  %v1129_v18 = vsel %vm1097_vm12, %v1071_v15, %v1113_v54 }
 0x15b   :  { %v1130_v31 = vsel %vm1098_vm13, %v1073_v55, %v1114_v60  ;;  %v1008_v3 = vadd.f32 %v1007_v63, %v935_v58  ;;  %v1115_v33 = vmul.f32 0.02, %v1075_v61  ;;  %v1077_v4 = vadd.f32 %v1076_v48, %v1004_v62  ;;  %v1086_v41 = vpop.f32.mrf.mxu1 }
 0x15c   :  { %v1344_v19 = vpack.c.bf16 %v1130_v31, %v1129_v18  ;;  %v1009_v5 = vpop.f32.mrf.mxu0  ;;  %vm1099_vm14 = vcmp.ge.f32.partialorder %v1075_v61, 0.0 }
 0x15d   :  { %v1081_v7 = vadd.f32 %v1080_v44, %v1008_v3  ;;  %v1010_v21 = vadd.f32 %v1009_v5, %v937_v1  ;;  %vm1100_vm15 = vcmp.ge.f32.partialorder %v1077_v4, 0.0  ;;  %v1116_v35 = vmul.f32 0.02, %v1077_v4 }
 0x15e   :  { %1192 = vst.msk [vmem:[%s2049_s2 + $0x20] sm:$0xff] %vm1983_vm5, %v1344_v19  ;;  %v1011_v9 = vpop.f32.mrf.mxu0  ;;  %v1131_v23 = vsel %vm1099_vm14, %v1075_v61, %v1115_v33 }
 0x15f   :  { %v1117_v12 = vmul.f32 0.02, %v1081_v7  ;;  %v1083_v14 = vadd.f32 %v1082_v2, %v1010_v21  ;;  %v1012_v17 = vadd.f32 %v1011_v9, %v939_v6  ;;  %v1132_v37 = vsel %vm1100_vm15, %v1077_v4, %v1116_v35 }
 0x160   :  { %vm1101_vm0 = vcmp.ge.f32.partialorder %v1081_v7, 0.0  ;;  %v1013_v28 = vpop.f32.mrf.mxu0  ;;  %v1345_v30 = vpack.c.bf16 %v1132_v37, %v1131_v23 }
 0x161   :  { %vm1102_vm1 = vcmp.ge.f32.partialorder %v1083_v14, 0.0  ;;  %v1118_v32 = vmul.f32 0.02, %v1083_v14  ;;  %v1085_v10 = vadd.f32 %v1084_v8, %v1012_v17  ;;  %v1014_v20 = vadd.f32 %v1013_v28, %v941_v26 }
 0x162   :  { %1193 = vst.msk [vmem:[%s2049_s2 + $0x28] sm:$0xff] %vm1983_vm5, %v1345_v30  ;;  %v1133_v34 = vsel %vm1101_vm0, %v1081_v7, %v1117_v12 }
 0x163   :  { %v1134_v40 = vsel %vm1102_vm1, %v1083_v14, %v1118_v32  ;;  %v1119_v25 = vmul.f32 0.02, %v1085_v10  ;;  %v1087_v39 = vadd.f32 %v1086_v41, %v1014_v20  ;;  %vm1103_vm2 = vcmp.ge.f32.partialorder %v1085_v10, 0.0 }
 0x164   :  { %v1346_v42 = vpack.c.bf16 %v1134_v40, %v1133_v34 }
 0x165   :  { %vm1104_vm3 = vcmp.ge.f32.partialorder %v1087_v39, 0.0  ;;  %v1120_v43 = vmul.f32 0.02, %v1087_v39  ;;  %v1135_v45 = vsel %vm1103_vm2, %v1085_v10, %v1119_v25 }
 0x166   :  { %1194 = vst.msk [vmem:[%s2049_s2 + $0x30] sm:$0xff] %vm1983_vm5, %v1346_v42 }
 0x167   :  { %v1136_v46 = vsel %vm1104_vm3, %v1087_v39, %v1120_v43 }
 0x168   :  { %v1347_v36 = vpack.c.bf16 %v1136_v46, %v1135_v45 }
 0x16a   :  { %1195 = vst.msk [vmem:[%s2049_s2 + $0x38] sm:$0xff] %vm1983_vm5, %v1347_v36 }

// kernel: discriminator_forward.9
= control target key start
LH: loop header
LB: loop body
LE: loop exit
PB: predicated region body
PF: predicated region fallthrough
CT: control target
= control target key end

     0   :  { %vm1444_vm0 = vcmask 523264   ;;  %vm2260_vm1 = vcmask 142336   ;;  %s4069_s1 = inlined_call_operand.vmem [shape: bf16[1600,18], index: 1, kind: input, shape index: {}]   ;;  %s4070_s0 = inlined_call_operand.vmem [shape: bf16[128,1600], index: 0, kind: input, shape index: {}]   ;;  %s4071_s2 = inlined_call_operand.vmem [shape: bf16[128,18], index: 2, kind: output, shape index: {}]  }
   0x1   :  { %v2953_v0 = vld [vmem:[%s4069_s1 + $0x78] sm:$0xff]   ;;  %v2957_v4 = vld [vmem:[%s4069_s1 + $0x70] sm:$0xff]   ;;  %v2961_v8 = vld [vmem:[%s4069_s1 + $0x68] sm:$0xff]  }
   0x2   :  { %v2954_v1 = vld [vmem:[%s4069_s1 + $0xf8] sm:$0xff]   ;;  %2525 = vmatprep.subr.bf16.mxu0 %v2953_v0  ;;  %v2958_v5 = vld [vmem:[%s4069_s1 + $0xf0] sm:$0xff]   ;;  %v2962_v9 = vld [vmem:[%s4069_s1 + $0xe8] sm:$0xff]  }
   0x3   :  { %v2955_v2 = vld [vmem:[%s4069_s1 + $0x38] sm:$0xff]   ;;  %2589 = vmatprep.subr.bf16.mxu1 %v2954_v1  ;;  %v2959_v6 = vld [vmem:[%s4069_s1 + $0x30] sm:$0xff]   ;;  %v2963_v10 = vld [vmem:[%s4069_s1 + $0x28] sm:$0xff]  }
   0x4   :  { %v2956_v3 = vld [vmem:[%s4069_s1 + $0xb8] sm:$0xff]   ;;  %2526 = vmatpush3.bf16.msra.mxu0 %v2955_v2  ;;  %v2960_v7 = vld [vmem:[%s4069_s1 + $0xb0] sm:$0xff]   ;;  %v2964_v11 = vld [vmem:[%s4069_s1 + $0xa8] sm:$0xff]  }
   0x5   :  { %2590 = vmatpush3.bf16.msra.mxu1 %v2956_v3  ;;  %2527 = vmatprep.subr.bf16.mxu0 %v2957_v4  ;;  %v2965_v12 = vld [vmem:[%s4069_s1 + $0x60] sm:$0xff]   ;;  %v2969_v16 = vld [vmem:[%s4069_s1 + $0x58] sm:$0xff]   ;;  %v2973_v20 = vld [vmem:[%s4069_s1 + $0x50] sm:$0xff]  }
   0x6   :  { %2591 = vmatprep.subr.bf16.mxu1 %v2958_v5  ;;  %v2966_v13 = vld [vmem:[%s4069_s1 + $0xe0] sm:$0xff]   ;;  %v2970_v17 = vld [vmem:[%s4069_s1 + $0xd8] sm:$0xff]   ;;  %v2974_v21 = vld [vmem:[%s4069_s1 + $0xd0] sm:$0xff]  }
   0x7   :  { %v2967_v14 = vld [vmem:[%s4069_s1 + $0x20] sm:$0xff]   ;;  %v2971_v18 = vld [vmem:[%s4069_s1 + $0x18] sm:$0xff]   ;;  %v2975_v22 = vld [vmem:[%s4069_s1 + $0x10] sm:$0xff]  }
   0x8   :  { %2528 = vmatpush3.bf16.msra.mxu0 %v2959_v6  ;;  %v2968_v15 = vld [vmem:[%s4069_s1 + $0xa0] sm:$0xff]   ;;  %v2972_v19 = vld [vmem:[%s4069_s1 + $0x98] sm:$0xff]   ;;  %v2976_v23 = vld [vmem:[%s4069_s1 + $0x90] sm:$0xff]  }
   0x9   :  { %2592 = vmatpush3.bf16.msra.mxu1 %v2960_v7  ;;  %2529 = vmatprep.subr.bf16.mxu0 %v2961_v8  ;;  %v2977_v24 = vld [vmem:[%s4069_s1 + $0x48] sm:$0xff]   ;;  %v2981_v28 = vld [vmem:[%s4069_s1 + $0x40] sm:$0xff]   ;;  %v2991_v36 = vld [vmem:[%s4069_s1 + $0x178] sm:$0xff]  }
   0xa   :  { %2593 = vmatprep.subr.bf16.mxu1 %v2962_v9  ;;  %v2978_v25 = vld [vmem:[%s4069_s1 + $0xc8] sm:$0xff]   ;;  %v2982_v29 = vld [vmem:[%s4069_s1 + $0xc0] sm:$0xff]   ;;  %v2992_v37 = vld [vmem:[%s4069_s1 + $0x1f8] sm:$0xff]  }
   0xb   :  { %v2979_v26 = vld [vmem:[%s4069_s1 + $0x8] sm:$0xff]   ;;  %v2983_v30 = vld [vmem:[%s4069_s1] sm:$0xff]   ;;  %v2993_v38 = vld [vmem:[%s4069_s1 + $0x138] sm:$0xff]  }
   0xc   :  { %2530 = vmatpush3.bf16.msra.mxu0 %v2963_v10  ;;  %v2980_v27 = vld [vmem:[%s4069_s1 + $0x88] sm:$0xff]   ;;  %v2984_v31 = vld [vmem:[%s4069_s1 + $0x80] sm:$0xff]   ;;  %v2994_v39 = vld [vmem:[%s4069_s1 + $0x1b8] sm:$0xff]  }
   0xd   :  { %2594 = vmatpush3.bf16.msra.mxu1 %v2964_v11  ;;  %2531 = vmatprep.subr.bf16.mxu0 %v2965_v12  ;;  %v2985_v32 = vld [vmem:[%s4070_s0] ss:$52 sps:$4 sm:$0xff]   ;;  %v2987_v33 = vld [vmem:[%s4070_s0 + $0x4] ss:$52 sps:$4 sm:$0xff]   ;;  %v2988_v34 = vld [vmem:[%s4070_s0 + $0x8] ss:$52 sps:$4 sm:$0xff]  }
   0xe   :  { %2595 = vmatprep.subr.bf16.mxu1 %v2966_v13  ;;  %v2990_v35 = vld [vmem:[%s4070_s0 + $0xc] ss:$52 sps:$4 sm:$0xff]   ;;  %1501 = vmatprep.mubr.bf16.mxu0 %v2987_v33  ;;  %v2997_v41 = vld [vmem:[%s4070_s0 + $0x74] ss:$52 sps:$4 sm:$0xff]   ;;  %v3000_v43 = vld [vmem:[%s4070_s0 + $0x70] ss:$52 sps:$4 sm:$0xff]  }
   0xf   :  { %1598 = vmatprep.mubr.bf16.mxu1 %v2990_v35  ;;  %v2995_v40 = vld [vmem:[%s4070_s0 + $0x6c] ss:$52 sps:$4 sm:$0xff]   ;;  %v2999_v42 = vld [vmem:[%s4070_s0 + $0x68] ss:$52 sps:$4 sm:$0xff]   ;;  %v3001_v44 = vld [vmem:[%s4069_s1 + $0x170] sm:$0xff]  }
  0x10   :  { %2532 = vmatpush3.bf16.msra.mxu0 %v2967_v14  ;;  %v3002_v45 = vld [vmem:[%s4069_s1 + $0x1f0] sm:$0xff]   ;;  %v3010_v51 = vld [vmem:[%s4070_s0 + $0xd8] ss:$52 sps:$4 sm:$0xff]   ;;  %v3021_v60 = vld [vmem:[%s4069_s1 + $0x160] sm:$0xff]  }
  0x11   :  { %2596 = vmatpush3.bf16.msra.mxu1 %v2968_v15  ;;  %2533 = vmatprep.subr.bf16.mxu0 %v2969_v16  ;;  %v3003_v46 = vld [vmem:[%s4069_s1 + $0x130] sm:$0xff]   ;;  %v3011_v52 = vld [vmem:[%s4069_s1 + $0x168] sm:$0xff]   ;;  %v3017_v57 = vld [vmem:[%s4070_s0 + $0x144] ss:$52 sps:$4 sm:$0xff]  }
  0x12   :  { %2597 = vmatprep.subr.bf16.mxu1 %v2970_v17  ;;  %v3004_v47 = vld [vmem:[%s4069_s1 + $0x1b0] sm:$0xff]   ;;  %v3012_v53 = vld [vmem:[%s4069_s1 + $0x1e8] sm:$0xff]   ;;  %v3022_v61 = vld [vmem:[%s4069_s1 + $0x1e0] sm:$0xff]  }
  0x13   :  { %v3005_v48 = vld [vmem:[%s4070_s0 + $0xd4] ss:$52 sps:$4 sm:$0xff]   ;;  %v3007_v49 = vld [vmem:[%s4070_s0 + $0xdc] ss:$52 sps:$4 sm:$0xff]   ;;  %v3019_v58 = vld [vmem:[%s4070_s0 + $0x138] ss:$52 sps:$4 sm:$0xff]  }
  0x14   :  { %2534 = vmatpush3.bf16.msra.mxu0 %v2971_v18  ;;  %v3009_v50 = vld [vmem:[%s4070_s0 + $0xd0] ss:$52 sps:$4 sm:$0xff]   ;;  %v3013_v54 = vld [vmem:[%s4069_s1 + $0x128] sm:$0xff]   ;;  %v3020_v59 = vld [vmem:[%s4070_s0 + $0x140] ss:$52 sps:$4 sm:$0xff]  }
  0x15   :  { %2598 = vmatpush3.bf16.msra.mxu1 %v2972_v19  ;;  %2535 = vmatprep.subr.bf16.mxu0 %v2973_v20  ;;  %v3014_v55 = vld [vmem:[%s4069_s1 + $0x1a8] sm:$0xff]   ;;  %v3015_v56 = vld [vmem:[%s4070_s0 + $0x13c] ss:$52 sps:$4 sm:$0xff]   ;;  %v3023_v62 = vld [vmem:[%s4069_s1 + $0x120] sm:$0xff]  }
  0x16   :  { %2599 = vmatprep.subr.bf16.mxu1 %v2974_v21  ;;  %v3024_v63 = vld [vmem:[%s4069_s1 + $0x1a0] sm:$0xff]   ;;  %v3031_v3 = vld [vmem:[%s4069_s1 + $0x158] sm:$0xff]   ;;  %v3037_v9 = vld [vmem:[%s4070_s0 + $0x214] ss:$52 sps:$4 sm:$0xff]  }
  0x17   :  { %v3025_v0 = vld [vmem:[%s4070_s0 + $0x1a4] ss:$52 sps:$4 sm:$0xff]   ;;  %v3027_v1 = vld [vmem:[%s4070_s0 + $0x1ac] ss:$52 sps:$4 sm:$0xff]   ;;  %v3030_v4 = vld [vmem:[%s4070_s0 + $0x1a8] ss:$52 sps:$4 sm:$0xff]  }
  0x18   :  { %2536 = vmatpush3.bf16.msra.mxu0 %v2975_v22  ;;  %v3029_v2 = vld [vmem:[%s4070_s0 + $0x1a0] ss:$52 sps:$4 sm:$0xff]   ;;  %v3032_v5 = vld [vmem:[%s4069_s1 + $0x1d8] sm:$0xff]   ;;  %v3040_v15 = vld [vmem:[%s4070_s0 + $0x210] ss:$52 sps:$4 sm:$0xff]  }
  0x19   :  { %2600 = vmatpush3.bf16.msra.mxu1 %v2976_v23  ;;  %2537 = vmatprep.subr.bf16.mxu0 %v2977_v24  ;;  %v3033_v6 = vld [vmem:[%s4069_s1 + $0x118] sm:$0xff]   ;;  %v3035_v8 = vld [vmem:[%s4070_s0 + $0x20c] ss:$52 sps:$4 sm:$0xff]   ;;  %v3041_v10 = vld [vmem:[%s4069_s1 + $0x150] sm:$0xff]  }
  0x1a   :  { %2601 = vmatprep.subr.bf16.mxu1 %v2978_v25  ;;  %v3034_v7 = vld [vmem:[%s4069_s1 + $0x198] sm:$0xff]   ;;  %v3042_v11 = vld [vmem:[%s4069_s1 + $0x1d0] sm:$0xff]   ;;  %v3051_v18 = vld [vmem:[%s4069_s1 + $0x148] sm:$0xff]  }
  0x1b   :  { %v3039_v12 = vld [vmem:[%s4070_s0 + $0x208] ss:$52 sps:$4 sm:$0xff]   ;;  %v3043_v13 = vld [vmem:[%s4069_s1 + $0x110] sm:$0xff]   ;;  %v3050_v23 = vld [vmem:[%s4070_s0 + $0x278] ss:$52 sps:$4 sm:$0xff]  }
  0x1c   :  { %2538 = vmatpush3.bf16.msra.mxu0 %v2979_v26  ;;  %v3044_v14 = vld [vmem:[%s4069_s1 + $0x190] sm:$0xff]   ;;  %v3052_v19 = vld [vmem:[%s4069_s1 + $0x1c8] sm:$0xff]   ;;  %v3057_v25 = vld [vmem:[%s4070_s0 + $0x2e4] ss:$52 sps:$4 sm:$0xff]  }
  0x1d   :  { %2602 = vmatpush3.bf16.msra.mxu1 %v2980_v27  ;;  %2539 = vmatprep.subr.bf16.mxu0 %v2981_v28  ;;  %v3045_v16 = vld [vmem:[%s4070_s0 + $0x274] ss:$52 sps:$4 sm:$0xff]   ;;  %v3047_v17 = vld [vmem:[%s4070_s0 + $0x27c] ss:$52 sps:$4 sm:$0xff]   ;;  %v3061_v26 = vld [vmem:[%s4069_s1 + $0x140] sm:$0xff]  }
  0x1e   :  { %2603 = vmatprep.subr.bf16.mxu1 %v2982_v29  ;;  %v3053_v20 = vld [vmem:[%s4069_s1 + $0x108] sm:$0xff]   ;;  %v3049_v22 = vld [vmem:[%s4070_s0 + $0x270] ss:$52 sps:$4 sm:$0xff]   ;;  %v3071_v33 = vld [vmem:[%s4069_s1 + $0x278] sm:$0xff]  }
  0x1f   :  { %v3054_v21 = vld [vmem:[%s4069_s1 + $0x188] sm:$0xff]   ;;  %v3055_v24 = vld [vmem:[%s4070_s0 + $0x2dc] ss:$52 sps:$4 sm:$0xff]   ;;  %v3062_v27 = vld [vmem:[%s4069_s1 + $0x1c0] sm:$0xff]  }
  0x20   :  { %2540 = vmatpush3.bf16.msra.mxu0 %v2983_v30  ;;  %v3063_v28 = vld [vmem:[%s4069_s1 + $0x100] sm:$0xff]   ;;  %v3059_v30 = vld [vmem:[%s4070_s0 + $0x2d8] ss:$52 sps:$4 sm:$0xff]   ;;  %v3070_v35 = vld [vmem:[%s4070_s0 + $0x1c] ss:$52 sps:$4 sm:$0xff]  }
  0x21   :  { %2604 = vmatpush3.bf16.msra.mxu1 %v2984_v31  ;;  %2653 = vmatprep.subr.bf16.mxu0 %v2991_v36  ;;  %v3064_v29 = vld [vmem:[%s4069_s1 + $0x180] sm:$0xff]  }
  0x22   :  { %2717 = vmatprep.subr.bf16.mxu1 %v2992_v37  ;;  %v3060_v31 = vld [vmem:[%s4070_s0 + $0x2e0] ss:$52 sps:$4 sm:$0xff]   ;;  %v3065_v36 = vld [vmem:[%s4070_s0 + $0x10] ss:$52 sps:$4 sm:$0xff]   ;;  %v3068_v37 = vld [vmem:[%s4070_s0 + $0x18] ss:$52 sps:$4 sm:$0xff]  }
  0x23   :  { %1502 = vmatmul.mubr.bf16.vlgmr.msra.gmra.mxu0 %v2985_v32  ;;  %v3067_v32 = vld [vmem:[%s4070_s0 + $0x14] ss:$52 sps:$4 sm:$0xff]  }
  0x24   :  { %1599 = vmatmul.mubr.bf16.vlgmr.msra.gmra.mxu1 %v2988_v34  ;;  %2654 = vmatpush3.bf16.msra.mxu0 %v2993_v38  ;;  %v3072_v34 = vld [vmem:[%s4069_s1 + $0x2f8] sm:$0xff]  }
  0x25   :  { %2718 = vmatpush3.bf16.msra.mxu1 %v2994_v39  ;;  %1509 = vmatprep.mubr.bf16.mxu0 %v2995_v40  ;;  %v3073_v38 = vld [vmem:[%s4069_s1 + $0x238] sm:$0xff]  }
  0x26   :  { %1606 = vmatprep.mubr.bf16.mxu1 %v2997_v41  ;;  %2655 = vmatprep.subr.bf16.mxu0 %v3001_v44  ;;  %v3074_v39 = vld [vmem:[%s4069_s1 + $0x2b8] sm:$0xff]   ;;  %v3083_v44 = vld [vmem:[%s4069_s1 + $0x230] sm:$0xff]  }
  0x27   :  { %2719 = vmatprep.subr.bf16.mxu1 %v3002_v45  ;;  %v3075_v40 = vld [vmem:[%s4070_s0 + $0x7c] ss:$52 sps:$4 sm:$0xff]   ;;  %v3077_v41 = vld [vmem:[%s4070_s0 + $0x84] ss:$52 sps:$4 sm:$0xff]  }
  0x28   :  { %2656 = vmatpush3.bf16.msra.mxu0 %v3003_v46  ;;  %v3084_v45 = vld [vmem:[%s4069_s1 + $0x2b0] sm:$0xff]   ;;  %v3079_v46 = vld [vmem:[%s4070_s0 + $0x78] ss:$52 sps:$4 sm:$0xff]  }
  0x29   :  { %2720 = vmatpush3.bf16.msra.mxu1 %v3004_v47  ;;  %2657 = vmatprep.subr.bf16.mxu0 %v3011_v52  ;;  %v3091_v47 = vld [vmem:[%s4069_s1 + $0x268] sm:$0xff]  }
  0x2a   :  { %2721 = vmatprep.subr.bf16.mxu1 %v3012_v53  ;;  %v3093_v52 = vld [vmem:[%s4069_s1 + $0x228] sm:$0xff]  }
  0x2b   :  { %1510 = vmatmul.mubr.bf16.gmra.mxu0 %v2999_v42  ;;  %v3081_v42 = vld [vmem:[%s4069_s1 + $0x270] sm:$0xff]   ;;  %v3094_v53 = vld [vmem:[%s4069_s1 + $0x2a8] sm:$0xff]  }
  0x2c   :  { %1607 = vmatmul.mubr.bf16.gmra.mxu1 %v3000_v43  ;;  %1517 = vmatprep.mubr.bf16.mxu0 %v3005_v48  ;;  %v3082_v43 = vld [vmem:[%s4069_s1 + $0x2f0] sm:$0xff]  }
  0x2d   :  { %1614 = vmatprep.mubr.bf16.mxu1 %v3007_v49  ;;  %2658 = vmatpush3.bf16.msra.mxu0 %v3013_v54  ;;  %v3080_v48 = vld [vmem:[%s4070_s0 + $0x80] ss:$52 sps:$4 sm:$0xff]   ;;  %v3092_v49 = vld [vmem:[%s4069_s1 + $0x2e8] sm:$0xff]  }
  0x2e   :  { %2722 = vmatpush3.bf16.msra.mxu1 %v3014_v55  ;;  %2659 = vmatprep.subr.bf16.mxu0 %v3021_v60  ;;  %v3101_v54 = vld [vmem:[%s4069_s1 + $0x260] sm:$0xff]  }
  0x2f   :  { %2723 = vmatprep.subr.bf16.mxu1 %v3022_v61  ;;  %v3102_v55 = vld [vmem:[%s4069_s1 + $0x2e0] sm:$0xff]   ;;  %v3097_v61 = vld [vmem:[%s4070_s0 + $0x154] ss:$52 sps:$4 sm:$0xff]  }
  0x30   :  { %v3095_v60 = vld [vmem:[%s4070_s0 + $0x14c] ss:$52 sps:$4 sm:$0xff]  }
  0x31   :  { %2660 = vmatpush3.bf16.msra.mxu0 %v3023_v62  ;;  %v3111_v62 = vld [vmem:[%s4069_s1 + $0x258] sm:$0xff]  }
  0x32   :  { %2724 = vmatpush3.bf16.msra.mxu1 %v3024_v63  ;;  %2661 = vmatprep.subr.bf16.mxu0 %v3031_v3  ;;  %v3112_v63 = vld [vmem:[%s4069_s1 + $0x2d8] sm:$0xff]   ;;  %v3100_v3 = vld [vmem:[%s4070_s0 + $0x150] ss:$52 sps:$4 sm:$0xff]  }
  0x33   :  { %1518 = vmatmul.mubr.bf16.gmra.mxu0 %v3009_v50  ;;  %2725 = vmatprep.subr.bf16.mxu1 %v3032_v5  ;;  %v3085_v50 = vld [vmem:[%s4070_s0 + $0xe4] ss:$52 sps:$4 sm:$0xff]   ;;  %v3107_v5 = vld [vmem:[%s4070_s0 + $0x1bc] ss:$52 sps:$4 sm:$0xff]  }
  0x34   :  { %1615 = vmatmul.mubr.bf16.gmra.mxu1 %v3010_v51  ;;  %1525 = vmatprep.mubr.bf16.mxu0 %v3015_v56  ;;  %v3087_v51 = vld [vmem:[%s4070_s0 + $0xec] ss:$52 sps:$4 sm:$0xff]  }
  0x35   :  { %1622 = vmatprep.mubr.bf16.mxu1 %v3017_v57  ;;  %2662 = vmatpush3.bf16.msra.mxu0 %v3033_v6  ;;  %v3089_v56 = vld [vmem:[%s4070_s0 + $0xe0] ss:$52 sps:$4 sm:$0xff]  }
  0x36   :  { %2726 = vmatpush3.bf16.msra.mxu1 %v3034_v7  ;;  %2663 = vmatprep.subr.bf16.mxu0 %v3041_v10  ;;  %v3103_v57 = vld [vmem:[%s4069_s1 + $0x220] sm:$0xff]   ;;  %v3121_v6 = vld [vmem:[%s4069_s1 + $0x250] sm:$0xff]  }
  0x37   :  { %2727 = vmatprep.subr.bf16.mxu1 %v3042_v11  ;;  %v3122_v7 = vld [vmem:[%s4069_s1 + $0x2d0] sm:$0xff]   ;;  %v3110_v11 = vld [vmem:[%s4070_s0 + $0x1b8] ss:$52 sps:$4 sm:$0xff]  }
  0x38   :  { %v3109_v10 = vld [vmem:[%s4070_s0 + $0x1b0] ss:$52 sps:$4 sm:$0xff]  }
  0x39   :  { %2664 = vmatpush3.bf16.msra.mxu0 %v3043_v13  ;;  %v3117_v13 = vld [vmem:[%s4070_s0 + $0x224] ss:$52 sps:$4 sm:$0xff]  }
  0x3a   :  { %2728 = vmatpush3.bf16.msra.mxu1 %v3044_v14  ;;  %2665 = vmatprep.subr.bf16.mxu0 %v3051_v18  ;;  %v3131_v14 = vld [vmem:[%s4069_s1 + $0x248] sm:$0xff]  }
  0x3b   :  { %1526 = vmatmul.mubr.bf16.gmra.mxu0 %v3019_v58  ;;  %2729 = vmatprep.subr.bf16.mxu1 %v3052_v19  ;;  %v3104_v58 = vld [vmem:[%s4069_s1 + $0x2a0] sm:$0xff]   ;;  %v3119_v18 = vld [vmem:[%s4070_s0 + $0x218] ss:$52 sps:$4 sm:$0xff]  }
  0x3c   :  { %1623 = vmatmul.mubr.bf16.gmra.mxu1 %v3020_v59  ;;  %1533 = vmatprep.mubr.bf16.mxu0 %v3025_v0  ;;  %v3090_v59 = vld [vmem:[%s4070_s0 + $0xe8] ss:$52 sps:$4 sm:$0xff]   ;;  %v3120_v19 = vld [vmem:[%s4070_s0 + $0x220] ss:$52 sps:$4 sm:$0xff]  }
  0x3d   :  { %1630 = vmatprep.mubr.bf16.mxu1 %v3027_v1  ;;  %2666 = vmatpush3.bf16.msra.mxu0 %v3053_v20  ;;  %v3113_v0 = vld [vmem:[%s4069_s1 + $0x218] sm:$0xff]  }
  0x3e   :  { %2730 = vmatpush3.bf16.msra.mxu1 %v3054_v21  ;;  %2667 = vmatprep.subr.bf16.mxu0 %v3061_v26  ;;  %v3114_v1 = vld [vmem:[%s4069_s1 + $0x298] sm:$0xff]   ;;  %v3141_v21 = vld [vmem:[%s4069_s1 + $0x240] sm:$0xff]  }
  0x3f   :  { %2731 = vmatprep.subr.bf16.mxu1 %v3062_v27  ;;  %v3125_v20 = vld [vmem:[%s4070_s0 + $0x284] ss:$52 sps:$4 sm:$0xff]   ;;  %v3129_v27 = vld [vmem:[%s4070_s0 + $0x280] ss:$52 sps:$4 sm:$0xff]  }
  0x40   :  { %v3151_v26 = vld [vmem:[%s4069_s1 + $0x318] sm:$0xff]  }
  0x41   :  { %2668 = vmatpush3.bf16.msra.mxu0 %v3063_v28  ;;  %v3130_v28 = vld [vmem:[%s4070_s0 + $0x288] ss:$52 sps:$4 sm:$0xff]  }
  0x42   :  { %2732 = vmatpush3.bf16.msra.mxu1 %v3064_v29  ;;  %2781 = vmatprep.subr.bf16.mxu0 %v3071_v33  ;;  %v3135_v29 = vld [vmem:[%s4070_s0 + $0x2ec] ss:$52 sps:$4 sm:$0xff]   ;;  %v3147_v33 = vld [vmem:[%s4070_s0 + $0x24] ss:$52 sps:$4 sm:$0xff]  }
  0x43   :  { %1534 = vmatmul.mubr.bf16.gmra.mxu0 %v3029_v2  ;;  %2845 = vmatprep.subr.bf16.mxu1 %v3072_v34  ;;  %v3099_v2 = vld [vmem:[%s4070_s0 + $0x148] ss:$52 sps:$4 sm:$0xff]   ;;  %v3150_v34 = vld [vmem:[%s4070_s0 + $0x2c] ss:$52 sps:$4 sm:$0xff]  }
  0x44   :  { %1631 = vmatmul.mubr.bf16.gmra.mxu1 %v3030_v4  ;;  %1541 = vmatprep.mubr.bf16.mxu0 %v3035_v8  ;;  %v3105_v4 = vld [vmem:[%s4070_s0 + $0x1b4] ss:$52 sps:$4 sm:$0xff]  }
  0x45   :  { %1638 = vmatprep.mubr.bf16.mxu1 %v3037_v9  ;;  %v3123_v8 = vld [vmem:[%s4069_s1 + $0x210] sm:$0xff]  }
  0x46   :  { %v3124_v9 = vld [vmem:[%s4069_s1 + $0x290] sm:$0xff]  }
  0x4b   :  { %1542 = vmatmul.mubr.bf16.gmra.mxu0 %v3039_v12  ;;  %v3115_v12 = vld [vmem:[%s4070_s0 + $0x21c] ss:$52 sps:$4 sm:$0xff]  }
  0x4c   :  { %1639 = vmatmul.mubr.bf16.gmra.mxu1 %v3040_v15  ;;  %1549 = vmatprep.mubr.bf16.mxu0 %v3045_v16  ;;  %v3132_v15 = vld [vmem:[%s4069_s1 + $0x2c8] sm:$0xff]  }
  0x4d   :  { %1646 = vmatprep.mubr.bf16.mxu1 %v3047_v17  ;;  %v3133_v16 = vld [vmem:[%s4069_s1 + $0x208] sm:$0xff]  }
  0x4e   :  { %v3134_v17 = vld [vmem:[%s4069_s1 + $0x288] sm:$0xff]  }
  0x53   :  { %1550 = vmatmul.mubr.bf16.gmra.mxu0 %v3049_v22  ;;  %v3127_v22 = vld [vmem:[%s4070_s0 + $0x28c] ss:$52 sps:$4 sm:$0xff]  }
  0x54   :  { %1647 = vmatmul.mubr.bf16.gmra.mxu1 %v3050_v23  ;;  %1557 = vmatprep.mubr.bf16.mxu0 %v3055_v24  ;;  %v3142_v23 = vld [vmem:[%s4069_s1 + $0x2c0] sm:$0xff]  }
  0x55   :  { %1654 = vmatprep.mubr.bf16.mxu1 %v3057_v25  ;;  %v3143_v24 = vld [vmem:[%s4069_s1 + $0x200] sm:$0xff]  }
  0x56   :  { %v3144_v25 = vld [vmem:[%s4069_s1 + $0x280] sm:$0xff]  }
  0x5b   :  { %1558 = vmatmul.mubr.bf16.gmra.mxu0 %v3059_v30  ;;  %v3137_v30 = vld [vmem:[%s4070_s0 + $0x2f4] ss:$52 sps:$4 sm:$0xff]  }
  0x5c   :  { %1655 = vmatmul.mubr.bf16.gmra.mxu1 %v3060_v31  ;;  %1695 = vmatprep.mubr.bf16.mxu0 %v3067_v32  ;;  %v3139_v31 = vld [vmem:[%s4070_s0 + $0x2e8] ss:$52 sps:$4 sm:$0xff]   ;;  %v3140_v32 = vld [vmem:[%s4070_s0 + $0x2f0] ss:$52 sps:$4 sm:$0xff]  }
  0x5d   :  { %1792 = vmatprep.mubr.bf16.mxu1 %v3070_v35  ;;  %v3145_v35 = vld [vmem:[%s4070_s0 + $0x20] ss:$52 sps:$4 sm:$0xff]  }
  0x63   :  { %1696 = vmatmul.mubr.bf16.vlgmr.msra.gmra.mxu0 %v3065_v36  ;;  %v3148_v36 = vld [vmem:[%s4070_s0 + $0x28] ss:$52 sps:$4 sm:$0xff]  }
  0x64   :  { %1793 = vmatmul.mubr.bf16.vlgmr.msra.gmra.mxu1 %v3068_v37  ;;  %2782 = vmatpush3.bf16.msra.mxu0 %v3073_v38  ;;  %v3152_v37 = vld [vmem:[%s4070_s0 + $0x8c] ss:$52 sps:$4 sm:$0xff]   ;;  %v3154_v38 = vld [vmem:[%s4070_s0 + $0x94] ss:$52 sps:$4 sm:$0xff]  }
  0x65   :  { %2846 = vmatpush3.bf16.msra.mxu1 %v3074_v39  ;;  %1703 = vmatprep.mubr.bf16.mxu0 %v3075_v40  ;;  %v3164_v39 = vld [vmem:[%s4069_s1 + $0x310] sm:$0xff]   ;;  %v3177_v40 = vld [vmem:[%s4069_s1 + $0x308] sm:$0xff]  }
  0x66   :  { %1800 = vmatprep.mubr.bf16.mxu1 %v3077_v41  ;;  %2783 = vmatprep.subr.bf16.mxu0 %v3081_v42  ;;  %v3156_v41 = vld [vmem:[%s4070_s0 + $0x88] ss:$52 sps:$4 sm:$0xff]   ;;  %v3157_v42 = vld [vmem:[%s4070_s0 + $0x90] ss:$52 sps:$4 sm:$0xff]  }
  0x67   :  { %2847 = vmatprep.subr.bf16.mxu1 %v3082_v43  ;;  %v3158_v43 = vld [vmem:[%s4070_s0 + $0xf4] ss:$52 sps:$4 sm:$0xff]  }
  0x68   :  { %2784 = vmatpush3.bf16.msra.mxu0 %v3083_v44  ;;  %v3160_v44 = vld [vmem:[%s4070_s0 + $0xfc] ss:$52 sps:$4 sm:$0xff]  }
  0x69   :  { %2848 = vmatpush3.bf16.msra.mxu1 %v3084_v45  ;;  %2785 = vmatprep.subr.bf16.mxu0 %v3091_v47  ;;  %v3190_v45 = vld [vmem:[%s4069_s1 + $0x300] sm:$0xff]   ;;  %v3163_v47 = vld [vmem:[%s4070_s0 + $0xf8] ss:$52 sps:$4 sm:$0xff]  }
  0x6a   :  { %2849 = vmatprep.subr.bf16.mxu1 %v3092_v49  ;;  %v3167_v49 = vld [vmem:[%s4070_s0 + $0x164] ss:$52 sps:$4 sm:$0xff]  }
  0x6b   :  { %1704 = vmatmul.mubr.bf16.gmra.mxu0 %v3079_v46  ;;  %v3162_v46 = vld [vmem:[%s4070_s0 + $0xf0] ss:$52 sps:$4 sm:$0xff]  }
  0x6c   :  { %1801 = vmatmul.mubr.bf16.gmra.mxu1 %v3080_v48  ;;  %1711 = vmatprep.mubr.bf16.mxu0 %v3085_v50  ;;  %v3165_v48 = vld [vmem:[%s4070_s0 + $0x15c] ss:$52 sps:$4 sm:$0xff]   ;;  %v3169_v50 = vld [vmem:[%s4070_s0 + $0x158] ss:$52 sps:$4 sm:$0xff]  }
  0x6d   :  { %1808 = vmatprep.mubr.bf16.mxu1 %v3087_v51  ;;  %2786 = vmatpush3.bf16.msra.mxu0 %v3093_v52  ;;  %v3170_v51 = vld [vmem:[%s4070_s0 + $0x160] ss:$52 sps:$4 sm:$0xff]   ;;  %v3171_v52 = vld [vmem:[%s4070_s0 + $0x1c4] ss:$52 sps:$4 sm:$0xff]  }
  0x6e   :  { %2850 = vmatpush3.bf16.msra.mxu1 %v3094_v53  ;;  %2787 = vmatprep.subr.bf16.mxu0 %v3101_v54  ;;  %v3173_v53 = vld [vmem:[%s4070_s0 + $0x1cc] ss:$52 sps:$4 sm:$0xff]  }
  0x6f   :  { %2851 = vmatprep.subr.bf16.mxu1 %v3102_v55  ;;  %v3175_v54 = vld [vmem:[%s4070_s0 + $0x1c0] ss:$52 sps:$4 sm:$0xff]   ;;  %v3176_v55 = vld [vmem:[%s4070_s0 + $0x1c8] ss:$52 sps:$4 sm:$0xff]  }
  0x71   :  { %2788 = vmatpush3.bf16.msra.mxu0 %v3103_v57  ;;  %v3180_v57 = vld [vmem:[%s4070_s0 + $0x234] ss:$52 sps:$4 sm:$0xff]  }
  0x72   :  { %2852 = vmatpush3.bf16.msra.mxu1 %v3104_v58  ;;  %2789 = vmatprep.subr.bf16.mxu0 %v3111_v62  ;;  %v3182_v58 = vld [vmem:[%s4070_s0 + $0x228] ss:$52 sps:$4 sm:$0xff]   ;;  %v3188_v62 = vld [vmem:[%s4070_s0 + $0x290] ss:$52 sps:$4 sm:$0xff]  }
  0x73   :  { %1712 = vmatmul.mubr.bf16.gmra.mxu0 %v3089_v56  ;;  %2853 = vmatprep.subr.bf16.mxu1 %v3112_v63  ;;  %v3178_v56 = vld [vmem:[%s4070_s0 + $0x22c] ss:$52 sps:$4 sm:$0xff]  }
  0x74   :  { %1809 = vmatmul.mubr.bf16.gmra.mxu1 %v3090_v59  ;;  %1719 = vmatprep.mubr.bf16.mxu0 %v3095_v60  ;;  %v3183_v59 = vld [vmem:[%s4070_s0 + $0x230] ss:$52 sps:$4 sm:$0xff]   ;;  %v3184_v60 = vld [vmem:[%s4070_s0 + $0x294] ss:$52 sps:$4 sm:$0xff]   ;;  %v3189_v63 = vld [vmem:[%s4070_s0 + $0x298] ss:$52 sps:$4 sm:$0xff]  }
  0x75   :  { %1816 = vmatprep.mubr.bf16.mxu1 %v3097_v61  ;;  %2790 = vmatpush3.bf16.msra.mxu0 %v3113_v0  ;;  %v3186_v61 = vld [vmem:[%s4070_s0 + $0x29c] ss:$52 sps:$4 sm:$0xff]  }
  0x76   :  { %2854 = vmatpush3.bf16.msra.mxu1 %v3114_v1  ;;  %2791 = vmatprep.subr.bf16.mxu0 %v3121_v6  ;;  %v3191_v0 = vld [vmem:[%s4070_s0 + $0x2fc] ss:$52 sps:$4 sm:$0xff]   ;;  %v3193_v1 = vld [vmem:[%s4070_s0 + $0x304] ss:$52 sps:$4 sm:$0xff]  }
  0x77   :  { %2855 = vmatprep.subr.bf16.mxu1 %v3122_v7  ;;  %v3199_v6 = vld [vmem:[%s4070_s0 + $0x98] ss:$52 sps:$4 sm:$0xff]  }
  0x78   :  { %v3200_v7 = vld [vmem:[%s4070_s0 + $0x238] ss:$52 sps:$4 sm:$0xff]  }
  0x79   :  { %2792 = vmatpush3.bf16.msra.mxu0 %v3123_v8  ;;  %v3201_v8 = vld [vmem:[%s4070_s0 + $0x100] ss:$52 sps:$4 sm:$0xff]  }
  0x7a   :  { %2856 = vmatpush3.bf16.msra.mxu1 %v3124_v9  ;;  %2793 = vmatprep.subr.bf16.mxu0 %v3131_v14  ;;  %v3202_v9 = vld [vmem:[%s4070_s0 + $0x2a0] ss:$52 sps:$4 sm:$0xff]  }
  0x7b   :  { %1720 = vmatmul.mubr.bf16.gmra.mxu0 %v3099_v2  ;;  %2857 = vmatprep.subr.bf16.mxu1 %v3132_v15  ;;  %v3195_v2 = vld [vmem:[%s4070_s0 + $0x2f8] ss:$52 sps:$4 sm:$0xff]  }
  0x7c   :  { %1817 = vmatmul.mubr.bf16.gmra.mxu1 %v3100_v3  ;;  %1727 = vmatprep.mubr.bf16.mxu0 %v3105_v4  ;;  %v3196_v3 = vld [vmem:[%s4070_s0 + $0x300] ss:$52 sps:$4 sm:$0xff]   ;;  %v3197_v4 = vld [vmem:[%s4070_s0 + $0x30] ss:$52 sps:$4 sm:$0xff]  }
  0x7d   :  { %1824 = vmatprep.mubr.bf16.mxu1 %v3107_v5  ;;  %2794 = vmatpush3.bf16.msra.mxu0 %v3133_v16  ;;  %v3198_v5 = vld [vmem:[%s4070_s0 + $0x1d0] ss:$52 sps:$4 sm:$0xff]  }
  0x7e   :  { %2858 = vmatpush3.bf16.msra.mxu1 %v3134_v17  ;;  %2795 = vmatprep.subr.bf16.mxu0 %v3141_v21  ;;  %v3203_v17 = vld [vmem:[%s4070_s0 + $0x168] ss:$52 sps:$4 sm:$0xff]  }
  0x7f   :  { %2859 = vmatprep.subr.bf16.mxu1 %v3142_v23 }
  0x81   :  { %2796 = vmatpush3.bf16.msra.mxu0 %v3143_v24 }
  0x82   :  { %2860 = vmatpush3.bf16.msra.mxu1 %v3144_v25  ;;  %2921 = vmatprep.subr.bf16.mxu0 %v3151_v26 }
  0x83   :  { %1728 = vmatmul.mubr.bf16.gmra.mxu0 %v3109_v10  ;;  %2945 = vmatprep.subr.bf16.mxu1 %v3151_v26 }
  0x84   :  { %1825 = vmatmul.mubr.bf16.gmra.mxu1 %v3110_v11  ;;  %1735 = vmatprep.mubr.bf16.mxu0 %v3115_v12 }
  0x85   :  { %1832 = vmatprep.mubr.bf16.mxu1 %v3117_v13 }
  0x8b   :  { %1736 = vmatmul.mubr.bf16.gmra.mxu0 %v3119_v18 }
  0x8c   :  { %1833 = vmatmul.mubr.bf16.gmra.mxu1 %v3120_v19  ;;  %1743 = vmatprep.mubr.bf16.mxu0 %v3125_v20  ;;  %v3204_v19 = vld [vmem:[%s4070_s0 + $0x308] ss:$52 sps:$4 sm:$0xff]  }
  0x8d   :  { %1840 = vmatprep.mubr.bf16.mxu1 %v3127_v22 }
  0x93   :  { %1744 = vmatmul.mubr.bf16.gmra.mxu0 %v3129_v27 }
  0x94   :  { %1841 = vmatmul.mubr.bf16.gmra.mxu1 %v3130_v28  ;;  %1751 = vmatprep.mubr.bf16.mxu0 %v3135_v29 }
  0x95   :  { %1848 = vmatprep.mubr.bf16.mxu1 %v3137_v30 }
  0x9b   :  { %1752 = vmatmul.mubr.bf16.gmra.mxu0 %v3139_v31 }
  0x9c   :  { %1849 = vmatmul.mubr.bf16.gmra.mxu1 %v3140_v32  ;;  %1889 = vmatprep.mubr.bf16.mxu0 %v3147_v33 }
  0x9d   :  { %1986 = vmatprep.mubr.bf16.mxu1 %v3150_v34 }
  0xa3   :  { %1890 = vmatmul.mubr.bf16.vlgmr.msra.gmra.mxu0 %v3145_v35 }
  0xa4   :  { %1987 = vmatmul.mubr.bf16.vlgmr.msra.gmra.mxu1 %v3148_v36  ;;  %2922 = vmatpush3.bf16.msra.mxu0 %v3151_v26 }
  0xa5   :  { %2949 = vmatpush3.bf16.msra.mxu1 %v3151_v26  ;;  %1897 = vmatprep.mubr.bf16.mxu0 %v3152_v37 }
  0xa6   :  { %1994 = vmatprep.mubr.bf16.mxu1 %v3154_v38  ;;  %2923 = vmatprep.subr.bf16.mxu0 %v3164_v39 }
  0xa7   :  { %2946 = vmatprep.subr.bf16.mxu1 %v3164_v39 }
  0xa8   :  { %2924 = vmatpush3.bf16.msra.mxu0 %v3164_v39 }
  0xa9   :  { %2950 = vmatpush3.bf16.msra.mxu1 %v3164_v39  ;;  %2925 = vmatprep.subr.bf16.mxu0 %v3177_v40 }
  0xaa   :  { %2947 = vmatprep.subr.bf16.mxu1 %v3177_v40 }
  0xab   :  { %1898 = vmatmul.mubr.bf16.gmra.mxu0 %v3156_v41 }
  0xac   :  { %1995 = vmatmul.mubr.bf16.gmra.mxu1 %v3157_v42  ;;  %1905 = vmatprep.mubr.bf16.mxu0 %v3158_v43 }
  0xad   :  { %2002 = vmatprep.mubr.bf16.mxu1 %v3160_v44  ;;  %2926 = vmatpush3.bf16.msra.mxu0 %v3177_v40 }
  0xae   :  { %2951 = vmatpush3.bf16.msra.mxu1 %v3177_v40  ;;  %2927 = vmatprep.subr.bf16.mxu0 %v3190_v45 }
  0xaf   :  { %2948 = vmatprep.subr.bf16.mxu1 %v3190_v45 }
  0xb1   :  { %2928 = vmatpush3.bf16.msra.mxu0 %v3190_v45 }
  0xb2   :  { %2952 = vmatpush3.bf16.msra.mxu1 %v3190_v45 }
  0xb3   :  { %1906 = vmatmul.mubr.bf16.gmra.mxu0 %v3162_v46 }
  0xb4   :  { %2003 = vmatmul.mubr.bf16.gmra.mxu1 %v3163_v47  ;;  %1913 = vmatprep.mubr.bf16.mxu0 %v3165_v48 }
  0xb5   :  { %2010 = vmatprep.mubr.bf16.mxu1 %v3167_v49 }
  0xbb   :  { %1914 = vmatmul.mubr.bf16.gmra.mxu0 %v3169_v50 }
  0xbc   :  { %2011 = vmatmul.mubr.bf16.gmra.mxu1 %v3170_v51  ;;  %1921 = vmatprep.mubr.bf16.mxu0 %v3171_v52 }
  0xbd   :  { %2018 = vmatprep.mubr.bf16.mxu1 %v3173_v53 }
  0xc3   :  { %1922 = vmatmul.mubr.bf16.gmra.mxu0 %v3175_v54 }
  0xc4   :  { %2019 = vmatmul.mubr.bf16.gmra.mxu1 %v3176_v55  ;;  %1929 = vmatprep.mubr.bf16.mxu0 %v3178_v56 }
  0xc5   :  { %2026 = vmatprep.mubr.bf16.mxu1 %v3180_v57 }
  0xcb   :  { %1930 = vmatmul.mubr.bf16.gmra.mxu0 %v3182_v58 }
  0xcc   :  { %2027 = vmatmul.mubr.bf16.gmra.mxu1 %v3183_v59  ;;  %1937 = vmatprep.mubr.bf16.mxu0 %v3184_v60 }
  0xcd   :  { %2034 = vmatprep.mubr.bf16.mxu1 %v3186_v61 }
  0xd3   :  { %1938 = vmatmul.mubr.bf16.gmra.mxu0 %v3188_v62 }
  0xd4   :  { %2035 = vmatmul.mubr.bf16.gmra.mxu1 %v3189_v63  ;;  %1945 = vmatprep.mubr.bf16.mxu0 %v3191_v0 }
  0xd5   :  { %2042 = vmatprep.mubr.bf16.mxu1 %v3193_v1 }
  0xdb   :  { %1946 = vmatmul.mubr.bf16.gmra.mxu0 %v3195_v2 }
  0xdc   :  { %2043 = vmatmul.mubr.bf16.gmra.mxu1 %v3196_v3  ;;  %2929 = vmatprep.mubr.msk.bf16.mxu0 %vm1444_vm0, %v3197_v4 }
  0xdd   :  { %2937 = vmatprep.mubr.msk.bf16.mxu1 %vm1444_vm0, %v3198_v5 }
  0xe3   :  { %v2541_v10 = vpop.f32.mrf.mxu0  ;;  %2930 = vmatmul.mubr.msk.bf16.vlgmr.msra.gmra.mxu0 %vm1444_vm0, %v3199_v6 }
  0xe4   :  { %v2605_v11 = vpop.f32.mrf.mxu1  ;;  %2938 = vmatmul.mubr.msk.bf16.vlgmr.msra.gmra.mxu1 %vm1444_vm0, %v3200_v7  ;;  %2933 = vmatprep.mubr.msk.bf16.mxu0 %vm1444_vm0, %v3201_v8 }
  0xe5   :  { %v2542_v12 = vpop.f32.mrf.mxu0  ;;  %2941 = vmatprep.mubr.msk.bf16.mxu1 %vm1444_vm0, %v3202_v9 }
  0xe6   :  { %v2543_v13 = vadd.f32 %v2542_v12, %v2541_v10  ;;  %v2606_v14 = vpop.f32.mrf.mxu1 }
  0xe7   :  { %v2607_v15 = vadd.f32 %v2606_v14, %v2605_v11  ;;  %v2544_v16 = vpop.f32.mrf.mxu0 }
  0xe8   :  { %v2608_v18 = vpop.f32.mrf.mxu1 }
  0xe9   :  { %v3838_v20 = vadd.f32 %v2607_v15, %v2543_v13  ;;  %v2545_v21 = vpop.f32.mrf.mxu0 }
  0xea   :  { %v2546_v22 = vadd.f32 %v2545_v21, %v2544_v16  ;;  %v2609_v23 = vpop.f32.mrf.mxu1 }
  0xeb   :  { %v2610_v24 = vadd.f32 %v2609_v23, %v2608_v18  ;;  %v2547_v25 = vpop.f32.mrf.mxu0  ;;  %2934 = vmatmul.mubr.msk.bf16.gmra.mxu0 %vm1444_vm0, %v3203_v17 }
  0xec   :  { %v2611_v26 = vpop.f32.mrf.mxu1  ;;  %2942 = vmatmul.mubr.msk.bf16.gmra.mxu1 %vm1444_vm0, %v3204_v19 }
  0xed   :  { %v3842_v27 = vadd.f32 %v2610_v24, %v2546_v22  ;;  %v2548_v28 = vpop.f32.mrf.mxu0 }
  0xee   :  { %v2549_v29 = vadd.f32 %v2548_v28, %v2547_v25  ;;  %v2612_v30 = vpop.f32.mrf.mxu1 }
  0xef   :  { %v2613_v31 = vadd.f32 %v2612_v30, %v2611_v26  ;;  %v2550_v32 = vpop.f32.mrf.mxu0 }
  0xf0   :  { %v2614_v33 = vpop.f32.mrf.mxu1 }
  0xf1   :  { %v3844_v34 = vadd.f32 %v2613_v31, %v2549_v29  ;;  %v2551_v35 = vpop.f32.mrf.mxu0 }
  0xf2   :  { %v2552_v36 = vadd.f32 %v2551_v35, %v2550_v32  ;;  %v2615_v37 = vpop.f32.mrf.mxu1 }
  0xf3   :  { %v2616_v38 = vadd.f32 %v2615_v37, %v2614_v33  ;;  %v2553_v39 = vpop.f32.mrf.mxu0 }
  0xf4   :  { %v2617_v40 = vpop.f32.mrf.mxu1 }
  0xf5   :  { %v3846_v41 = vadd.f32 %v2616_v38, %v2552_v36  ;;  %v2554_v42 = vpop.f32.mrf.mxu0 }
  0xf6   :  { %v2555_v43 = vadd.f32 %v2554_v42, %v2553_v39  ;;  %v2618_v44 = vpop.f32.mrf.mxu1 }
  0xf7   :  { %v2619_v45 = vadd.f32 %v2618_v44, %v2617_v40  ;;  %v2556_v46 = vpop.f32.mrf.mxu0 }
  0xf8   :  { %v2620_v47 = vpop.f32.mrf.mxu1 }
  0xf9   :  { %v3848_v48 = vadd.f32 %v2619_v45, %v2555_v43  ;;  %v2557_v49 = vpop.f32.mrf.mxu0 }
  0xfa   :  { %v2558_v50 = vadd.f32 %v2557_v49, %v2556_v46  ;;  %v2621_v51 = vpop.f32.mrf.mxu1 }
  0xfb   :  { %v2622_v52 = vadd.f32 %v2621_v51, %v2620_v47  ;;  %v2559_v53 = vpop.f32.mrf.mxu0 }
  0xfc   :  { %v2623_v54 = vpop.f32.mrf.mxu1 }
  0xfd   :  { %v3850_v55 = vadd.f32 %v2622_v52, %v2558_v50  ;;  %v2560_v56 = vpop.f32.mrf.mxu0 }
  0xfe   :  { %v2561_v57 = vadd.f32 %v2560_v56, %v2559_v53  ;;  %v2624_v58 = vpop.f32.mrf.mxu1 }
  0xff   :  { %v2625_v59 = vadd.f32 %v2624_v58, %v2623_v54  ;;  %v2562_v60 = vpop.f32.mrf.mxu0 }
 0x100   :  { %v2626_v61 = vpop.f32.mrf.mxu1 }
 0x101   :  { %v3852_v62 = vadd.f32 %v2625_v59, %v2561_v57  ;;  %v2563_v63 = vpop.f32.mrf.mxu0 }
 0x102   :  { %v2564_v0 = vadd.f32 %v2563_v63, %v2562_v60  ;;  %v2627_v1 = vpop.f32.mrf.mxu1 }
 0x103   :  { %v2628_v2 = vadd.f32 %v2627_v1, %v2626_v61  ;;  %v2565_v3 = vpop.f32.mrf.mxu0 }
 0x104   :  { %v2629_v4 = vpop.f32.mrf.mxu1 }
 0x105   :  { %v3854_v5 = vadd.f32 %v2628_v2, %v2564_v0  ;;  %v2566_v6 = vpop.f32.mrf.mxu0 }
 0x106   :  { %v2567_v7 = vadd.f32 %v2566_v6, %v2565_v3  ;;  %v2630_v8 = vpop.f32.mrf.mxu1 }
 0x107   :  { %v2631_v9 = vadd.f32 %v2630_v8, %v2629_v4  ;;  %v2568_v10 = vpop.f32.mrf.mxu0 }
 0x108   :  { %v2632_v11 = vpop.f32.mrf.mxu1 }
 0x109   :  { %v3856_v12 = vadd.f32 %v2631_v9, %v2567_v7  ;;  %v2569_v13 = vpop.f32.mrf.mxu0 }
 0x10a   :  { %v2570_v14 = vadd.f32 %v2569_v13, %v2568_v10  ;;  %v2633_v15 = vpop.f32.mrf.mxu1 }
 0x10b   :  { %v2634_v16 = vadd.f32 %v2633_v15, %v2632_v11  ;;  %v2571_v17 = vpop.f32.mrf.mxu0 }
 0x10c   :  { %v2635_v18 = vpop.f32.mrf.mxu1 }
 0x10d   :  { %v3858_v19 = vadd.f32 %v2634_v16, %v2570_v14  ;;  %v2572_v21 = vpop.f32.mrf.mxu0 }
 0x10e   :  { %v2573_v22 = vadd.f32 %v2572_v21, %v2571_v17  ;;  %v2636_v23 = vpop.f32.mrf.mxu1 }
 0x10f   :  { %v2637_v24 = vadd.f32 %v2636_v23, %v2635_v18  ;;  %v2574_v25 = vpop.f32.mrf.mxu0 }
 0x110   :  { %v2638_v26 = vpop.f32.mrf.mxu1 }
 0x111   :  { %v3860_v28 = vadd.f32 %v2637_v24, %v2573_v22  ;;  %v2575_v29 = vpop.f32.mrf.mxu0 }
 0x112   :  { %v2576_v30 = vadd.f32 %v2575_v29, %v2574_v25  ;;  %v2639_v31 = vpop.f32.mrf.mxu1 }
 0x113   :  { %v2640_v32 = vadd.f32 %v2639_v31, %v2638_v26  ;;  %v2577_v33 = vpop.f32.mrf.mxu0 }
 0x114   :  { %v2641_v35 = vpop.f32.mrf.mxu1 }
 0x115   :  { %v3862_v36 = vadd.f32 %v2640_v32, %v2576_v30  ;;  %v2578_v37 = vpop.f32.mrf.mxu0 }
 0x116   :  { %v2579_v38 = vadd.f32 %v2578_v37, %v2577_v33  ;;  %v2642_v39 = vpop.f32.mrf.mxu1 }
 0x117   :  { %v2643_v40 = vadd.f32 %v2642_v39, %v2641_v35  ;;  %v2580_v42 = vpop.f32.mrf.mxu0 }
 0x118   :  { %v2644_v43 = vpop.f32.mrf.mxu1 }
 0x119   :  { %v3864_v44 = vadd.f32 %v2643_v40, %v2579_v38  ;;  %v2581_v45 = vpop.f32.mrf.mxu0 }
 0x11a   :  { %v2582_v46 = vadd.f32 %v2581_v45, %v2580_v42  ;;  %v2645_v47 = vpop.f32.mrf.mxu1 }
 0x11b   :  { %v2646_v49 = vadd.f32 %v2645_v47, %v2644_v43  ;;  %v2583_v50 = vpop.f32.mrf.mxu0 }
 0x11c   :  { %v2647_v51 = vpop.f32.mrf.mxu1 }
 0x11d   :  { %v3866_v52 = vadd.f32 %v2646_v49, %v2582_v46  ;;  %v2584_v53 = vpop.f32.mrf.mxu0 }
 0x11e   :  { %v2585_v54 = vadd.f32 %v2584_v53, %v2583_v50  ;;  %v2648_v56 = vpop.f32.mrf.mxu1 }
 0x11f   :  { %v2649_v57 = vadd.f32 %v2648_v56, %v2647_v51  ;;  %v2586_v58 = vpop.f32.mrf.mxu0 }
 0x120   :  { %v2650_v59 = vpop.f32.mrf.mxu1 }
 0x121   :  { %v3868_v60 = vadd.f32 %v2649_v57, %v2585_v54  ;;  %v2587_v61 = vpop.f32.mrf.mxu0 }
 0x122   :  { %v2588_v63 = vadd.f32 %v2587_v61, %v2586_v58  ;;  %v2651_v0 = vpop.f32.mrf.mxu1 }
 0x123   :  { %v2652_v1 = vadd.f32 %v2651_v0, %v2650_v59  ;;  %v2669_v2 = vpop.f32.mrf.mxu0 }
 0x124   :  { %v2733_v3 = vpop.f32.mrf.mxu1 }
 0x125   :  { %v3870_v4 = vadd.f32 %v2652_v1, %v2588_v63  ;;  %v2670_v6 = vpop.f32.mrf.mxu0 }
 0x126   :  { %v2671_v7 = vadd.f32 %v2670_v6, %v2669_v2  ;;  %v2734_v8 = vpop.f32.mrf.mxu1 }
 0x127   :  { %v2735_v9 = vadd.f32 %v2734_v8, %v2733_v3  ;;  %v2672_v10 = vpop.f32.mrf.mxu0 }
 0x128   :  { %v1698_v11 = vadd.f32 %v2671_v7, %v3838_v20  ;;  %v2736_v13 = vpop.f32.mrf.mxu1 }
 0x129   :  { %v2673_v14 = vpop.f32.mrf.mxu0 }
 0x12a   :  { %v3873_v15 = vadd.f32 %v2735_v9, %v1698_v11  ;;  %v2674_v16 = vadd.f32 %v2673_v14, %v2672_v10  ;;  %v2737_v17 = vpop.f32.mrf.mxu1 }
 0x12b   :  { %v2738_v18 = vadd.f32 %v2737_v17, %v2736_v13  ;;  %v2675_v21 = vpop.f32.mrf.mxu0 }
 0x12c   :  { %v1701_v22 = vadd.f32 %v2674_v16, %v3842_v27  ;;  %v2739_v23 = vpop.f32.mrf.mxu1 }
 0x12d   :  { %v2676_v24 = vpop.f32.mrf.mxu0 }
 0x12e   :  { %v3876_v25 = vadd.f32 %v2738_v18, %v1701_v22  ;;  %v2677_v26 = vadd.f32 %v2676_v24, %v2675_v21  ;;  %v2740_v29 = vpop.f32.mrf.mxu1 }
 0x12f   :  { %v2741_v30 = vadd.f32 %v2740_v29, %v2739_v23  ;;  %v2678_v31 = vpop.f32.mrf.mxu0 }
 0x130   :  { %v1706_v20 = vadd.f32 %v2677_v26, %v3844_v34  ;;  %v2742_v32 = vpop.f32.mrf.mxu1 }
 0x131   :  { %v2679_v33 = vpop.f32.mrf.mxu0 }
 0x132   :  { %v3879_v35 = vadd.f32 %v2741_v30, %v1706_v20  ;;  %v2680_v37 = vadd.f32 %v2679_v33, %v2678_v31  ;;  %v2743_v38 = vpop.f32.mrf.mxu1 }
 0x133   :  { %v2744_v39 = vadd.f32 %v2743_v38, %v2742_v32  ;;  %v2681_v40 = vpop.f32.mrf.mxu0 }
 0x134   :  { %v1709_v27 = vadd.f32 %v2680_v37, %v3846_v41  ;;  %v2745_v42 = vpop.f32.mrf.mxu1 }
 0x135   :  { %v2682_v43 = vpop.f32.mrf.mxu0 }
 0x136   :  { %v3882_v45 = vadd.f32 %v2744_v39, %v1709_v27  ;;  %v2683_v46 = vadd.f32 %v2682_v43, %v2681_v40  ;;  %v2746_v47 = vpop.f32.mrf.mxu1 }
 0x137   :  { %v2747_v49 = vadd.f32 %v2746_v47, %v2745_v42  ;;  %v2684_v50 = vpop.f32.mrf.mxu0 }
 0x138   :  { %v1714_v34 = vadd.f32 %v2683_v46, %v3848_v48  ;;  %v2748_v51 = vpop.f32.mrf.mxu1 }
 0x139   :  { %v2685_v53 = vpop.f32.mrf.mxu0 }
 0x13a   :  { %v3885_v54 = vadd.f32 %v2747_v49, %v1714_v34  ;;  %v2686_v56 = vadd.f32 %v2685_v53, %v2684_v50  ;;  %v2749_v57 = vpop.f32.mrf.mxu1 }
 0x13b   :  { %v2750_v58 = vadd.f32 %v2749_v57, %v2748_v51  ;;  %v2687_v59 = vpop.f32.mrf.mxu0 }
 0x13c   :  { %v1717_v41 = vadd.f32 %v2686_v56, %v3850_v55  ;;  %v2751_v61 = vpop.f32.mrf.mxu1 }
 0x13d   :  { %v2688_v63 = vpop.f32.mrf.mxu0 }
 0x13e   :  { %v3888_v0 = vadd.f32 %v2750_v58, %v1717_v41  ;;  %v2689_v1 = vadd.f32 %v2688_v63, %v2687_v59  ;;  %v2752_v2 = vpop.f32.mrf.mxu1 }
 0x13f   :  { %v2753_v3 = vadd.f32 %v2752_v2, %v2751_v61  ;;  %v2690_v6 = vpop.f32.mrf.mxu0 }
 0x140   :  { %v1722_v48 = vadd.f32 %v2689_v1, %v3852_v62  ;;  %v2754_v7 = vpop.f32.mrf.mxu1 }
 0x141   :  { %v2691_v8 = vpop.f32.mrf.mxu0 }
 0x142   :  { %v3891_v9 = vadd.f32 %v2753_v3, %v1722_v48  ;;  %v2692_v10 = vadd.f32 %v2691_v8, %v2690_v6  ;;  %v2755_v11 = vpop.f32.mrf.mxu1 }
 0x143   :  { %v2756_v13 = vadd.f32 %v2755_v11, %v2754_v7  ;;  %v2693_v14 = vpop.f32.mrf.mxu0 }
 0x144   :  { %v1725_v55 = vadd.f32 %v2692_v10, %v3854_v5  ;;  %v2757_v16 = vpop.f32.mrf.mxu1 }
 0x145   :  { %v2694_v17 = vpop.f32.mrf.mxu0 }
 0x146   :  { %v3894_v18 = vadd.f32 %v2756_v13, %v1725_v55  ;;  %v2695_v21 = vadd.f32 %v2694_v17, %v2693_v14  ;;  %v2758_v22 = vpop.f32.mrf.mxu1 }
 0x147   :  { %v2759_v23 = vadd.f32 %v2758_v22, %v2757_v16  ;;  %v2696_v24 = vpop.f32.mrf.mxu0 }
 0x148   :  { %v1730_v62 = vadd.f32 %v2695_v21, %v3856_v12  ;;  %v2760_v26 = vpop.f32.mrf.mxu1 }
 0x149   :  { %v2697_v29 = vpop.f32.mrf.mxu0 }
 0x14a   :  { %v3897_v30 = vadd.f32 %v2759_v23, %v1730_v62  ;;  %v2698_v31 = vadd.f32 %v2697_v29, %v2696_v24  ;;  %v2761_v20 = vpop.f32.mrf.mxu1 }
 0x14b   :  { %v2762_v32 = vadd.f32 %v2761_v20, %v2760_v26  ;;  %v2699_v33 = vpop.f32.mrf.mxu0 }
 0x14c   :  { %v1733_v5 = vadd.f32 %v2698_v31, %v3858_v19  ;;  %v2763_v37 = vpop.f32.mrf.mxu1 }
 0x14d   :  { %v2700_v38 = vpop.f32.mrf.mxu0 }
 0x14e   :  { %v3900_v39 = vadd.f32 %v2762_v32, %v1733_v5  ;;  %v2701_v40 = vadd.f32 %v2700_v38, %v2699_v33  ;;  %v2764_v27 = vpop.f32.mrf.mxu1 }
 0x14f   :  { %v2765_v42 = vadd.f32 %v2764_v27, %v2763_v37  ;;  %v2702_v43 = vpop.f32.mrf.mxu0 }
 0x150   :  { %4072 = vst [vmem:[#allocation2_spill] sm:$0xff] %v3900_v39  ;;  %v1738_v12 = vadd.f32 %v2701_v40, %v3860_v28  ;;  %v2766_v46 = vpop.f32.mrf.mxu1 }
 0x151   :  { %v2703_v47 = vpop.f32.mrf.mxu0 }
 0x152   :  { %v3903_v49 = vadd.f32 %v2765_v42, %v1738_v12  ;;  %v2704_v50 = vadd.f32 %v2703_v47, %v2702_v43  ;;  %v2767_v34 = vpop.f32.mrf.mxu1 }
 0x153   :  { %v2768_v51 = vadd.f32 %v2767_v34, %v2766_v46  ;;  %v2705_v53 = vpop.f32.mrf.mxu0 }
 0x154   :  { %4073 = vst [vmem:[#allocation3_spill] sm:$0xff] %v3903_v49  ;;  %v1741_v19 = vadd.f32 %v2704_v50, %v3862_v36  ;;  %v2769_v56 = vpop.f32.mrf.mxu1 }
 0x155   :  { %v2706_v57 = vpop.f32.mrf.mxu0 }
 0x156   :  { %v3906_v58 = vadd.f32 %v2768_v51, %v1741_v19  ;;  %v2707_v59 = vadd.f32 %v2706_v57, %v2705_v53  ;;  %v2770_v41 = vpop.f32.mrf.mxu1 }
 0x157   :  { %v2771_v61 = vadd.f32 %v2770_v41, %v2769_v56  ;;  %v2708_v63 = vpop.f32.mrf.mxu0 }
 0x158   :  { %4074 = vst [vmem:[#allocation4_spill] sm:$0xff] %v3906_v58  ;;  %v1746_v28 = vadd.f32 %v2707_v59, %v3864_v44  ;;  %v2772_v1 = vpop.f32.mrf.mxu1 }
 0x159   :  { %v2709_v2 = vpop.f32.mrf.mxu0 }
 0x15a   :  { %v3909_v3 = vadd.f32 %v2771_v61, %v1746_v28  ;;  %v2710_v6 = vadd.f32 %v2709_v2, %v2708_v63  ;;  %v2773_v48 = vpop.f32.mrf.mxu1 }
 0x15b   :  { %v2774_v7 = vadd.f32 %v2773_v48, %v2772_v1  ;;  %v2711_v8 = vpop.f32.mrf.mxu0 }
 0x15c   :  { %4075 = vst [vmem:[#allocation5_spill] sm:$0xff] %v3909_v3  ;;  %v1749_v36 = vadd.f32 %v2710_v6, %v3866_v52  ;;  %v2775_v10 = vpop.f32.mrf.mxu1 }
 0x15d   :  { %v2712_v11 = vpop.f32.mrf.mxu0 }
 0x15e   :  { %v3912_v13 = vadd.f32 %v2774_v7, %v1749_v36  ;;  %v2713_v14 = vadd.f32 %v2712_v11, %v2711_v8  ;;  %v2776_v55 = vpop.f32.mrf.mxu1 }
 0x15f   :  { %v2777_v16 = vadd.f32 %v2776_v55, %v2775_v10  ;;  %v2714_v17 = vpop.f32.mrf.mxu0 }
 0x160   :  { %4076 = vst [vmem:[#allocation6_spill] sm:$0xff] %v3912_v13  ;;  %v1754_v44 = vadd.f32 %v2713_v14, %v3868_v60  ;;  %v2778_v21 = vpop.f32.mrf.mxu1 }
 0x161   :  { %v2715_v22 = vpop.f32.mrf.mxu0 }
 0x162   :  { %v3915_v23 = vadd.f32 %v2777_v16, %v1754_v44  ;;  %v2716_v24 = vadd.f32 %v2715_v22, %v2714_v17  ;;  %v2779_v62 = vpop.f32.mrf.mxu1 }
 0x163   :  { %v2780_v26 = vadd.f32 %v2779_v62, %v2778_v21  ;;  %v2797_v29 = vpop.f32.mrf.mxu0 }
 0x164   :  { %4077 = vst [vmem:[#allocation7_spill] sm:$0xff] %v3915_v23  ;;  %v1757_v52 = vadd.f32 %v2716_v24, %v3870_v4  ;;  %v2861_v31 = vpop.f32.mrf.mxu1 }
 0x165   :  { %v2798_v20 = vpop.f32.mrf.mxu0 }
 0x166   :  { %v3918_v32 = vadd.f32 %v2780_v26, %v1757_v52  ;;  %v2862_v33 = vpop.f32.mrf.mxu1  ;;  %v2799_v26 = vadd.f32 %v2798_v20, %v2797_v29 }
 0x167   :  { %v2800_v5 = vpop.f32.mrf.mxu0  ;;  %v2863_v49 = vadd.f32 %v2862_v33, %v2861_v31 }
 0x168   :  { %4078 = vst [vmem:[#allocation8_spill] sm:$0xff] %v3918_v32  ;;  %v2864_v37 = vpop.f32.mrf.mxu1 }
 0x169   :  { %v2801_v38 = vpop.f32.mrf.mxu0 }
 0x16a   :  { %v2865_v40 = vpop.f32.mrf.mxu1  ;;  %v2802_v32 = vadd.f32 %v2801_v38, %v2800_v5 }
 0x16b   :  { %v2803_v60 = vpop.f32.mrf.mxu0  ;;  %v2866_v39 = vadd.f32 %v2865_v40, %v2864_v37 }
 0x16c   :  { %v2867_v27 = vpop.f32.mrf.mxu1 }
 0x16d   :  { %v2804_v42 = vpop.f32.mrf.mxu0 }
 0x16e   :  { %v2868_v43 = vpop.f32.mrf.mxu1  ;;  %v2805_v23 = vadd.f32 %v2804_v42, %v2803_v60 }
 0x16f   :  { %v2806_v12 = vpop.f32.mrf.mxu0  ;;  %v2869_v5 = vadd.f32 %v2868_v43, %v2867_v27 }
 0x170   :  { %v2870_v46 = vpop.f32.mrf.mxu1 }
 0x171   :  { %v2807_v47 = vpop.f32.mrf.mxu0 }
 0x172   :  { %v2871_v50 = vpop.f32.mrf.mxu1  ;;  %v2808_v58 = vadd.f32 %v2807_v47, %v2806_v12 }
 0x173   :  { %v2809_v34 = vpop.f32.mrf.mxu0 }
 0x174   :  { %v3920_v51 = vpop.f32.mrf.mxu1  ;;  %v1903_v38 = vadd.f32 %v2808_v58, %v3882_v45 }
 0x175   :  { %v2810_v4 = vpop.f32.mrf.mxu0 }
 0x176   :  { %v3922_v53 = vpop.f32.mrf.mxu1 }
 0x177   :  { %v2812_v19 = vpop.f32.mrf.mxu0 }
 0x178   :  { %v3924_v56 = vpop.f32.mrf.mxu1 }
 0x179   :  { %v2813_v57 = vpop.f32.mrf.mxu0 }
 0x17a   :  { %v3926_v59 = vpop.f32.mrf.mxu1  ;;  %v2814_v29 = vadd.f32 %v2813_v57, %v2812_v19  ;;  %v4087_v57 = vld [vmem:[#allocation2_spill] sm:$0xff] }
 0x17b   :  { %v2815_v41 = vpop.f32.mrf.mxu0 }
 0x17c   :  { %v3928_v61 = vpop.f32.mrf.mxu1  ;;  %v1911_v31 = vadd.f32 %v2814_v29, %v3888_v0  ;;  %v4099_v29 = vld [vmem:[#allocation7_spill] sm:$0xff] }
 0x17d   :  { %v2816_v63 = vpop.f32.mrf.mxu0 }
 0x17e   :  { %v3930_v28 = vpop.f32.mrf.mxu1  ;;  %v2817_v60 = vadd.f32 %v2816_v63, %v2815_v41  ;;  %v4088_v63 = vld [vmem:[#allocation3_spill] sm:$0xff] }
 0x17f   :  { %v2818_v1 = vpop.f32.mrf.mxu0  ;;  %v2881_v0 = vadd.f32 %v3930_v28, %v3928_v61 }
 0x180   :  { %v3932_v2 = vpop.f32.mrf.mxu1  ;;  %v1916_v45 = vadd.f32 %v2817_v60, %v3891_v9 }
 0x181   :  { %v2819_v6 = vpop.f32.mrf.mxu0 }
 0x182   :  { %v2883_v48 = vpop.f32.mrf.mxu1  ;;  %v2820_v42 = vadd.f32 %v2819_v6, %v2818_v1 }
 0x183   :  { %v2821_v7 = vpop.f32.mrf.mxu0 }
 0x184   :  { %v3934_v8 = vpop.f32.mrf.mxu1  ;;  %v1919_v58 = vadd.f32 %v2820_v42, %v3894_v18 }
 0x185   :  { %4079 = vst [vmem:[#allocation9_spill] sm:$0xff] %v3934_v8  ;;  %v2822_v36 = vpop.f32.mrf.mxu0  ;;  %v1900_v8 = vadd.f32 %v2805_v23, %v3879_v35 }
 0x186   :  { %v3936_v10 = vpop.f32.mrf.mxu1 }
 0x187   :  { %4080 = vst [vmem:[#allocation10_spill] sm:$0xff] %v3936_v10  ;;  %v2824_v11 = vpop.f32.mrf.mxu0 }
 0x188   :  { %v3938_v14 = vpop.f32.mrf.mxu1 }
 0x189   :  { %4081 = vst [vmem:[#allocation11_spill] sm:$0xff] %v3938_v14  ;;  %v2825_v55 = vpop.f32.mrf.mxu0 }
 0x18a   :  { %v3940_v16 = vpop.f32.mrf.mxu1  ;;  %v2826_v33 = vadd.f32 %v2825_v55, %v2824_v11 }
 0x18b   :  { %4082 = vst [vmem:[#allocation12_spill] sm:$0xff] %v3940_v16  ;;  %v2827_v17 = vpop.f32.mrf.mxu0  ;;  %v1892_v16 = vadd.f32 %v2799_v26, %v3873_v15  ;;  %v2872_v15 = vadd.f32 %v2871_v50, %v2870_v46  ;;  %v2823_v26 = vadd.f32 %v2822_v36, %v2821_v7  ;;  %v2875_v46 = vadd.f32 %v3922_v53, %v3920_v51  ;;  %v4091_v7 = vld [vmem:[#allocation4_spill] sm:$0xff] }
 0x18c   :  { %v3942_v44 = vpop.f32.mrf.mxu1  ;;  %v1927_v41 = vadd.f32 %v2826_v33, %v4087_v57 }
 0x18d   :  { %4083 = vst [vmem:[#allocation13_spill] sm:$0xff] %v3942_v44  ;;  %v2828_v21 = vpop.f32.mrf.mxu0  ;;  %v1895_v44 = vadd.f32 %v2802_v32, %v3876_v25  ;;  %v1997_v32 = vadd.f32 %v2869_v5, %v1900_v8  ;;  %v2000_v43 = vadd.f32 %v2872_v15, %v1903_v38  ;;  %v1924_v9 = vadd.f32 %v2823_v26, %v3897_v30 }
 0x18e   :  { %v3944_v22 = vpop.f32.mrf.mxu1  ;;  %v2829_v37 = vadd.f32 %v2828_v21, %v2827_v17 }
 0x18f   :  { %4084 = vst [vmem:[#allocation14_spill] sm:$0xff] %v3944_v22  ;;  %v2830_v24 = vpop.f32.mrf.mxu0  ;;  %v3956_v35 = vadd.f32 %v2866_v39, %v1895_v44  ;;  %v2878_v39 = vadd.f32 %v3926_v59, %v3924_v56  ;;  %v4090_v59 = vld [vmem:[#allocation10_spill] sm:$0xff] }
 0x190   :  { %v3946_v62 = vpop.f32.mrf.mxu1  ;;  %v1932_v1 = vadd.f32 %v2829_v37, %v4088_v63  ;;  %v4097_v44 = vld [vmem:[#allocation6_spill] sm:$0xff]  ;;  %v4101_v37 = vld [vmem:[#allocation8_spill] sm:$0xff] }
 0x191   :  { %4085 = vst [vmem:[#allocation15_spill] sm:$0xff] %v3946_v62  ;;  %v2831_v52 = vpop.f32.mrf.mxu0  ;;  %v2811_v62 = vadd.f32 %v2810_v4, %v2809_v34  ;;  %v2884_v4 = vadd.f32 %v2883_v48, %v3932_v2  ;;  %v3974_v56 = vadd.f32 %v2878_v39, %v1911_v31  ;;  %v3979_v2 = vadd.f32 %v2881_v0, %v1916_v45  ;;  %v4092_v48 = vld [vmem:[#allocation11_spill] sm:$0xff] }
 0x192   :  { %v2895_v13 = vpop.f32.mrf.mxu1  ;;  %v2832_v27 = vadd.f32 %v2831_v52, %v2830_v24  ;;  %v4093_v8 = vld [vmem:[#allocation12_spill] sm:$0xff] }
 0x193   :  { %v2833_v3 = vpop.f32.mrf.mxu0  ;;  %v1908_v23 = vadd.f32 %v2811_v62, %v3885_v54  ;;  %v3981_v30 = vadd.f32 %v2884_v4, %v1919_v58  ;;  %v2890_v36 = vadd.f32 %v4093_v8, %v4092_v48 }
 0x194   :  { %v3948_v14 = vpop.f32.mrf.mxu1  ;;  %v1935_v61 = vadd.f32 %v2832_v27, %v4091_v7 }
 0x195   :  { %4086 = vst [vmem:[#allocation16_spill] sm:$0xff] %v3948_v14  ;;  %v2834_v10 = vpop.f32.mrf.mxu0  ;;  %v3954_v14 = vadd.f32 %v2863_v49, %v1892_v16  ;;  %v3972_v53 = vadd.f32 %v2875_v46, %v1908_v23  ;;  %v4096_v16 = vld [vmem:[#allocation5_spill] sm:$0xff]  ;;  %v2024_v31 = vadd.f32 %v2890_v36, %v1927_v41 }
 0x196   :  { %v2898_v22 = vpop.f32.mrf.mxu1  ;;  %v2835_v50 = vadd.f32 %v2834_v10, %v2833_v3  ;;  %v4089_v3 = vld [vmem:[#allocation9_spill] sm:$0xff]  ;;  %v4095_v11 = vld [vmem:[#allocation14_spill] sm:$0xff] }
 0x197   :  { %v2836_v20 = vpop.f32.mrf.mxu0  ;;  %v2887_v6 = vadd.f32 %v4090_v59, %v4089_v3  ;;  %v4094_v10 = vld [vmem:[#allocation13_spill] sm:$0xff] }
 0x198   :  { %v2900_v12 = vpop.f32.mrf.mxu1  ;;  %v2893_v55 = vadd.f32 %v4095_v11, %v4094_v10  ;;  %v1940_v17 = vadd.f32 %v2835_v50, %v4096_v16  ;;  %v4098_v62 = vld [vmem:[#allocation15_spill] sm:$0xff] }
 0x199   :  { %v2837_v47 = vpop.f32.mrf.mxu0  ;;  %v2896_v52 = vadd.f32 %v2895_v13, %v4098_v62  ;;  %v2021_v60 = vadd.f32 %v2887_v6, %v1924_v9 }
 0x19a   :  { %v2901_v25 = vpop.f32.mrf.mxu1  ;;  %v2838_v54 = vadd.f32 %v2837_v47, %v2836_v20  ;;  %v2029_v23 = vadd.f32 %v2893_v55, %v1932_v1 }
 0x19b   :  { %v2839_v40 = vpop.f32.mrf.mxu0  ;;  %v2902_v15 = vadd.f32 %v2901_v25, %v2900_v12  ;;  %v2032_v27 = vadd.f32 %v2896_v52, %v1935_v61 }
 0x19c   :  { %v2903_v49 = vpop.f32.mrf.mxu1  ;;  %v1943_v21 = vadd.f32 %v2838_v54, %v4097_v44  ;;  %v4100_v42 = vld [vmem:[#allocation16_spill] sm:$0xff] }
 0x19d   :  { %v2840_v34 = vpop.f32.mrf.mxu0  ;;  %v2899_v47 = vadd.f32 %v2898_v22, %v4100_v42 }
 0x19e   :  { %v2841_v18 = vadd.f32 %v2840_v34, %v2839_v40  ;;  %v2904_v19 = vpop.f32.mrf.mxu1  ;;  %v3993_v54 = vadd.f32 %v2902_v15, %v1943_v21 }
 0x19f   :  { %v2842_v51 = vpop.f32.mrf.mxu0  ;;  %v2905_v33 = vadd.f32 %v2904_v19, %v2903_v49  ;;  %v2037_v50 = vadd.f32 %v2899_v47, %v1940_v17 }
 0x1a0   :  { %v2906_v28 = vpop.f32.mrf.mxu1  ;;  %v1948_v20 = vadd.f32 %v2841_v18, %v4099_v29 }
 0x1a1   :  { %v2843_v24 = vpop.f32.mrf.mxu0 }
 0x1a2   :  { %v2844_v5 = vadd.f32 %v2843_v24, %v2842_v51  ;;  %v2907_v38 = vpop.f32.mrf.mxu1  ;;  %v2045_v25 = vadd.f32 %v2905_v33, %v1948_v20 }
 0x1a3   :  { %v2931_v26 = vpop.f32.mrf.mxu0  ;;  %v2908_v46 = vadd.f32 %v2907_v38, %v2906_v28 }
 0x1a4   :  { %v1951_v40 = vadd.f32 %v2844_v5, %v4101_v37  ;;  %v2094_v45 = vadd.f32 %v2931_v26, %v1997_v32  ;;  %v2939_v58 = vpop.f32.mrf.mxu1 }
 0x1a5   :  { %v2126_v39 = vadd.f32 %v2939_v58, %v2029_v23  ;;  %v2085_v13 = vpop.f32.mrf.mxu0 }
 0x1a6   :  { %vm2150_vm2 = vcmp.ge.f32.partialorder %v2094_v45, 0.0  ;;  %v2166_v34 = vmul.f32 0.02, %v2094_v45  ;;  %v2086_v22 = vadd.f32 %v2085_v13, %v3954_v14  ;;  %v2117_v12 = vpop.f32.mrf.mxu1  ;;  %v3996_v9 = vadd.f32 %v2908_v46, %v1951_v40 }
 0x1a7   :  { %vm2158_vm3 = vcmp.ge.f32.partialorder %v2126_v39, 0.0  ;;  %v2174_v0 = vmul.f32 0.02, %v2126_v39  ;;  %v2118_v49 = vadd.f32 %v2117_v12, %v2021_v60  ;;  %v2932_v4 = vpop.f32.mrf.mxu0 }
 0x1a8   :  { %v2182_v32 = vsel %vm2150_vm2, %v2094_v45, %v2166_v34  ;;  %vm2148_vm4 = vcmp.ge.f32.partialorder %v2086_v22, 0.0  ;;  %v2164_v18 = vmul.f32 0.02, %v2086_v22  ;;  %v2097_v19 = vadd.f32 %v2932_v4, %v2000_v43  ;;  %v2940_v57 = vpop.f32.mrf.mxu1 }
 0x1a9   :  { %v2511_v41 = vpack.c.bf16 %v2182_v32, %v2182_v32  ;;  %v2190_v63 = vsel %vm2158_vm3, %v2126_v39, %v2174_v0  ;;  %vm2156_vm5 = vcmp.ge.f32.partialorder %v2118_v49, 0.0  ;;  %v2172_v1 = vmul.f32 0.02, %v2118_v49  ;;  %v2088_v51 = vpop.f32.mrf.mxu0 }
 0x1aa   :  { %v2519_v3 = vpack.c.bf16 %v2190_v63, %v2190_v63  ;;  %v2180_v14 = vsel %vm2148_vm4, %v2086_v22, %v2164_v18  ;;  %vm2151_vm6 = vcmp.ge.f32.partialorder %v2097_v19, 0.0  ;;  %v2167_v59 = vmul.f32 0.02, %v2097_v19  ;;  %v2120_v6 = vpop.f32.mrf.mxu1 }
 0x1ab   :  { %2263 = vst.msk [vmem:[%s4071_s2 + $0x8] sm:$0xf] %vm2260_vm1, %v2511_v41  ;;  %v2509_v7 = vpack.c.bf16 %v2180_v14, %v2180_v14  ;;  %v2188_v61 = vsel %vm2156_vm5, %v2118_v49, %v2172_v1  ;;  %v2129_v28 = vadd.f32 %v2940_v57, %v2032_v27  ;;  %v2089_v43 = vadd.f32 %v2088_v51, %v3956_v35  ;;  %v2935_v48 = vpop.f32.mrf.mxu0 }
 0x1ac   :  { %2271 = vst.msk [vmem:[%s4071_s2 + $0x28] sm:$0xf] %vm2260_vm1, %v2519_v3  ;;  %v2517_v8 = vpack.c.bf16 %v2188_v61, %v2188_v61  ;;  %v2183_v36 = vsel %vm2151_vm6, %v2097_v19, %v2167_v59  ;;  %v2121_v10 = vadd.f32 %v2120_v6, %v2024_v31  ;;  %v2110_v11 = vadd.f32 %v2935_v48, %v3979_v2  ;;  %v2943_v55 = vpop.f32.mrf.mxu1 }
 0x1ad   :  { %2261 = vst.msk [vmem:[%s4071_s2] sm:$0xf] %vm2260_vm1, %v2509_v7  ;;  %v2512_v16 = vpack.c.bf16 %v2183_v36, %v2183_v36  ;;  %vm2159_vm7 = vcmp.ge.f32.partialorder %v2129_v28, 0.0  ;;  %v2175_v35 = vmul.f32 0.02, %v2129_v28  ;;  %vm2149_vm8 = vcmp.ge.f32.partialorder %v2089_v43, 0.0  ;;  %v2101_v17 = vpop.f32.mrf.mxu0 }
 0x1ae   :  { %2269 = vst.msk [vmem:[%s4071_s2 + $0x20] sm:$0xf] %vm2260_vm1, %v2517_v8  ;;  %v2165_v44 = vmul.f32 0.02, %v2089_v43  ;;  %vm2157_vm9 = vcmp.ge.f32.partialorder %v2121_v10, 0.0  ;;  %vm2154_vm10 = vcmp.ge.f32.partialorder %v2110_v11, 0.0  ;;  %v2133_v2 = vpop.f32.mrf.mxu1  ;;  %v2142_v52 = vadd.f32 %v2943_v55, %v2045_v25 }
 0x1af   :  { %v2173_v21 = vmul.f32 0.02, %v2121_v10  ;;  %2264 = vst.msk [vmem:[%s4071_s2 + $0xc] sm:$0xf] %vm2260_vm1, %v2512_v16  ;;  %v2191_v24 = vsel %vm2159_vm7, %v2129_v28, %v2175_v35  ;;  %v2170_v62 = vmul.f32 0.02, %v2110_v11  ;;  %v2102_v29 = vadd.f32 %v2101_v17, %v3972_v53  ;;  %v2936_v20 = vpop.f32.mrf.mxu0 }
 0x1b0   :  { %v2520_v5 = vpack.c.bf16 %v2191_v24, %v2191_v24  ;;  %v2181_v38 = vsel %vm2149_vm8, %v2089_v43, %v2165_v44  ;;  %v2134_v42 = vadd.f32 %v2133_v2, %v2037_v50  ;;  %v2944_v47 = vpop.f32.mrf.mxu1  ;;  %vm2162_vm11 = vcmp.ge.f32.partialorder %v2142_v52, 0.0 }
 0x1b1   :  { %v2189_v60 = vsel %vm2157_vm9, %v2121_v10, %v2173_v21  ;;  %v2510_v15 = vpack.c.bf16 %v2181_v38, %v2181_v38  ;;  %v2186_v23 = vsel %vm2154_vm10, %v2110_v11, %v2170_v62  ;;  %v2104_v31 = vpop.f32.mrf.mxu0  ;;  %v2178_v37 = vmul.f32 0.02, %v2142_v52 }
 0x1b2   :  { %v2518_v26 = vpack.c.bf16 %v2189_v60, %v2189_v60  ;;  %2272 = vst.msk [vmem:[%s4071_s2 + $0x2c] sm:$0xf] %vm2260_vm1, %v2520_v5  ;;  %v2515_v33 = vpack.c.bf16 %v2186_v23, %v2186_v23  ;;  %vm2152_vm12 = vcmp.ge.f32.partialorder %v2102_v29, 0.0  ;;  %v2168_v53 = vmul.f32 0.02, %v2102_v29  ;;  %v2136_v40 = vpop.f32.mrf.mxu1 }
 0x1b3   :  { %2262 = vst.msk [vmem:[%s4071_s2 + $0x4] sm:$0xf] %vm2260_vm1, %v2510_v15  ;;  %vm2160_vm13 = vcmp.ge.f32.partialorder %v2134_v42, 0.0  ;;  %v2176_v45 = vmul.f32 0.02, %v2134_v42  ;;  %v2113_v58 = vadd.f32 %v2936_v20, %v3981_v30  ;;  %v2145_v27 = vadd.f32 %v2944_v47, %v3996_v9 }
 0x1b4   :  { %2270 = vst.msk [vmem:[%s4071_s2 + $0x24] sm:$0xf] %vm2260_vm1, %v2518_v26  ;;  %2267 = vst.msk [vmem:[%s4071_s2 + $0x18] sm:$0xf] %vm2260_vm1, %v2515_v33  ;;  %v2194_v46 = vsel %vm2162_vm11, %v2142_v52, %v2178_v37  ;;  %v2184_v39 = vsel %vm2152_vm12, %v2102_v29, %v2168_v53  ;;  %v2105_v13 = vadd.f32 %v2104_v31, %v3974_v56 }
 0x1b5   :  { %v2137_v50 = vadd.f32 %v2136_v40, %v3993_v54  ;;  %v2523_v34 = vpack.c.bf16 %v2194_v46, %v2194_v46  ;;  %v2513_v22 = vpack.c.bf16 %v2184_v39, %v2184_v39  ;;  %v2192_v12 = vsel %vm2160_vm13, %v2134_v42, %v2176_v45 }
 0x1b6   :  { %vm2155_vm14 = vcmp.ge.f32.partialorder %v2113_v58, 0.0  ;;  %v2521_v25 = vpack.c.bf16 %v2192_v12, %v2192_v12  ;;  %v2171_v0 = vmul.f32 0.02, %v2113_v58  ;;  %vm2163_vm15 = vcmp.ge.f32.partialorder %v2145_v27, 0.0 }
 0x1b7   :  { %v2179_v30 = vmul.f32 0.02, %v2145_v27  ;;  %2275 = vst.msk [vmem:[%s4071_s2 + $0x38] sm:$0xf] %vm2260_vm1, %v2523_v34  ;;  %2265 = vst.msk [vmem:[%s4071_s2 + $0x10] sm:$0xf] %vm2260_vm1, %v2513_v22 }
 0x1b8   :  { %vm2153_vm0 = vcmp.ge.f32.partialorder %v2105_v13, 0.0  ;;  %v2169_v56 = vmul.f32 0.02, %v2105_v13  ;;  %vm2161_vm2 = vcmp.ge.f32.partialorder %v2137_v50, 0.0  ;;  %v2177_v54 = vmul.f32 0.02, %v2137_v50 }
 0x1b9   :  { %2273 = vst.msk [vmem:[%s4071_s2 + $0x30] sm:$0xf] %vm2260_vm1, %v2521_v25  ;;  %v2187_v49 = vsel %vm2155_vm14, %v2113_v58, %v2171_v0  ;;  %v2195_v4 = vsel %vm2163_vm15, %v2145_v27, %v2179_v30 }
 0x1ba   :  { %v2516_v9 = vpack.c.bf16 %v2187_v49, %v2187_v49  ;;  %v2524_v32 = vpack.c.bf16 %v2195_v4, %v2195_v4  ;;  %v2185_v18 = vsel %vm2153_vm0, %v2105_v13, %v2169_v56  ;;  %v2193_v19 = vsel %vm2161_vm2, %v2137_v50, %v2177_v54 }
 0x1bb   :  { %v2514_v57 = vpack.c.bf16 %v2185_v18, %v2185_v18  ;;  %v2522_v41 = vpack.c.bf16 %v2193_v19, %v2193_v19 }
 0x1bc   :  { %2268 = vst.msk [vmem:[%s4071_s2 + $0x1c] sm:$0xf] %vm2260_vm1, %v2516_v9  ;;  %2276 = vst.msk [vmem:[%s4071_s2 + $0x3c] sm:$0xf] %vm2260_vm1, %v2524_v32 }
 0x1bd   :  { %2266 = vst.msk [vmem:[%s4071_s2 + $0x14] sm:$0xf] %vm2260_vm1, %v2514_v57  ;;  %2274 = vst.msk [vmem:[%s4071_s2 + $0x34] sm:$0xf] %vm2260_vm1, %v2522_v41 }

</bundles_post_ra>
